<compile_context>
chip_gen: v7x
topology: tpu7x:2x2x1
jax: 0.10.0
libtpu: 0.0.40
codegen_flags: <defaults>
</compile_context>

<pallas_src>
import jax
import jax.numpy as jnp
from jax.experimental import pallas as pl
from jax.experimental.pallas import tpu as pltpu


# bf16 MXU inputs (v6e/v7x native); accumulation, bias and activations remain f32.
# Use jnp.float32 here if bit-level parity with an f32 PyTorch reference is required.
MATMUL_INPUT_DTYPE = jnp.bfloat16


def _round_up(x, m):
    return (x + m - 1) // m * m


# ----------------------------------------------------------------------------
# Pallas kernel 1: fused  y = act(x @ w + b)   (used by every conv layer via im2col)
# ----------------------------------------------------------------------------
def fused_matmul_act(x, w, b, act):
    """x: (M, K) f32, w: (K, N) f32, b: (1, N) f32 -> (M, N) f32."""
    M, K = x.shape
    _, N = w.shape

    # Adaptive, 8-aligned row tile.  For the small shapes here this gives a single
    # grid step with everything (x tile, full weights, bias, output) resident in VMEM.
    TM = min(1024, _round_up(M, 8))
    grid = pl.cdiv(M, TM)

    def kernel(x_ref, w_ref, b_ref, o_ref):
        xa = x_ref[...].astype(MATMUL_INPUT_DTYPE)
        wa = w_ref[...].astype(MATMUL_INPUT_DTYPE)
        y = jnp.dot(xa, wa, preferred_element_type=jnp.float32)
        y = y + b_ref[...]                               # f32 bias / activation (v5e-safe)
        if act == "relu":
            y = jnp.maximum(y, 0.0)
        elif act == "leaky_relu":
            y = jnp.where(y >= 0.0, y, 0.01 * y)         # PyTorch LeakyReLU default slope
        o_ref[...] = y

    # Avoid 2-TC grid sharding for tiny grids (pure overhead); allow it for large batches.
    sem = ("parallel",) if grid >= 8 else ("arbitrary",)

    return pl.pallas_call(
        kernel,
        out_shape=jax.ShapeDtypeStruct((M, N), jnp.float32),
        grid=(grid,),
        in_specs=[
            pl.BlockSpec((TM, K), lambda i: (i, 0)),
            pl.BlockSpec((K, N), lambda i: (0, 0)),
            pl.BlockSpec((1, N), lambda i: (0, 0)),
        ],
        out_specs=pl.BlockSpec((TM, N), lambda i: (i, 0)),
        compiler_params=pltpu.CompilerParams(dimension_semantics=sem),
    )(x, w, b)


# ----------------------------------------------------------------------------
# Pallas kernel 2: fused head
#   h1 = relu(flat2d @ W_fc1 + b1)        (B, 256)
#   h2 = relu(h1     @ W_fc2 + b2)        (B, 64)
#   h3 = relu(flat1d @ W_c1dfc + b3)      (B, 64)
#   out = relu(h2 @ W_ir_img + h3 @ W_ir_ray + b_ir)   == relu(cat(h2,h3) @ W_ir + b_ir)
# All intermediates stay in vregs/VMEM; a single HBM store of (B, out_dim).
# ----------------------------------------------------------------------------
def fused_head(flat2d, flat1d, params):
    B = flat2d.shape[0]
    out_dim = params["fc_ir_b"].shape[1]

    def kernel(f2_ref, f1_ref, w1_ref, b1_ref, w2_ref, b2_ref,
               w3_ref, b3_ref, wia_ref, wib_ref, bi_ref, o_ref):
        dt = MATMUL_INPUT_DTYPE
        h1 = jnp.dot(f2_ref[...].astype(dt), w1_ref[...].astype(dt),
                     preferred_element_type=jnp.float32) + b1_ref[...]
        h1 = jnp.maximum(h1, 0.0)
        h2 = jnp.dot(h1.astype(dt), w2_ref[...].astype(dt),
                     preferred_element_type=jnp.float32) + b2_ref[...]
        h2 = jnp.maximum(h2, 0.0)
        h3 = jnp.dot(f1_ref[...].astype(dt), w3_ref[...].astype(dt),
                     preferred_element_type=jnp.float32) + b3_ref[...]
        h3 = jnp.maximum(h3, 0.0)
        y = (jnp.dot(h2.astype(dt), wia_ref[...].astype(dt), preferred_element_type=jnp.float32)
             + jnp.dot(h3.astype(dt), wib_ref[...].astype(dt), preferred_element_type=jnp.float32)
             + bi_ref[...])
        o_ref[...] = jnp.maximum(y, 0.0)

    args = (flat2d, flat1d,
            params["fc1_w"], params["fc1_b"],
            params["fc2_w"], params["fc2_b"],
            params["c1d_fc_w"], params["c1d_fc_b"],
            params["fc_ir_w_img"], params["fc_ir_w_ray"], params["fc_ir_b"])

    in_specs = [pl.BlockSpec(a.shape, lambda i: (0, 0)) for a in args]   # all 2-D, full-array blocks

    return pl.pallas_call(
        kernel,
        out_shape=jax.ShapeDtypeStruct((B, out_dim), jnp.float32),
        grid=(1,),
        in_specs=in_specs,
        out_specs=pl.BlockSpec((B, out_dim), lambda i: (0, 0)),
        compiler_params=pltpu.CompilerParams(dimension_semantics=("arbitrary",)),
    )(*args)


# ----------------------------------------------------------------------------
# im2col glue (plain JAX strided slices; sits at pallas_call boundaries)
# ----------------------------------------------------------------------------
def _extract_patches_2d(x, ksize, stride):
    """x: (B, H, W, C) -> (B, OH, OW, ksize*ksize*C); feature order (kh, kw, c)."""
    B, H, W, C = x.shape
    OH = (H - ksize) // stride + 1
    OW = (W - ksize) // stride + 1
    cols = []
    for kh in range(ksize):
        for kw in range(ksize):
            cols.append(
                x[:,
                  kh:kh + stride * (OH - 1) + 1:stride,
                  kw:kw + stride * (OW - 1) + 1:stride,
                  :]
            )
    return jnp.concatenate(cols, axis=-1), OH, OW


def _extract_patches_1d(x, ksize, stride):
    """x: (B, L, C) -> (B, OL, ksize*C); feature order (k, c)."""
    B, L, C = x.shape
    OL = (L - ksize) // stride + 1
    cols = [x[:, k:k + stride * (OL - 1) + 1:stride, :] for k in range(ksize)]
    return jnp.concatenate(cols, axis=-1), OL


# ----------------------------------------------------------------------------
# Parameters (deterministic synthetic init, PyTorch-layout then converted once)
# TODO(synk): weights_init_ from the original repo is not given in the snippet;
#             a deterministic fan-in-scaled normal init is used instead.
# ----------------------------------------------------------------------------
def init_params(key, hidden_dim=256, out_dim=64):
    def norm(k, shape, fan_in):
        return jax.random.normal(k, shape, jnp.float32) * (1.0 / jnp.sqrt(float(fan_in)))

    def conv2d_mat(k, cin, cout, ksz):
        # PyTorch Conv2d weight (cout, cin, kh, kw) -> im2col matrix with rows in (kh, kw, c) order
        w_pt = norm(k, (cout, cin, ksz, ksz), cin * ksz * ksz)
        return jnp.transpose(w_pt, (2, 3, 1, 0)).reshape(ksz * ksz * cin, cout)

    def conv1d_mat(k, cin, cout, ksz):
        # PyTorch Conv1d weight (cout, cin, k) -> im2col matrix with rows in (k, c) order
        w_pt = norm(k, (cout, cin, ksz), cin * ksz)
        return jnp.transpose(w_pt, (2, 1, 0)).reshape(ksz * cin, cout)

    ks = jax.random.split(key, 9)
    p = {}

    # Conv2d branch: 3->32 (8x8,s4), 32->64 (4x4,s2), 64->64 (3x3,s1)
    p["c2d_w1"] = conv2d_mat(ks[0], 3, 32, 8);   p["c2d_b1"] = jnp.zeros((1, 32), jnp.float32)
    p["c2d_w2"] = conv2d_mat(ks[1], 32, 64, 4);  p["c2d_b2"] = jnp.zeros((1, 64), jnp.float32)
    p["c2d_w3"] = conv2d_mat(ks[2], 64, 64, 3);  p["c2d_b3"] = jnp.zeros((1, 64), jnp.float32)

    # FC1 3136->hidden: PyTorch flattens NCHW, i.e. rows ordered (c, h, w).
    # Bake the permutation to our NHWC (h, w, c) flatten order into the weight rows (init-time only).
    w_fc1_chw = norm(ks[3], (64, 7, 7, hidden_dim), 64 * 7 * 7)
    p["fc1_w"] = jnp.transpose(w_fc1_chw, (1, 2, 0, 3)).reshape(64 * 7 * 7, hidden_dim)
    p["fc1_b"] = jnp.zeros((1, hidden_dim), jnp.float32)
    p["fc2_w"] = norm(ks[4], (hidden_dim, 64), hidden_dim)
    p["fc2_b"] = jnp.zeros((1, 64), jnp.float32)

    # Conv1d branch: 2->16 (k8,s4), 16->32 (k4,s2)
    p["c1d_w1"] = conv1d_mat(ks[5], 2, 16, 8);   p["c1d_b1"] = jnp.zeros((1, 16), jnp.float32)
    p["c1d_w2"] = conv1d_mat(ks[6], 16, 32, 4);  p["c1d_b2"] = jnp.zeros((1, 32), jnp.float32)

    # Conv1d FC 352->64: PyTorch flattens (C, L); bake permutation to our (l, c) order.
    w_cf_cl = norm(ks[7], (32, 11, 64), 32 * 11)
    p["c1d_fc_w"] = jnp.transpose(w_cf_cl, (1, 0, 2)).reshape(32 * 11, 64)
    p["c1d_fc_b"] = jnp.zeros((1, 64), jnp.float32)

    # fusion FC: 128 -> out_dim, split into the two 64-row halves so the runtime concat disappears.
    w_ir = norm(ks[8], (128, out_dim), 128)
    p["fc_ir_w_img"] = w_ir[:64]
    p["fc_ir_w_ray"] = w_ir[64:]
    p["fc_ir_b"] = jnp.zeros((1, out_dim), jnp.float32)
    return p


# ----------------------------------------------------------------------------
# Forward passes
# ----------------------------------------------------------------------------
def conv2d_branch(params, img):
    # img: (B, 84, 84, 3) NHWC
    B = img.shape[0]

    patches, oh, ow = _extract_patches_2d(img, 8, 4)                 # (B, 20, 20, 192)
    y = fused_matmul_act(patches.reshape(B * oh * ow, -1),
                         params["c2d_w1"], params["c2d_b1"], "leaky_relu")
    x = y.reshape(B, oh, ow, 32)

    patches, oh, ow = _extract_patches_2d(x, 4, 2)                   # (B, 9, 9, 512)
    y = fused_matmul_act(patches.reshape(B * oh * ow, -1),
                         params["c2d_w2"], params["c2d_b2"], "leaky_relu")
    x = y.reshape(B, oh, ow, 64)

    patches, oh, ow = _extract_patches_2d(x, 3, 1)                   # (B, 7, 7, 576)
    y = fused_matmul_act(patches.reshape(B * oh * ow, -1),
                         params["c2d_w3"], params["c2d_b3"], "leaky_relu")

    # Flatten directly in (h, w, c) order -- no runtime transpose; the NCHW permutation
    # that PyTorch applies is already baked into fc1_w's rows at init.
    return y.reshape(B, oh * ow * 64)                                # (B, 3136)


def conv1d_branch(params, ray):
    # ray: (B, 202) -> torch.reshape to (B, 2, 101): channel 0 = first 101, channel 1 = last 101
    B = ray.shape[0]
    x = ray.reshape(B, 2, ray.shape[-1] // 2)
    x = jnp.transpose(x, (0, 2, 1))                                  # (B, 101, 2) channel-last (tiny)

    patches, ol = _extract_patches_1d(x, 8, 4)                       # (B, 24, 16)
    y = fused_matmul_act(patches.reshape(B * ol, -1),
                         params["c1d_w1"], params["c1d_b1"], "leaky_relu")
    x = y.reshape(B, ol, 16)

    patches, ol = _extract_patches_1d(x, 4, 2)                       # (B, 11, 64)
    y = fused_matmul_act(patches.reshape(B * ol, -1),
                         params["c1d_w2"], params["c1d_b2"], "leaky_relu")

    # Flatten in (l, c) order; PyTorch's (C, L) permutation is baked into c1d_fc_w's rows.
    return y.reshape(B, ol * 32)                                     # (B, 352)


@jax.jit
def state_network_forward(params, img, ray):
    flat_img = conv2d_branch(params, img)                            # (B, 3136)
    flat_ray = conv1d_branch(params, ray)                            # (B, 352)
    # Fused head: fc1 -> fc2, c1d_fc and fc_ir (with the concat folded in) in one kernel.
    return fused_head(flat_img, flat_ray, params)                    # (B, out_dim)


if __name__ == "__main__":
    key = jax.random.PRNGKey(0)
    k_img, k_ray, k_par = jax.random.split(key, 3)

    B = 2
    img = jax.random.normal(k_img, (B, 84, 84, 3), jnp.float32)      # obs_space[0]: (84, 84, 3)
    ray = jax.random.normal(k_ray, (B, 202), jnp.float32)            # obs_space[1]: (202,)

    params = init_params(k_par, hidden_dim=256, out_dim=64)

    out = state_network_forward(params, img, ray)
    out = jax.block_until_ready(out)

    assert out.shape == (B, 64), out.shape
    assert out.dtype == jnp.float32
    assert bool(jnp.all(out >= 0.0))          # final ReLU
    assert bool(jnp.all(jnp.isfinite(out)))
    print("KERNEL_OK")
</pallas_src>

<mosaic_0001>
module attributes {stable_mosaic.version = 11 : i64} {
  func.func @kernel(%arg0: i32, %arg1: memref<800x192xf32, #tpu.memory_space<vmem>>, %arg2: memref<192x32xf32, #tpu.memory_space<vmem>>, %arg3: memref<1x32xf32, #tpu.memory_space<vmem>>, %arg4: memref<800x32xf32, #tpu.memory_space<vmem>>) attributes {dimension_semantics = [#tpu.dimension_semantics<arbitrary>], iteration_bounds = array<i64: 1>, scalar_prefetch = 0 : i64, scratch_operands = 0 : i64, tpu.core_type = #tpu.core_type<tc>, window_params = [{transform_indices = @transform_0, window_bounds = array<i64: 800, 192>}, {pipeline_mode = #tpu.pipeline_mode<synchronous>, transform_indices = @transform_1, window_bounds = array<i64: 192, 32>}, {pipeline_mode = #tpu.pipeline_mode<synchronous>, transform_indices = @transform_2, window_bounds = array<i64: 1, 32>}, {transform_indices = @transform_3, window_bounds = array<i64: 800, 32>}]} {
    %c0 = arith.constant 0 : index
    %c0_0 = arith.constant 0 : index
    %0 = vector.load %arg1[%c0, %c0_0] : memref<800x192xf32, #tpu.memory_space<vmem>>, vector<800x192xf32>
    %1 = arith.truncf %0 : vector<800x192xf32> to vector<800x192xbf16>
    %c0_1 = arith.constant 0 : index
    %c0_2 = arith.constant 0 : index
    %2 = vector.load %arg2[%c0_1, %c0_2] : memref<192x32xf32, #tpu.memory_space<vmem>>, vector<192x32xf32>
    %3 = arith.truncf %2 : vector<192x32xf32> to vector<192x32xbf16>
    %cst = arith.constant dense<0.000000e+00> : vector<800x32xf32>
    %4 = tpu.matmul %1, %3, %cst {dimension_numbers = #tpu.dot_dimension_numbers<[1], [0], [0], [1], [0, 0, 1, 1], [], []>} : vector<800x192xbf16>, vector<192x32xbf16>, vector<800x32xf32> -> vector<800x32xf32>
    %c0_3 = arith.constant 0 : index
    %c0_4 = arith.constant 0 : index
    %5 = vector.load %arg3[%c0_3, %c0_4] : memref<1x32xf32, #tpu.memory_space<vmem>>, vector<1x32xf32>
    %6 = vector.broadcast %5 : vector<1x32xf32> to vector<800x32xf32>
    %7 = arith.addf %4, %6 : vector<800x32xf32>
    %cst_5 = arith.constant 0.000000e+00 : f32
    %8 = vector.broadcast %cst_5 : f32 to vector<800x32xf32>
    %9 = arith.cmpf oge, %7, %8 : vector<800x32xf32>
    %cst_6 = arith.constant 0.00999999977 : f32
    %10 = vector.broadcast %cst_6 : f32 to vector<800x32xf32>
    %11 = arith.mulf %10, %7 : vector<800x32xf32>
    %12 = arith.select %9, %7, %11 : vector<800x32xi1>, vector<800x32xf32>
    %c0_7 = arith.constant 0 : index
    %c0_8 = arith.constant 0 : index
    %13 = vector.load %arg4[%c0_7, %c0_8] : memref<800x32xf32, #tpu.memory_space<vmem>>, vector<800x32xf32>
    tpu.vector_store %arg4[%c0_7, %c0_8], %12 {strides = array<i32>} : memref<800x32xf32, #tpu.memory_space<vmem>>, vector<800x32xf32>,
    return
  }
  func.func @transform_0(%arg0: i32) -> (i32, i32) {
    %c0_i32 = arith.constant 0 : i32
    %c0_i32_0 = arith.constant 0 : i32
    return %arg0, %c0_i32 : i32, i32
  }
  func.func @transform_1(%arg0: i32) -> (i32, i32) {
    %c0_i32 = arith.constant 0 : i32
    %c0_i32_0 = arith.constant 0 : i32
    %c0_i32_1 = arith.constant 0 : i32
    return %c0_i32, %c0_i32_0 : i32, i32
  }
  func.func @transform_2(%arg0: i32) -> (i32, i32) {
    %c0_i32 = arith.constant 0 : i32
    %c0_i32_0 = arith.constant 0 : i32
    %c0_i32_1 = arith.constant 0 : i32
    return %c0_i32, %c0_i32_0 : i32, i32
  }
  func.func @transform_3(%arg0: i32) -> (i32, i32) {
    %c0_i32 = arith.constant 0 : i32
    %c0_i32_0 = arith.constant 0 : i32
    return %arg0, %c0_i32 : i32, i32
  }
}

module attributes {stable_mosaic.version = 11 : i64} {
  func.func @kernel(%arg0: i32, %arg1: memref<168x512xf32, #tpu.memory_space<vmem>>, %arg2: memref<512x64xf32, #tpu.memory_space<vmem>>, %arg3: memref<1x64xf32, #tpu.memory_space<vmem>>, %arg4: memref<168x64xf32, #tpu.memory_space<vmem>>) attributes {dimension_semantics = [#tpu.dimension_semantics<arbitrary>], iteration_bounds = array<i64: 1>, scalar_prefetch = 0 : i64, scratch_operands = 0 : i64, tpu.core_type = #tpu.core_type<tc>, window_params = [{transform_indices = @transform_0, window_bounds = array<i64: 168, 512>}, {pipeline_mode = #tpu.pipeline_mode<synchronous>, transform_indices = @transform_1, window_bounds = array<i64: 512, 64>}, {pipeline_mode = #tpu.pipeline_mode<synchronous>, transform_indices = @transform_2, window_bounds = array<i64: 1, 64>}, {transform_indices = @transform_3, window_bounds = array<i64: 168, 64>}]} {
    %c0 = arith.constant 0 : index
    %c0_0 = arith.constant 0 : index
    %0 = vector.load %arg1[%c0, %c0_0] : memref<168x512xf32, #tpu.memory_space<vmem>>, vector<168x512xf32>
    %1 = arith.truncf %0 : vector<168x512xf32> to vector<168x512xbf16>
    %c0_1 = arith.constant 0 : index
    %c0_2 = arith.constant 0 : index
    %2 = vector.load %arg2[%c0_1, %c0_2] : memref<512x64xf32, #tpu.memory_space<vmem>>, vector<512x64xf32>
    %3 = arith.truncf %2 : vector<512x64xf32> to vector<512x64xbf16>
    %cst = arith.constant dense<0.000000e+00> : vector<168x64xf32>
    %4 = tpu.matmul %1, %3, %cst {dimension_numbers = #tpu.dot_dimension_numbers<[1], [0], [0], [1], [0, 0, 1, 1], [], []>} : vector<168x512xbf16>, vector<512x64xbf16>, vector<168x64xf32> -> vector<168x64xf32>
    %c0_3 = arith.constant 0 : index
    %c0_4 = arith.constant 0 : index
    %5 = vector.load %arg3[%c0_3, %c0_4] : memref<1x64xf32, #tpu.memory_space<vmem>>, vector<1x64xf32>
    %6 = vector.broadcast %5 : vector<1x64xf32> to vector<168x64xf32>
    %7 = arith.addf %4, %6 : vector<168x64xf32>
    %cst_5 = arith.constant 0.000000e+00 : f32
    %8 = vector.broadcast %cst_5 : f32 to vector<168x64xf32>
    %9 = arith.cmpf oge, %7, %8 : vector<168x64xf32>
    %cst_6 = arith.constant 0.00999999977 : f32
    %10 = vector.broadcast %cst_6 : f32 to vector<168x64xf32>
    %11 = arith.mulf %10, %7 : vector<168x64xf32>
    %12 = arith.select %9, %7, %11 : vector<168x64xi1>, vector<168x64xf32>
    %c0_7 = arith.constant 0 : index
    %c0_8 = arith.constant 0 : index
    %13 = vector.load %arg4[%c0_7, %c0_8] : memref<168x64xf32, #tpu.memory_space<vmem>>, vector<168x64xf32>
    tpu.vector_store %arg4[%c0_7, %c0_8], %12 {strides = array<i32>} : memref<168x64xf32, #tpu.memory_space<vmem>>, vector<168x64xf32>,
    return
  }
  func.func @transform_0(%arg0: i32) -> (i32, i32) {
    %c0_i32 = arith.constant 0 : i32
    %c0_i32_0 = arith.constant 0 : i32
    return %arg0, %c0_i32 : i32, i32
  }
  func.func @transform_1(%arg0: i32) -> (i32, i32) {
    %c0_i32 = arith.constant 0 : i32
    %c0_i32_0 = arith.constant 0 : i32
    %c0_i32_1 = arith.constant 0 : i32
    return %c0_i32, %c0_i32_0 : i32, i32
  }
  func.func @transform_2(%arg0: i32) -> (i32, i32) {
    %c0_i32 = arith.constant 0 : i32
    %c0_i32_0 = arith.constant 0 : i32
    %c0_i32_1 = arith.constant 0 : i32
    return %c0_i32, %c0_i32_0 : i32, i32
  }
  func.func @transform_3(%arg0: i32) -> (i32, i32) {
    %c0_i32 = arith.constant 0 : i32
    %c0_i32_0 = arith.constant 0 : i32
    return %arg0, %c0_i32 : i32, i32
  }
}

module attributes {stable_mosaic.version = 11 : i64} {
  func.func @kernel(%arg0: i32, %arg1: memref<104x576xf32, #tpu.memory_space<vmem>>, %arg2: memref<576x64xf32, #tpu.memory_space<vmem>>, %arg3: memref<1x64xf32, #tpu.memory_space<vmem>>, %arg4: memref<104x64xf32, #tpu.memory_space<vmem>>) attributes {dimension_semantics = [#tpu.dimension_semantics<arbitrary>], iteration_bounds = array<i64: 1>, scalar_prefetch = 0 : i64, scratch_operands = 0 : i64, tpu.core_type = #tpu.core_type<tc>, window_params = [{transform_indices = @transform_0, window_bounds = array<i64: 104, 576>}, {pipeline_mode = #tpu.pipeline_mode<synchronous>, transform_indices = @transform_1, window_bounds = array<i64: 576, 64>}, {pipeline_mode = #tpu.pipeline_mode<synchronous>, transform_indices = @transform_2, window_bounds = array<i64: 1, 64>}, {transform_indices = @transform_3, window_bounds = array<i64: 104, 64>}]} {
    %c0 = arith.constant 0 : index
    %c0_0 = arith.constant 0 : index
    %0 = vector.load %arg1[%c0, %c0_0] : memref<104x576xf32, #tpu.memory_space<vmem>>, vector<104x576xf32>
    %1 = arith.truncf %0 : vector<104x576xf32> to vector<104x576xbf16>
    %c0_1 = arith.constant 0 : index
    %c0_2 = arith.constant 0 : index
    %2 = vector.load %arg2[%c0_1, %c0_2] : memref<576x64xf32, #tpu.memory_space<vmem>>, vector<576x64xf32>
    %3 = arith.truncf %2 : vector<576x64xf32> to vector<576x64xbf16>
    %cst = arith.constant dense<0.000000e+00> : vector<104x64xf32>
    %4 = tpu.matmul %1, %3, %cst {dimension_numbers = #tpu.dot_dimension_numbers<[1], [0], [0], [1], [0, 0, 1, 1], [], []>} : vector<104x576xbf16>, vector<576x64xbf16>, vector<104x64xf32> -> vector<104x64xf32>
    %c0_3 = arith.constant 0 : index
    %c0_4 = arith.constant 0 : index
    %5 = vector.load %arg3[%c0_3, %c0_4] : memref<1x64xf32, #tpu.memory_space<vmem>>, vector<1x64xf32>
    %6 = vector.broadcast %5 : vector<1x64xf32> to vector<104x64xf32>
    %7 = arith.addf %4, %6 : vector<104x64xf32>
    %cst_5 = arith.constant 0.000000e+00 : f32
    %8 = vector.broadcast %cst_5 : f32 to vector<104x64xf32>
    %9 = arith.cmpf oge, %7, %8 : vector<104x64xf32>
    %cst_6 = arith.constant 0.00999999977 : f32
    %10 = vector.broadcast %cst_6 : f32 to vector<104x64xf32>
    %11 = arith.mulf %10, %7 : vector<104x64xf32>
    %12 = arith.select %9, %7, %11 : vector<104x64xi1>, vector<104x64xf32>
    %c0_7 = arith.constant 0 : index
    %c0_8 = arith.constant 0 : index
    %13 = vector.load %arg4[%c0_7, %c0_8] : memref<104x64xf32, #tpu.memory_space<vmem>>, vector<104x64xf32>
    tpu.vector_store %arg4[%c0_7, %c0_8], %12 {strides = array<i32>} : memref<104x64xf32, #tpu.memory_space<vmem>>, vector<104x64xf32>,
    return
  }
  func.func @transform_0(%arg0: i32) -> (i32, i32) {
    %c0_i32 = arith.constant 0 : i32
    %c0_i32_0 = arith.constant 0 : i32
    return %arg0, %c0_i32 : i32, i32
  }
  func.func @transform_1(%arg0: i32) -> (i32, i32) {
    %c0_i32 = arith.constant 0 : i32
    %c0_i32_0 = arith.constant 0 : i32
    %c0_i32_1 = arith.constant 0 : i32
    return %c0_i32, %c0_i32_0 : i32, i32
  }
  func.func @transform_2(%arg0: i32) -> (i32, i32) {
    %c0_i32 = arith.constant 0 : i32
    %c0_i32_0 = arith.constant 0 : i32
    %c0_i32_1 = arith.constant 0 : i32
    return %c0_i32, %c0_i32_0 : i32, i32
  }
  func.func @transform_3(%arg0: i32) -> (i32, i32) {
    %c0_i32 = arith.constant 0 : i32
    %c0_i32_0 = arith.constant 0 : i32
    return %arg0, %c0_i32 : i32, i32
  }
}

module attributes {stable_mosaic.version = 11 : i64} {
  func.func @kernel(%arg0: i32, %arg1: memref<48x16xf32, #tpu.memory_space<vmem>>, %arg2: memref<16x16xf32, #tpu.memory_space<vmem>>, %arg3: memref<1x16xf32, #tpu.memory_space<vmem>>, %arg4: memref<48x16xf32, #tpu.memory_space<vmem>>) attributes {dimension_semantics = [#tpu.dimension_semantics<arbitrary>], iteration_bounds = array<i64: 1>, scalar_prefetch = 0 : i64, scratch_operands = 0 : i64, tpu.core_type = #tpu.core_type<tc>, window_params = [{transform_indices = @transform_0, window_bounds = array<i64: 48, 16>}, {pipeline_mode = #tpu.pipeline_mode<synchronous>, transform_indices = @transform_1, window_bounds = array<i64: 16, 16>}, {pipeline_mode = #tpu.pipeline_mode<synchronous>, transform_indices = @transform_2, window_bounds = array<i64: 1, 16>}, {transform_indices = @transform_3, window_bounds = array<i64: 48, 16>}]} {
    %c0 = arith.constant 0 : index
    %c0_0 = arith.constant 0 : index
    %0 = vector.load %arg1[%c0, %c0_0] : memref<48x16xf32, #tpu.memory_space<vmem>>, vector<48x16xf32>
    %1 = arith.truncf %0 : vector<48x16xf32> to vector<48x16xbf16>
    %c0_1 = arith.constant 0 : index
    %c0_2 = arith.constant 0 : index
    %2 = vector.load %arg2[%c0_1, %c0_2] : memref<16x16xf32, #tpu.memory_space<vmem>>, vector<16x16xf32>
    %3 = arith.truncf %2 : vector<16x16xf32> to vector<16x16xbf16>
    %cst = arith.constant dense<0.000000e+00> : vector<48x16xf32>
    %4 = tpu.matmul %1, %3, %cst {dimension_numbers = #tpu.dot_dimension_numbers<[1], [0], [0], [1], [0, 0, 1, 1], [], []>} : vector<48x16xbf16>, vector<16x16xbf16>, vector<48x16xf32> -> vector<48x16xf32>
    %c0_3 = arith.constant 0 : index
    %c0_4 = arith.constant 0 : index
    %5 = vector.load %arg3[%c0_3, %c0_4] : memref<1x16xf32, #tpu.memory_space<vmem>>, vector<1x16xf32>
    %6 = vector.broadcast %5 : vector<1x16xf32> to vector<48x16xf32>
    %7 = arith.addf %4, %6 : vector<48x16xf32>
    %cst_5 = arith.constant 0.000000e+00 : f32
    %8 = vector.broadcast %cst_5 : f32 to vector<48x16xf32>
    %9 = arith.cmpf oge, %7, %8 : vector<48x16xf32>
    %cst_6 = arith.constant 0.00999999977 : f32
    %10 = vector.broadcast %cst_6 : f32 to vector<48x16xf32>
    %11 = arith.mulf %10, %7 : vector<48x16xf32>
    %12 = arith.select %9, %7, %11 : vector<48x16xi1>, vector<48x16xf32>
    %c0_7 = arith.constant 0 : index
    %c0_8 = arith.constant 0 : index
    %13 = vector.load %arg4[%c0_7, %c0_8] : memref<48x16xf32, #tpu.memory_space<vmem>>, vector<48x16xf32>
    tpu.vector_store %arg4[%c0_7, %c0_8], %12 {strides = array<i32>} : memref<48x16xf32, #tpu.memory_space<vmem>>, vector<48x16xf32>,
    return
  }
  func.func @transform_0(%arg0: i32) -> (i32, i32) {
    %c0_i32 = arith.constant 0 : i32
    %c0_i32_0 = arith.constant 0 : i32
    return %arg0, %c0_i32 : i32, i32
  }
  func.func @transform_1(%arg0: i32) -> (i32, i32) {
    %c0_i32 = arith.constant 0 : i32
    %c0_i32_0 = arith.constant 0 : i32
    %c0_i32_1 = arith.constant 0 : i32
    return %c0_i32, %c0_i32_0 : i32, i32
  }
  func.func @transform_2(%arg0: i32) -> (i32, i32) {
    %c0_i32 = arith.constant 0 : i32
    %c0_i32_0 = arith.constant 0 : i32
    %c0_i32_1 = arith.constant 0 : i32
    return %c0_i32, %c0_i32_0 : i32, i32
  }
  func.func @transform_3(%arg0: i32) -> (i32, i32) {
    %c0_i32 = arith.constant 0 : i32
    %c0_i32_0 = arith.constant 0 : i32
    return %arg0, %c0_i32 : i32, i32
  }
}

module attributes {stable_mosaic.version = 11 : i64} {
  func.func @kernel(%arg0: i32, %arg1: memref<24x64xf32, #tpu.memory_space<vmem>>, %arg2: memref<64x32xf32, #tpu.memory_space<vmem>>, %arg3: memref<1x32xf32, #tpu.memory_space<vmem>>, %arg4: memref<24x32xf32, #tpu.memory_space<vmem>>) attributes {dimension_semantics = [#tpu.dimension_semantics<arbitrary>], iteration_bounds = array<i64: 1>, scalar_prefetch = 0 : i64, scratch_operands = 0 : i64, tpu.core_type = #tpu.core_type<tc>, window_params = [{transform_indices = @transform_0, window_bounds = array<i64: 24, 64>}, {pipeline_mode = #tpu.pipeline_mode<synchronous>, transform_indices = @transform_1, window_bounds = array<i64: 64, 32>}, {pipeline_mode = #tpu.pipeline_mode<synchronous>, transform_indices = @transform_2, window_bounds = array<i64: 1, 32>}, {transform_indices = @transform_3, window_bounds = array<i64: 24, 32>}]} {
    %c0 = arith.constant 0 : index
    %c0_0 = arith.constant 0 : index
    %0 = vector.load %arg1[%c0, %c0_0] : memref<24x64xf32, #tpu.memory_space<vmem>>, vector<24x64xf32>
    %1 = arith.truncf %0 : vector<24x64xf32> to vector<24x64xbf16>
    %c0_1 = arith.constant 0 : index
    %c0_2 = arith.constant 0 : index
    %2 = vector.load %arg2[%c0_1, %c0_2] : memref<64x32xf32, #tpu.memory_space<vmem>>, vector<64x32xf32>
    %3 = arith.truncf %2 : vector<64x32xf32> to vector<64x32xbf16>
    %cst = arith.constant dense<0.000000e+00> : vector<24x32xf32>
    %4 = tpu.matmul %1, %3, %cst {dimension_numbers = #tpu.dot_dimension_numbers<[1], [0], [0], [1], [0, 0, 1, 1], [], []>} : vector<24x64xbf16>, vector<64x32xbf16>, vector<24x32xf32> -> vector<24x32xf32>
    %c0_3 = arith.constant 0 : index
    %c0_4 = arith.constant 0 : index
    %5 = vector.load %arg3[%c0_3, %c0_4] : memref<1x32xf32, #tpu.memory_space<vmem>>, vector<1x32xf32>
    %6 = vector.broadcast %5 : vector<1x32xf32> to vector<24x32xf32>
    %7 = arith.addf %4, %6 : vector<24x32xf32>
    %cst_5 = arith.constant 0.000000e+00 : f32
    %8 = vector.broadcast %cst_5 : f32 to vector<24x32xf32>
    %9 = arith.cmpf oge, %7, %8 : vector<24x32xf32>
    %cst_6 = arith.constant 0.00999999977 : f32
    %10 = vector.broadcast %cst_6 : f32 to vector<24x32xf32>
    %11 = arith.mulf %10, %7 : vector<24x32xf32>
    %12 = arith.select %9, %7, %11 : vector<24x32xi1>, vector<24x32xf32>
    %c0_7 = arith.constant 0 : index
    %c0_8 = arith.constant 0 : index
    %13 = vector.load %arg4[%c0_7, %c0_8] : memref<24x32xf32, #tpu.memory_space<vmem>>, vector<24x32xf32>
    tpu.vector_store %arg4[%c0_7, %c0_8], %12 {strides = array<i32>} : memref<24x32xf32, #tpu.memory_space<vmem>>, vector<24x32xf32>,
    return
  }
  func.func @transform_0(%arg0: i32) -> (i32, i32) {
    %c0_i32 = arith.constant 0 : i32
    %c0_i32_0 = arith.constant 0 : i32
    return %arg0, %c0_i32 : i32, i32
  }
  func.func @transform_1(%arg0: i32) -> (i32, i32) {
    %c0_i32 = arith.constant 0 : i32
    %c0_i32_0 = arith.constant 0 : i32
    %c0_i32_1 = arith.constant 0 : i32
    return %c0_i32, %c0_i32_0 : i32, i32
  }
  func.func @transform_2(%arg0: i32) -> (i32, i32) {
    %c0_i32 = arith.constant 0 : i32
    %c0_i32_0 = arith.constant 0 : i32
    %c0_i32_1 = arith.constant 0 : i32
    return %c0_i32, %c0_i32_0 : i32, i32
  }
  func.func @transform_3(%arg0: i32) -> (i32, i32) {
    %c0_i32 = arith.constant 0 : i32
    %c0_i32_0 = arith.constant 0 : i32
    return %arg0, %c0_i32 : i32, i32
  }
}

module attributes {stable_mosaic.version = 11 : i64} {
  func.func @kernel(%arg0: i32, %arg1: memref<2x3136xf32, #tpu.memory_space<vmem>>, %arg2: memref<2x352xf32, #tpu.memory_space<vmem>>, %arg3: memref<3136x256xf32, #tpu.memory_space<vmem>>, %arg4: memref<1x256xf32, #tpu.memory_space<vmem>>, %arg5: memref<256x64xf32, #tpu.memory_space<vmem>>, %arg6: memref<1x64xf32, #tpu.memory_space<vmem>>, %arg7: memref<352x64xf32, #tpu.memory_space<vmem>>, %arg8: memref<1x64xf32, #tpu.memory_space<vmem>>, %arg9: memref<64x64xf32, #tpu.memory_space<vmem>>, %arg10: memref<64x64xf32, #tpu.memory_space<vmem>>, %arg11: memref<1x64xf32, #tpu.memory_space<vmem>>, %arg12: memref<2x64xf32, #tpu.memory_space<vmem>>) attributes {dimension_semantics = [#tpu.dimension_semantics<arbitrary>], iteration_bounds = array<i64: 1>, scalar_prefetch = 0 : i64, scratch_operands = 0 : i64, tpu.core_type = #tpu.core_type<tc>, window_params = [{pipeline_mode = #tpu.pipeline_mode<synchronous>, transform_indices = @transform_0, window_bounds = array<i64: 2, 3136>}, {pipeline_mode = #tpu.pipeline_mode<synchronous>, transform_indices = @transform_1, window_bounds = array<i64: 2, 352>}, {pipeline_mode = #tpu.pipeline_mode<synchronous>, transform_indices = @transform_2, window_bounds = array<i64: 3136, 256>}, {pipeline_mode = #tpu.pipeline_mode<synchronous>, transform_indices = @transform_3, window_bounds = array<i64: 1, 256>}, {pipeline_mode = #tpu.pipeline_mode<synchronous>, transform_indices = @transform_4, window_bounds = array<i64: 256, 64>}, {pipeline_mode = #tpu.pipeline_mode<synchronous>, transform_indices = @transform_5, window_bounds = array<i64: 1, 64>}, {pipeline_mode = #tpu.pipeline_mode<synchronous>, transform_indices = @transform_6, window_bounds = array<i64: 352, 64>}, {pipeline_mode = #tpu.pipeline_mode<synchronous>, transform_indices = @transform_7, window_bounds = array<i64: 1, 64>}, {pipeline_mode = #tpu.pipeline_mode<synchronous>, transform_indices = @transform_8, window_bounds = array<i64: 64, 64>}, {pipeline_mode = #tpu.pipeline_mode<synchronous>, transform_indices = @transform_9, window_bounds = array<i64: 64, 64>}, {pipeline_mode = #tpu.pipeline_mode<synchronous>, transform_indices = @transform_10, window_bounds = array<i64: 1, 64>}, {pipeline_mode = #tpu.pipeline_mode<synchronous>, transform_indices = @transform_11, window_bounds = array<i64: 2, 64>}]} {
    %c0 = arith.constant 0 : index
    %c0_0 = arith.constant 0 : index
    %0 = vector.load %arg1[%c0, %c0_0] : memref<2x3136xf32, #tpu.memory_space<vmem>>, vector<2x3136xf32>
    %1 = arith.truncf %0 : vector<2x3136xf32> to vector<2x3136xbf16>
    %c0_1 = arith.constant 0 : index
    %c0_2 = arith.constant 0 : index
    %2 = vector.load %arg3[%c0_1, %c0_2] : memref<3136x256xf32, #tpu.memory_space<vmem>>, vector<3136x256xf32>
    %3 = arith.truncf %2 : vector<3136x256xf32> to vector<3136x256xbf16>
    %cst = arith.constant dense<0.000000e+00> : vector<2x256xf32>
    %4 = tpu.matmul %1, %3, %cst {dimension_numbers = #tpu.dot_dimension_numbers<[1], [0], [0], [1], [0, 0, 1, 1], [], []>} : vector<2x3136xbf16>, vector<3136x256xbf16>, vector<2x256xf32> -> vector<2x256xf32>
    %c0_3 = arith.constant 0 : index
    %c0_4 = arith.constant 0 : index
    %5 = vector.load %arg4[%c0_3, %c0_4] : memref<1x256xf32, #tpu.memory_space<vmem>>, vector<1x256xf32>
    %6 = vector.broadcast %5 : vector<1x256xf32> to vector<2x256xf32>
    %7 = arith.addf %4, %6 : vector<2x256xf32>
    %cst_5 = arith.constant 0.000000e+00 : f32
    %8 = vector.broadcast %cst_5 : f32 to vector<2x256xf32>
    %9 = arith.maximumf %7, %8 : vector<2x256xf32>
    %10 = arith.truncf %9 : vector<2x256xf32> to vector<2x256xbf16>
    %c0_6 = arith.constant 0 : index
    %c0_7 = arith.constant 0 : index
    %11 = vector.load %arg5[%c0_6, %c0_7] : memref<256x64xf32, #tpu.memory_space<vmem>>, vector<256x64xf32>
    %12 = arith.truncf %11 : vector<256x64xf32> to vector<256x64xbf16>
    %cst_8 = arith.constant dense<0.000000e+00> : vector<2x64xf32>
    %13 = tpu.matmul %10, %12, %cst_8 {dimension_numbers = #tpu.dot_dimension_numbers<[1], [0], [0], [1], [0, 0, 1, 1], [], []>} : vector<2x256xbf16>, vector<256x64xbf16>, vector<2x64xf32> -> vector<2x64xf32>
    %c0_9 = arith.constant 0 : index
    %c0_10 = arith.constant 0 : index
    %14 = vector.load %arg6[%c0_9, %c0_10] : memref<1x64xf32, #tpu.memory_space<vmem>>, vector<1x64xf32>
    %15 = vector.broadcast %14 : vector<1x64xf32> to vector<2x64xf32>
    %16 = arith.addf %13, %15 : vector<2x64xf32>
    %cst_11 = arith.constant 0.000000e+00 : f32
    %17 = vector.broadcast %cst_11 : f32 to vector<2x64xf32>
    %18 = arith.maximumf %16, %17 : vector<2x64xf32>
    %c0_12 = arith.constant 0 : index
    %c0_13 = arith.constant 0 : index
    %19 = vector.load %arg2[%c0_12, %c0_13] : memref<2x352xf32, #tpu.memory_space<vmem>>, vector<2x352xf32>
    %20 = arith.truncf %19 : vector<2x352xf32> to vector<2x352xbf16>
    %c0_14 = arith.constant 0 : index
    %c0_15 = arith.constant 0 : index
    %21 = vector.load %arg7[%c0_14, %c0_15] : memref<352x64xf32, #tpu.memory_space<vmem>>, vector<352x64xf32>
    %22 = arith.truncf %21 : vector<352x64xf32> to vector<352x64xbf16>
    %cst_16 = arith.constant dense<0.000000e+00> : vector<2x64xf32>
    %23 = tpu.matmul %20, %22, %cst_16 {dimension_numbers = #tpu.dot_dimension_numbers<[1], [0], [0], [1], [0, 0, 1, 1], [], []>} : vector<2x352xbf16>, vector<352x64xbf16>, vector<2x64xf32> -> vector<2x64xf32>
    %c0_17 = arith.constant 0 : index
    %c0_18 = arith.constant 0 : index
    %24 = vector.load %arg8[%c0_17, %c0_18] : memref<1x64xf32, #tpu.memory_space<vmem>>, vector<1x64xf32>
    %25 = vector.broadcast %24 : vector<1x64xf32> to vector<2x64xf32>
    %26 = arith.addf %23, %25 : vector<2x64xf32>
    %cst_19 = arith.constant 0.000000e+00 : f32
    %27 = vector.broadcast %cst_19 : f32 to vector<2x64xf32>
    %28 = arith.maximumf %26, %27 : vector<2x64xf32>
    %29 = arith.truncf %18 : vector<2x64xf32> to vector<2x64xbf16>
    %c0_20 = arith.constant 0 : index
    %c0_21 = arith.constant 0 : index
    %30 = vector.load %arg9[%c0_20, %c0_21] : memref<64x64xf32, #tpu.memory_space<vmem>>, vector<64x64xf32>
    %31 = arith.truncf %30 : vector<64x64xf32> to vector<64x64xbf16>
    %cst_22 = arith.constant dense<0.000000e+00> : vector<2x64xf32>
    %32 = tpu.matmul %29, %31, %cst_22 {dimension_numbers = #tpu.dot_dimension_numbers<[1], [0], [0], [1], [0, 0, 1, 1], [], []>} : vector<2x64xbf16>, vector<64x64xbf16>, vector<2x64xf32> -> vector<2x64xf32>
    %33 = arith.truncf %28 : vector<2x64xf32> to vector<2x64xbf16>
    %c0_23 = arith.constant 0 : index
    %c0_24 = arith.constant 0 : index
    %34 = vector.load %arg10[%c0_23, %c0_24] : memref<64x64xf32, #tpu.memory_space<vmem>>, vector<64x64xf32>
    %35 = arith.truncf %34 : vector<64x64xf32> to vector<64x64xbf16>
    %cst_25 = arith.constant dense<0.000000e+00> : vector<2x64xf32>
    %36 = tpu.matmul %33, %35, %cst_25 {dimension_numbers = #tpu.dot_dimension_numbers<[1], [0], [0], [1], [0, 0, 1, 1], [], []>} : vector<2x64xbf16>, vector<64x64xbf16>, vector<2x64xf32> -> vector<2x64xf32>
    %37 = arith.addf %32, %36 : vector<2x64xf32>
    %c0_26 = arith.constant 0 : index
    %c0_27 = arith.constant 0 : index
    %38 = vector.load %arg11[%c0_26, %c0_27] : memref<1x64xf32, #tpu.memory_space<vmem>>, vector<1x64xf32>
    %39 = vector.broadcast %38 : vector<1x64xf32> to vector<2x64xf32>
    %40 = arith.addf %37, %39 : vector<2x64xf32>
    %cst_28 = arith.constant 0.000000e+00 : f32
    %41 = vector.broadcast %cst_28 : f32 to vector<2x64xf32>
    %42 = arith.maximumf %40, %41 : vector<2x64xf32>
    %c0_29 = arith.constant 0 : index
    %c0_30 = arith.constant 0 : index
    %43 = vector.load %arg12[%c0_29, %c0_30] : memref<2x64xf32, #tpu.memory_space<vmem>>, vector<2x64xf32>
    tpu.vector_store %arg12[%c0_29, %c0_30], %42 {strides = array<i32>} : memref<2x64xf32, #tpu.memory_space<vmem>>, vector<2x64xf32>,
    return
  }
  func.func @transform_0(%arg0: i32) -> (i32, i32) {
    %c0_i32 = arith.constant 0 : i32
    %c0_i32_0 = arith.constant 0 : i32
    %c0_i32_1 = arith.constant 0 : i32
    return %c0_i32, %c0_i32_0 : i32, i32
  }
  func.func @transform_1(%arg0: i32) -> (i32, i32) {
    %c0_i32 = arith.constant 0 : i32
    %c0_i32_0 = arith.constant 0 : i32
    %c0_i32_1 = arith.constant 0 : i32
    return %c0_i32, %c0_i32_0 : i32, i32
  }
  func.func @transform_2(%arg0: i32) -> (i32, i32) {
    %c0_i32 = arith.constant 0 : i32
    %c0_i32_0 = arith.constant 0 : i32
    %c0_i32_1 = arith.constant 0 : i32
    return %c0_i32, %c0_i32_0 : i32, i32
  }
  func.func @transform_3(%arg0: i32) -> (i32, i32) {
    %c0_i32 = arith.constant 0 : i32
    %c0_i32_0 = arith.constant 0 : i32
    %c0_i32_1 = arith.constant 0 : i32
    return %c0_i32, %c0_i32_0 : i32, i32
  }
  func.func @transform_4(%arg0: i32) -> (i32, i32) {
    %c0_i32 = arith.constant 0 : i32
    %c0_i32_0 = arith.constant 0 : i32
    %c0_i32_1 = arith.constant 0 : i32
    return %c0_i32, %c0_i32_0 : i32, i32
  }
  func.func @transform_5(%arg0: i32) -> (i32, i32) {
    %c0_i32 = arith.constant 0 : i32
    %c0_i32_0 = arith.constant 0 : i32
    %c0_i32_1 = arith.constant 0 : i32
    return %c0_i32, %c0_i32_0 : i32, i32
  }
  func.func @transform_6(%arg0: i32) -> (i32, i32) {
    %c0_i32 = arith.constant 0 : i32
    %c0_i32_0 = arith.constant 0 : i32
    %c0_i32_1 = arith.constant 0 : i32
    return %c0_i32, %c0_i32_0 : i32, i32
  }
  func.func @transform_7(%arg0: i32) -> (i32, i32) {
    %c0_i32 = arith.constant 0 : i32
    %c0_i32_0 = arith.constant 0 : i32
    %c0_i32_1 = arith.constant 0 : i32
    return %c0_i32, %c0_i32_0 : i32, i32
  }
  func.func @transform_8(%arg0: i32) -> (i32, i32) {
    %c0_i32 = arith.constant 0 : i32
    %c0_i32_0 = arith.constant 0 : i32
    %c0_i32_1 = arith.constant 0 : i32
    return %c0_i32, %c0_i32_0 : i32, i32
  }
  func.func @transform_9(%arg0: i32) -> (i32, i32) {
    %c0_i32 = arith.constant 0 : i32
    %c0_i32_0 = arith.constant 0 : i32
    %c0_i32_1 = arith.constant 0 : i32
    return %c0_i32, %c0_i32_0 : i32, i32
  }
  func.func @transform_10(%arg0: i32) -> (i32, i32) {
    %c0_i32 = arith.constant 0 : i32
    %c0_i32_0 = arith.constant 0 : i32
    %c0_i32_1 = arith.constant 0 : i32
    return %c0_i32, %c0_i32_0 : i32, i32
  }
  func.func @transform_11(%arg0: i32) -> (i32, i32) {
    %c0_i32 = arith.constant 0 : i32
    %c0_i32_0 = arith.constant 0 : i32
    %c0_i32_1 = arith.constant 0 : i32
    return %c0_i32, %c0_i32_0 : i32, i32
  }
}

</mosaic_0001>

<bundles_post_ra>
// kernel: state_network_forward.6
= control target key start
LH: loop header
LB: loop body
LE: loop exit
PB: predicated region body
PF: predicated region fallthrough
CT: control target
= control target key end

     0   :  { %v1424_v0 = vmov 0   ;;  %vm358_vm0 = vcmask 523264   ;;  %vm1242_vm1 = vcmask 261120   ;;  %s2701_s1 = inlined_call_operand.vmem [shape: f32[192,32], index: 1, kind: input, shape index: {}]   ;;  %s2702_s0 = inlined_call_operand.vmem [shape: f32[800,192], index: 0, kind: input, shape index: {}]   ;;  %s2703_s2 = inlined_call_operand.vmem [shape: f32[1,32], index: 2, kind: input, shape index: {}]   ;;  %s2704_s3 = inlined_call_operand.vmem [shape: f32[800,32], index: 3, kind: output, shape index: {}]  }
   0x1   :  { %509 = vmatprep.subr.bf16.mxu0 %v1424_v0  ;;  %1398 = vmatprep.subr.bf16.mxu1 %v1424_v0  ;;  %v315_v1 = vld [vmem:[%s2701_s1] sm:$0xff]  ;;  %v316_v2 = vld [vmem:[%s2701_s1 + $0x8] sm:$0xff]  ;;  %v317_v3 = vld [vmem:[%s2701_s1 + $0x10] sm:$0xff] }
   0x2   :  { %v339_v4 = vpack.c.bf16 %v316_v2, %v315_v1  ;;  %v318_v5 = vld [vmem:[%s2701_s1 + $0x18] sm:$0xff]  ;;  %v319_v7 = vld [vmem:[%s2701_s1 + $0x20] sm:$0xff]  ;;  %v320_v8 = vld [vmem:[%s2701_s1 + $0x28] sm:$0xff] }
   0x3   :  { %v340_v6 = vpack.c.bf16 %v318_v5, %v317_v3  ;;  %v341_v9 = vpack.c.bf16 %v320_v8, %v319_v7  ;;  %v321_v10 = vld [vmem:[%s2701_s1 + $0x30] sm:$0xff]  ;;  %v322_v11 = vld [vmem:[%s2701_s1 + $0x38] sm:$0xff]  ;;  %v16_v12 = vld [vmem:[%s2702_s0 + $0x8] sm:$0xff] }
   0x4   :  { %510 = vmatpush1.bf16.msra.mxu0 %v339_v4  ;;  %1410 = vmatpush1.bf16.msra.mxu1 %v339_v4  ;;  %v18_v13 = vld [vmem:[%s2702_s0 + $0x18] sm:$0xff]  ;;  %v116_v14 = vld [vmem:[%s2702_s0 + $0x328] sm:$0xff]  ;;  %v342_v18 = vpack.c.bf16 %v322_v11, %v321_v10  ;;  %v323_v19 = vld [vmem:[%s2701_s1 + $0x40] sm:$0xff] }
   0x5   :  { %511 = vmatprep.subr.bf16.mxu0 %v1424_v0  ;;  %1399 = vmatprep.subr.bf16.mxu1 %v1424_v0  ;;  %v216_v15 = vpack.c.bf16 %v18_v13, %v16_v12  ;;  %v118_v16 = vld [vmem:[%s2702_s0 + $0x338] sm:$0xff]  ;;  %v324_v20 = vld [vmem:[%s2701_s1 + $0x48] sm:$0xff]  ;;  %v325_v22 = vld [vmem:[%s2701_s1 + $0x50] sm:$0xff] }
   0x6   :  { %v266_v17 = vpack.c.bf16 %v118_v16, %v116_v14  ;;  %v343_v21 = vpack.c.bf16 %v324_v20, %v323_v19  ;;  %v326_v23 = vld [vmem:[%s2701_s1 + $0x58] sm:$0xff]  ;;  %v327_v25 = vld [vmem:[%s2701_s1 + $0x60] sm:$0xff]  ;;  %v328_v26 = vld [vmem:[%s2701_s1 + $0x68] sm:$0xff] }
   0x7   :  { %1348 = vmatprep.mubr.msk.bf16.mxu0 %vm358_vm0, %v216_v15  ;;  %v344_v24 = vpack.c.bf16 %v326_v23, %v325_v22  ;;  %v345_v27 = vpack.c.bf16 %v328_v26, %v327_v25  ;;  %v329_v28 = vld [vmem:[%s2701_s1 + $0x70] sm:$0xff]  ;;  %v330_v29 = vld [vmem:[%s2701_s1 + $0x78] sm:$0xff]  ;;  %v331_v31 = vld [vmem:[%s2701_s1 + $0x80] sm:$0xff] }
   0x8   :  { %512 = vmatpush1.bf16.msra.mxu0 %v340_v6  ;;  %1411 = vmatpush1.bf16.msra.mxu1 %v340_v6  ;;  %v346_v30 = vpack.c.bf16 %v330_v29, %v329_v28  ;;  %v332_v32 = vld [vmem:[%s2701_s1 + $0x88] sm:$0xff]  ;;  %v333_v34 = vld [vmem:[%s2701_s1 + $0x90] sm:$0xff]  ;;  %v334_v35 = vld [vmem:[%s2701_s1 + $0x98] sm:$0xff] }
   0x9   :  { %513 = vmatprep.subr.bf16.mxu0 %v1424_v0  ;;  %1400 = vmatprep.subr.bf16.mxu1 %v1424_v0  ;;  %v347_v33 = vpack.c.bf16 %v332_v32, %v331_v31  ;;  %v348_v36 = vpack.c.bf16 %v334_v35, %v333_v34  ;;  %v335_v37 = vld [vmem:[%s2701_s1 + $0xa0] sm:$0xff]  ;;  %v336_v38 = vld [vmem:[%s2701_s1 + $0xa8] sm:$0xff]  ;;  %v337_v40 = vld [vmem:[%s2701_s1 + $0xb0] sm:$0xff] }
   0xa   :  { %1373 = vmatprep.mubr.msk.bf16.mxu1 %vm358_vm0, %v266_v17  ;;  %v349_v39 = vpack.c.bf16 %v336_v38, %v335_v37  ;;  %v338_v41 = vld [vmem:[%s2701_s1 + $0xb8] sm:$0xff]  ;;  %v15_v42 = vld [vmem:[%s2702_s0] sm:$0xff]  ;;  %v17_v43 = vld [vmem:[%s2702_s0 + $0x10] sm:$0xff] }
   0xb   :  { %v350_v44 = vpack.c.bf16 %v338_v41, %v337_v40  ;;  %v115_v45 = vld [vmem:[%s2702_s0 + $0x320] sm:$0xff]  ;;  %v117_v46 = vld [vmem:[%s2702_s0 + $0x330] sm:$0xff]  ;;  %v20_v47 = vld [vmem:[%s2702_s0 + $0x28] sm:$0xff]  ;;  %v215_v51 = vpack.c.bf16 %v17_v43, %v15_v42 }
   0xc   :  { %514 = vmatpush1.bf16.msra.mxu0 %v341_v9  ;;  %1412 = vmatpush1.bf16.msra.mxu1 %v341_v9  ;;  %v22_v48 = vld [vmem:[%s2702_s0 + $0x38] sm:$0xff]  ;;  %v120_v49 = vld [vmem:[%s2702_s0 + $0x348] sm:$0xff]  ;;  %v265_v52 = vpack.c.bf16 %v117_v46, %v115_v45  ;;  %v19_v55 = vld [vmem:[%s2702_s0 + $0x20] sm:$0xff] }
   0xd   :  { %515 = vmatprep.subr.bf16.mxu0 %v1424_v0  ;;  %1401 = vmatprep.subr.bf16.mxu1 %v1424_v0  ;;  %v122_v50 = vld [vmem:[%s2702_s0 + $0x358] sm:$0xff]  ;;  %v218_v53 = vpack.c.bf16 %v22_v48, %v20_v47  ;;  %v21_v56 = vld [vmem:[%s2702_s0 + $0x30] sm:$0xff]  ;;  %v119_v57 = vld [vmem:[%s2702_s0 + $0x340] sm:$0xff] }
   0xe   :  { %v268_v54 = vpack.c.bf16 %v122_v50, %v120_v49  ;;  %v121_v58 = vld [vmem:[%s2702_s0 + $0x350] sm:$0xff]  ;;  %v24_v59 = vld [vmem:[%s2702_s0 + $0x48] sm:$0xff]  ;;  %v26_v60 = vld [vmem:[%s2702_s0 + $0x58] sm:$0xff]  ;;  %v217_v63 = vpack.c.bf16 %v21_v56, %v19_v55 }
   0xf   :  { %v124_v61 = vld [vmem:[%s2702_s0 + $0x368] sm:$0xff]  ;;  %v126_v62 = vld [vmem:[%s2702_s0 + $0x378] sm:$0xff]  ;;  %v220_v1 = vpack.c.bf16 %v26_v60, %v24_v59  ;;  %v23_v3 = vld [vmem:[%s2702_s0 + $0x40] sm:$0xff] }
  0x10   :  { %516 = vmatpush1.bf16.msra.mxu0 %v342_v18  ;;  %1413 = vmatpush1.bf16.msra.mxu1 %v342_v18  ;;  %v270_v2 = vpack.c.bf16 %v126_v62, %v124_v61  ;;  %v25_v4 = vld [vmem:[%s2702_s0 + $0x50] sm:$0xff]  ;;  %v123_v5 = vld [vmem:[%s2702_s0 + $0x360] sm:$0xff]  ;;  %v28_v7 = vld [vmem:[%s2702_s0 + $0x68] sm:$0xff] }
  0x11   :  { %517 = vmatprep.subr.bf16.mxu0 %v1424_v0  ;;  %1402 = vmatprep.subr.bf16.mxu1 %v1424_v0  ;;  %v125_v6 = vld [vmem:[%s2702_s0 + $0x370] sm:$0xff]  ;;  %v30_v8 = vld [vmem:[%s2702_s0 + $0x78] sm:$0xff]  ;;  %v128_v9 = vld [vmem:[%s2702_s0 + $0x388] sm:$0xff]  ;;  %v219_v11 = vpack.c.bf16 %v25_v4, %v23_v3 }
  0x12   :  { %v130_v10 = vld [vmem:[%s2702_s0 + $0x398] sm:$0xff]  ;;  %v269_v12 = vpack.c.bf16 %v125_v6, %v123_v5  ;;  %v222_v13 = vpack.c.bf16 %v30_v8, %v28_v7  ;;  %v27_v15 = vld [vmem:[%s2702_s0 + $0x60] sm:$0xff]  ;;  %v29_v16 = vld [vmem:[%s2702_s0 + $0x70] sm:$0xff] }
  0x13   :  { %v272_v14 = vpack.c.bf16 %v130_v10, %v128_v9  ;;  %v127_v17 = vld [vmem:[%s2702_s0 + $0x380] sm:$0xff]  ;;  %v129_v18 = vld [vmem:[%s2702_s0 + $0x390] sm:$0xff]  ;;  %v32_v19 = vld [vmem:[%s2702_s0 + $0x88] sm:$0xff]  ;;  %v221_v23 = vpack.c.bf16 %v29_v16, %v27_v15 }
  0x14   :  { %518 = vmatpush1.bf16.msra.mxu0 %v343_v21  ;;  %1414 = vmatpush1.bf16.msra.mxu1 %v343_v21  ;;  %v34_v20 = vld [vmem:[%s2702_s0 + $0x98] sm:$0xff]  ;;  %v132_v21 = vld [vmem:[%s2702_s0 + $0x3a8] sm:$0xff]  ;;  %v33_v28 = vld [vmem:[%s2702_s0 + $0x90] sm:$0xff] }
  0x15   :  { %519 = vmatprep.subr.bf16.mxu0 %v1424_v0  ;;  %1403 = vmatprep.subr.bf16.mxu1 %v1424_v0  ;;  %v134_v22 = vld [vmem:[%s2702_s0 + $0x3b8] sm:$0xff]  ;;  %v224_v25 = vpack.c.bf16 %v34_v20, %v32_v19  ;;  %v131_v29 = vld [vmem:[%s2702_s0 + $0x3a0] sm:$0xff]  ;;  %v36_v31 = vld [vmem:[%s2702_s0 + $0xa8] sm:$0xff] }
  0x16   :  { %v274_v26 = vpack.c.bf16 %v134_v22, %v132_v21  ;;  %v38_v32 = vld [vmem:[%s2702_s0 + $0xb8] sm:$0xff]  ;;  %v37_v40 = vld [vmem:[%s2702_s0 + $0xb0] sm:$0xff]  ;;  %v135_v41 = vld [vmem:[%s2702_s0 + $0x3c0] sm:$0xff] }
  0x17   :  { %v138_v34 = vld [vmem:[%s2702_s0 + $0x3d8] sm:$0xff]  ;;  %v226_v37 = vpack.c.bf16 %v38_v32, %v36_v31  ;;  %v137_v42 = vld [vmem:[%s2702_s0 + $0x3d0] sm:$0xff]  ;;  %v40_v43 = vld [vmem:[%s2702_s0 + $0xc8] sm:$0xff] }
  0x18   :  { %520 = vmatpush1.bf16.msra.mxu0 %v344_v24  ;;  %1415 = vmatpush1.bf16.msra.mxu1 %v344_v24  ;;  %v271_v24 = vpack.c.bf16 %v129_v18, %v127_v17  ;;  %v140_v45 = vld [vmem:[%s2702_s0 + $0x3e8] sm:$0xff]  ;;  %v142_v46 = vld [vmem:[%s2702_s0 + $0x3f8] sm:$0xff]  ;;  %v275_v48 = vpack.c.bf16 %v137_v42, %v135_v41 }
  0x19   :  { %521 = vmatprep.subr.bf16.mxu0 %v1424_v0  ;;  %1404 = vmatprep.subr.bf16.mxu1 %v1424_v0  ;;  %v278_v50 = vpack.c.bf16 %v142_v46, %v140_v45  ;;  %v44_v55 = vld [vmem:[%s2702_s0 + $0xe8] sm:$0xff]  ;;  %v46_v56 = vld [vmem:[%s2702_s0 + $0xf8] sm:$0xff] }
  0x1a   :  { %v230_v61 = vpack.c.bf16 %v46_v56, %v44_v55  ;;  %v48_v3 = vld [vmem:[%s2702_s0 + $0x108] sm:$0xff]  ;;  %v50_v4 = vld [vmem:[%s2702_s0 + $0x118] sm:$0xff] }
  0x1b   :  { %v148_v5 = vld [vmem:[%s2702_s0 + $0x428] sm:$0xff]  ;;  %v150_v6 = vld [vmem:[%s2702_s0 + $0x438] sm:$0xff]  ;;  %v232_v9 = vpack.c.bf16 %v50_v4, %v48_v3 }
  0x1c   :  { %522 = vmatpush1.bf16.msra.mxu0 %v345_v27  ;;  %1416 = vmatpush1.bf16.msra.mxu1 %v345_v27  ;;  %v31_v27 = vld [vmem:[%s2702_s0 + $0x80] sm:$0xff]  ;;  %v282_v10 = vpack.c.bf16 %v150_v6, %v148_v5  ;;  %v52_v15 = vld [vmem:[%s2702_s0 + $0x128] sm:$0xff]  ;;  %v54_v16 = vld [vmem:[%s2702_s0 + $0x138] sm:$0xff] }
  0x1d   :  { %523 = vmatprep.subr.bf16.mxu0 %v1424_v0  ;;  %1405 = vmatprep.subr.bf16.mxu1 %v1424_v0  ;;  %v223_v35 = vpack.c.bf16 %v33_v28, %v31_v27  ;;  %v152_v17 = vld [vmem:[%s2702_s0 + $0x448] sm:$0xff]  ;;  %v154_v18 = vld [vmem:[%s2702_s0 + $0x458] sm:$0xff]  ;;  %v234_v21 = vpack.c.bf16 %v54_v16, %v52_v15 }
  0x1e   :  { %v284_v22 = vpack.c.bf16 %v154_v18, %v152_v17  ;;  %v56_v27 = vld [vmem:[%s2702_s0 + $0x148] sm:$0xff]  ;;  %v58_v28 = vld [vmem:[%s2702_s0 + $0x158] sm:$0xff] }
  0x1f   :  { %v160_v41 = vld [vmem:[%s2702_s0 + $0x488] sm:$0xff]  ;;  %v162_v42 = vld [vmem:[%s2702_s0 + $0x498] sm:$0xff] }
  0x20   :  { %524 = vmatpush1.bf16.msra.mxu0 %v346_v30  ;;  %1417 = vmatpush1.bf16.msra.mxu1 %v346_v30  ;;  %v133_v30 = vld [vmem:[%s2702_s0 + $0x3b0] sm:$0xff]  ;;  %v288_v46 = vpack.c.bf16 %v162_v42, %v160_v41 }
  0x21   :  { %525 = vmatprep.subr.bf16.mxu0 %v1424_v0  ;;  %1406 = vmatprep.subr.bf16.mxu1 %v1424_v0 }
  0x24   :  { %526 = vmatpush1.bf16.msra.mxu0 %v347_v33  ;;  %1418 = vmatpush1.bf16.msra.mxu1 %v347_v33  ;;  %v136_v33 = vld [vmem:[%s2702_s0 + $0x3c8] sm:$0xff] }
  0x25   :  { %527 = vmatprep.subr.bf16.mxu0 %v1424_v0  ;;  %1407 = vmatprep.subr.bf16.mxu1 %v1424_v0  ;;  %v276_v38 = vpack.c.bf16 %v138_v34, %v136_v33  ;;  %v236_v33 = vpack.c.bf16 %v58_v28, %v56_v27 }
  0x28   :  { %528 = vmatpush1.bf16.msra.mxu0 %v348_v36  ;;  %1419 = vmatpush1.bf16.msra.mxu1 %v348_v36  ;;  %v273_v36 = vpack.c.bf16 %v133_v30, %v131_v29  ;;  %v156_v29 = vld [vmem:[%s2702_s0 + $0x468] sm:$0xff]  ;;  %v158_v30 = vld [vmem:[%s2702_s0 + $0x478] sm:$0xff] }
  0x29   :  { %529 = vmatprep.subr.bf16.mxu0 %v1424_v0  ;;  %1408 = vmatprep.subr.bf16.mxu1 %v1424_v0  ;;  %v286_v34 = vpack.c.bf16 %v158_v30, %v156_v29 }
  0x2c   :  { %530 = vmatpush1.bf16.msra.mxu0 %v349_v39  ;;  %1420 = vmatpush1.bf16.msra.mxu1 %v349_v39  ;;  %v35_v39 = vld [vmem:[%s2702_s0 + $0xa0] sm:$0xff] }
  0x2d   :  { %531 = vmatprep.subr.bf16.mxu0 %v1424_v0  ;;  %1409 = vmatprep.subr.bf16.mxu1 %v1424_v0  ;;  %v267_v0 = vpack.c.bf16 %v121_v58, %v119_v57  ;;  %v225_v47 = vpack.c.bf16 %v37_v40, %v35_v39  ;;  %v144_v57 = vld [vmem:[%s2702_s0 + $0x408] sm:$0xff]  ;;  %v146_v58 = vld [vmem:[%s2702_s0 + $0x418] sm:$0xff] }
  0x2e   :  { %v280_v62 = vpack.c.bf16 %v146_v58, %v144_v57  ;;  %v60_v39 = vld [vmem:[%s2702_s0 + $0x168] sm:$0xff]  ;;  %v62_v40 = vld [vmem:[%s2702_s0 + $0x178] sm:$0xff] }
  0x2f   :  { %v238_v45 = vpack.c.bf16 %v62_v40, %v60_v39 }
  0x30   :  { %532 = vmatpush1.bf16.msra.mxu0 %v350_v44  ;;  %1421 = vmatpush1.bf16.msra.mxu1 %v350_v44  ;;  %v42_v44 = vld [vmem:[%s2702_s0 + $0xd8] sm:$0xff] }
  0x31   :  { %v228_v49 = vpack.c.bf16 %v42_v44, %v40_v43 }
  0x33   :  { %542 = vmatmul.mubr.bf16.vlgmr.msra.gmra.mrb[0].mxu0 %v215_v51  ;;  %742 = vmatmul.mubr.bf16.vlgmr.msra.gmra.mrb[0].mxu1 %v265_v52  ;;  %v39_v51 = vld [vmem:[%s2702_s0 + $0xc0] sm:$0xff]  ;;  %v41_v52 = vld [vmem:[%s2702_s0 + $0xd0] sm:$0xff] }
  0x34   :  { %1349 = vmatprep.mubr.msk.bf16.mxu0 %vm358_vm0, %v218_v53  ;;  %1374 = vmatprep.mubr.msk.bf16.mxu1 %vm358_vm0, %v268_v54  ;;  %v139_v53 = vld [vmem:[%s2702_s0 + $0x3e0] sm:$0xff]  ;;  %v141_v54 = vld [vmem:[%s2702_s0 + $0x3f0] sm:$0xff]  ;;  %v227_v59 = vpack.c.bf16 %v41_v52, %v39_v51  ;;  %v64_v51 = vld [vmem:[%s2702_s0 + $0x188] sm:$0xff] }
  0x35   :  { %v277_v60 = vpack.c.bf16 %v141_v54, %v139_v53  ;;  %v66_v52 = vld [vmem:[%s2702_s0 + $0x198] sm:$0xff]  ;;  %v164_v53 = vld [vmem:[%s2702_s0 + $0x4a8] sm:$0xff] }
  0x36   :  { %v166_v54 = vld [vmem:[%s2702_s0 + $0x4b8] sm:$0xff]  ;;  %v240_v57 = vpack.c.bf16 %v66_v52, %v64_v51 }
  0x37   :  { %v290_v58 = vpack.c.bf16 %v166_v54, %v164_v53 }
  0x3b   :  { %550 = vmatmul.mubr.bf16.gmra.mrb[4].mxu0 %v217_v63  ;;  %750 = vmatmul.mubr.bf16.gmra.mrb[4].mxu1 %v267_v0  ;;  %v43_v63 = vld [vmem:[%s2702_s0 + $0xe0] sm:$0xff]  ;;  %v45_v0 = vld [vmem:[%s2702_s0 + $0xf0] sm:$0xff] }
  0x3c   :  { %1350 = vmatprep.mubr.msk.bf16.mxu0 %vm358_vm0, %v220_v1  ;;  %1375 = vmatprep.mubr.msk.bf16.mxu1 %vm358_vm0, %v270_v2  ;;  %v143_v1 = vld [vmem:[%s2702_s0 + $0x400] sm:$0xff]  ;;  %v145_v2 = vld [vmem:[%s2702_s0 + $0x410] sm:$0xff]  ;;  %v229_v7 = vpack.c.bf16 %v45_v0, %v43_v63  ;;  %v68_v63 = vld [vmem:[%s2702_s0 + $0x1a8] sm:$0xff] }
  0x3d   :  { %v279_v8 = vpack.c.bf16 %v145_v2, %v143_v1  ;;  %v70_v0 = vld [vmem:[%s2702_s0 + $0x1b8] sm:$0xff]  ;;  %v168_v1 = vld [vmem:[%s2702_s0 + $0x4c8] sm:$0xff] }
  0x3e   :  { %v170_v2 = vld [vmem:[%s2702_s0 + $0x4d8] sm:$0xff]  ;;  %v242_v5 = vpack.c.bf16 %v70_v0, %v68_v63 }
  0x3f   :  { %v292_v6 = vpack.c.bf16 %v170_v2, %v168_v1 }
  0x43   :  { %558 = vmatmul.mubr.bf16.gmra.mrb[8].mxu0 %v219_v11  ;;  %758 = vmatmul.mubr.bf16.gmra.mrb[8].mxu1 %v269_v12  ;;  %v47_v11 = vld [vmem:[%s2702_s0 + $0x100] sm:$0xff]  ;;  %v49_v12 = vld [vmem:[%s2702_s0 + $0x110] sm:$0xff] }
  0x44   :  { %1351 = vmatprep.mubr.msk.bf16.mxu0 %vm358_vm0, %v222_v13  ;;  %1376 = vmatprep.mubr.msk.bf16.mxu1 %vm358_vm0, %v272_v14  ;;  %v147_v13 = vld [vmem:[%s2702_s0 + $0x420] sm:$0xff]  ;;  %v149_v14 = vld [vmem:[%s2702_s0 + $0x430] sm:$0xff]  ;;  %v231_v19 = vpack.c.bf16 %v49_v12, %v47_v11  ;;  %v72_v11 = vld [vmem:[%s2702_s0 + $0x1c8] sm:$0xff] }
  0x45   :  { %v281_v20 = vpack.c.bf16 %v149_v14, %v147_v13  ;;  %v74_v12 = vld [vmem:[%s2702_s0 + $0x1d8] sm:$0xff]  ;;  %v172_v13 = vld [vmem:[%s2702_s0 + $0x4e8] sm:$0xff] }
  0x46   :  { %v174_v14 = vld [vmem:[%s2702_s0 + $0x4f8] sm:$0xff]  ;;  %v244_v17 = vpack.c.bf16 %v74_v12, %v72_v11 }
  0x47   :  { %v294_v18 = vpack.c.bf16 %v174_v14, %v172_v13 }
  0x4b   :  { %566 = vmatmul.mubr.bf16.gmra.mrb[12].mxu0 %v221_v23  ;;  %766 = vmatmul.mubr.bf16.gmra.mrb[12].mxu1 %v271_v24  ;;  %v51_v23 = vld [vmem:[%s2702_s0 + $0x120] sm:$0xff]  ;;  %v53_v24 = vld [vmem:[%s2702_s0 + $0x130] sm:$0xff] }
  0x4c   :  { %1352 = vmatprep.mubr.msk.bf16.mxu0 %vm358_vm0, %v224_v25  ;;  %1377 = vmatprep.mubr.msk.bf16.mxu1 %vm358_vm0, %v274_v26  ;;  %v151_v25 = vld [vmem:[%s2702_s0 + $0x440] sm:$0xff]  ;;  %v153_v26 = vld [vmem:[%s2702_s0 + $0x450] sm:$0xff]  ;;  %v233_v31 = vpack.c.bf16 %v53_v24, %v51_v23  ;;  %v76_v23 = vld [vmem:[%s2702_s0 + $0x1e8] sm:$0xff] }
  0x4d   :  { %v283_v32 = vpack.c.bf16 %v153_v26, %v151_v25  ;;  %v78_v24 = vld [vmem:[%s2702_s0 + $0x1f8] sm:$0xff]  ;;  %v176_v25 = vld [vmem:[%s2702_s0 + $0x508] sm:$0xff] }
  0x4e   :  { %v178_v26 = vld [vmem:[%s2702_s0 + $0x518] sm:$0xff]  ;;  %v246_v29 = vpack.c.bf16 %v78_v24, %v76_v23 }
  0x4f   :  { %v296_v30 = vpack.c.bf16 %v178_v26, %v176_v25 }
  0x53   :  { %574 = vmatmul.mubr.bf16.gmra.mrb[16].mxu0 %v223_v35  ;;  %774 = vmatmul.mubr.bf16.gmra.mrb[16].mxu1 %v273_v36  ;;  %v55_v35 = vld [vmem:[%s2702_s0 + $0x140] sm:$0xff]  ;;  %v57_v36 = vld [vmem:[%s2702_s0 + $0x150] sm:$0xff] }
  0x54   :  { %1353 = vmatprep.mubr.msk.bf16.mxu0 %vm358_vm0, %v226_v37  ;;  %1378 = vmatprep.mubr.msk.bf16.mxu1 %vm358_vm0, %v276_v38  ;;  %v155_v37 = vld [vmem:[%s2702_s0 + $0x460] sm:$0xff]  ;;  %v157_v38 = vld [vmem:[%s2702_s0 + $0x470] sm:$0xff]  ;;  %v235_v43 = vpack.c.bf16 %v57_v36, %v55_v35  ;;  %v80_v35 = vld [vmem:[%s2702_s0 + $0x208] sm:$0xff] }
  0x55   :  { %v285_v44 = vpack.c.bf16 %v157_v38, %v155_v37  ;;  %v82_v36 = vld [vmem:[%s2702_s0 + $0x218] sm:$0xff]  ;;  %v180_v37 = vld [vmem:[%s2702_s0 + $0x528] sm:$0xff] }
  0x56   :  { %v182_v38 = vld [vmem:[%s2702_s0 + $0x538] sm:$0xff]  ;;  %v248_v41 = vpack.c.bf16 %v82_v36, %v80_v35 }
  0x57   :  { %v298_v42 = vpack.c.bf16 %v182_v38, %v180_v37 }
  0x5b   :  { %582 = vmatmul.mubr.bf16.gmra.mrb[20].mxu0 %v225_v47  ;;  %782 = vmatmul.mubr.bf16.gmra.mrb[20].mxu1 %v275_v48  ;;  %v59_v47 = vld [vmem:[%s2702_s0 + $0x160] sm:$0xff]  ;;  %v61_v48 = vld [vmem:[%s2702_s0 + $0x170] sm:$0xff] }
  0x5c   :  { %1354 = vmatprep.mubr.msk.bf16.mxu0 %vm358_vm0, %v228_v49  ;;  %1379 = vmatprep.mubr.msk.bf16.mxu1 %vm358_vm0, %v278_v50  ;;  %v159_v49 = vld [vmem:[%s2702_s0 + $0x480] sm:$0xff]  ;;  %v161_v50 = vld [vmem:[%s2702_s0 + $0x490] sm:$0xff]  ;;  %v237_v55 = vpack.c.bf16 %v61_v48, %v59_v47  ;;  %v84_v47 = vld [vmem:[%s2702_s0 + $0x228] sm:$0xff] }
  0x5d   :  { %v287_v56 = vpack.c.bf16 %v161_v50, %v159_v49  ;;  %v86_v48 = vld [vmem:[%s2702_s0 + $0x238] sm:$0xff]  ;;  %v184_v49 = vld [vmem:[%s2702_s0 + $0x548] sm:$0xff] }
  0x5e   :  { %v186_v50 = vld [vmem:[%s2702_s0 + $0x558] sm:$0xff]  ;;  %v250_v53 = vpack.c.bf16 %v86_v48, %v84_v47 }
  0x5f   :  { %v300_v54 = vpack.c.bf16 %v186_v50, %v184_v49 }
  0x63   :  { %590 = vmatmul.mubr.bf16.gmra.mrb[24].mxu0 %v227_v59  ;;  %790 = vmatmul.mubr.bf16.gmra.mrb[24].mxu1 %v277_v60  ;;  %v63_v59 = vld [vmem:[%s2702_s0 + $0x180] sm:$0xff]  ;;  %v65_v60 = vld [vmem:[%s2702_s0 + $0x190] sm:$0xff] }
  0x64   :  { %1355 = vmatprep.mubr.msk.bf16.mxu0 %vm358_vm0, %v230_v61  ;;  %1380 = vmatprep.mubr.msk.bf16.mxu1 %vm358_vm0, %v280_v62  ;;  %v163_v61 = vld [vmem:[%s2702_s0 + $0x4a0] sm:$0xff]  ;;  %v165_v62 = vld [vmem:[%s2702_s0 + $0x4b0] sm:$0xff]  ;;  %v239_v3 = vpack.c.bf16 %v65_v60, %v63_v59  ;;  %v88_v59 = vld [vmem:[%s2702_s0 + $0x248] sm:$0xff] }
  0x65   :  { %v289_v4 = vpack.c.bf16 %v165_v62, %v163_v61  ;;  %v90_v60 = vld [vmem:[%s2702_s0 + $0x258] sm:$0xff]  ;;  %v188_v61 = vld [vmem:[%s2702_s0 + $0x568] sm:$0xff] }
  0x66   :  { %v190_v62 = vld [vmem:[%s2702_s0 + $0x578] sm:$0xff]  ;;  %v252_v1 = vpack.c.bf16 %v90_v60, %v88_v59 }
  0x67   :  { %v302_v2 = vpack.c.bf16 %v190_v62, %v188_v61 }
  0x6b   :  { %598 = vmatmul.mubr.bf16.gmra.mrb[28].mxu0 %v229_v7  ;;  %798 = vmatmul.mubr.bf16.gmra.mrb[28].mxu1 %v279_v8  ;;  %v67_v7 = vld [vmem:[%s2702_s0 + $0x1a0] sm:$0xff]  ;;  %v69_v8 = vld [vmem:[%s2702_s0 + $0x1b0] sm:$0xff] }
  0x6c   :  { %1356 = vmatprep.mubr.msk.bf16.mxu0 %vm358_vm0, %v232_v9  ;;  %1381 = vmatprep.mubr.msk.bf16.mxu1 %vm358_vm0, %v282_v10  ;;  %v167_v9 = vld [vmem:[%s2702_s0 + $0x4c0] sm:$0xff]  ;;  %v169_v10 = vld [vmem:[%s2702_s0 + $0x4d0] sm:$0xff]  ;;  %v241_v15 = vpack.c.bf16 %v69_v8, %v67_v7  ;;  %v92_v7 = vld [vmem:[%s2702_s0 + $0x268] sm:$0xff] }
  0x6d   :  { %v291_v16 = vpack.c.bf16 %v169_v10, %v167_v9  ;;  %v94_v8 = vld [vmem:[%s2702_s0 + $0x278] sm:$0xff]  ;;  %v192_v9 = vld [vmem:[%s2702_s0 + $0x588] sm:$0xff] }
  0x6e   :  { %v194_v10 = vld [vmem:[%s2702_s0 + $0x598] sm:$0xff]  ;;  %v254_v13 = vpack.c.bf16 %v94_v8, %v92_v7 }
  0x6f   :  { %v304_v14 = vpack.c.bf16 %v194_v10, %v192_v9 }
  0x73   :  { %606 = vmatmul.mubr.bf16.gmra.mrb[32].mxu0 %v231_v19  ;;  %806 = vmatmul.mubr.bf16.gmra.mrb[32].mxu1 %v281_v20  ;;  %v71_v19 = vld [vmem:[%s2702_s0 + $0x1c0] sm:$0xff]  ;;  %v73_v20 = vld [vmem:[%s2702_s0 + $0x1d0] sm:$0xff] }
  0x74   :  { %1357 = vmatprep.mubr.msk.bf16.mxu0 %vm358_vm0, %v234_v21  ;;  %1382 = vmatprep.mubr.msk.bf16.mxu1 %vm358_vm0, %v284_v22  ;;  %v171_v21 = vld [vmem:[%s2702_s0 + $0x4e0] sm:$0xff]  ;;  %v173_v22 = vld [vmem:[%s2702_s0 + $0x4f0] sm:$0xff]  ;;  %v243_v27 = vpack.c.bf16 %v73_v20, %v71_v19  ;;  %v96_v19 = vld [vmem:[%s2702_s0 + $0x288] sm:$0xff] }
  0x75   :  { %v293_v28 = vpack.c.bf16 %v173_v22, %v171_v21  ;;  %v98_v20 = vld [vmem:[%s2702_s0 + $0x298] sm:$0xff]  ;;  %v196_v21 = vld [vmem:[%s2702_s0 + $0x5a8] sm:$0xff] }
  0x76   :  { %v198_v22 = vld [vmem:[%s2702_s0 + $0x5b8] sm:$0xff]  ;;  %v256_v25 = vpack.c.bf16 %v98_v20, %v96_v19 }
  0x77   :  { %v306_v26 = vpack.c.bf16 %v198_v22, %v196_v21 }
  0x7b   :  { %614 = vmatmul.mubr.bf16.gmra.mrb[36].mxu0 %v233_v31  ;;  %814 = vmatmul.mubr.bf16.gmra.mrb[36].mxu1 %v283_v32  ;;  %v75_v31 = vld [vmem:[%s2702_s0 + $0x1e0] sm:$0xff]  ;;  %v77_v32 = vld [vmem:[%s2702_s0 + $0x1f0] sm:$0xff] }
  0x7c   :  { %1358 = vmatprep.mubr.msk.bf16.mxu0 %vm358_vm0, %v236_v33  ;;  %1383 = vmatprep.mubr.msk.bf16.mxu1 %vm358_vm0, %v286_v34  ;;  %v175_v33 = vld [vmem:[%s2702_s0 + $0x500] sm:$0xff]  ;;  %v177_v34 = vld [vmem:[%s2702_s0 + $0x510] sm:$0xff]  ;;  %v245_v39 = vpack.c.bf16 %v77_v32, %v75_v31  ;;  %v100_v31 = vld [vmem:[%s2702_s0 + $0x2a8] sm:$0xff] }
  0x7d   :  { %v295_v40 = vpack.c.bf16 %v177_v34, %v175_v33  ;;  %v102_v32 = vld [vmem:[%s2702_s0 + $0x2b8] sm:$0xff]  ;;  %v200_v33 = vld [vmem:[%s2702_s0 + $0x5c8] sm:$0xff] }
  0x7e   :  { %v202_v34 = vld [vmem:[%s2702_s0 + $0x5d8] sm:$0xff]  ;;  %v258_v37 = vpack.c.bf16 %v102_v32, %v100_v31 }
  0x7f   :  { %v308_v38 = vpack.c.bf16 %v202_v34, %v200_v33 }
  0x83   :  { %622 = vmatmul.mubr.bf16.gmra.mrb[40].mxu0 %v235_v43  ;;  %822 = vmatmul.mubr.bf16.gmra.mrb[40].mxu1 %v285_v44  ;;  %v79_v43 = vld [vmem:[%s2702_s0 + $0x200] sm:$0xff]  ;;  %v81_v44 = vld [vmem:[%s2702_s0 + $0x210] sm:$0xff] }
  0x84   :  { %1359 = vmatprep.mubr.msk.bf16.mxu0 %vm358_vm0, %v238_v45  ;;  %1384 = vmatprep.mubr.msk.bf16.mxu1 %vm358_vm0, %v288_v46  ;;  %v179_v45 = vld [vmem:[%s2702_s0 + $0x520] sm:$0xff]  ;;  %v181_v46 = vld [vmem:[%s2702_s0 + $0x530] sm:$0xff]  ;;  %v247_v51 = vpack.c.bf16 %v81_v44, %v79_v43  ;;  %v104_v43 = vld [vmem:[%s2702_s0 + $0x2c8] sm:$0xff] }
  0x85   :  { %v297_v52 = vpack.c.bf16 %v181_v46, %v179_v45  ;;  %v106_v44 = vld [vmem:[%s2702_s0 + $0x2d8] sm:$0xff]  ;;  %v204_v45 = vld [vmem:[%s2702_s0 + $0x5e8] sm:$0xff] }
  0x86   :  { %v206_v46 = vld [vmem:[%s2702_s0 + $0x5f8] sm:$0xff]  ;;  %v260_v49 = vpack.c.bf16 %v106_v44, %v104_v43 }
  0x87   :  { %v310_v50 = vpack.c.bf16 %v206_v46, %v204_v45 }
  0x8b   :  { %630 = vmatmul.mubr.bf16.gmra.mrb[44].mxu0 %v237_v55  ;;  %830 = vmatmul.mubr.bf16.gmra.mrb[44].mxu1 %v287_v56  ;;  %v83_v55 = vld [vmem:[%s2702_s0 + $0x220] sm:$0xff]  ;;  %v85_v56 = vld [vmem:[%s2702_s0 + $0x230] sm:$0xff] }
  0x8c   :  { %1360 = vmatprep.mubr.msk.bf16.mxu0 %vm358_vm0, %v240_v57  ;;  %1385 = vmatprep.mubr.msk.bf16.mxu1 %vm358_vm0, %v290_v58  ;;  %v183_v57 = vld [vmem:[%s2702_s0 + $0x540] sm:$0xff]  ;;  %v185_v58 = vld [vmem:[%s2702_s0 + $0x550] sm:$0xff]  ;;  %v249_v63 = vpack.c.bf16 %v85_v56, %v83_v55  ;;  %v108_v55 = vld [vmem:[%s2702_s0 + $0x2e8] sm:$0xff] }
  0x8d   :  { %v299_v0 = vpack.c.bf16 %v185_v58, %v183_v57  ;;  %v110_v56 = vld [vmem:[%s2702_s0 + $0x2f8] sm:$0xff]  ;;  %v208_v57 = vld [vmem:[%s2702_s0 + $0x608] sm:$0xff] }
  0x8e   :  { %v210_v58 = vld [vmem:[%s2702_s0 + $0x618] sm:$0xff]  ;;  %v262_v61 = vpack.c.bf16 %v110_v56, %v108_v55 }
  0x8f   :  { %v312_v62 = vpack.c.bf16 %v210_v58, %v208_v57 }
  0x93   :  { %638 = vmatmul.mubr.bf16.gmra.mrb[48].mxu0 %v239_v3  ;;  %838 = vmatmul.mubr.bf16.gmra.mrb[48].mxu1 %v289_v4  ;;  %v87_v3 = vld [vmem:[%s2702_s0 + $0x240] sm:$0xff]  ;;  %v89_v4 = vld [vmem:[%s2702_s0 + $0x250] sm:$0xff] }
  0x94   :  { %1361 = vmatprep.mubr.msk.bf16.mxu0 %vm358_vm0, %v242_v5  ;;  %1386 = vmatprep.mubr.msk.bf16.mxu1 %vm358_vm0, %v292_v6  ;;  %v187_v5 = vld [vmem:[%s2702_s0 + $0x560] sm:$0xff]  ;;  %v189_v6 = vld [vmem:[%s2702_s0 + $0x570] sm:$0xff]  ;;  %v251_v11 = vpack.c.bf16 %v89_v4, %v87_v3  ;;  %v112_v3 = vld [vmem:[%s2702_s0 + $0x308] sm:$0xff] }
  0x95   :  { %v301_v12 = vpack.c.bf16 %v189_v6, %v187_v5  ;;  %v114_v4 = vld [vmem:[%s2702_s0 + $0x318] sm:$0xff]  ;;  %v212_v5 = vld [vmem:[%s2702_s0 + $0x628] sm:$0xff] }
  0x96   :  { %v214_v6 = vld [vmem:[%s2702_s0 + $0x638] sm:$0xff]  ;;  %v264_v9 = vpack.c.bf16 %v114_v4, %v112_v3 }
  0x97   :  { %v314_v10 = vpack.c.bf16 %v214_v6, %v212_v5 }
  0x9b   :  { %646 = vmatmul.mubr.bf16.gmra.mrb[52].mxu0 %v241_v15  ;;  %846 = vmatmul.mubr.bf16.gmra.mrb[52].mxu1 %v291_v16  ;;  %v91_v15 = vld [vmem:[%s2702_s0 + $0x260] sm:$0xff]  ;;  %v93_v16 = vld [vmem:[%s2702_s0 + $0x270] sm:$0xff] }
  0x9c   :  { %1362 = vmatprep.mubr.msk.bf16.mxu0 %vm358_vm0, %v244_v17  ;;  %1387 = vmatprep.mubr.msk.bf16.mxu1 %vm358_vm0, %v294_v18  ;;  %v191_v17 = vld [vmem:[%s2702_s0 + $0x580] sm:$0xff]  ;;  %v193_v18 = vld [vmem:[%s2702_s0 + $0x590] sm:$0xff]  ;;  %v253_v23 = vpack.c.bf16 %v93_v16, %v91_v15 }
  0x9d   :  { %v303_v24 = vpack.c.bf16 %v193_v18, %v191_v17  ;;  %v2194_v17 = vld [vmem:[%s2703_s2] ss:$0 sm:$0xff] }
  0xa3   :  { %654 = vmatmul.mubr.bf16.gmra.mrb[56].mxu0 %v243_v27  ;;  %854 = vmatmul.mubr.bf16.gmra.mrb[56].mxu1 %v293_v28  ;;  %v95_v27 = vld [vmem:[%s2702_s0 + $0x280] sm:$0xff]  ;;  %v97_v28 = vld [vmem:[%s2702_s0 + $0x290] sm:$0xff] }
  0xa4   :  { %1363 = vmatprep.mubr.msk.bf16.mxu0 %vm358_vm0, %v246_v29  ;;  %1388 = vmatprep.mubr.msk.bf16.mxu1 %vm358_vm0, %v296_v30  ;;  %v195_v29 = vld [vmem:[%s2702_s0 + $0x5a0] sm:$0xff]  ;;  %v197_v30 = vld [vmem:[%s2702_s0 + $0x5b0] sm:$0xff]  ;;  %v255_v35 = vpack.c.bf16 %v97_v28, %v95_v27 }
  0xa5   :  { %v305_v36 = vpack.c.bf16 %v197_v30, %v195_v29 }
  0xab   :  { %662 = vmatmul.mubr.bf16.gmra.mrb[60].mxu0 %v245_v39  ;;  %862 = vmatmul.mubr.bf16.gmra.mrb[60].mxu1 %v295_v40  ;;  %v99_v39 = vld [vmem:[%s2702_s0 + $0x2a0] sm:$0xff]  ;;  %v101_v40 = vld [vmem:[%s2702_s0 + $0x2b0] sm:$0xff] }
  0xac   :  { %1364 = vmatprep.mubr.msk.bf16.mxu0 %vm358_vm0, %v248_v41  ;;  %1389 = vmatprep.mubr.msk.bf16.mxu1 %vm358_vm0, %v298_v42  ;;  %v199_v41 = vld [vmem:[%s2702_s0 + $0x5c0] sm:$0xff]  ;;  %v201_v42 = vld [vmem:[%s2702_s0 + $0x5d0] sm:$0xff]  ;;  %v257_v47 = vpack.c.bf16 %v101_v40, %v99_v39 }
  0xad   :  { %v307_v48 = vpack.c.bf16 %v201_v42, %v199_v41 }
  0xb3   :  { %670 = vmatmul.mubr.bf16.gmra.mrb[64].mxu0 %v247_v51  ;;  %870 = vmatmul.mubr.bf16.gmra.mrb[64].mxu1 %v297_v52  ;;  %v103_v51 = vld [vmem:[%s2702_s0 + $0x2c0] sm:$0xff]  ;;  %v105_v52 = vld [vmem:[%s2702_s0 + $0x2d0] sm:$0xff] }
  0xb4   :  { %1365 = vmatprep.mubr.msk.bf16.mxu0 %vm358_vm0, %v250_v53  ;;  %1390 = vmatprep.mubr.msk.bf16.mxu1 %vm358_vm0, %v300_v54  ;;  %v203_v53 = vld [vmem:[%s2702_s0 + $0x5e0] sm:$0xff]  ;;  %v205_v54 = vld [vmem:[%s2702_s0 + $0x5f0] sm:$0xff]  ;;  %v259_v59 = vpack.c.bf16 %v105_v52, %v103_v51 }
  0xb5   :  { %v309_v60 = vpack.c.bf16 %v205_v54, %v203_v53 }
  0xbb   :  { %678 = vmatmul.mubr.bf16.gmra.mrb[68].mxu0 %v249_v63  ;;  %878 = vmatmul.mubr.bf16.gmra.mrb[68].mxu1 %v299_v0  ;;  %v107_v63 = vld [vmem:[%s2702_s0 + $0x2e0] sm:$0xff]  ;;  %v109_v0 = vld [vmem:[%s2702_s0 + $0x2f0] sm:$0xff] }
  0xbc   :  { %1366 = vmatprep.mubr.msk.bf16.mxu0 %vm358_vm0, %v252_v1  ;;  %1391 = vmatprep.mubr.msk.bf16.mxu1 %vm358_vm0, %v302_v2  ;;  %v207_v1 = vld [vmem:[%s2702_s0 + $0x600] sm:$0xff]  ;;  %v209_v2 = vld [vmem:[%s2702_s0 + $0x610] sm:$0xff]  ;;  %v261_v7 = vpack.c.bf16 %v109_v0, %v107_v63 }
  0xbd   :  { %v311_v8 = vpack.c.bf16 %v209_v2, %v207_v1 }
  0xc3   :  { %686 = vmatmul.mubr.bf16.gmra.mrb[72].mxu0 %v251_v11  ;;  %886 = vmatmul.mubr.bf16.gmra.mrb[72].mxu1 %v301_v12  ;;  %v111_v11 = vld [vmem:[%s2702_s0 + $0x300] sm:$0xff]  ;;  %v113_v12 = vld [vmem:[%s2702_s0 + $0x310] sm:$0xff] }
  0xc4   :  { %1367 = vmatprep.mubr.msk.bf16.mxu0 %vm358_vm0, %v254_v13  ;;  %1392 = vmatprep.mubr.msk.bf16.mxu1 %vm358_vm0, %v304_v14  ;;  %v211_v13 = vld [vmem:[%s2702_s0 + $0x620] sm:$0xff]  ;;  %v213_v14 = vld [vmem:[%s2702_s0 + $0x630] sm:$0xff]  ;;  %v263_v15 = vpack.c.bf16 %v113_v12, %v111_v11 }
  0xc5   :  { %v313_v16 = vpack.c.bf16 %v213_v14, %v211_v13 }
  0xcb   :  { %694 = vmatmul.mubr.bf16.gmra.mrb[76].mxu0 %v253_v23  ;;  %894 = vmatmul.mubr.bf16.gmra.mrb[76].mxu1 %v303_v24 }
  0xcc   :  { %1368 = vmatprep.mubr.msk.bf16.mxu0 %vm358_vm0, %v256_v25  ;;  %1393 = vmatprep.mubr.msk.bf16.mxu1 %vm358_vm0, %v306_v26 }
  0xd3   :  { %702 = vmatmul.mubr.bf16.gmra.mrb[80].mxu0 %v255_v35  ;;  %902 = vmatmul.mubr.bf16.gmra.mrb[80].mxu1 %v305_v36 }
  0xd4   :  { %1369 = vmatprep.mubr.msk.bf16.mxu0 %vm358_vm0, %v258_v37  ;;  %1394 = vmatprep.mubr.msk.bf16.mxu1 %vm358_vm0, %v308_v38 }
  0xdb   :  { %710 = vmatmul.mubr.bf16.gmra.mrb[84].mxu0 %v257_v47  ;;  %910 = vmatmul.mubr.bf16.gmra.mrb[84].mxu1 %v307_v48 }
  0xdc   :  { %1370 = vmatprep.mubr.msk.bf16.mxu0 %vm358_vm0, %v260_v49  ;;  %1395 = vmatprep.mubr.msk.bf16.mxu1 %vm358_vm0, %v310_v50 }
  0xe3   :  { %718 = vmatmul.mubr.bf16.gmra.mrb[88].mxu0 %v259_v59  ;;  %918 = vmatmul.mubr.bf16.gmra.mrb[88].mxu1 %v309_v60 }
  0xe4   :  { %1371 = vmatprep.mubr.msk.bf16.mxu0 %vm358_vm0, %v262_v61  ;;  %1396 = vmatprep.mubr.msk.bf16.mxu1 %vm358_vm0, %v312_v62 }
  0xeb   :  { %726 = vmatmul.mubr.bf16.gmra.mrb[92].mxu0 %v261_v7  ;;  %926 = vmatmul.mubr.bf16.gmra.mrb[92].mxu1 %v311_v8 }
  0xec   :  { %1372 = vmatprep.mubr.msk.bf16.mxu0 %vm358_vm0, %v264_v9  ;;  %1397 = vmatprep.mubr.msk.bf16.mxu1 %vm358_vm0, %v314_v10 }
  0xf3   :  { %734 = vmatmul.mubr.bf16.gmra.mrb[96].mxu0 %v263_v15  ;;  %934 = vmatmul.mubr.bf16.gmra.mrb[96].mxu1 %v313_v16 }
 0x106   :  { %v543_v18 = vpop.f32.mrb[0].mxu0  ;;  %v743_v19 = vpop.f32.mrb[0].mxu1 }
 0x107   :  { %v544_v20 = vadd.f32 %v2194_v17, %v543_v18  ;;  %v744_v21 = vadd.f32 %v2194_v17, %v743_v19  ;;  %v545_v22 = vpop.f32.mrb[1].mxu0  ;;  %v745_v23 = vpop.f32.mrb[1].mxu1 }
 0x108   :  { %v546_v24 = vpop.f32.mrb[2].mxu0  ;;  %v746_v25 = vpop.f32.mrb[2].mxu1 }
 0x109   :  { %vm942_vm2 = vcmp.ge.f32.partialorder %v544_v20, 0.0  ;;  %v1042_v26 = vmul.f32 0.01, %v544_v20  ;;  %vm992_vm3 = vcmp.ge.f32.partialorder %v744_v21, 0.0  ;;  %v1092_v27 = vmul.f32 0.01, %v744_v21 }
 0x10a   :  { %v547_v28 = vadd.f32 %v2194_v17, %v546_v24  ;;  %v747_v29 = vadd.f32 %v2194_v17, %v746_v25  ;;  %v548_v30 = vpop.f32.mrb[3].mxu0  ;;  %v748_v31 = vpop.f32.mrb[3].mxu1 }
 0x10b   :  { %v1142_v32 = vsel %vm942_vm2, %v544_v20, %v1042_v26  ;;  %v1192_v33 = vsel %vm992_vm3, %v744_v21, %v1092_v27 }
 0x10c   :  { %1243 = vst.msk [vmem:[%s2704_s3] sm:$0xff] %vm1242_vm1, %v1142_v32  ;;  %1293 = vst.msk [vmem:[%s2704_s3 + $0x190] sm:$0xff] %vm1242_vm1, %v1192_v33  ;;  %vm943_vm4 = vcmp.ge.f32.partialorder %v547_v28, 0.0  ;;  %v1043_v34 = vmul.f32 0.01, %v547_v28  ;;  %vm993_vm5 = vcmp.ge.f32.partialorder %v747_v29, 0.0 }
 0x10d   :  { %v1093_v35 = vmul.f32 0.01, %v747_v29 }
 0x10e   :  { %v1143_v36 = vsel %vm943_vm4, %v547_v28, %v1043_v34  ;;  %v551_v38 = vpop.f32.mrb[4].mxu0  ;;  %v751_v39 = vpop.f32.mrb[4].mxu1 }
 0x10f   :  { %v1193_v37 = vsel %vm993_vm5, %v747_v29, %v1093_v35  ;;  %1244 = vst.msk [vmem:[%s2704_s3 + $0x8] sm:$0xff] %vm1242_vm1, %v1143_v36  ;;  %v552_v40 = vadd.f32 %v2194_v17, %v551_v38  ;;  %v752_v41 = vadd.f32 %v2194_v17, %v751_v39  ;;  %v553_v42 = vpop.f32.mrb[5].mxu0  ;;  %v753_v43 = vpop.f32.mrb[5].mxu1 }
 0x110   :  { %1294 = vst.msk [vmem:[%s2704_s3 + $0x198] sm:$0xff] %vm1242_vm1, %v1193_v37  ;;  %v554_v44 = vpop.f32.mrb[6].mxu0  ;;  %v754_v45 = vpop.f32.mrb[6].mxu1 }
 0x111   :  { %vm944_vm6 = vcmp.ge.f32.partialorder %v552_v40, 0.0  ;;  %v1044_v46 = vmul.f32 0.01, %v552_v40  ;;  %vm994_vm7 = vcmp.ge.f32.partialorder %v752_v41, 0.0  ;;  %v1094_v47 = vmul.f32 0.01, %v752_v41 }
 0x112   :  { %v555_v48 = vadd.f32 %v2194_v17, %v554_v44  ;;  %v755_v49 = vadd.f32 %v2194_v17, %v754_v45  ;;  %v556_v50 = vpop.f32.mrb[7].mxu0  ;;  %v756_v51 = vpop.f32.mrb[7].mxu1 }
 0x113   :  { %v1144_v52 = vsel %vm944_vm6, %v552_v40, %v1044_v46  ;;  %v1194_v53 = vsel %vm994_vm7, %v752_v41, %v1094_v47 }
 0x114   :  { %1245 = vst.msk [vmem:[%s2704_s3 + $0x10] sm:$0xff] %vm1242_vm1, %v1144_v52  ;;  %1295 = vst.msk [vmem:[%s2704_s3 + $0x1a0] sm:$0xff] %vm1242_vm1, %v1194_v53  ;;  %vm945_vm8 = vcmp.ge.f32.partialorder %v555_v48, 0.0  ;;  %v1045_v54 = vmul.f32 0.01, %v555_v48  ;;  %vm995_vm9 = vcmp.ge.f32.partialorder %v755_v49, 0.0 }
 0x115   :  { %v1095_v55 = vmul.f32 0.01, %v755_v49 }
 0x116   :  { %v1145_v56 = vsel %vm945_vm8, %v555_v48, %v1045_v54  ;;  %v559_v58 = vpop.f32.mrb[8].mxu0  ;;  %v759_v59 = vpop.f32.mrb[8].mxu1 }
 0x117   :  { %v1195_v57 = vsel %vm995_vm9, %v755_v49, %v1095_v55  ;;  %1246 = vst.msk [vmem:[%s2704_s3 + $0x18] sm:$0xff] %vm1242_vm1, %v1145_v56  ;;  %v560_v60 = vadd.f32 %v2194_v17, %v559_v58  ;;  %v760_v61 = vadd.f32 %v2194_v17, %v759_v59  ;;  %v561_v62 = vpop.f32.mrb[9].mxu0  ;;  %v761_v63 = vpop.f32.mrb[9].mxu1 }
 0x118   :  { %1296 = vst.msk [vmem:[%s2704_s3 + $0x1a8] sm:$0xff] %vm1242_vm1, %v1195_v57  ;;  %v562_v0 = vpop.f32.mrb[10].mxu0  ;;  %v762_v1 = vpop.f32.mrb[10].mxu1 }
 0x119   :  { %vm946_vm10 = vcmp.ge.f32.partialorder %v560_v60, 0.0  ;;  %v1046_v2 = vmul.f32 0.01, %v560_v60  ;;  %vm996_vm11 = vcmp.ge.f32.partialorder %v760_v61, 0.0  ;;  %v1096_v3 = vmul.f32 0.01, %v760_v61 }
 0x11a   :  { %v563_v4 = vadd.f32 %v2194_v17, %v562_v0  ;;  %v763_v5 = vadd.f32 %v2194_v17, %v762_v1  ;;  %v564_v6 = vpop.f32.mrb[11].mxu0  ;;  %v764_v7 = vpop.f32.mrb[11].mxu1 }
 0x11b   :  { %v1146_v8 = vsel %vm946_vm10, %v560_v60, %v1046_v2  ;;  %v1196_v9 = vsel %vm996_vm11, %v760_v61, %v1096_v3 }
 0x11c   :  { %1247 = vst.msk [vmem:[%s2704_s3 + $0x20] sm:$0xff] %vm1242_vm1, %v1146_v8  ;;  %1297 = vst.msk [vmem:[%s2704_s3 + $0x1b0] sm:$0xff] %vm1242_vm1, %v1196_v9  ;;  %vm947_vm12 = vcmp.ge.f32.partialorder %v563_v4, 0.0  ;;  %v1047_v10 = vmul.f32 0.01, %v563_v4  ;;  %vm997_vm13 = vcmp.ge.f32.partialorder %v763_v5, 0.0 }
 0x11d   :  { %v1097_v11 = vmul.f32 0.01, %v763_v5 }
 0x11e   :  { %v1147_v12 = vsel %vm947_vm12, %v563_v4, %v1047_v10  ;;  %v567_v14 = vpop.f32.mrb[12].mxu0  ;;  %v767_v15 = vpop.f32.mrb[12].mxu1 }
 0x11f   :  { %v1197_v13 = vsel %vm997_vm13, %v763_v5, %v1097_v11  ;;  %1248 = vst.msk [vmem:[%s2704_s3 + $0x28] sm:$0xff] %vm1242_vm1, %v1147_v12  ;;  %v568_v16 = vadd.f32 %v2194_v17, %v567_v14  ;;  %v768_v18 = vadd.f32 %v2194_v17, %v767_v15  ;;  %v569_v19 = vpop.f32.mrb[13].mxu0  ;;  %v769_v20 = vpop.f32.mrb[13].mxu1 }
 0x120   :  { %1298 = vst.msk [vmem:[%s2704_s3 + $0x1b8] sm:$0xff] %vm1242_vm1, %v1197_v13  ;;  %v570_v21 = vpop.f32.mrb[14].mxu0  ;;  %v770_v22 = vpop.f32.mrb[14].mxu1 }
 0x121   :  { %vm948_vm14 = vcmp.ge.f32.partialorder %v568_v16, 0.0  ;;  %v1048_v23 = vmul.f32 0.01, %v568_v16  ;;  %vm998_vm15 = vcmp.ge.f32.partialorder %v768_v18, 0.0  ;;  %v1098_v24 = vmul.f32 0.01, %v768_v18 }
 0x122   :  { %v571_v25 = vadd.f32 %v2194_v17, %v570_v21  ;;  %v771_v26 = vadd.f32 %v2194_v17, %v770_v22  ;;  %v572_v27 = vpop.f32.mrb[15].mxu0  ;;  %v772_v28 = vpop.f32.mrb[15].mxu1 }
 0x123   :  { %v1148_v29 = vsel %vm948_vm14, %v568_v16, %v1048_v23  ;;  %v1198_v30 = vsel %vm998_vm15, %v768_v18, %v1098_v24 }
 0x124   :  { %1249 = vst.msk [vmem:[%s2704_s3 + $0x30] sm:$0xff] %vm1242_vm1, %v1148_v29  ;;  %1299 = vst.msk [vmem:[%s2704_s3 + $0x1c0] sm:$0xff] %vm1242_vm1, %v1198_v30  ;;  %vm949_vm0 = vcmp.ge.f32.partialorder %v571_v25, 0.0  ;;  %v1049_v31 = vmul.f32 0.01, %v571_v25  ;;  %vm999_vm2 = vcmp.ge.f32.partialorder %v771_v26, 0.0 }
 0x125   :  { %v1099_v32 = vmul.f32 0.01, %v771_v26 }
 0x126   :  { %v1149_v33 = vsel %vm949_vm0, %v571_v25, %v1049_v31  ;;  %v575_v35 = vpop.f32.mrb[16].mxu0  ;;  %v775_v36 = vpop.f32.mrb[16].mxu1 }
 0x127   :  { %v1199_v34 = vsel %vm999_vm2, %v771_v26, %v1099_v32  ;;  %1250 = vst.msk [vmem:[%s2704_s3 + $0x38] sm:$0xff] %vm1242_vm1, %v1149_v33  ;;  %v576_v37 = vadd.f32 %v2194_v17, %v575_v35  ;;  %v776_v38 = vadd.f32 %v2194_v17, %v775_v36  ;;  %v577_v39 = vpop.f32.mrb[17].mxu0  ;;  %v777_v40 = vpop.f32.mrb[17].mxu1 }
 0x128   :  { %1300 = vst.msk [vmem:[%s2704_s3 + $0x1c8] sm:$0xff] %vm1242_vm1, %v1199_v34  ;;  %v578_v41 = vpop.f32.mrb[18].mxu0  ;;  %v778_v42 = vpop.f32.mrb[18].mxu1 }
 0x129   :  { %vm950_vm3 = vcmp.ge.f32.partialorder %v576_v37, 0.0  ;;  %v1050_v43 = vmul.f32 0.01, %v576_v37  ;;  %vm1000_vm4 = vcmp.ge.f32.partialorder %v776_v38, 0.0  ;;  %v1100_v44 = vmul.f32 0.01, %v776_v38 }
 0x12a   :  { %v579_v45 = vadd.f32 %v2194_v17, %v578_v41  ;;  %v779_v46 = vadd.f32 %v2194_v17, %v778_v42  ;;  %v580_v47 = vpop.f32.mrb[19].mxu0  ;;  %v780_v48 = vpop.f32.mrb[19].mxu1 }
 0x12b   :  { %v1150_v49 = vsel %vm950_vm3, %v576_v37, %v1050_v43  ;;  %v1200_v50 = vsel %vm1000_vm4, %v776_v38, %v1100_v44 }
 0x12c   :  { %1251 = vst.msk [vmem:[%s2704_s3 + $0x40] sm:$0xff] %vm1242_vm1, %v1150_v49  ;;  %1301 = vst.msk [vmem:[%s2704_s3 + $0x1d0] sm:$0xff] %vm1242_vm1, %v1200_v50  ;;  %vm951_vm5 = vcmp.ge.f32.partialorder %v579_v45, 0.0  ;;  %v1051_v51 = vmul.f32 0.01, %v579_v45  ;;  %vm1001_vm6 = vcmp.ge.f32.partialorder %v779_v46, 0.0 }
 0x12d   :  { %v1101_v52 = vmul.f32 0.01, %v779_v46 }
 0x12e   :  { %v1151_v53 = vsel %vm951_vm5, %v579_v45, %v1051_v51  ;;  %v583_v55 = vpop.f32.mrb[20].mxu0  ;;  %v783_v56 = vpop.f32.mrb[20].mxu1 }
 0x12f   :  { %v1201_v54 = vsel %vm1001_vm6, %v779_v46, %v1101_v52  ;;  %1252 = vst.msk [vmem:[%s2704_s3 + $0x48] sm:$0xff] %vm1242_vm1, %v1151_v53  ;;  %v584_v57 = vadd.f32 %v2194_v17, %v583_v55  ;;  %v784_v58 = vadd.f32 %v2194_v17, %v783_v56  ;;  %v585_v59 = vpop.f32.mrb[21].mxu0  ;;  %v785_v60 = vpop.f32.mrb[21].mxu1 }
 0x130   :  { %1302 = vst.msk [vmem:[%s2704_s3 + $0x1d8] sm:$0xff] %vm1242_vm1, %v1201_v54  ;;  %v586_v61 = vpop.f32.mrb[22].mxu0  ;;  %v786_v62 = vpop.f32.mrb[22].mxu1 }
 0x131   :  { %vm952_vm7 = vcmp.ge.f32.partialorder %v584_v57, 0.0  ;;  %v1052_v63 = vmul.f32 0.01, %v584_v57  ;;  %vm1002_vm8 = vcmp.ge.f32.partialorder %v784_v58, 0.0  ;;  %v1102_v0 = vmul.f32 0.01, %v784_v58 }
 0x132   :  { %v587_v1 = vadd.f32 %v2194_v17, %v586_v61  ;;  %v787_v2 = vadd.f32 %v2194_v17, %v786_v62  ;;  %v588_v3 = vpop.f32.mrb[23].mxu0  ;;  %v788_v4 = vpop.f32.mrb[23].mxu1 }
 0x133   :  { %v1152_v5 = vsel %vm952_vm7, %v584_v57, %v1052_v63  ;;  %v1202_v6 = vsel %vm1002_vm8, %v784_v58, %v1102_v0 }
 0x134   :  { %1253 = vst.msk [vmem:[%s2704_s3 + $0x50] sm:$0xff] %vm1242_vm1, %v1152_v5  ;;  %1303 = vst.msk [vmem:[%s2704_s3 + $0x1e0] sm:$0xff] %vm1242_vm1, %v1202_v6  ;;  %vm953_vm9 = vcmp.ge.f32.partialorder %v587_v1, 0.0  ;;  %v1053_v7 = vmul.f32 0.01, %v587_v1  ;;  %vm1003_vm10 = vcmp.ge.f32.partialorder %v787_v2, 0.0 }
 0x135   :  { %v1103_v8 = vmul.f32 0.01, %v787_v2 }
 0x136   :  { %v1153_v9 = vsel %vm953_vm9, %v587_v1, %v1053_v7  ;;  %v591_v11 = vpop.f32.mrb[24].mxu0  ;;  %v791_v12 = vpop.f32.mrb[24].mxu1 }
 0x137   :  { %v1203_v10 = vsel %vm1003_vm10, %v787_v2, %v1103_v8  ;;  %1254 = vst.msk [vmem:[%s2704_s3 + $0x58] sm:$0xff] %vm1242_vm1, %v1153_v9  ;;  %v592_v13 = vadd.f32 %v2194_v17, %v591_v11  ;;  %v792_v14 = vadd.f32 %v2194_v17, %v791_v12  ;;  %v593_v15 = vpop.f32.mrb[25].mxu0  ;;  %v793_v16 = vpop.f32.mrb[25].mxu1 }
 0x138   :  { %1304 = vst.msk [vmem:[%s2704_s3 + $0x1e8] sm:$0xff] %vm1242_vm1, %v1203_v10  ;;  %v594_v18 = vpop.f32.mrb[26].mxu0  ;;  %v794_v19 = vpop.f32.mrb[26].mxu1 }
 0x139   :  { %vm954_vm11 = vcmp.ge.f32.partialorder %v592_v13, 0.0  ;;  %v1054_v20 = vmul.f32 0.01, %v592_v13  ;;  %vm1004_vm12 = vcmp.ge.f32.partialorder %v792_v14, 0.0  ;;  %v1104_v21 = vmul.f32 0.01, %v792_v14 }
 0x13a   :  { %v595_v22 = vadd.f32 %v2194_v17, %v594_v18  ;;  %v795_v23 = vadd.f32 %v2194_v17, %v794_v19  ;;  %v596_v24 = vpop.f32.mrb[27].mxu0  ;;  %v796_v25 = vpop.f32.mrb[27].mxu1 }
 0x13b   :  { %v1154_v26 = vsel %vm954_vm11, %v592_v13, %v1054_v20  ;;  %v1204_v27 = vsel %vm1004_vm12, %v792_v14, %v1104_v21 }
 0x13c   :  { %1255 = vst.msk [vmem:[%s2704_s3 + $0x60] sm:$0xff] %vm1242_vm1, %v1154_v26  ;;  %1305 = vst.msk [vmem:[%s2704_s3 + $0x1f0] sm:$0xff] %vm1242_vm1, %v1204_v27  ;;  %vm955_vm13 = vcmp.ge.f32.partialorder %v595_v22, 0.0  ;;  %v1055_v28 = vmul.f32 0.01, %v595_v22  ;;  %vm1005_vm14 = vcmp.ge.f32.partialorder %v795_v23, 0.0 }
 0x13d   :  { %v1105_v29 = vmul.f32 0.01, %v795_v23 }
 0x13e   :  { %v1155_v30 = vsel %vm955_vm13, %v595_v22, %v1055_v28  ;;  %v599_v32 = vpop.f32.mrb[28].mxu0  ;;  %v799_v33 = vpop.f32.mrb[28].mxu1 }
 0x13f   :  { %v1205_v31 = vsel %vm1005_vm14, %v795_v23, %v1105_v29  ;;  %1256 = vst.msk [vmem:[%s2704_s3 + $0x68] sm:$0xff] %vm1242_vm1, %v1155_v30  ;;  %v600_v34 = vadd.f32 %v2194_v17, %v599_v32  ;;  %v800_v35 = vadd.f32 %v2194_v17, %v799_v33  ;;  %v601_v36 = vpop.f32.mrb[29].mxu0  ;;  %v801_v37 = vpop.f32.mrb[29].mxu1 }
 0x140   :  { %1306 = vst.msk [vmem:[%s2704_s3 + $0x1f8] sm:$0xff] %vm1242_vm1, %v1205_v31  ;;  %v602_v38 = vpop.f32.mrb[30].mxu0  ;;  %v802_v39 = vpop.f32.mrb[30].mxu1 }
 0x141   :  { %vm956_vm15 = vcmp.ge.f32.partialorder %v600_v34, 0.0  ;;  %v1056_v40 = vmul.f32 0.01, %v600_v34  ;;  %vm1006_vm0 = vcmp.ge.f32.partialorder %v800_v35, 0.0  ;;  %v1106_v41 = vmul.f32 0.01, %v800_v35 }
 0x142   :  { %v603_v42 = vadd.f32 %v2194_v17, %v602_v38  ;;  %v803_v43 = vadd.f32 %v2194_v17, %v802_v39  ;;  %v604_v44 = vpop.f32.mrb[31].mxu0  ;;  %v804_v45 = vpop.f32.mrb[31].mxu1 }
 0x143   :  { %v1156_v46 = vsel %vm956_vm15, %v600_v34, %v1056_v40  ;;  %v1206_v47 = vsel %vm1006_vm0, %v800_v35, %v1106_v41 }
 0x144   :  { %1257 = vst.msk [vmem:[%s2704_s3 + $0x70] sm:$0xff] %vm1242_vm1, %v1156_v46  ;;  %1307 = vst.msk [vmem:[%s2704_s3 + $0x200] sm:$0xff] %vm1242_vm1, %v1206_v47  ;;  %vm957_vm2 = vcmp.ge.f32.partialorder %v603_v42, 0.0  ;;  %v1057_v48 = vmul.f32 0.01, %v603_v42  ;;  %vm1007_vm3 = vcmp.ge.f32.partialorder %v803_v43, 0.0 }
 0x145   :  { %v1107_v49 = vmul.f32 0.01, %v803_v43 }
 0x146   :  { %v1157_v50 = vsel %vm957_vm2, %v603_v42, %v1057_v48  ;;  %v607_v52 = vpop.f32.mrb[32].mxu0  ;;  %v807_v53 = vpop.f32.mrb[32].mxu1 }
 0x147   :  { %v1207_v51 = vsel %vm1007_vm3, %v803_v43, %v1107_v49  ;;  %1258 = vst.msk [vmem:[%s2704_s3 + $0x78] sm:$0xff] %vm1242_vm1, %v1157_v50  ;;  %v608_v54 = vadd.f32 %v2194_v17, %v607_v52  ;;  %v808_v55 = vadd.f32 %v2194_v17, %v807_v53  ;;  %v609_v56 = vpop.f32.mrb[33].mxu0  ;;  %v809_v57 = vpop.f32.mrb[33].mxu1 }
 0x148   :  { %1308 = vst.msk [vmem:[%s2704_s3 + $0x208] sm:$0xff] %vm1242_vm1, %v1207_v51  ;;  %v610_v58 = vpop.f32.mrb[34].mxu0  ;;  %v810_v59 = vpop.f32.mrb[34].mxu1 }
 0x149   :  { %vm958_vm4 = vcmp.ge.f32.partialorder %v608_v54, 0.0  ;;  %v1058_v60 = vmul.f32 0.01, %v608_v54  ;;  %vm1008_vm5 = vcmp.ge.f32.partialorder %v808_v55, 0.0  ;;  %v1108_v61 = vmul.f32 0.01, %v808_v55 }
 0x14a   :  { %v611_v62 = vadd.f32 %v2194_v17, %v610_v58  ;;  %v811_v63 = vadd.f32 %v2194_v17, %v810_v59  ;;  %v612_v0 = vpop.f32.mrb[35].mxu0  ;;  %v812_v1 = vpop.f32.mrb[35].mxu1 }
 0x14b   :  { %v1158_v2 = vsel %vm958_vm4, %v608_v54, %v1058_v60  ;;  %v1208_v3 = vsel %vm1008_vm5, %v808_v55, %v1108_v61 }
 0x14c   :  { %1259 = vst.msk [vmem:[%s2704_s3 + $0x80] sm:$0xff] %vm1242_vm1, %v1158_v2  ;;  %1309 = vst.msk [vmem:[%s2704_s3 + $0x210] sm:$0xff] %vm1242_vm1, %v1208_v3  ;;  %vm959_vm6 = vcmp.ge.f32.partialorder %v611_v62, 0.0  ;;  %v1059_v4 = vmul.f32 0.01, %v611_v62  ;;  %vm1009_vm7 = vcmp.ge.f32.partialorder %v811_v63, 0.0 }
 0x14d   :  { %v1109_v5 = vmul.f32 0.01, %v811_v63 }
 0x14e   :  { %v1159_v6 = vsel %vm959_vm6, %v611_v62, %v1059_v4  ;;  %v615_v8 = vpop.f32.mrb[36].mxu0  ;;  %v815_v9 = vpop.f32.mrb[36].mxu1 }
 0x14f   :  { %v1209_v7 = vsel %vm1009_vm7, %v811_v63, %v1109_v5  ;;  %1260 = vst.msk [vmem:[%s2704_s3 + $0x88] sm:$0xff] %vm1242_vm1, %v1159_v6  ;;  %v616_v10 = vadd.f32 %v2194_v17, %v615_v8  ;;  %v816_v11 = vadd.f32 %v2194_v17, %v815_v9  ;;  %v617_v12 = vpop.f32.mrb[37].mxu0  ;;  %v817_v13 = vpop.f32.mrb[37].mxu1 }
 0x150   :  { %1310 = vst.msk [vmem:[%s2704_s3 + $0x218] sm:$0xff] %vm1242_vm1, %v1209_v7  ;;  %v618_v14 = vpop.f32.mrb[38].mxu0  ;;  %v818_v15 = vpop.f32.mrb[38].mxu1 }
 0x151   :  { %vm960_vm8 = vcmp.ge.f32.partialorder %v616_v10, 0.0  ;;  %v1060_v16 = vmul.f32 0.01, %v616_v10  ;;  %vm1010_vm9 = vcmp.ge.f32.partialorder %v816_v11, 0.0  ;;  %v1110_v18 = vmul.f32 0.01, %v816_v11 }
 0x152   :  { %v619_v19 = vadd.f32 %v2194_v17, %v618_v14  ;;  %v819_v20 = vadd.f32 %v2194_v17, %v818_v15  ;;  %v620_v21 = vpop.f32.mrb[39].mxu0  ;;  %v820_v22 = vpop.f32.mrb[39].mxu1 }
 0x153   :  { %v1160_v23 = vsel %vm960_vm8, %v616_v10, %v1060_v16  ;;  %v1210_v24 = vsel %vm1010_vm9, %v816_v11, %v1110_v18 }
 0x154   :  { %1261 = vst.msk [vmem:[%s2704_s3 + $0x90] sm:$0xff] %vm1242_vm1, %v1160_v23  ;;  %1311 = vst.msk [vmem:[%s2704_s3 + $0x220] sm:$0xff] %vm1242_vm1, %v1210_v24  ;;  %vm961_vm10 = vcmp.ge.f32.partialorder %v619_v19, 0.0  ;;  %v1061_v25 = vmul.f32 0.01, %v619_v19  ;;  %vm1011_vm11 = vcmp.ge.f32.partialorder %v819_v20, 0.0 }
 0x155   :  { %v1111_v26 = vmul.f32 0.01, %v819_v20 }
 0x156   :  { %v1161_v27 = vsel %vm961_vm10, %v619_v19, %v1061_v25  ;;  %v623_v29 = vpop.f32.mrb[40].mxu0  ;;  %v823_v30 = vpop.f32.mrb[40].mxu1 }
 0x157   :  { %v1211_v28 = vsel %vm1011_vm11, %v819_v20, %v1111_v26  ;;  %1262 = vst.msk [vmem:[%s2704_s3 + $0x98] sm:$0xff] %vm1242_vm1, %v1161_v27  ;;  %v624_v31 = vadd.f32 %v2194_v17, %v623_v29  ;;  %v824_v32 = vadd.f32 %v2194_v17, %v823_v30  ;;  %v625_v33 = vpop.f32.mrb[41].mxu0  ;;  %v825_v34 = vpop.f32.mrb[41].mxu1 }
 0x158   :  { %1312 = vst.msk [vmem:[%s2704_s3 + $0x228] sm:$0xff] %vm1242_vm1, %v1211_v28  ;;  %v626_v35 = vpop.f32.mrb[42].mxu0  ;;  %v826_v36 = vpop.f32.mrb[42].mxu1 }
 0x159   :  { %vm962_vm12 = vcmp.ge.f32.partialorder %v624_v31, 0.0  ;;  %v1062_v37 = vmul.f32 0.01, %v624_v31  ;;  %vm1012_vm13 = vcmp.ge.f32.partialorder %v824_v32, 0.0  ;;  %v1112_v38 = vmul.f32 0.01, %v824_v32 }
 0x15a   :  { %v627_v39 = vadd.f32 %v2194_v17, %v626_v35  ;;  %v827_v40 = vadd.f32 %v2194_v17, %v826_v36  ;;  %v628_v41 = vpop.f32.mrb[43].mxu0  ;;  %v828_v42 = vpop.f32.mrb[43].mxu1 }
 0x15b   :  { %v1162_v43 = vsel %vm962_vm12, %v624_v31, %v1062_v37  ;;  %v1212_v44 = vsel %vm1012_vm13, %v824_v32, %v1112_v38 }
 0x15c   :  { %1263 = vst.msk [vmem:[%s2704_s3 + $0xa0] sm:$0xff] %vm1242_vm1, %v1162_v43  ;;  %1313 = vst.msk [vmem:[%s2704_s3 + $0x230] sm:$0xff] %vm1242_vm1, %v1212_v44  ;;  %vm963_vm14 = vcmp.ge.f32.partialorder %v627_v39, 0.0  ;;  %v1063_v45 = vmul.f32 0.01, %v627_v39  ;;  %vm1013_vm15 = vcmp.ge.f32.partialorder %v827_v40, 0.0 }
 0x15d   :  { %v1113_v46 = vmul.f32 0.01, %v827_v40 }
 0x15e   :  { %v1163_v47 = vsel %vm963_vm14, %v627_v39, %v1063_v45  ;;  %v631_v49 = vpop.f32.mrb[44].mxu0  ;;  %v831_v50 = vpop.f32.mrb[44].mxu1 }
 0x15f   :  { %v1213_v48 = vsel %vm1013_vm15, %v827_v40, %v1113_v46  ;;  %1264 = vst.msk [vmem:[%s2704_s3 + $0xa8] sm:$0xff] %vm1242_vm1, %v1163_v47  ;;  %v632_v51 = vadd.f32 %v2194_v17, %v631_v49  ;;  %v832_v52 = vadd.f32 %v2194_v17, %v831_v50  ;;  %v633_v53 = vpop.f32.mrb[45].mxu0  ;;  %v833_v54 = vpop.f32.mrb[45].mxu1 }
 0x160   :  { %1314 = vst.msk [vmem:[%s2704_s3 + $0x238] sm:$0xff] %vm1242_vm1, %v1213_v48  ;;  %v634_v55 = vpop.f32.mrb[46].mxu0  ;;  %v834_v56 = vpop.f32.mrb[46].mxu1 }
 0x161   :  { %vm964_vm0 = vcmp.ge.f32.partialorder %v632_v51, 0.0  ;;  %v1064_v57 = vmul.f32 0.01, %v632_v51  ;;  %vm1014_vm2 = vcmp.ge.f32.partialorder %v832_v52, 0.0  ;;  %v1114_v58 = vmul.f32 0.01, %v832_v52 }
 0x162   :  { %v635_v59 = vadd.f32 %v2194_v17, %v634_v55  ;;  %v835_v60 = vadd.f32 %v2194_v17, %v834_v56  ;;  %v636_v61 = vpop.f32.mrb[47].mxu0  ;;  %v836_v62 = vpop.f32.mrb[47].mxu1 }
 0x163   :  { %v1164_v63 = vsel %vm964_vm0, %v632_v51, %v1064_v57  ;;  %v1214_v0 = vsel %vm1014_vm2, %v832_v52, %v1114_v58 }
 0x164   :  { %1265 = vst.msk [vmem:[%s2704_s3 + $0xb0] sm:$0xff] %vm1242_vm1, %v1164_v63  ;;  %1315 = vst.msk [vmem:[%s2704_s3 + $0x240] sm:$0xff] %vm1242_vm1, %v1214_v0  ;;  %vm965_vm3 = vcmp.ge.f32.partialorder %v635_v59, 0.0  ;;  %v1065_v1 = vmul.f32 0.01, %v635_v59  ;;  %vm1015_vm4 = vcmp.ge.f32.partialorder %v835_v60, 0.0 }
 0x165   :  { %v1115_v2 = vmul.f32 0.01, %v835_v60 }
 0x166   :  { %v1165_v3 = vsel %vm965_vm3, %v635_v59, %v1065_v1  ;;  %v639_v5 = vpop.f32.mrb[48].mxu0  ;;  %v839_v6 = vpop.f32.mrb[48].mxu1 }
 0x167   :  { %v1215_v4 = vsel %vm1015_vm4, %v835_v60, %v1115_v2  ;;  %1266 = vst.msk [vmem:[%s2704_s3 + $0xb8] sm:$0xff] %vm1242_vm1, %v1165_v3  ;;  %v640_v7 = vadd.f32 %v2194_v17, %v639_v5  ;;  %v840_v8 = vadd.f32 %v2194_v17, %v839_v6  ;;  %v641_v9 = vpop.f32.mrb[49].mxu0  ;;  %v841_v10 = vpop.f32.mrb[49].mxu1 }
 0x168   :  { %1316 = vst.msk [vmem:[%s2704_s3 + $0x248] sm:$0xff] %vm1242_vm1, %v1215_v4  ;;  %v642_v11 = vpop.f32.mrb[50].mxu0  ;;  %v842_v12 = vpop.f32.mrb[50].mxu1 }
 0x169   :  { %vm966_vm5 = vcmp.ge.f32.partialorder %v640_v7, 0.0  ;;  %v1066_v13 = vmul.f32 0.01, %v640_v7  ;;  %vm1016_vm6 = vcmp.ge.f32.partialorder %v840_v8, 0.0  ;;  %v1116_v14 = vmul.f32 0.01, %v840_v8 }
 0x16a   :  { %v643_v15 = vadd.f32 %v2194_v17, %v642_v11  ;;  %v843_v16 = vadd.f32 %v2194_v17, %v842_v12  ;;  %v644_v18 = vpop.f32.mrb[51].mxu0  ;;  %v844_v19 = vpop.f32.mrb[51].mxu1 }
 0x16b   :  { %v1166_v20 = vsel %vm966_vm5, %v640_v7, %v1066_v13  ;;  %v1216_v21 = vsel %vm1016_vm6, %v840_v8, %v1116_v14 }
 0x16c   :  { %1267 = vst.msk [vmem:[%s2704_s3 + $0xc0] sm:$0xff] %vm1242_vm1, %v1166_v20  ;;  %1317 = vst.msk [vmem:[%s2704_s3 + $0x250] sm:$0xff] %vm1242_vm1, %v1216_v21  ;;  %vm967_vm7 = vcmp.ge.f32.partialorder %v643_v15, 0.0  ;;  %v1067_v22 = vmul.f32 0.01, %v643_v15  ;;  %vm1017_vm8 = vcmp.ge.f32.partialorder %v843_v16, 0.0 }
 0x16d   :  { %v1117_v23 = vmul.f32 0.01, %v843_v16 }
 0x16e   :  { %v1167_v24 = vsel %vm967_vm7, %v643_v15, %v1067_v22  ;;  %v647_v26 = vpop.f32.mrb[52].mxu0  ;;  %v847_v27 = vpop.f32.mrb[52].mxu1 }
 0x16f   :  { %v1217_v25 = vsel %vm1017_vm8, %v843_v16, %v1117_v23  ;;  %1268 = vst.msk [vmem:[%s2704_s3 + $0xc8] sm:$0xff] %vm1242_vm1, %v1167_v24  ;;  %v648_v28 = vadd.f32 %v2194_v17, %v647_v26  ;;  %v848_v29 = vadd.f32 %v2194_v17, %v847_v27  ;;  %v649_v30 = vpop.f32.mrb[53].mxu0  ;;  %v849_v31 = vpop.f32.mrb[53].mxu1 }
 0x170   :  { %1318 = vst.msk [vmem:[%s2704_s3 + $0x258] sm:$0xff] %vm1242_vm1, %v1217_v25  ;;  %v650_v32 = vpop.f32.mrb[54].mxu0  ;;  %v850_v33 = vpop.f32.mrb[54].mxu1 }
 0x171   :  { %vm968_vm9 = vcmp.ge.f32.partialorder %v648_v28, 0.0  ;;  %v1068_v34 = vmul.f32 0.01, %v648_v28  ;;  %vm1018_vm10 = vcmp.ge.f32.partialorder %v848_v29, 0.0  ;;  %v1118_v35 = vmul.f32 0.01, %v848_v29 }
 0x172   :  { %v651_v36 = vadd.f32 %v2194_v17, %v650_v32  ;;  %v851_v37 = vadd.f32 %v2194_v17, %v850_v33  ;;  %v652_v38 = vpop.f32.mrb[55].mxu0  ;;  %v852_v39 = vpop.f32.mrb[55].mxu1 }
 0x173   :  { %v1168_v40 = vsel %vm968_vm9, %v648_v28, %v1068_v34  ;;  %v1218_v41 = vsel %vm1018_vm10, %v848_v29, %v1118_v35 }
 0x174   :  { %1269 = vst.msk [vmem:[%s2704_s3 + $0xd0] sm:$0xff] %vm1242_vm1, %v1168_v40  ;;  %1319 = vst.msk [vmem:[%s2704_s3 + $0x260] sm:$0xff] %vm1242_vm1, %v1218_v41  ;;  %vm969_vm11 = vcmp.ge.f32.partialorder %v651_v36, 0.0  ;;  %v1069_v42 = vmul.f32 0.01, %v651_v36  ;;  %vm1019_vm12 = vcmp.ge.f32.partialorder %v851_v37, 0.0 }
 0x175   :  { %v1119_v43 = vmul.f32 0.01, %v851_v37 }
 0x176   :  { %v1169_v44 = vsel %vm969_vm11, %v651_v36, %v1069_v42  ;;  %v655_v46 = vpop.f32.mrb[56].mxu0  ;;  %v855_v47 = vpop.f32.mrb[56].mxu1 }
 0x177   :  { %v1219_v45 = vsel %vm1019_vm12, %v851_v37, %v1119_v43  ;;  %1270 = vst.msk [vmem:[%s2704_s3 + $0xd8] sm:$0xff] %vm1242_vm1, %v1169_v44  ;;  %v656_v48 = vadd.f32 %v2194_v17, %v655_v46  ;;  %v856_v49 = vadd.f32 %v2194_v17, %v855_v47  ;;  %v657_v50 = vpop.f32.mrb[57].mxu0  ;;  %v857_v51 = vpop.f32.mrb[57].mxu1 }
 0x178   :  { %1320 = vst.msk [vmem:[%s2704_s3 + $0x268] sm:$0xff] %vm1242_vm1, %v1219_v45  ;;  %v658_v52 = vpop.f32.mrb[58].mxu0  ;;  %v858_v53 = vpop.f32.mrb[58].mxu1 }
 0x179   :  { %vm970_vm13 = vcmp.ge.f32.partialorder %v656_v48, 0.0  ;;  %v1070_v54 = vmul.f32 0.01, %v656_v48  ;;  %vm1020_vm14 = vcmp.ge.f32.partialorder %v856_v49, 0.0  ;;  %v1120_v55 = vmul.f32 0.01, %v856_v49 }
 0x17a   :  { %v659_v56 = vadd.f32 %v2194_v17, %v658_v52  ;;  %v859_v57 = vadd.f32 %v2194_v17, %v858_v53  ;;  %v660_v58 = vpop.f32.mrb[59].mxu0  ;;  %v860_v59 = vpop.f32.mrb[59].mxu1 }
 0x17b   :  { %v1170_v60 = vsel %vm970_vm13, %v656_v48, %v1070_v54  ;;  %v1220_v61 = vsel %vm1020_vm14, %v856_v49, %v1120_v55 }
 0x17c   :  { %1271 = vst.msk [vmem:[%s2704_s3 + $0xe0] sm:$0xff] %vm1242_vm1, %v1170_v60  ;;  %1321 = vst.msk [vmem:[%s2704_s3 + $0x270] sm:$0xff] %vm1242_vm1, %v1220_v61  ;;  %vm971_vm15 = vcmp.ge.f32.partialorder %v659_v56, 0.0  ;;  %v1071_v62 = vmul.f32 0.01, %v659_v56  ;;  %vm1021_vm0 = vcmp.ge.f32.partialorder %v859_v57, 0.0 }
 0x17d   :  { %v1121_v63 = vmul.f32 0.01, %v859_v57 }
 0x17e   :  { %v1171_v0 = vsel %vm971_vm15, %v659_v56, %v1071_v62  ;;  %v663_v2 = vpop.f32.mrb[60].mxu0  ;;  %v863_v3 = vpop.f32.mrb[60].mxu1 }
 0x17f   :  { %v1221_v1 = vsel %vm1021_vm0, %v859_v57, %v1121_v63  ;;  %1272 = vst.msk [vmem:[%s2704_s3 + $0xe8] sm:$0xff] %vm1242_vm1, %v1171_v0  ;;  %v664_v4 = vadd.f32 %v2194_v17, %v663_v2  ;;  %v864_v5 = vadd.f32 %v2194_v17, %v863_v3  ;;  %v665_v6 = vpop.f32.mrb[61].mxu0  ;;  %v865_v7 = vpop.f32.mrb[61].mxu1 }
 0x180   :  { %1322 = vst.msk [vmem:[%s2704_s3 + $0x278] sm:$0xff] %vm1242_vm1, %v1221_v1  ;;  %v666_v8 = vpop.f32.mrb[62].mxu0  ;;  %v866_v9 = vpop.f32.mrb[62].mxu1 }
 0x181   :  { %vm972_vm2 = vcmp.ge.f32.partialorder %v664_v4, 0.0  ;;  %v1072_v10 = vmul.f32 0.01, %v664_v4  ;;  %vm1022_vm3 = vcmp.ge.f32.partialorder %v864_v5, 0.0  ;;  %v1122_v11 = vmul.f32 0.01, %v864_v5 }
 0x182   :  { %v667_v12 = vadd.f32 %v2194_v17, %v666_v8  ;;  %v867_v13 = vadd.f32 %v2194_v17, %v866_v9  ;;  %v668_v14 = vpop.f32.mrb[63].mxu0  ;;  %v868_v15 = vpop.f32.mrb[63].mxu1  ;;  %v2561_v9 = vld [vmem:[%s2703_s2] ss:$0 sm:$0xff] }
 0x183   :  { %v1172_v16 = vsel %vm972_vm2, %v664_v4, %v1072_v10  ;;  %v1222_v18 = vsel %vm1022_vm3, %v864_v5, %v1122_v11 }
 0x184   :  { %1273 = vst.msk [vmem:[%s2704_s3 + $0xf0] sm:$0xff] %vm1242_vm1, %v1172_v16  ;;  %1323 = vst.msk [vmem:[%s2704_s3 + $0x280] sm:$0xff] %vm1242_vm1, %v1222_v18  ;;  %vm973_vm4 = vcmp.ge.f32.partialorder %v667_v12, 0.0  ;;  %v1073_v19 = vmul.f32 0.01, %v667_v12  ;;  %vm1023_vm5 = vcmp.ge.f32.partialorder %v867_v13, 0.0 }
 0x185   :  { %v1123_v20 = vmul.f32 0.01, %v867_v13 }
 0x186   :  { %v1173_v21 = vsel %vm973_vm4, %v667_v12, %v1073_v19  ;;  %v671_v23 = vpop.f32.mrb[64].mxu0  ;;  %v871_v24 = vpop.f32.mrb[64].mxu1 }
 0x187   :  { %v1223_v22 = vsel %vm1023_vm5, %v867_v13, %v1123_v20  ;;  %1274 = vst.msk [vmem:[%s2704_s3 + $0xf8] sm:$0xff] %vm1242_vm1, %v1173_v21  ;;  %v672_v25 = vadd.f32 %v2194_v17, %v671_v23  ;;  %v872_v26 = vadd.f32 %v2194_v17, %v871_v24  ;;  %v673_v27 = vpop.f32.mrb[65].mxu0  ;;  %v873_v28 = vpop.f32.mrb[65].mxu1 }
 0x188   :  { %1324 = vst.msk [vmem:[%s2704_s3 + $0x288] sm:$0xff] %vm1242_vm1, %v1223_v22  ;;  %v674_v29 = vpop.f32.mrb[66].mxu0  ;;  %v874_v30 = vpop.f32.mrb[66].mxu1 }
 0x189   :  { %vm974_vm6 = vcmp.ge.f32.partialorder %v672_v25, 0.0  ;;  %v1074_v31 = vmul.f32 0.01, %v672_v25  ;;  %vm1024_vm7 = vcmp.ge.f32.partialorder %v872_v26, 0.0  ;;  %v1124_v32 = vmul.f32 0.01, %v872_v26 }
 0x18a   :  { %v675_v33 = vadd.f32 %v2194_v17, %v674_v29  ;;  %v875_v34 = vadd.f32 %v2194_v17, %v874_v30  ;;  %v676_v35 = vpop.f32.mrb[67].mxu0  ;;  %v876_v36 = vpop.f32.mrb[67].mxu1 }
 0x18b   :  { %v1174_v37 = vsel %vm974_vm6, %v672_v25, %v1074_v31  ;;  %v1224_v38 = vsel %vm1024_vm7, %v872_v26, %v1124_v32 }
 0x18c   :  { %1275 = vst.msk [vmem:[%s2704_s3 + $0x100] sm:$0xff] %vm1242_vm1, %v1174_v37  ;;  %1325 = vst.msk [vmem:[%s2704_s3 + $0x290] sm:$0xff] %vm1242_vm1, %v1224_v38  ;;  %vm975_vm8 = vcmp.ge.f32.partialorder %v675_v33, 0.0  ;;  %v1075_v39 = vmul.f32 0.01, %v675_v33  ;;  %vm1025_vm9 = vcmp.ge.f32.partialorder %v875_v34, 0.0 }
 0x18d   :  { %v1125_v40 = vmul.f32 0.01, %v875_v34 }
 0x18e   :  { %v1175_v41 = vsel %vm975_vm8, %v675_v33, %v1075_v39  ;;  %v679_v43 = vpop.f32.mrb[68].mxu0  ;;  %v879_v44 = vpop.f32.mrb[68].mxu1 }
 0x18f   :  { %v1225_v42 = vsel %vm1025_vm9, %v875_v34, %v1125_v40  ;;  %1276 = vst.msk [vmem:[%s2704_s3 + $0x108] sm:$0xff] %vm1242_vm1, %v1175_v41  ;;  %v680_v45 = vadd.f32 %v2194_v17, %v679_v43  ;;  %v880_v46 = vadd.f32 %v2194_v17, %v879_v44  ;;  %v681_v47 = vpop.f32.mrb[69].mxu0  ;;  %v881_v48 = vpop.f32.mrb[69].mxu1 }
 0x190   :  { %1326 = vst.msk [vmem:[%s2704_s3 + $0x298] sm:$0xff] %vm1242_vm1, %v1225_v42  ;;  %v682_v49 = vpop.f32.mrb[70].mxu0  ;;  %v882_v50 = vpop.f32.mrb[70].mxu1 }
 0x191   :  { %vm976_vm10 = vcmp.ge.f32.partialorder %v680_v45, 0.0  ;;  %v1076_v51 = vmul.f32 0.01, %v680_v45  ;;  %vm1026_vm11 = vcmp.ge.f32.partialorder %v880_v46, 0.0  ;;  %v1126_v52 = vmul.f32 0.01, %v880_v46 }
 0x192   :  { %v683_v53 = vadd.f32 %v2194_v17, %v682_v49  ;;  %v883_v54 = vadd.f32 %v2194_v17, %v882_v50  ;;  %v684_v55 = vpop.f32.mrb[71].mxu0  ;;  %v884_v56 = vpop.f32.mrb[71].mxu1 }
 0x193   :  { %v1176_v57 = vsel %vm976_vm10, %v680_v45, %v1076_v51  ;;  %v1226_v58 = vsel %vm1026_vm11, %v880_v46, %v1126_v52 }
 0x194   :  { %1277 = vst.msk [vmem:[%s2704_s3 + $0x110] sm:$0xff] %vm1242_vm1, %v1176_v57  ;;  %1327 = vst.msk [vmem:[%s2704_s3 + $0x2a0] sm:$0xff] %vm1242_vm1, %v1226_v58  ;;  %vm977_vm12 = vcmp.ge.f32.partialorder %v683_v53, 0.0  ;;  %v1077_v59 = vmul.f32 0.01, %v683_v53  ;;  %vm1027_vm13 = vcmp.ge.f32.partialorder %v883_v54, 0.0 }
 0x195   :  { %v1127_v60 = vmul.f32 0.01, %v883_v54 }
 0x196   :  { %v1177_v61 = vsel %vm977_vm12, %v683_v53, %v1077_v59  ;;  %v687_v63 = vpop.f32.mrb[72].mxu0  ;;  %v887_v0 = vpop.f32.mrb[72].mxu1 }
 0x197   :  { %v1227_v62 = vsel %vm1027_vm13, %v883_v54, %v1127_v60  ;;  %1278 = vst.msk [vmem:[%s2704_s3 + $0x118] sm:$0xff] %vm1242_vm1, %v1177_v61  ;;  %v688_v1 = vadd.f32 %v2194_v17, %v687_v63  ;;  %v888_v2 = vadd.f32 %v2194_v17, %v887_v0  ;;  %v689_v3 = vpop.f32.mrb[73].mxu0  ;;  %v889_v4 = vpop.f32.mrb[73].mxu1 }
 0x198   :  { %1328 = vst.msk [vmem:[%s2704_s3 + $0x2a8] sm:$0xff] %vm1242_vm1, %v1227_v62  ;;  %v690_v5 = vpop.f32.mrb[74].mxu0  ;;  %v890_v6 = vpop.f32.mrb[74].mxu1 }
 0x199   :  { %vm978_vm14 = vcmp.ge.f32.partialorder %v688_v1, 0.0  ;;  %v1078_v7 = vmul.f32 0.01, %v688_v1  ;;  %vm1028_vm15 = vcmp.ge.f32.partialorder %v888_v2, 0.0  ;;  %v1128_v8 = vmul.f32 0.01, %v888_v2 }
 0x19a   :  { %v691_v10 = vadd.f32 %v2561_v9, %v690_v5  ;;  %v891_v11 = vadd.f32 %v2561_v9, %v890_v6  ;;  %v692_v12 = vpop.f32.mrb[75].mxu0  ;;  %v892_v13 = vpop.f32.mrb[75].mxu1 }
 0x19b   :  { %v1178_v17 = vsel %vm978_vm14, %v688_v1, %v1078_v7  ;;  %v1228_v14 = vsel %vm1028_vm15, %v888_v2, %v1128_v8 }
 0x19c   :  { %1279 = vst.msk [vmem:[%s2704_s3 + $0x120] sm:$0xff] %vm1242_vm1, %v1178_v17  ;;  %1329 = vst.msk [vmem:[%s2704_s3 + $0x2b0] sm:$0xff] %vm1242_vm1, %v1228_v14  ;;  %vm979_vm0 = vcmp.ge.f32.partialorder %v691_v10, 0.0  ;;  %v1079_v15 = vmul.f32 0.01, %v691_v10  ;;  %vm1029_vm2 = vcmp.ge.f32.partialorder %v891_v11, 0.0 }
 0x19d   :  { %v1129_v16 = vmul.f32 0.01, %v891_v11 }
 0x19e   :  { %v1179_v18 = vsel %vm979_vm0, %v691_v10, %v1079_v15  ;;  %v695_v20 = vpop.f32.mrb[76].mxu0  ;;  %v895_v21 = vpop.f32.mrb[76].mxu1 }
 0x19f   :  { %v1229_v19 = vsel %vm1029_vm2, %v891_v11, %v1129_v16  ;;  %1280 = vst.msk [vmem:[%s2704_s3 + $0x128] sm:$0xff] %vm1242_vm1, %v1179_v18  ;;  %v696_v22 = vadd.f32 %v2561_v9, %v695_v20  ;;  %v896_v23 = vadd.f32 %v2561_v9, %v895_v21  ;;  %v697_v24 = vpop.f32.mrb[77].mxu0  ;;  %v897_v25 = vpop.f32.mrb[77].mxu1 }
 0x1a0   :  { %1330 = vst.msk [vmem:[%s2704_s3 + $0x2b8] sm:$0xff] %vm1242_vm1, %v1229_v19  ;;  %v698_v26 = vpop.f32.mrb[78].mxu0  ;;  %v898_v27 = vpop.f32.mrb[78].mxu1 }
 0x1a1   :  { %vm980_vm3 = vcmp.ge.f32.partialorder %v696_v22, 0.0  ;;  %v1080_v28 = vmul.f32 0.01, %v696_v22  ;;  %vm1030_vm4 = vcmp.ge.f32.partialorder %v896_v23, 0.0  ;;  %v1130_v29 = vmul.f32 0.01, %v896_v23 }
 0x1a2   :  { %v699_v30 = vadd.f32 %v2561_v9, %v698_v26  ;;  %v899_v31 = vadd.f32 %v2561_v9, %v898_v27  ;;  %v700_v32 = vpop.f32.mrb[79].mxu0  ;;  %v900_v33 = vpop.f32.mrb[79].mxu1 }
 0x1a3   :  { %v1180_v34 = vsel %vm980_vm3, %v696_v22, %v1080_v28  ;;  %v1230_v35 = vsel %vm1030_vm4, %v896_v23, %v1130_v29 }
 0x1a4   :  { %1281 = vst.msk [vmem:[%s2704_s3 + $0x130] sm:$0xff] %vm1242_vm1, %v1180_v34  ;;  %1331 = vst.msk [vmem:[%s2704_s3 + $0x2c0] sm:$0xff] %vm1242_vm1, %v1230_v35  ;;  %vm981_vm5 = vcmp.ge.f32.partialorder %v699_v30, 0.0  ;;  %v1081_v36 = vmul.f32 0.01, %v699_v30  ;;  %vm1031_vm6 = vcmp.ge.f32.partialorder %v899_v31, 0.0 }
 0x1a5   :  { %v1131_v37 = vmul.f32 0.01, %v899_v31 }
 0x1a6   :  { %v1181_v38 = vsel %vm981_vm5, %v699_v30, %v1081_v36  ;;  %v703_v40 = vpop.f32.mrb[80].mxu0  ;;  %v903_v41 = vpop.f32.mrb[80].mxu1 }
 0x1a7   :  { %v1231_v39 = vsel %vm1031_vm6, %v899_v31, %v1131_v37  ;;  %1282 = vst.msk [vmem:[%s2704_s3 + $0x138] sm:$0xff] %vm1242_vm1, %v1181_v38  ;;  %v704_v42 = vadd.f32 %v2561_v9, %v703_v40  ;;  %v904_v43 = vadd.f32 %v2561_v9, %v903_v41  ;;  %v705_v44 = vpop.f32.mrb[81].mxu0  ;;  %v905_v45 = vpop.f32.mrb[81].mxu1 }
 0x1a8   :  { %1332 = vst.msk [vmem:[%s2704_s3 + $0x2c8] sm:$0xff] %vm1242_vm1, %v1231_v39  ;;  %v706_v46 = vpop.f32.mrb[82].mxu0  ;;  %v906_v47 = vpop.f32.mrb[82].mxu1 }
 0x1a9   :  { %vm982_vm7 = vcmp.ge.f32.partialorder %v704_v42, 0.0  ;;  %v1082_v48 = vmul.f32 0.01, %v704_v42  ;;  %vm1032_vm8 = vcmp.ge.f32.partialorder %v904_v43, 0.0  ;;  %v1132_v49 = vmul.f32 0.01, %v904_v43 }
 0x1aa   :  { %v707_v50 = vadd.f32 %v2561_v9, %v706_v46  ;;  %v907_v51 = vadd.f32 %v2561_v9, %v906_v47  ;;  %v708_v52 = vpop.f32.mrb[83].mxu0  ;;  %v908_v53 = vpop.f32.mrb[83].mxu1 }
 0x1ab   :  { %v1182_v54 = vsel %vm982_vm7, %v704_v42, %v1082_v48  ;;  %v1232_v55 = vsel %vm1032_vm8, %v904_v43, %v1132_v49 }
 0x1ac   :  { %1283 = vst.msk [vmem:[%s2704_s3 + $0x140] sm:$0xff] %vm1242_vm1, %v1182_v54  ;;  %1333 = vst.msk [vmem:[%s2704_s3 + $0x2d0] sm:$0xff] %vm1242_vm1, %v1232_v55  ;;  %vm983_vm9 = vcmp.ge.f32.partialorder %v707_v50, 0.0  ;;  %v1083_v56 = vmul.f32 0.01, %v707_v50  ;;  %vm1033_vm10 = vcmp.ge.f32.partialorder %v907_v51, 0.0 }
 0x1ad   :  { %v1133_v57 = vmul.f32 0.01, %v907_v51 }
 0x1ae   :  { %v1183_v58 = vsel %vm983_vm9, %v707_v50, %v1083_v56  ;;  %v711_v60 = vpop.f32.mrb[84].mxu0  ;;  %v911_v61 = vpop.f32.mrb[84].mxu1 }
 0x1af   :  { %v1233_v59 = vsel %vm1033_vm10, %v907_v51, %v1133_v57  ;;  %1284 = vst.msk [vmem:[%s2704_s3 + $0x148] sm:$0xff] %vm1242_vm1, %v1183_v58  ;;  %v712_v62 = vadd.f32 %v2561_v9, %v711_v60  ;;  %v912_v63 = vadd.f32 %v2561_v9, %v911_v61  ;;  %v713_v0 = vpop.f32.mrb[85].mxu0  ;;  %v913_v1 = vpop.f32.mrb[85].mxu1 }
 0x1b0   :  { %1334 = vst.msk [vmem:[%s2704_s3 + $0x2d8] sm:$0xff] %vm1242_vm1, %v1233_v59  ;;  %v714_v2 = vpop.f32.mrb[86].mxu0  ;;  %v914_v3 = vpop.f32.mrb[86].mxu1 }
 0x1b1   :  { %vm984_vm11 = vcmp.ge.f32.partialorder %v712_v62, 0.0  ;;  %v1084_v4 = vmul.f32 0.01, %v712_v62  ;;  %vm1034_vm12 = vcmp.ge.f32.partialorder %v912_v63, 0.0  ;;  %v1134_v5 = vmul.f32 0.01, %v912_v63 }
 0x1b2   :  { %v715_v6 = vadd.f32 %v2561_v9, %v714_v2  ;;  %v915_v7 = vadd.f32 %v2561_v9, %v914_v3  ;;  %v716_v8 = vpop.f32.mrb[87].mxu0  ;;  %v916_v10 = vpop.f32.mrb[87].mxu1 }
 0x1b3   :  { %v1184_v11 = vsel %vm984_vm11, %v712_v62, %v1084_v4  ;;  %v1234_v12 = vsel %vm1034_vm12, %v912_v63, %v1134_v5 }
 0x1b4   :  { %1285 = vst.msk [vmem:[%s2704_s3 + $0x150] sm:$0xff] %vm1242_vm1, %v1184_v11  ;;  %1335 = vst.msk [vmem:[%s2704_s3 + $0x2e0] sm:$0xff] %vm1242_vm1, %v1234_v12  ;;  %vm985_vm13 = vcmp.ge.f32.partialorder %v715_v6, 0.0  ;;  %v1085_v13 = vmul.f32 0.01, %v715_v6  ;;  %vm1035_vm14 = vcmp.ge.f32.partialorder %v915_v7, 0.0 }
 0x1b5   :  { %v1135_v17 = vmul.f32 0.01, %v915_v7 }
 0x1b6   :  { %v1185_v14 = vsel %vm985_vm13, %v715_v6, %v1085_v13  ;;  %v719_v16 = vpop.f32.mrb[88].mxu0  ;;  %v919_v18 = vpop.f32.mrb[88].mxu1 }
 0x1b7   :  { %v1235_v15 = vsel %vm1035_vm14, %v915_v7, %v1135_v17  ;;  %1286 = vst.msk [vmem:[%s2704_s3 + $0x158] sm:$0xff] %vm1242_vm1, %v1185_v14  ;;  %v720_v19 = vadd.f32 %v2561_v9, %v719_v16  ;;  %v920_v20 = vadd.f32 %v2561_v9, %v919_v18  ;;  %v721_v21 = vpop.f32.mrb[89].mxu0  ;;  %v921_v22 = vpop.f32.mrb[89].mxu1 }
 0x1b8   :  { %1336 = vst.msk [vmem:[%s2704_s3 + $0x2e8] sm:$0xff] %vm1242_vm1, %v1235_v15  ;;  %v722_v23 = vpop.f32.mrb[90].mxu0  ;;  %v922_v24 = vpop.f32.mrb[90].mxu1 }
 0x1b9   :  { %vm986_vm15 = vcmp.ge.f32.partialorder %v720_v19, 0.0  ;;  %v1086_v25 = vmul.f32 0.01, %v720_v19  ;;  %vm1036_vm0 = vcmp.ge.f32.partialorder %v920_v20, 0.0  ;;  %v1136_v26 = vmul.f32 0.01, %v920_v20 }
 0x1ba   :  { %v723_v27 = vadd.f32 %v2561_v9, %v722_v23  ;;  %v923_v28 = vadd.f32 %v2561_v9, %v922_v24  ;;  %v724_v29 = vpop.f32.mrb[91].mxu0  ;;  %v924_v30 = vpop.f32.mrb[91].mxu1 }
 0x1bb   :  { %v1186_v31 = vsel %vm986_vm15, %v720_v19, %v1086_v25  ;;  %v1236_v32 = vsel %vm1036_vm0, %v920_v20, %v1136_v26 }
 0x1bc   :  { %1287 = vst.msk [vmem:[%s2704_s3 + $0x160] sm:$0xff] %vm1242_vm1, %v1186_v31  ;;  %1337 = vst.msk [vmem:[%s2704_s3 + $0x2f0] sm:$0xff] %vm1242_vm1, %v1236_v32  ;;  %vm987_vm2 = vcmp.ge.f32.partialorder %v723_v27, 0.0  ;;  %v1087_v33 = vmul.f32 0.01, %v723_v27  ;;  %vm1037_vm3 = vcmp.ge.f32.partialorder %v923_v28, 0.0 }
 0x1bd   :  { %v1137_v34 = vmul.f32 0.01, %v923_v28 }
 0x1be   :  { %v1187_v35 = vsel %vm987_vm2, %v723_v27, %v1087_v33  ;;  %v727_v37 = vpop.f32.mrb[92].mxu0  ;;  %v927_v38 = vpop.f32.mrb[92].mxu1 }
 0x1bf   :  { %v1237_v36 = vsel %vm1037_vm3, %v923_v28, %v1137_v34  ;;  %1288 = vst.msk [vmem:[%s2704_s3 + $0x168] sm:$0xff] %vm1242_vm1, %v1187_v35  ;;  %v728_v39 = vadd.f32 %v2561_v9, %v727_v37  ;;  %v928_v40 = vadd.f32 %v2561_v9, %v927_v38  ;;  %v729_v41 = vpop.f32.mrb[93].mxu0  ;;  %v929_v42 = vpop.f32.mrb[93].mxu1 }
 0x1c0   :  { %1338 = vst.msk [vmem:[%s2704_s3 + $0x2f8] sm:$0xff] %vm1242_vm1, %v1237_v36  ;;  %v730_v43 = vpop.f32.mrb[94].mxu0  ;;  %v930_v44 = vpop.f32.mrb[94].mxu1 }
 0x1c1   :  { %vm988_vm4 = vcmp.ge.f32.partialorder %v728_v39, 0.0  ;;  %v1088_v45 = vmul.f32 0.01, %v728_v39  ;;  %vm1038_vm5 = vcmp.ge.f32.partialorder %v928_v40, 0.0  ;;  %v1138_v46 = vmul.f32 0.01, %v928_v40 }
 0x1c2   :  { %v731_v47 = vadd.f32 %v2561_v9, %v730_v43  ;;  %v931_v48 = vadd.f32 %v2561_v9, %v930_v44  ;;  %v732_v49 = vpop.f32.mrb[95].mxu0  ;;  %v932_v50 = vpop.f32.mrb[95].mxu1 }
 0x1c3   :  { %v1188_v51 = vsel %vm988_vm4, %v728_v39, %v1088_v45  ;;  %v1238_v52 = vsel %vm1038_vm5, %v928_v40, %v1138_v46 }
 0x1c4   :  { %1289 = vst.msk [vmem:[%s2704_s3 + $0x170] sm:$0xff] %vm1242_vm1, %v1188_v51  ;;  %1339 = vst.msk [vmem:[%s2704_s3 + $0x300] sm:$0xff] %vm1242_vm1, %v1238_v52  ;;  %vm989_vm6 = vcmp.ge.f32.partialorder %v731_v47, 0.0  ;;  %v1089_v53 = vmul.f32 0.01, %v731_v47  ;;  %vm1039_vm7 = vcmp.ge.f32.partialorder %v931_v48, 0.0 }
 0x1c5   :  { %v1139_v54 = vmul.f32 0.01, %v931_v48 }
 0x1c6   :  { %v1189_v55 = vsel %vm989_vm6, %v731_v47, %v1089_v53  ;;  %v735_v57 = vpop.f32.mrb[96].mxu0  ;;  %v935_v58 = vpop.f32.mrb[96].mxu1 }
 0x1c7   :  { %v1239_v56 = vsel %vm1039_vm7, %v931_v48, %v1139_v54  ;;  %1290 = vst.msk [vmem:[%s2704_s3 + $0x178] sm:$0xff] %vm1242_vm1, %v1189_v55  ;;  %v736_v59 = vadd.f32 %v2561_v9, %v735_v57  ;;  %v936_v60 = vadd.f32 %v2561_v9, %v935_v58  ;;  %v737_v61 = vpop.f32.mrb[97].mxu0  ;;  %v937_v62 = vpop.f32.mrb[97].mxu1 }
 0x1c8   :  { %1340 = vst.msk [vmem:[%s2704_s3 + $0x308] sm:$0xff] %vm1242_vm1, %v1239_v56  ;;  %v738_v63 = vpop.f32.mrb[98].mxu0  ;;  %v938_v0 = vpop.f32.mrb[98].mxu1 }
 0x1c9   :  { %vm990_vm8 = vcmp.ge.f32.partialorder %v736_v59, 0.0  ;;  %v1090_v1 = vmul.f32 0.01, %v736_v59  ;;  %vm1040_vm9 = vcmp.ge.f32.partialorder %v936_v60, 0.0  ;;  %v1140_v2 = vmul.f32 0.01, %v936_v60 }
 0x1ca   :  { %v739_v3 = vadd.f32 %v2561_v9, %v738_v63  ;;  %v939_v4 = vadd.f32 %v2561_v9, %v938_v0  ;;  %v740_v5 = vpop.f32.mrb[99].mxu0  ;;  %v940_v6 = vpop.f32.mrb[99].mxu1 }
 0x1cb   :  { %v1190_v7 = vsel %vm990_vm8, %v736_v59, %v1090_v1  ;;  %v1240_v8 = vsel %vm1040_vm9, %v936_v60, %v1140_v2 }
 0x1cc   :  { %1291 = vst.msk [vmem:[%s2704_s3 + $0x180] sm:$0xff] %vm1242_vm1, %v1190_v7  ;;  %1341 = vst.msk [vmem:[%s2704_s3 + $0x310] sm:$0xff] %vm1242_vm1, %v1240_v8  ;;  %vm991_vm10 = vcmp.ge.f32.partialorder %v739_v3, 0.0  ;;  %v1091_v10 = vmul.f32 0.01, %v739_v3  ;;  %vm1041_vm11 = vcmp.ge.f32.partialorder %v939_v4, 0.0 }
 0x1cd   :  { %v1141_v11 = vmul.f32 0.01, %v939_v4 }
 0x1ce   :  { %v1191_v12 = vsel %vm991_vm10, %v739_v3, %v1091_v10 }
 0x1cf   :  { %v1241_v9 = vsel %vm1041_vm11, %v939_v4, %v1141_v11  ;;  %1292 = vst.msk [vmem:[%s2704_s3 + $0x188] sm:$0xff] %vm1242_vm1, %v1191_v12 }
 0x1d0   :  { %1342 = vst.msk [vmem:[%s2704_s3 + $0x318] sm:$0xff] %vm1242_vm1, %v1241_v9 }

// kernel: state_network_forward.7
= control target key start
LH: loop header
LB: loop body
LE: loop exit
PB: predicated region body
PF: predicated region fallthrough
CT: control target
= control target key end

     0   :  { %vm549_vm1 = vcmask 523264   ;;  %s1314_s1 = inlined_call_operand.vmem [shape: f32[512,64], index: 1, kind: input, shape index: {}]   ;;  %s1315_s0 = inlined_call_operand.vmem [shape: f32[162,512], index: 0, kind: input, shape index: {}]   ;;  %s1316_s2 = inlined_call_operand.vmem [shape: f32[1,64], index: 2, kind: input, shape index: {}]   ;;  %s1317_s3 = inlined_call_operand.vmem [shape: f32[162,64], index: 3, kind: output, shape index: {}]  }
   0x1   :  { %v159_v0 = vld [vmem:[%s1314_s1 + $0x80] sm:$0xff]  ;;  %v160_v1 = vld [vmem:[%s1314_s1 + $0x88] sm:$0xff]  ;;  %v161_v11 = vld [vmem:[%s1314_s1 + $0x90] sm:$0xff] }
   0x2   :  { %v191_v2 = vld [vmem:[%s1314_s1 + $0x180] sm:$0xff]  ;;  %v215_v3 = vpack.c.bf16 %v160_v1, %v159_v0  ;;  %v192_v4 = vld [vmem:[%s1314_s1 + $0x188] sm:$0xff]  ;;  %v162_v13 = vld [vmem:[%s1314_s1 + $0x98] sm:$0xff] }
   0x3   :  { %v143_v5 = vld [vmem:[%s1314_s1] sm:$0xff]  ;;  %v144_v6 = vld [vmem:[%s1314_s1 + $0x8] sm:$0xff]  ;;  %v231_v7 = vpack.c.bf16 %v192_v4, %v191_v2  ;;  %v193_v14 = vld [vmem:[%s1314_s1 + $0x190] sm:$0xff]  ;;  %v216_v16 = vpack.c.bf16 %v162_v13, %v161_v11 }
   0x4   :  { %v207_v8 = vpack.c.bf16 %v144_v6, %v143_v5  ;;  %v175_v9 = vld [vmem:[%s1314_s1 + $0x100] sm:$0xff]  ;;  %v176_v10 = vld [vmem:[%s1314_s1 + $0x108] sm:$0xff]  ;;  %576 = vmatprep.subr.bf16.mxu0 %v215_v3  ;;  %v194_v15 = vld [vmem:[%s1314_s1 + $0x198] sm:$0xff] }
   0x5   :  { %v223_v12 = vpack.c.bf16 %v176_v10, %v175_v9  ;;  %658 = vmatprep.subr.bf16.mxu1 %v231_v7  ;;  %v232_v17 = vpack.c.bf16 %v194_v15, %v193_v14  ;;  %v145_v18 = vld [vmem:[%s1314_s1 + $0x10] sm:$0xff]  ;;  %v146_v19 = vld [vmem:[%s1314_s1 + $0x18] sm:$0xff]  ;;  %v163_v23 = vld [vmem:[%s1314_s1 + $0xa0] sm:$0xff] }
   0x6   :  { %577 = vmatpush3.bf16.msra.mxu0 %v207_v8  ;;  %v177_v20 = vld [vmem:[%s1314_s1 + $0x110] sm:$0xff]  ;;  %v208_v21 = vpack.c.bf16 %v146_v19, %v145_v18  ;;  %v178_v22 = vld [vmem:[%s1314_s1 + $0x118] sm:$0xff]  ;;  %v164_v24 = vld [vmem:[%s1314_s1 + $0xa8] sm:$0xff] }
   0x7   :  { %659 = vmatpush3.bf16.msra.mxu1 %v223_v12  ;;  %578 = vmatprep.subr.bf16.mxu0 %v216_v16  ;;  %v224_v25 = vpack.c.bf16 %v178_v22, %v177_v20  ;;  %v217_v26 = vpack.c.bf16 %v164_v24, %v163_v23  ;;  %v195_v27 = vld [vmem:[%s1314_s1 + $0x1a0] sm:$0xff]  ;;  %v196_v28 = vld [vmem:[%s1314_s1 + $0x1a8] sm:$0xff]  ;;  %v165_v35 = vld [vmem:[%s1314_s1 + $0xb0] sm:$0xff] }
   0x8   :  { %660 = vmatprep.subr.bf16.mxu1 %v232_v17  ;;  %v147_v29 = vld [vmem:[%s1314_s1 + $0x20] sm:$0xff]  ;;  %v233_v30 = vpack.c.bf16 %v196_v28, %v195_v27  ;;  %v148_v31 = vld [vmem:[%s1314_s1 + $0x28] sm:$0xff]  ;;  %v166_v36 = vld [vmem:[%s1314_s1 + $0xb8] sm:$0xff] }
   0x9   :  { %v179_v32 = vld [vmem:[%s1314_s1 + $0x120] sm:$0xff]  ;;  %v180_v33 = vld [vmem:[%s1314_s1 + $0x128] sm:$0xff]  ;;  %v209_v34 = vpack.c.bf16 %v148_v31, %v147_v29  ;;  %v197_v37 = vld [vmem:[%s1314_s1 + $0x1b0] sm:$0xff]  ;;  %v218_v39 = vpack.c.bf16 %v166_v36, %v165_v35 }
   0xa   :  { %579 = vmatpush3.bf16.msra.mxu0 %v208_v21  ;;  %v225_v38 = vpack.c.bf16 %v180_v33, %v179_v32  ;;  %v198_v40 = vld [vmem:[%s1314_s1 + $0x1b8] sm:$0xff]  ;;  %v149_v41 = vld [vmem:[%s1314_s1 + $0x30] sm:$0xff]  ;;  %v167_v46 = vld [vmem:[%s1314_s1 + $0xc0] sm:$0xff] }
   0xb   :  { %661 = vmatpush3.bf16.msra.mxu1 %v224_v25  ;;  %580 = vmatprep.subr.bf16.mxu0 %v217_v26  ;;  %v150_v42 = vld [vmem:[%s1314_s1 + $0x38] sm:$0xff]  ;;  %v234_v43 = vpack.c.bf16 %v198_v40, %v197_v37  ;;  %v181_v44 = vld [vmem:[%s1314_s1 + $0x130] sm:$0xff]  ;;  %v168_v47 = vld [vmem:[%s1314_s1 + $0xc8] sm:$0xff] }
   0xc   :  { %662 = vmatprep.subr.bf16.mxu1 %v233_v30  ;;  %v182_v45 = vld [vmem:[%s1314_s1 + $0x138] sm:$0xff]  ;;  %v199_v48 = vld [vmem:[%s1314_s1 + $0x1c0] sm:$0xff]  ;;  %v200_v49 = vld [vmem:[%s1314_s1 + $0x1c8] sm:$0xff]  ;;  %v210_v50 = vpack.c.bf16 %v150_v42, %v149_v41  ;;  %v219_v52 = vpack.c.bf16 %v168_v47, %v167_v46 }
   0xd   :  { %v226_v51 = vpack.c.bf16 %v182_v45, %v181_v44  ;;  %v151_v53 = vld [vmem:[%s1314_s1 + $0x40] sm:$0xff]  ;;  %v152_v54 = vld [vmem:[%s1314_s1 + $0x48] sm:$0xff]  ;;  %v235_v56 = vpack.c.bf16 %v200_v49, %v199_v48  ;;  %v169_v58 = vld [vmem:[%s1314_s1 + $0xd0] sm:$0xff] }
   0xe   :  { %581 = vmatpush3.bf16.msra.mxu0 %v209_v34  ;;  %v183_v55 = vld [vmem:[%s1314_s1 + $0x140] sm:$0xff]  ;;  %v184_v57 = vld [vmem:[%s1314_s1 + $0x148] sm:$0xff]  ;;  %v170_v59 = vld [vmem:[%s1314_s1 + $0xd8] sm:$0xff]  ;;  %v211_v62 = vpack.c.bf16 %v152_v54, %v151_v53 }
   0xf   :  { %663 = vmatpush3.bf16.msra.mxu1 %v225_v38  ;;  %582 = vmatprep.subr.bf16.mxu0 %v218_v39  ;;  %v201_v60 = vld [vmem:[%s1314_s1 + $0x1d0] sm:$0xff]  ;;  %v202_v61 = vld [vmem:[%s1314_s1 + $0x1d8] sm:$0xff]  ;;  %v227_v63 = vpack.c.bf16 %v184_v57, %v183_v55  ;;  %v220_v0 = vpack.c.bf16 %v170_v59, %v169_v58  ;;  %v171_v6 = vld [vmem:[%s1314_s1 + $0xe0] sm:$0xff] }
  0x10   :  { %664 = vmatprep.subr.bf16.mxu1 %v234_v43  ;;  %v153_v1 = vld [vmem:[%s1314_s1 + $0x50] sm:$0xff]  ;;  %v154_v2 = vld [vmem:[%s1314_s1 + $0x58] sm:$0xff]  ;;  %v236_v4 = vpack.c.bf16 %v202_v61, %v201_v60  ;;  %v172_v7 = vld [vmem:[%s1314_s1 + $0xe8] sm:$0xff] }
  0x11   :  { %v185_v3 = vld [vmem:[%s1314_s1 + $0x150] sm:$0xff]  ;;  %v186_v5 = vld [vmem:[%s1314_s1 + $0x158] sm:$0xff]  ;;  %v203_v8 = vld [vmem:[%s1314_s1 + $0x1e0] sm:$0xff]  ;;  %v212_v11 = vpack.c.bf16 %v154_v2, %v153_v1  ;;  %v221_v16 = vpack.c.bf16 %v172_v7, %v171_v6 }
  0x12   :  { %583 = vmatpush3.bf16.msra.mxu0 %v210_v50  ;;  %v204_v9 = vld [vmem:[%s1314_s1 + $0x1e8] sm:$0xff]  ;;  %v155_v10 = vld [vmem:[%s1314_s1 + $0x60] sm:$0xff]  ;;  %v228_v15 = vpack.c.bf16 %v186_v5, %v185_v3  ;;  %v173_v17 = vld [vmem:[%s1314_s1 + $0xf0] sm:$0xff] }
  0x13   :  { %665 = vmatpush3.bf16.msra.mxu1 %v226_v51  ;;  %584 = vmatprep.subr.bf16.mxu0 %v219_v52  ;;  %v156_v12 = vld [vmem:[%s1314_s1 + $0x68] sm:$0xff]  ;;  %v187_v13 = vld [vmem:[%s1314_s1 + $0x160] sm:$0xff]  ;;  %v237_v20 = vpack.c.bf16 %v204_v9, %v203_v8  ;;  %v174_v21 = vld [vmem:[%s1314_s1 + $0xf8] sm:$0xff] }
  0x14   :  { %666 = vmatprep.subr.bf16.mxu1 %v235_v56  ;;  %v188_v14 = vld [vmem:[%s1314_s1 + $0x168] sm:$0xff]  ;;  %v18_v23 = vld [vmem:[%s1315_s0 + $0x18] sm:$0xff]  ;;  %v205_v25 = vld [vmem:[%s1314_s1 + $0x1f0] sm:$0xff]  ;;  %v213_v28 = vpack.c.bf16 %v156_v12, %v155_v10  ;;  %v222_v30 = vpack.c.bf16 %v174_v21, %v173_v17 }
  0x15   :  { %v16_v18 = vld [vmem:[%s1315_s0 + $0x8] sm:$0xff]  ;;  %v22_v24 = vld [vmem:[%s1315_s0 + $0x38] sm:$0xff]  ;;  %v229_v29 = vpack.c.bf16 %v188_v14, %v187_v13  ;;  %v157_v31 = vld [vmem:[%s1314_s1 + $0x70] sm:$0xff] }
  0x16   :  { %585 = vmatpush3.bf16.msra.mxu0 %v211_v62  ;;  %v20_v19 = vld [vmem:[%s1315_s0 + $0x28] sm:$0xff]  ;;  %v206_v26 = vld [vmem:[%s1314_s1 + $0x1f8] sm:$0xff]  ;;  %v102_v27 = vpack.c.bf16 %v22_v24, %v18_v23  ;;  %v189_v34 = vld [vmem:[%s1314_s1 + $0x170] sm:$0xff] }
  0x17   :  { %667 = vmatpush3.bf16.msra.mxu1 %v227_v63  ;;  %586 = vmatprep.subr.bf16.mxu0 %v220_v0  ;;  %v100_v22 = vpack.c.bf16 %v20_v19, %v16_v18  ;;  %v158_v32 = vld [vmem:[%s1314_s1 + $0x78] sm:$0xff]  ;;  %v238_v33 = vpack.c.bf16 %v206_v26, %v205_v25  ;;  %v15_v37 = vld [vmem:[%s1315_s0] sm:$0xff]  ;;  %v17_v39 = vld [vmem:[%s1315_s0 + $0x10] sm:$0xff] }
  0x18   :  { %668 = vmatprep.subr.bf16.mxu1 %v236_v4  ;;  %v190_v35 = vld [vmem:[%s1314_s1 + $0x178] sm:$0xff]  ;;  %398 = vmatprep.mubr.bf16.mxu1 %v102_v27  ;;  %v214_v36 = vpack.c.bf16 %v158_v32, %v157_v31  ;;  %v19_v38 = vld [vmem:[%s1315_s0 + $0x20] sm:$0xff]  ;;  %v21_v41 = vld [vmem:[%s1315_s0 + $0x30] sm:$0xff] }
  0x19   :  { %278 = vmatprep.mubr.bf16.mxu0 %v100_v22  ;;  %v230_v40 = vpack.c.bf16 %v190_v35, %v189_v34  ;;  %v24_v42 = vld [vmem:[%s1315_s0 + $0x48] sm:$0xff]  ;;  %v26_v44 = vld [vmem:[%s1315_s0 + $0x58] sm:$0xff]  ;;  %v99_v46 = vpack.c.bf16 %v19_v38, %v15_v37  ;;  %v101_v47 = vpack.c.bf16 %v21_v41, %v17_v39  ;;  %v23_v50 = vld [vmem:[%s1315_s0 + $0x40] sm:$0xff] }
  0x1a   :  { %587 = vmatpush3.bf16.msra.mxu0 %v212_v11  ;;  %v28_v43 = vld [vmem:[%s1315_s0 + $0x68] sm:$0xff]  ;;  %v30_v45 = vld [vmem:[%s1315_s0 + $0x78] sm:$0xff]  ;;  %v27_v51 = vld [vmem:[%s1315_s0 + $0x60] sm:$0xff] }
  0x1b   :  { %669 = vmatpush3.bf16.msra.mxu1 %v228_v15  ;;  %588 = vmatprep.subr.bf16.mxu0 %v221_v16  ;;  %v104_v48 = vpack.c.bf16 %v28_v43, %v24_v42  ;;  %v106_v49 = vpack.c.bf16 %v30_v45, %v26_v44  ;;  %v25_v52 = vld [vmem:[%s1315_s0 + $0x50] sm:$0xff]  ;;  %v32_v54 = vld [vmem:[%s1315_s0 + $0x88] sm:$0xff]  ;;  %v34_v56 = vld [vmem:[%s1315_s0 + $0x98] sm:$0xff]  ;;  %v103_v58 = vpack.c.bf16 %v27_v51, %v23_v50 }
  0x1c   :  { %670 = vmatprep.subr.bf16.mxu1 %v237_v20  ;;  %v29_v53 = vld [vmem:[%s1315_s0 + $0x70] sm:$0xff]  ;;  %v36_v55 = vld [vmem:[%s1315_s0 + $0xa8] sm:$0xff]  ;;  %v38_v57 = vld [vmem:[%s1315_s0 + $0xb8] sm:$0xff] }
  0x1d   :  { %v105_v59 = vpack.c.bf16 %v29_v53, %v25_v52  ;;  %v108_v60 = vpack.c.bf16 %v36_v55, %v32_v54  ;;  %v110_v61 = vpack.c.bf16 %v38_v57, %v34_v56  ;;  %v31_v62 = vld [vmem:[%s1315_s0 + $0x80] sm:$0xff]  ;;  %v33_v0 = vld [vmem:[%s1315_s0 + $0x90] sm:$0xff]  ;;  %v40_v2 = vld [vmem:[%s1315_s0 + $0xc8] sm:$0xff] }
  0x1e   :  { %589 = vmatpush3.bf16.msra.mxu0 %v213_v28  ;;  %v35_v63 = vld [vmem:[%s1315_s0 + $0xa0] sm:$0xff]  ;;  %v37_v1 = vld [vmem:[%s1315_s0 + $0xb0] sm:$0xff]  ;;  %v44_v3 = vld [vmem:[%s1315_s0 + $0xe8] sm:$0xff] }
  0x1f   :  { %671 = vmatpush3.bf16.msra.mxu1 %v229_v29  ;;  %590 = vmatprep.subr.bf16.mxu0 %v222_v30  ;;  %v42_v4 = vld [vmem:[%s1315_s0 + $0xd8] sm:$0xff]  ;;  %v107_v6 = vpack.c.bf16 %v35_v63, %v31_v62  ;;  %v109_v7 = vpack.c.bf16 %v37_v1, %v33_v0  ;;  %v112_v8 = vpack.c.bf16 %v44_v3, %v40_v2  ;;  %v39_v10 = vld [vmem:[%s1315_s0 + $0xc0] sm:$0xff]  ;;  %v41_v12 = vld [vmem:[%s1315_s0 + $0xd0] sm:$0xff] }
  0x20   :  { %672 = vmatprep.subr.bf16.mxu1 %v238_v33  ;;  %v46_v5 = vld [vmem:[%s1315_s0 + $0xf8] sm:$0xff]  ;;  %v43_v11 = vld [vmem:[%s1315_s0 + $0xe0] sm:$0xff]  ;;  %v45_v13 = vld [vmem:[%s1315_s0 + $0xf0] sm:$0xff] }
  0x21   :  { %v114_v9 = vpack.c.bf16 %v46_v5, %v42_v4  ;;  %v48_v14 = vld [vmem:[%s1315_s0 + $0x108] sm:$0xff]  ;;  %v50_v16 = vld [vmem:[%s1315_s0 + $0x118] sm:$0xff]  ;;  %v111_v18 = vpack.c.bf16 %v43_v11, %v39_v10  ;;  %v113_v19 = vpack.c.bf16 %v45_v13, %v41_v12  ;;  %v47_v22 = vld [vmem:[%s1315_s0 + $0x100] sm:$0xff] }
  0x22   :  { %591 = vmatpush3.bf16.msra.mxu0 %v214_v36  ;;  %v52_v15 = vld [vmem:[%s1315_s0 + $0x128] sm:$0xff]  ;;  %v54_v17 = vld [vmem:[%s1315_s0 + $0x138] sm:$0xff]  ;;  %v51_v23 = vld [vmem:[%s1315_s0 + $0x120] sm:$0xff] }
  0x23   :  { %673 = vmatpush3.bf16.msra.mxu1 %v230_v40  ;;  %v116_v20 = vpack.c.bf16 %v52_v15, %v48_v14  ;;  %v118_v21 = vpack.c.bf16 %v54_v17, %v50_v16  ;;  %v49_v24 = vld [vmem:[%s1315_s0 + $0x110] sm:$0xff]  ;;  %v56_v26 = vld [vmem:[%s1315_s0 + $0x148] sm:$0xff]  ;;  %v58_v28 = vld [vmem:[%s1315_s0 + $0x158] sm:$0xff]  ;;  %v115_v30 = vpack.c.bf16 %v51_v23, %v47_v22 }
  0x24   :  { %v53_v25 = vld [vmem:[%s1315_s0 + $0x130] sm:$0xff]  ;;  %v60_v27 = vld [vmem:[%s1315_s0 + $0x168] sm:$0xff]  ;;  %v62_v29 = vld [vmem:[%s1315_s0 + $0x178] sm:$0xff] }
  0x25   :  { %279 = vmatmul.mubr.bf16.vlgmr.msra.gmra.mrb[0].mxu0 %v99_v46  ;;  %v117_v31 = vpack.c.bf16 %v53_v25, %v49_v24  ;;  %v120_v32 = vpack.c.bf16 %v60_v27, %v56_v26  ;;  %v122_v33 = vpack.c.bf16 %v62_v29, %v58_v28  ;;  %v55_v34 = vld [vmem:[%s1315_s0 + $0x140] sm:$0xff]  ;;  %v57_v36 = vld [vmem:[%s1315_s0 + $0x150] sm:$0xff]  ;;  %v64_v38 = vld [vmem:[%s1315_s0 + $0x188] sm:$0xff] }
  0x26   :  { %399 = vmatmul.mubr.bf16.vlgmr.msra.gmra.mrb[0].mxu1 %v101_v47  ;;  %286 = vmatprep.mubr.bf16.mxu0 %v104_v48  ;;  %v59_v35 = vld [vmem:[%s1315_s0 + $0x160] sm:$0xff]  ;;  %v61_v37 = vld [vmem:[%s1315_s0 + $0x170] sm:$0xff]  ;;  %v68_v39 = vld [vmem:[%s1315_s0 + $0x1a8] sm:$0xff] }
  0x27   :  { %406 = vmatprep.mubr.bf16.mxu1 %v106_v49  ;;  %v66_v40 = vld [vmem:[%s1315_s0 + $0x198] sm:$0xff]  ;;  %v119_v42 = vpack.c.bf16 %v59_v35, %v55_v34  ;;  %v121_v43 = vpack.c.bf16 %v61_v37, %v57_v36  ;;  %v124_v44 = vpack.c.bf16 %v68_v39, %v64_v38  ;;  %v63_v46 = vld [vmem:[%s1315_s0 + $0x180] sm:$0xff]  ;;  %v65_v48 = vld [vmem:[%s1315_s0 + $0x190] sm:$0xff] }
  0x28   :  { %v70_v41 = vld [vmem:[%s1315_s0 + $0x1b8] sm:$0xff]  ;;  %v67_v47 = vld [vmem:[%s1315_s0 + $0x1a0] sm:$0xff]  ;;  %v69_v49 = vld [vmem:[%s1315_s0 + $0x1b0] sm:$0xff] }
  0x29   :  { %v126_v45 = vpack.c.bf16 %v70_v41, %v66_v40  ;;  %v72_v50 = vld [vmem:[%s1315_s0 + $0x1c8] sm:$0xff]  ;;  %v74_v52 = vld [vmem:[%s1315_s0 + $0x1d8] sm:$0xff]  ;;  %v123_v54 = vpack.c.bf16 %v67_v47, %v63_v46  ;;  %v125_v55 = vpack.c.bf16 %v69_v49, %v65_v48  ;;  %v95_v28 = vld [vmem:[%s1315_s0 + $0x280] sm:$0xff] }
  0x2a   :  { %v76_v51 = vld [vmem:[%s1315_s0 + $0x1e8] sm:$0xff]  ;;  %v78_v53 = vld [vmem:[%s1315_s0 + $0x1f8] sm:$0xff]  ;;  %v97_v29 = vld [vmem:[%s1315_s0 + $0x290] sm:$0xff] }
  0x2b   :  { %v128_v56 = vpack.c.bf16 %v76_v51, %v72_v50  ;;  %v130_v57 = vpack.c.bf16 %v78_v53, %v74_v52  ;;  %v80_v62 = vld [vmem:[%s1315_s0 + $0x208] sm:$0xff]  ;;  %v82_v0 = vld [vmem:[%s1315_s0 + $0x218] sm:$0xff]  ;;  %v1207_v34 = vld [vmem:[%s1316_s2] ss:$0 sm:$0xff] }
  0x2c   :  { %v84_v63 = vld [vmem:[%s1315_s0 + $0x228] sm:$0xff]  ;;  %v86_v1 = vld [vmem:[%s1315_s0 + $0x238] sm:$0xff] }
  0x2d   :  { %287 = vmatmul.mubr.bf16.gmra.mrb[4].mxu0 %v103_v58  ;;  %v71_v58 = vld [vmem:[%s1315_s0 + $0x1c0] sm:$0xff]  ;;  %v132_v4 = vpack.c.bf16 %v84_v63, %v80_v62  ;;  %v134_v5 = vpack.c.bf16 %v86_v1, %v82_v0  ;;  %v88_v10 = vld [vmem:[%s1315_s0 + $0x248] sm:$0xff]  ;;  %v90_v12 = vld [vmem:[%s1315_s0 + $0x258] sm:$0xff] }
  0x2e   :  { %407 = vmatmul.mubr.bf16.gmra.mrb[4].mxu1 %v105_v59  ;;  %294 = vmatprep.mubr.bf16.mxu0 %v108_v60  ;;  %v75_v59 = vld [vmem:[%s1315_s0 + $0x1e0] sm:$0xff]  ;;  %v73_v60 = vld [vmem:[%s1315_s0 + $0x1d0] sm:$0xff]  ;;  %v92_v11 = vld [vmem:[%s1315_s0 + $0x268] sm:$0xff] }
  0x2f   :  { %414 = vmatprep.mubr.bf16.mxu1 %v110_v61  ;;  %v77_v61 = vld [vmem:[%s1315_s0 + $0x1f0] sm:$0xff]  ;;  %v127_v2 = vpack.c.bf16 %v75_v59, %v71_v58  ;;  %v94_v13 = vld [vmem:[%s1315_s0 + $0x278] sm:$0xff]  ;;  %v136_v16 = vpack.c.bf16 %v92_v11, %v88_v10  ;;  %v96_v22 = vld [vmem:[%s1315_s0 + $0x288] sm:$0xff] }
  0x30   :  { %v129_v3 = vpack.c.bf16 %v77_v61, %v73_v60  ;;  %v138_v17 = vpack.c.bf16 %v94_v13, %v90_v12  ;;  %v98_v23 = vld [vmem:[%s1315_s0 + $0x298] sm:$0xff]  ;;  %v140_v26 = vpack.c.bf16 %v96_v22, %v96_v22 }
  0x31   :  { %v142_v27 = vpack.c.bf16 %v98_v23, %v98_v23 }
  0x35   :  { %295 = vmatmul.mubr.bf16.gmra.mrb[8].mxu0 %v107_v6  ;;  %v79_v6 = vld [vmem:[%s1315_s0 + $0x200] sm:$0xff] }
  0x36   :  { %415 = vmatmul.mubr.bf16.gmra.mrb[8].mxu1 %v109_v7  ;;  %302 = vmatprep.mubr.bf16.mxu0 %v112_v8  ;;  %v83_v7 = vld [vmem:[%s1315_s0 + $0x220] sm:$0xff]  ;;  %v81_v8 = vld [vmem:[%s1315_s0 + $0x210] sm:$0xff] }
  0x37   :  { %422 = vmatprep.mubr.bf16.mxu1 %v114_v9  ;;  %v85_v9 = vld [vmem:[%s1315_s0 + $0x230] sm:$0xff]  ;;  %v131_v14 = vpack.c.bf16 %v83_v7, %v79_v6 }
  0x38   :  { %v133_v15 = vpack.c.bf16 %v85_v9, %v81_v8 }
  0x3d   :  { %303 = vmatmul.mubr.bf16.gmra.mrb[12].mxu0 %v111_v18  ;;  %v87_v18 = vld [vmem:[%s1315_s0 + $0x240] sm:$0xff] }
  0x3e   :  { %423 = vmatmul.mubr.bf16.gmra.mrb[12].mxu1 %v113_v19  ;;  %310 = vmatprep.mubr.bf16.mxu0 %v116_v20  ;;  %v91_v19 = vld [vmem:[%s1315_s0 + $0x260] sm:$0xff]  ;;  %v89_v20 = vld [vmem:[%s1315_s0 + $0x250] sm:$0xff] }
  0x3f   :  { %430 = vmatprep.mubr.bf16.mxu1 %v118_v21  ;;  %v93_v21 = vld [vmem:[%s1315_s0 + $0x270] sm:$0xff]  ;;  %v135_v24 = vpack.c.bf16 %v91_v19, %v87_v18 }
  0x40   :  { %v137_v25 = vpack.c.bf16 %v93_v21, %v89_v20 }
  0x45   :  { %311 = vmatmul.mubr.bf16.gmra.mrb[16].mxu0 %v115_v30  ;;  %v139_v30 = vpack.c.bf16 %v95_v28, %v95_v28 }
  0x46   :  { %431 = vmatmul.mubr.bf16.gmra.mrb[16].mxu1 %v117_v31  ;;  %318 = vmatprep.mubr.bf16.mxu0 %v120_v32  ;;  %v141_v31 = vpack.c.bf16 %v97_v29, %v97_v29 }
  0x47   :  { %438 = vmatprep.mubr.bf16.mxu1 %v122_v33 }
  0x4d   :  { %319 = vmatmul.mubr.bf16.gmra.mrb[20].mxu0 %v119_v42 }
  0x4e   :  { %439 = vmatmul.mubr.bf16.gmra.mrb[20].mxu1 %v121_v43  ;;  %326 = vmatprep.mubr.bf16.mxu0 %v124_v44 }
  0x4f   :  { %446 = vmatprep.mubr.bf16.mxu1 %v126_v45 }
  0x55   :  { %327 = vmatmul.mubr.bf16.gmra.mrb[24].mxu0 %v123_v54 }
  0x56   :  { %447 = vmatmul.mubr.bf16.gmra.mrb[24].mxu1 %v125_v55  ;;  %334 = vmatprep.mubr.bf16.mxu0 %v128_v56 }
  0x57   :  { %454 = vmatprep.mubr.bf16.mxu1 %v130_v57 }
  0x5d   :  { %335 = vmatmul.mubr.bf16.gmra.mrb[28].mxu0 %v127_v2 }
  0x5e   :  { %455 = vmatmul.mubr.bf16.gmra.mrb[28].mxu1 %v129_v3  ;;  %342 = vmatprep.mubr.bf16.mxu0 %v132_v4 }
  0x5f   :  { %462 = vmatprep.mubr.bf16.mxu1 %v134_v5 }
  0x65   :  { %343 = vmatmul.mubr.bf16.gmra.mrb[32].mxu0 %v131_v14 }
  0x66   :  { %463 = vmatmul.mubr.bf16.gmra.mrb[32].mxu1 %v133_v15  ;;  %350 = vmatprep.mubr.bf16.mxu0 %v136_v16 }
  0x67   :  { %470 = vmatprep.mubr.bf16.mxu1 %v138_v17 }
  0x6d   :  { %351 = vmatmul.mubr.bf16.gmra.mrb[36].mxu0 %v135_v24 }
  0x6e   :  { %471 = vmatmul.mubr.bf16.gmra.mrb[36].mxu1 %v137_v25  ;;  %358 = vmatprep.mubr.bf16.mxu0 %v140_v26 }
  0x6f   :  { %478 = vmatprep.mubr.bf16.mxu1 %v142_v27 }
  0x75   :  { %359 = vmatmul.mubr.bf16.gmra.mrb[40].mxu0 %v139_v30 }
  0x76   :  { %479 = vmatmul.mubr.bf16.gmra.mrb[40].mxu1 %v141_v31 }
  0xf8   :  { %v592_v32 = vpop.f32.mrb[0].mxu0 }
  0xf9   :  { %v674_v33 = vpop.f32.mrb[0].mxu1  ;;  %v593_v35 = vpop.f32.mrb[1].mxu0 }
  0xfa   :  { %v594_v36 = vadd.f32 %v593_v35, %v592_v32  ;;  %v675_v37 = vpop.f32.mrb[1].mxu1  ;;  %v595_v38 = vpop.f32.mrb[2].mxu0 }
  0xfb   :  { %v676_v39 = vadd.f32 %v675_v37, %v674_v33  ;;  %v677_v40 = vpop.f32.mrb[2].mxu1  ;;  %v596_v41 = vpop.f32.mrb[3].mxu0 }
  0xfc   :  { %v281_v42 = vadd.f32 %v594_v36, %v1207_v34  ;;  %v597_v43 = vadd.f32 %v596_v41, %v595_v38  ;;  %v678_v44 = vpop.f32.mrb[3].mxu1 }
  0xfd   :  { %v679_v45 = vadd.f32 %v678_v44, %v677_v40 }
  0xfe   :  { %v401_v46 = vadd.f32 %v676_v39, %v281_v42  ;;  %v284_v47 = vadd.f32 %v597_v43, %v1207_v34 }
 0x100   :  { %vm486_vm0 = vcmp.ge.f32.partialorder %v401_v46, 0.0  ;;  %v507_v48 = vmul.f32 0.01, %v401_v46  ;;  %v404_v49 = vadd.f32 %v679_v45, %v284_v47  ;;  %v598_v50 = vpop.f32.mrb[4].mxu0 }
 0x101   :  { %v680_v51 = vpop.f32.mrb[4].mxu1  ;;  %v599_v52 = vpop.f32.mrb[5].mxu0 }
 0x102   :  { %v528_v53 = vsel %vm486_vm0, %v401_v46, %v507_v48  ;;  %vm487_vm2 = vcmp.ge.f32.partialorder %v404_v49, 0.0  ;;  %v508_v54 = vmul.f32 0.01, %v404_v49  ;;  %v600_v55 = vadd.f32 %v599_v52, %v598_v50  ;;  %v681_v56 = vpop.f32.mrb[5].mxu1  ;;  %v601_v57 = vpop.f32.mrb[6].mxu0 }
 0x103   :  { %550 = vst.msk [vmem:[%s1317_s3] sm:$0xff] %vm549_vm1, %v528_v53  ;;  %v682_v58 = vadd.f32 %v681_v56, %v680_v51  ;;  %v683_v59 = vpop.f32.mrb[6].mxu1  ;;  %v602_v60 = vpop.f32.mrb[7].mxu0 }
 0x104   :  { %v529_v61 = vsel %vm487_vm2, %v404_v49, %v508_v54  ;;  %v289_v62 = vadd.f32 %v600_v55, %v1207_v34  ;;  %v603_v63 = vadd.f32 %v602_v60, %v601_v57  ;;  %v684_v0 = vpop.f32.mrb[7].mxu1 }
 0x105   :  { %551 = vst.msk [vmem:[%s1317_s3 + $0x8] sm:$0xff] %vm549_vm1, %v529_v61  ;;  %v685_v1 = vadd.f32 %v684_v0, %v683_v59 }
 0x106   :  { %v409_v2 = vadd.f32 %v682_v58, %v289_v62  ;;  %v292_v3 = vadd.f32 %v603_v63, %v1207_v34 }
 0x108   :  { %vm488_vm3 = vcmp.ge.f32.partialorder %v409_v2, 0.0  ;;  %v509_v4 = vmul.f32 0.01, %v409_v2  ;;  %v412_v5 = vadd.f32 %v685_v1, %v292_v3  ;;  %v604_v6 = vpop.f32.mrb[8].mxu0 }
 0x109   :  { %v686_v7 = vpop.f32.mrb[8].mxu1  ;;  %v605_v8 = vpop.f32.mrb[9].mxu0 }
 0x10a   :  { %v530_v9 = vsel %vm488_vm3, %v409_v2, %v509_v4  ;;  %vm489_vm4 = vcmp.ge.f32.partialorder %v412_v5, 0.0  ;;  %v510_v10 = vmul.f32 0.01, %v412_v5  ;;  %v606_v11 = vadd.f32 %v605_v8, %v604_v6  ;;  %v687_v12 = vpop.f32.mrb[9].mxu1  ;;  %v607_v13 = vpop.f32.mrb[10].mxu0 }
 0x10b   :  { %552 = vst.msk [vmem:[%s1317_s3 + $0x10] sm:$0xff] %vm549_vm1, %v530_v9  ;;  %v688_v14 = vadd.f32 %v687_v12, %v686_v7  ;;  %v689_v15 = vpop.f32.mrb[10].mxu1  ;;  %v608_v16 = vpop.f32.mrb[11].mxu0 }
 0x10c   :  { %v531_v17 = vsel %vm489_vm4, %v412_v5, %v510_v10  ;;  %v297_v18 = vadd.f32 %v606_v11, %v1207_v34  ;;  %v609_v19 = vadd.f32 %v608_v16, %v607_v13  ;;  %v690_v20 = vpop.f32.mrb[11].mxu1 }
 0x10d   :  { %553 = vst.msk [vmem:[%s1317_s3 + $0x18] sm:$0xff] %vm549_vm1, %v531_v17  ;;  %v691_v21 = vadd.f32 %v690_v20, %v689_v15 }
 0x10e   :  { %v417_v22 = vadd.f32 %v688_v14, %v297_v18  ;;  %v300_v23 = vadd.f32 %v609_v19, %v1207_v34 }
 0x110   :  { %vm490_vm5 = vcmp.ge.f32.partialorder %v417_v22, 0.0  ;;  %v511_v24 = vmul.f32 0.01, %v417_v22  ;;  %v420_v25 = vadd.f32 %v691_v21, %v300_v23  ;;  %v610_v26 = vpop.f32.mrb[12].mxu0 }
 0x111   :  { %v692_v27 = vpop.f32.mrb[12].mxu1  ;;  %v611_v28 = vpop.f32.mrb[13].mxu0 }
 0x112   :  { %v532_v29 = vsel %vm490_vm5, %v417_v22, %v511_v24  ;;  %vm491_vm6 = vcmp.ge.f32.partialorder %v420_v25, 0.0  ;;  %v512_v30 = vmul.f32 0.01, %v420_v25  ;;  %v612_v31 = vadd.f32 %v611_v28, %v610_v26  ;;  %v693_v32 = vpop.f32.mrb[13].mxu1  ;;  %v613_v33 = vpop.f32.mrb[14].mxu0 }
 0x113   :  { %554 = vst.msk [vmem:[%s1317_s3 + $0x20] sm:$0xff] %vm549_vm1, %v532_v29  ;;  %v694_v35 = vadd.f32 %v693_v32, %v692_v27  ;;  %v695_v36 = vpop.f32.mrb[14].mxu1  ;;  %v614_v37 = vpop.f32.mrb[15].mxu0 }
 0x114   :  { %v533_v38 = vsel %vm491_vm6, %v420_v25, %v512_v30  ;;  %v305_v39 = vadd.f32 %v612_v31, %v1207_v34  ;;  %v615_v40 = vadd.f32 %v614_v37, %v613_v33  ;;  %v696_v41 = vpop.f32.mrb[15].mxu1 }
 0x115   :  { %555 = vst.msk [vmem:[%s1317_s3 + $0x28] sm:$0xff] %vm549_vm1, %v533_v38  ;;  %v697_v42 = vadd.f32 %v696_v41, %v695_v36 }
 0x116   :  { %v425_v43 = vadd.f32 %v694_v35, %v305_v39  ;;  %v308_v44 = vadd.f32 %v615_v40, %v1207_v34 }
 0x118   :  { %vm492_vm7 = vcmp.ge.f32.partialorder %v425_v43, 0.0  ;;  %v513_v45 = vmul.f32 0.01, %v425_v43  ;;  %v428_v46 = vadd.f32 %v697_v42, %v308_v44  ;;  %v616_v47 = vpop.f32.mrb[16].mxu0 }
 0x119   :  { %v698_v48 = vpop.f32.mrb[16].mxu1  ;;  %v617_v49 = vpop.f32.mrb[17].mxu0 }
 0x11a   :  { %v534_v50 = vsel %vm492_vm7, %v425_v43, %v513_v45  ;;  %vm493_vm8 = vcmp.ge.f32.partialorder %v428_v46, 0.0  ;;  %v514_v51 = vmul.f32 0.01, %v428_v46  ;;  %v618_v52 = vadd.f32 %v617_v49, %v616_v47  ;;  %v699_v53 = vpop.f32.mrb[17].mxu1  ;;  %v619_v54 = vpop.f32.mrb[18].mxu0 }
 0x11b   :  { %556 = vst.msk [vmem:[%s1317_s3 + $0x30] sm:$0xff] %vm549_vm1, %v534_v50  ;;  %v700_v55 = vadd.f32 %v699_v53, %v698_v48  ;;  %v701_v56 = vpop.f32.mrb[18].mxu1  ;;  %v620_v57 = vpop.f32.mrb[19].mxu0 }
 0x11c   :  { %v535_v58 = vsel %vm493_vm8, %v428_v46, %v514_v51  ;;  %v313_v59 = vadd.f32 %v618_v52, %v1207_v34  ;;  %v621_v60 = vadd.f32 %v620_v57, %v619_v54  ;;  %v702_v61 = vpop.f32.mrb[19].mxu1 }
 0x11d   :  { %557 = vst.msk [vmem:[%s1317_s3 + $0x38] sm:$0xff] %vm549_vm1, %v535_v58  ;;  %v703_v62 = vadd.f32 %v702_v61, %v701_v56 }
 0x11e   :  { %v433_v63 = vadd.f32 %v700_v55, %v313_v59  ;;  %v316_v0 = vadd.f32 %v621_v60, %v1207_v34 }
 0x120   :  { %vm494_vm9 = vcmp.ge.f32.partialorder %v433_v63, 0.0  ;;  %v515_v1 = vmul.f32 0.01, %v433_v63  ;;  %v436_v2 = vadd.f32 %v703_v62, %v316_v0  ;;  %v622_v3 = vpop.f32.mrb[20].mxu0 }
 0x121   :  { %v704_v4 = vpop.f32.mrb[20].mxu1  ;;  %v623_v5 = vpop.f32.mrb[21].mxu0 }
 0x122   :  { %v536_v6 = vsel %vm494_vm9, %v433_v63, %v515_v1  ;;  %vm495_vm10 = vcmp.ge.f32.partialorder %v436_v2, 0.0  ;;  %v516_v7 = vmul.f32 0.01, %v436_v2  ;;  %v624_v8 = vadd.f32 %v623_v5, %v622_v3  ;;  %v705_v9 = vpop.f32.mrb[21].mxu1  ;;  %v625_v10 = vpop.f32.mrb[22].mxu0 }
 0x123   :  { %558 = vst.msk [vmem:[%s1317_s3 + $0x40] sm:$0xff] %vm549_vm1, %v536_v6  ;;  %v706_v11 = vadd.f32 %v705_v9, %v704_v4  ;;  %v707_v12 = vpop.f32.mrb[22].mxu1  ;;  %v626_v13 = vpop.f32.mrb[23].mxu0 }
 0x124   :  { %v537_v14 = vsel %vm495_vm10, %v436_v2, %v516_v7  ;;  %v321_v15 = vadd.f32 %v624_v8, %v1207_v34  ;;  %v627_v16 = vadd.f32 %v626_v13, %v625_v10  ;;  %v708_v17 = vpop.f32.mrb[23].mxu1 }
 0x125   :  { %559 = vst.msk [vmem:[%s1317_s3 + $0x48] sm:$0xff] %vm549_vm1, %v537_v14  ;;  %v709_v18 = vadd.f32 %v708_v17, %v707_v12 }
 0x126   :  { %v441_v19 = vadd.f32 %v706_v11, %v321_v15  ;;  %v324_v20 = vadd.f32 %v627_v16, %v1207_v34 }
 0x128   :  { %vm496_vm11 = vcmp.ge.f32.partialorder %v441_v19, 0.0  ;;  %v517_v21 = vmul.f32 0.01, %v441_v19  ;;  %v444_v22 = vadd.f32 %v709_v18, %v324_v20  ;;  %v628_v23 = vpop.f32.mrb[24].mxu0 }
 0x129   :  { %v710_v24 = vpop.f32.mrb[24].mxu1  ;;  %v629_v25 = vpop.f32.mrb[25].mxu0 }
 0x12a   :  { %v538_v26 = vsel %vm496_vm11, %v441_v19, %v517_v21  ;;  %vm497_vm12 = vcmp.ge.f32.partialorder %v444_v22, 0.0  ;;  %v518_v27 = vmul.f32 0.01, %v444_v22  ;;  %v630_v28 = vadd.f32 %v629_v25, %v628_v23  ;;  %v711_v29 = vpop.f32.mrb[25].mxu1  ;;  %v631_v30 = vpop.f32.mrb[26].mxu0 }
 0x12b   :  { %560 = vst.msk [vmem:[%s1317_s3 + $0x50] sm:$0xff] %vm549_vm1, %v538_v26  ;;  %v712_v31 = vadd.f32 %v711_v29, %v710_v24  ;;  %v713_v32 = vpop.f32.mrb[26].mxu1  ;;  %v632_v33 = vpop.f32.mrb[27].mxu0 }
 0x12c   :  { %v539_v35 = vsel %vm497_vm12, %v444_v22, %v518_v27  ;;  %v329_v36 = vadd.f32 %v630_v28, %v1207_v34  ;;  %v633_v37 = vadd.f32 %v632_v33, %v631_v30  ;;  %v714_v38 = vpop.f32.mrb[27].mxu1 }
 0x12d   :  { %561 = vst.msk [vmem:[%s1317_s3 + $0x58] sm:$0xff] %vm549_vm1, %v539_v35  ;;  %v715_v39 = vadd.f32 %v714_v38, %v713_v32 }
 0x12e   :  { %v449_v40 = vadd.f32 %v712_v31, %v329_v36  ;;  %v332_v41 = vadd.f32 %v633_v37, %v1207_v34 }
 0x130   :  { %vm498_vm13 = vcmp.ge.f32.partialorder %v449_v40, 0.0  ;;  %v519_v42 = vmul.f32 0.01, %v449_v40  ;;  %v452_v43 = vadd.f32 %v715_v39, %v332_v41  ;;  %v634_v44 = vpop.f32.mrb[28].mxu0 }
 0x131   :  { %v716_v45 = vpop.f32.mrb[28].mxu1  ;;  %v635_v46 = vpop.f32.mrb[29].mxu0 }
 0x132   :  { %v540_v47 = vsel %vm498_vm13, %v449_v40, %v519_v42  ;;  %vm499_vm14 = vcmp.ge.f32.partialorder %v452_v43, 0.0  ;;  %v520_v48 = vmul.f32 0.01, %v452_v43  ;;  %v636_v49 = vadd.f32 %v635_v46, %v634_v44  ;;  %v717_v50 = vpop.f32.mrb[29].mxu1  ;;  %v637_v51 = vpop.f32.mrb[30].mxu0 }
 0x133   :  { %562 = vst.msk [vmem:[%s1317_s3 + $0x60] sm:$0xff] %vm549_vm1, %v540_v47  ;;  %v718_v52 = vadd.f32 %v717_v50, %v716_v45  ;;  %v719_v53 = vpop.f32.mrb[30].mxu1  ;;  %v638_v54 = vpop.f32.mrb[31].mxu0 }
 0x134   :  { %v541_v55 = vsel %vm499_vm14, %v452_v43, %v520_v48  ;;  %v337_v56 = vadd.f32 %v636_v49, %v1207_v34  ;;  %v639_v57 = vadd.f32 %v638_v54, %v637_v51  ;;  %v720_v58 = vpop.f32.mrb[31].mxu1 }
 0x135   :  { %563 = vst.msk [vmem:[%s1317_s3 + $0x68] sm:$0xff] %vm549_vm1, %v541_v55  ;;  %v721_v59 = vadd.f32 %v720_v58, %v719_v53 }
 0x136   :  { %v457_v60 = vadd.f32 %v718_v52, %v337_v56  ;;  %v340_v61 = vadd.f32 %v639_v57, %v1207_v34 }
 0x138   :  { %vm500_vm15 = vcmp.ge.f32.partialorder %v457_v60, 0.0  ;;  %v521_v62 = vmul.f32 0.01, %v457_v60  ;;  %v460_v63 = vadd.f32 %v721_v59, %v340_v61  ;;  %v640_v0 = vpop.f32.mrb[32].mxu0 }
 0x139   :  { %v722_v1 = vpop.f32.mrb[32].mxu1  ;;  %v641_v2 = vpop.f32.mrb[33].mxu0 }
 0x13a   :  { %v542_v3 = vsel %vm500_vm15, %v457_v60, %v521_v62  ;;  %vm501_vm0 = vcmp.ge.f32.partialorder %v460_v63, 0.0  ;;  %v522_v4 = vmul.f32 0.01, %v460_v63  ;;  %v642_v5 = vadd.f32 %v641_v2, %v640_v0  ;;  %v723_v6 = vpop.f32.mrb[33].mxu1  ;;  %v643_v7 = vpop.f32.mrb[34].mxu0 }
 0x13b   :  { %564 = vst.msk [vmem:[%s1317_s3 + $0x70] sm:$0xff] %vm549_vm1, %v542_v3  ;;  %v724_v8 = vadd.f32 %v723_v6, %v722_v1  ;;  %v725_v9 = vpop.f32.mrb[34].mxu1  ;;  %v644_v10 = vpop.f32.mrb[35].mxu0 }
 0x13c   :  { %v543_v11 = vsel %vm501_vm0, %v460_v63, %v522_v4  ;;  %v345_v12 = vadd.f32 %v642_v5, %v1207_v34  ;;  %v645_v13 = vadd.f32 %v644_v10, %v643_v7  ;;  %v726_v14 = vpop.f32.mrb[35].mxu1 }
 0x13d   :  { %565 = vst.msk [vmem:[%s1317_s3 + $0x78] sm:$0xff] %vm549_vm1, %v543_v11  ;;  %v727_v15 = vadd.f32 %v726_v14, %v725_v9 }
 0x13e   :  { %v465_v16 = vadd.f32 %v724_v8, %v345_v12  ;;  %v348_v17 = vadd.f32 %v645_v13, %v1207_v34 }
 0x140   :  { %vm502_vm2 = vcmp.ge.f32.partialorder %v465_v16, 0.0  ;;  %v523_v18 = vmul.f32 0.01, %v465_v16  ;;  %v468_v19 = vadd.f32 %v727_v15, %v348_v17  ;;  %v646_v20 = vpop.f32.mrb[36].mxu0 }
 0x141   :  { %v728_v21 = vpop.f32.mrb[36].mxu1  ;;  %v647_v22 = vpop.f32.mrb[37].mxu0 }
 0x142   :  { %v544_v23 = vsel %vm502_vm2, %v465_v16, %v523_v18  ;;  %vm503_vm3 = vcmp.ge.f32.partialorder %v468_v19, 0.0  ;;  %v524_v24 = vmul.f32 0.01, %v468_v19  ;;  %v648_v25 = vadd.f32 %v647_v22, %v646_v20  ;;  %v729_v26 = vpop.f32.mrb[37].mxu1  ;;  %v649_v27 = vpop.f32.mrb[38].mxu0 }
 0x143   :  { %566 = vst.msk [vmem:[%s1317_s3 + $0x80] sm:$0xff] %vm549_vm1, %v544_v23  ;;  %v730_v28 = vadd.f32 %v729_v26, %v728_v21  ;;  %v731_v29 = vpop.f32.mrb[38].mxu1  ;;  %v650_v30 = vpop.f32.mrb[39].mxu0 }
 0x144   :  { %v545_v31 = vsel %vm503_vm3, %v468_v19, %v524_v24  ;;  %v353_v32 = vadd.f32 %v648_v25, %v1207_v34  ;;  %v651_v33 = vadd.f32 %v650_v30, %v649_v27  ;;  %v732_v35 = vpop.f32.mrb[39].mxu1 }
 0x145   :  { %567 = vst.msk [vmem:[%s1317_s3 + $0x88] sm:$0xff] %vm549_vm1, %v545_v31  ;;  %v733_v36 = vadd.f32 %v732_v35, %v731_v29 }
 0x146   :  { %v473_v37 = vadd.f32 %v730_v28, %v353_v32  ;;  %v356_v38 = vadd.f32 %v651_v33, %v1207_v34 }
 0x148   :  { %vm504_vm4 = vcmp.ge.f32.partialorder %v473_v37, 0.0  ;;  %v525_v39 = vmul.f32 0.01, %v473_v37  ;;  %v476_v40 = vadd.f32 %v733_v36, %v356_v38  ;;  %v652_v41 = vpop.f32.mrb[40].mxu0 }
 0x149   :  { %v734_v42 = vpop.f32.mrb[40].mxu1  ;;  %v653_v43 = vpop.f32.mrb[41].mxu0 }
 0x14a   :  { %v546_v44 = vsel %vm504_vm4, %v473_v37, %v525_v39  ;;  %vm505_vm5 = vcmp.ge.f32.partialorder %v476_v40, 0.0  ;;  %v526_v45 = vmul.f32 0.01, %v476_v40  ;;  %v654_v46 = vadd.f32 %v653_v43, %v652_v41  ;;  %v735_v47 = vpop.f32.mrb[41].mxu1  ;;  %v655_v48 = vpop.f32.mrb[42].mxu0 }
 0x14b   :  { %568 = vst.msk [vmem:[%s1317_s3 + $0x90] sm:$0xff] %vm549_vm1, %v546_v44  ;;  %v736_v49 = vadd.f32 %v735_v47, %v734_v42  ;;  %v737_v50 = vpop.f32.mrb[42].mxu1  ;;  %v656_v51 = vpop.f32.mrb[43].mxu0 }
 0x14c   :  { %v547_v52 = vsel %vm505_vm5, %v476_v40, %v526_v45  ;;  %v361_v53 = vadd.f32 %v654_v46, %v1207_v34  ;;  %v738_v54 = vpop.f32.mrb[43].mxu1 }
 0x14d   :  { %569 = vst.msk [vmem:[%s1317_s3 + $0x98] sm:$0xff] %vm549_vm1, %v547_v52 }
 0x14e   :  { %v481_v55 = vadd.f32 %v736_v49, %v361_v53 }
 0x150   :  { %vm506_vm6 = vcmp.ge.f32.partialorder %v481_v55, 0.0  ;;  %v527_v56 = vmul.f32 0.01, %v481_v55 }
 0x152   :  { %v548_v57 = vsel %vm506_vm6, %v481_v55, %v527_v56 }
 0x153   :  { %570 = vst.msk [vmem:[%s1317_s3 + $0xa0] sm:$0xff] %vm549_vm1, %v548_v57 }

// kernel: state_network_forward.8
= control target key start
LH: loop header
LB: loop body
LE: loop exit
PB: predicated region body
PF: predicated region fallthrough
CT: control target
= control target key end

     0   :  { %vm754_vm0 = vmmov 0   ;;  %vm230_vm1 = vcmask 523264   ;;  %s1309_s1 = inlined_call_operand.vmem [shape: f32[576,64], index: 1, kind: input, shape index: {}]   ;;  %s1310_s0 = inlined_call_operand.vmem [shape: f32[98,576], index: 0, kind: input, shape index: {}]   ;;  %s1311_s2 = inlined_call_operand.vmem [shape: f32[1,64], index: 2, kind: input, shape index: {}]   ;;  %s1312_s3 = inlined_call_operand.vmem [shape: f32[98,64], index: 3, kind: output, shape index: {}]  }
   0x1   :  { %v131_v0 = vld [vmem:[%s1309_s1 + $0x80] sm:$0xff]  ;;  %v132_v1 = vld [vmem:[%s1309_s1 + $0x88] sm:$0xff]  ;;  %v133_v11 = vld [vmem:[%s1309_s1 + $0x90] sm:$0xff] }
   0x2   :  { %v163_v2 = vld [vmem:[%s1309_s1 + $0x180] sm:$0xff]  ;;  %v195_v3 = vpack.c.bf16 %v132_v1, %v131_v0  ;;  %v164_v4 = vld [vmem:[%s1309_s1 + $0x188] sm:$0xff]  ;;  %v134_v13 = vld [vmem:[%s1309_s1 + $0x98] sm:$0xff] }
   0x3   :  { %v115_v5 = vld [vmem:[%s1309_s1] sm:$0xff]  ;;  %v116_v6 = vld [vmem:[%s1309_s1 + $0x8] sm:$0xff]  ;;  %v211_v7 = vpack.c.bf16 %v164_v4, %v163_v2  ;;  %v165_v14 = vld [vmem:[%s1309_s1 + $0x190] sm:$0xff]  ;;  %v196_v16 = vpack.c.bf16 %v134_v13, %v133_v11 }
   0x4   :  { %v187_v8 = vpack.c.bf16 %v116_v6, %v115_v5  ;;  %v147_v9 = vld [vmem:[%s1309_s1 + $0x100] sm:$0xff]  ;;  %v148_v10 = vld [vmem:[%s1309_s1 + $0x108] sm:$0xff]  ;;  %580 = vmatprep.subr.bf16.mxu0 %v195_v3  ;;  %v166_v15 = vld [vmem:[%s1309_s1 + $0x198] sm:$0xff] }
   0x5   :  { %v203_v12 = vpack.c.bf16 %v148_v10, %v147_v9  ;;  %638 = vmatprep.subr.bf16.mxu1 %v211_v7  ;;  %v212_v17 = vpack.c.bf16 %v166_v15, %v165_v14  ;;  %v117_v18 = vld [vmem:[%s1309_s1 + $0x10] sm:$0xff]  ;;  %v118_v19 = vld [vmem:[%s1309_s1 + $0x18] sm:$0xff]  ;;  %v135_v23 = vld [vmem:[%s1309_s1 + $0xa0] sm:$0xff] }
   0x6   :  { %581 = vmatpush3.bf16.msra.mxu0 %v187_v8  ;;  %v149_v20 = vld [vmem:[%s1309_s1 + $0x110] sm:$0xff]  ;;  %v188_v21 = vpack.c.bf16 %v118_v19, %v117_v18  ;;  %v150_v22 = vld [vmem:[%s1309_s1 + $0x118] sm:$0xff]  ;;  %v136_v24 = vld [vmem:[%s1309_s1 + $0xa8] sm:$0xff] }
   0x7   :  { %639 = vmatpush3.bf16.msra.mxu1 %v203_v12  ;;  %582 = vmatprep.subr.bf16.mxu0 %v196_v16  ;;  %v204_v25 = vpack.c.bf16 %v150_v22, %v149_v20  ;;  %v197_v26 = vpack.c.bf16 %v136_v24, %v135_v23  ;;  %v167_v27 = vld [vmem:[%s1309_s1 + $0x1a0] sm:$0xff]  ;;  %v168_v28 = vld [vmem:[%s1309_s1 + $0x1a8] sm:$0xff]  ;;  %v137_v35 = vld [vmem:[%s1309_s1 + $0xb0] sm:$0xff] }
   0x8   :  { %640 = vmatprep.subr.bf16.mxu1 %v212_v17  ;;  %v119_v29 = vld [vmem:[%s1309_s1 + $0x20] sm:$0xff]  ;;  %v213_v30 = vpack.c.bf16 %v168_v28, %v167_v27  ;;  %v120_v31 = vld [vmem:[%s1309_s1 + $0x28] sm:$0xff]  ;;  %v138_v36 = vld [vmem:[%s1309_s1 + $0xb8] sm:$0xff] }
   0x9   :  { %v151_v32 = vld [vmem:[%s1309_s1 + $0x120] sm:$0xff]  ;;  %v152_v33 = vld [vmem:[%s1309_s1 + $0x128] sm:$0xff]  ;;  %v189_v34 = vpack.c.bf16 %v120_v31, %v119_v29  ;;  %v169_v37 = vld [vmem:[%s1309_s1 + $0x1b0] sm:$0xff]  ;;  %v198_v39 = vpack.c.bf16 %v138_v36, %v137_v35 }
   0xa   :  { %583 = vmatpush3.bf16.msra.mxu0 %v188_v21  ;;  %v205_v38 = vpack.c.bf16 %v152_v33, %v151_v32  ;;  %v170_v40 = vld [vmem:[%s1309_s1 + $0x1b8] sm:$0xff]  ;;  %v121_v41 = vld [vmem:[%s1309_s1 + $0x30] sm:$0xff]  ;;  %v139_v46 = vld [vmem:[%s1309_s1 + $0xc0] sm:$0xff] }
   0xb   :  { %641 = vmatpush3.bf16.msra.mxu1 %v204_v25  ;;  %584 = vmatprep.subr.bf16.mxu0 %v197_v26  ;;  %v122_v42 = vld [vmem:[%s1309_s1 + $0x38] sm:$0xff]  ;;  %v214_v43 = vpack.c.bf16 %v170_v40, %v169_v37  ;;  %v153_v44 = vld [vmem:[%s1309_s1 + $0x130] sm:$0xff]  ;;  %v140_v47 = vld [vmem:[%s1309_s1 + $0xc8] sm:$0xff] }
   0xc   :  { %642 = vmatprep.subr.bf16.mxu1 %v213_v30  ;;  %v154_v45 = vld [vmem:[%s1309_s1 + $0x138] sm:$0xff]  ;;  %v171_v48 = vld [vmem:[%s1309_s1 + $0x1c0] sm:$0xff]  ;;  %v172_v49 = vld [vmem:[%s1309_s1 + $0x1c8] sm:$0xff]  ;;  %v190_v50 = vpack.c.bf16 %v122_v42, %v121_v41  ;;  %v199_v52 = vpack.c.bf16 %v140_v47, %v139_v46 }
   0xd   :  { %v206_v51 = vpack.c.bf16 %v154_v45, %v153_v44  ;;  %v123_v53 = vld [vmem:[%s1309_s1 + $0x40] sm:$0xff]  ;;  %v124_v54 = vld [vmem:[%s1309_s1 + $0x48] sm:$0xff]  ;;  %v215_v56 = vpack.c.bf16 %v172_v49, %v171_v48  ;;  %v141_v58 = vld [vmem:[%s1309_s1 + $0xd0] sm:$0xff] }
   0xe   :  { %585 = vmatpush3.bf16.msra.mxu0 %v189_v34  ;;  %v155_v55 = vld [vmem:[%s1309_s1 + $0x140] sm:$0xff]  ;;  %v156_v57 = vld [vmem:[%s1309_s1 + $0x148] sm:$0xff]  ;;  %v142_v59 = vld [vmem:[%s1309_s1 + $0xd8] sm:$0xff]  ;;  %v191_v62 = vpack.c.bf16 %v124_v54, %v123_v53 }
   0xf   :  { %643 = vmatpush3.bf16.msra.mxu1 %v205_v38  ;;  %586 = vmatprep.subr.bf16.mxu0 %v198_v39  ;;  %v173_v60 = vld [vmem:[%s1309_s1 + $0x1d0] sm:$0xff]  ;;  %v174_v61 = vld [vmem:[%s1309_s1 + $0x1d8] sm:$0xff]  ;;  %v207_v63 = vpack.c.bf16 %v156_v57, %v155_v55  ;;  %v200_v0 = vpack.c.bf16 %v142_v59, %v141_v58  ;;  %v143_v6 = vld [vmem:[%s1309_s1 + $0xe0] sm:$0xff] }
  0x10   :  { %644 = vmatprep.subr.bf16.mxu1 %v214_v43  ;;  %v125_v1 = vld [vmem:[%s1309_s1 + $0x50] sm:$0xff]  ;;  %v126_v2 = vld [vmem:[%s1309_s1 + $0x58] sm:$0xff]  ;;  %v216_v4 = vpack.c.bf16 %v174_v61, %v173_v60  ;;  %v144_v7 = vld [vmem:[%s1309_s1 + $0xe8] sm:$0xff] }
  0x11   :  { %v157_v3 = vld [vmem:[%s1309_s1 + $0x150] sm:$0xff]  ;;  %v158_v5 = vld [vmem:[%s1309_s1 + $0x158] sm:$0xff]  ;;  %v175_v8 = vld [vmem:[%s1309_s1 + $0x1e0] sm:$0xff]  ;;  %v192_v11 = vpack.c.bf16 %v126_v2, %v125_v1  ;;  %v201_v16 = vpack.c.bf16 %v144_v7, %v143_v6 }
  0x12   :  { %587 = vmatpush3.bf16.msra.mxu0 %v190_v50  ;;  %v176_v9 = vld [vmem:[%s1309_s1 + $0x1e8] sm:$0xff]  ;;  %v127_v10 = vld [vmem:[%s1309_s1 + $0x60] sm:$0xff]  ;;  %v208_v15 = vpack.c.bf16 %v158_v5, %v157_v3  ;;  %v145_v17 = vld [vmem:[%s1309_s1 + $0xf0] sm:$0xff] }
  0x13   :  { %645 = vmatpush3.bf16.msra.mxu1 %v206_v51  ;;  %588 = vmatprep.subr.bf16.mxu0 %v199_v52  ;;  %v128_v12 = vld [vmem:[%s1309_s1 + $0x68] sm:$0xff]  ;;  %v159_v13 = vld [vmem:[%s1309_s1 + $0x160] sm:$0xff]  ;;  %v21_v19 = vld [vmem:[%s1310_s0 + $0x30] sm:$0xff]  ;;  %v217_v20 = vpack.c.bf16 %v176_v9, %v175_v8  ;;  %v753_v51 = vmov 0.0  }
  0x14   :  { %646 = vmatprep.subr.bf16.mxu1 %v215_v56  ;;  %v160_v14 = vld [vmem:[%s1309_s1 + $0x168] sm:$0xff]  ;;  %v146_v21 = vld [vmem:[%s1309_s1 + $0xf8] sm:$0xff]  ;;  %v23_v24 = vld [vmem:[%s1310_s0 + $0x40] sm:$0xff]  ;;  %v193_v28 = vpack.c.bf16 %v128_v12, %v127_v10 }
  0x15   :  { %v16_v18 = vld [vmem:[%s1310_s0 + $0x8] sm:$0xff]  ;;  %v18_v23 = vld [vmem:[%s1310_s0 + $0x18] sm:$0xff]  ;;  %v177_v25 = vld [vmem:[%s1309_s1 + $0x1f0] sm:$0xff]  ;;  %v209_v29 = vpack.c.bf16 %v160_v14, %v159_v13  ;;  %v202_v30 = vpack.c.bf16 %v146_v21, %v145_v17 }
  0x16   :  { %589 = vmatpush3.bf16.msra.mxu0 %v191_v62  ;;  %v81_v22 = vpack.c.bf16 %v21_v19, %v16_v18  ;;  %v178_v26 = vld [vmem:[%s1309_s1 + $0x1f8] sm:$0xff]  ;;  %v83_v27 = vpack.c.bf16 %v23_v24, %v18_v23  ;;  %v129_v31 = vld [vmem:[%s1309_s1 + $0x70] sm:$0xff]  ;;  %v15_v36 = vld [vmem:[%s1310_s0] sm:$0xff] }
  0x17   :  { %647 = vmatpush3.bf16.msra.mxu1 %v207_v63  ;;  %590 = vmatprep.subr.bf16.mxu0 %v200_v0  ;;  %v130_v32 = vld [vmem:[%s1309_s1 + $0x78] sm:$0xff]  ;;  %v218_v33 = vpack.c.bf16 %v178_v26, %v177_v25  ;;  %v161_v34 = vld [vmem:[%s1309_s1 + $0x170] sm:$0xff]  ;;  %v20_v38 = vld [vmem:[%s1310_s0 + $0x28] sm:$0xff] }
  0x18   :  { %648 = vmatprep.subr.bf16.mxu1 %v216_v4  ;;  %284 = vmatprep.mubr.bf16.mxu0 %v81_v22  ;;  %v162_v35 = vld [vmem:[%s1309_s1 + $0x178] sm:$0xff]  ;;  %v194_v37 = vpack.c.bf16 %v130_v32, %v129_v31  ;;  %v17_v39 = vld [vmem:[%s1310_s0 + $0x10] sm:$0xff]  ;;  %v179_v42 = vld [vmem:[%s1309_s1 + $0x200] sm:$0xff]  ;;  %v80_v48 = vpack.c.bf16 %v20_v38, %v15_v36 }
  0x19   :  { %372 = vmatprep.mubr.bf16.mxu1 %v83_v27  ;;  %v22_v40 = vld [vmem:[%s1310_s0 + $0x38] sm:$0xff]  ;;  %v210_v41 = vpack.c.bf16 %v162_v35, %v161_v34  ;;  %v180_v43 = vld [vmem:[%s1309_s1 + $0x208] sm:$0xff]  ;;  %v31_v45 = vld [vmem:[%s1310_s0 + $0x80] sm:$0xff] }
  0x1a   :  { %591 = vmatpush3.bf16.msra.mxu0 %v192_v11  ;;  %v26_v44 = vld [vmem:[%s1310_s0 + $0x58] sm:$0xff]  ;;  %v28_v46 = vld [vmem:[%s1310_s0 + $0x68] sm:$0xff]  ;;  %v33_v47 = vld [vmem:[%s1310_s0 + $0x90] sm:$0xff]  ;;  %v82_v49 = vpack.c.bf16 %v22_v40, %v17_v39  ;;  %v219_v50 = vpack.c.bf16 %v180_v43, %v179_v42 }
  0x1b   :  { %649 = vmatpush3.bf16.msra.mxu1 %v208_v15  ;;  %592 = vmatprep.subr.bf16.mxu0 %v201_v16  ;;  %v86_v52 = vpack.c.bf16 %v31_v45, %v26_v44  ;;  %v88_v53 = vpack.c.bf16 %v33_v47, %v28_v46  ;;  %v181_v54 = vld [vmem:[%s1309_s1 + $0x210] sm:$0xff]  ;;  %v182_v55 = vld [vmem:[%s1309_s1 + $0x218] sm:$0xff]  ;;  %v27_v58 = vld [vmem:[%s1310_s0 + $0x60] sm:$0xff] }
  0x1c   :  { %650 = vmatprep.subr.bf16.mxu1 %v217_v20  ;;  %v25_v56 = vld [vmem:[%s1310_s0 + $0x50] sm:$0xff]  ;;  %v30_v57 = vld [vmem:[%s1310_s0 + $0x78] sm:$0xff]  ;;  %v32_v59 = vld [vmem:[%s1310_s0 + $0x88] sm:$0xff]  ;;  %v220_v60 = vpack.c.bf16 %v182_v55, %v181_v54 }
  0x1d   :  { %v36_v61 = vld [vmem:[%s1310_s0 + $0xa8] sm:$0xff]  ;;  %v41_v62 = vld [vmem:[%s1310_s0 + $0xd0] sm:$0xff]  ;;  %v38_v63 = vld [vmem:[%s1310_s0 + $0xb8] sm:$0xff]  ;;  %v85_v3 = vpack.c.bf16 %v30_v57, %v25_v56  ;;  %v87_v4 = vpack.c.bf16 %v32_v59, %v27_v58 }
  0x1e   :  { %593 = vmatpush3.bf16.msra.mxu0 %v193_v28  ;;  %v43_v0 = vld [vmem:[%s1310_s0 + $0xe0] sm:$0xff]  ;;  %v184_v2 = vld [vmem:[%s1309_s1 + $0x228] sm:$0xff]  ;;  %v91_v5 = vpack.c.bf16 %v41_v62, %v36_v61  ;;  %v185_v8 = vld [vmem:[%s1309_s1 + $0x230] sm:$0xff] }
  0x1f   :  { %651 = vmatpush3.bf16.msra.mxu1 %v209_v29  ;;  %594 = vmatprep.subr.bf16.mxu0 %v202_v30  ;;  %v183_v1 = vld [vmem:[%s1309_s1 + $0x220] sm:$0xff]  ;;  %v93_v6 = vpack.c.bf16 %v43_v0, %v38_v63  ;;  %v186_v9 = vld [vmem:[%s1309_s1 + $0x238] sm:$0xff]  ;;  %v40_v11 = vld [vmem:[%s1310_s0 + $0xc8] sm:$0xff] }
  0x20   :  { %652 = vmatprep.subr.bf16.mxu1 %v218_v33  ;;  %v221_v7 = vpack.c.bf16 %v184_v2, %v183_v1  ;;  %v35_v10 = vld [vmem:[%s1310_s0 + $0xa0] sm:$0xff]  ;;  %v37_v12 = vld [vmem:[%s1310_s0 + $0xb0] sm:$0xff]  ;;  %v42_v13 = vld [vmem:[%s1310_s0 + $0xd8] sm:$0xff]  ;;  %v222_v16 = vpack.c.bf16 %v186_v9, %v185_v8 }
  0x21   :  { %v46_v14 = vld [vmem:[%s1310_s0 + $0xf8] sm:$0xff]  ;;  %v51_v15 = vld [vmem:[%s1310_s0 + $0x120] sm:$0xff]  ;;  %v48_v17 = vld [vmem:[%s1310_s0 + $0x108] sm:$0xff]  ;;  %v90_v19 = vpack.c.bf16 %v40_v11, %v35_v10  ;;  %v92_v20 = vpack.c.bf16 %v42_v13, %v37_v12 }
  0x22   :  { %595 = vmatpush3.bf16.msra.mxu0 %v194_v37  ;;  %v53_v18 = vld [vmem:[%s1310_s0 + $0x130] sm:$0xff]  ;;  %v96_v21 = vpack.c.bf16 %v51_v15, %v46_v14  ;;  %v50_v24 = vld [vmem:[%s1310_s0 + $0x118] sm:$0xff]  ;;  %v47_v25 = vld [vmem:[%s1310_s0 + $0x100] sm:$0xff] }
  0x23   :  { %653 = vmatpush3.bf16.msra.mxu1 %v210_v41  ;;  %707 = vmatprep.subr.bf16.mxu0 %v753_v51  ;;  %v98_v22 = vpack.c.bf16 %v53_v18, %v48_v17  ;;  %v45_v23 = vld [vmem:[%s1310_s0 + $0xf0] sm:$0xff]  ;;  %v52_v26 = vld [vmem:[%s1310_s0 + $0x128] sm:$0xff]  ;;  %v58_v29 = vld [vmem:[%s1310_s0 + $0x158] sm:$0xff] }
  0x24   :  { %743 = vmatprep.subr.bf16.mxu1 %v753_v51  ;;  %v56_v27 = vld [vmem:[%s1310_s0 + $0x148] sm:$0xff]  ;;  %v61_v28 = vld [vmem:[%s1310_s0 + $0x170] sm:$0xff]  ;;  %v63_v30 = vld [vmem:[%s1310_s0 + $0x180] sm:$0xff]  ;;  %v95_v31 = vpack.c.bf16 %v50_v24, %v45_v23  ;;  %v97_v32 = vpack.c.bf16 %v52_v26, %v47_v25 }
  0x25   :  { %285 = vmatmul.mubr.bf16.vlgmr.msra.gmra.mrb[0].mxu0 %v80_v48  ;;  %v101_v33 = vpack.c.bf16 %v61_v28, %v56_v27  ;;  %v103_v34 = vpack.c.bf16 %v63_v30, %v58_v29  ;;  %v55_v35 = vld [vmem:[%s1310_s0 + $0x140] sm:$0xff]  ;;  %v60_v36 = vld [vmem:[%s1310_s0 + $0x168] sm:$0xff]  ;;  %v57_v37 = vld [vmem:[%s1310_s0 + $0x150] sm:$0xff] }
  0x26   :  { %373 = vmatmul.mubr.bf16.vlgmr.msra.gmra.mrb[0].mxu1 %v82_v49  ;;  %708 = vmatpush3.bf16.msra.mxu0 %v219_v50  ;;  %v62_v38 = vld [vmem:[%s1310_s0 + $0x178] sm:$0xff]  ;;  %v71_v40 = vld [vmem:[%s1310_s0 + $0x1c0] sm:$0xff]  ;;  %v68_v41 = vld [vmem:[%s1310_s0 + $0x1a8] sm:$0xff]  ;;  %v100_v43 = vpack.c.bf16 %v60_v36, %v55_v35 }
  0x27   :  { %292 = vmatprep.mubr.bf16.mxu0 %v86_v52  ;;  %380 = vmatprep.mubr.bf16.mxu1 %v88_v53  ;;  %v66_v39 = vld [vmem:[%s1310_s0 + $0x198] sm:$0xff]  ;;  %v73_v42 = vld [vmem:[%s1310_s0 + $0x1d0] sm:$0xff]  ;;  %v102_v44 = vpack.c.bf16 %v62_v38, %v57_v37  ;;  %v67_v49 = vld [vmem:[%s1310_s0 + $0x1a0] sm:$0xff] }
  0x28   :  { %747 = vmatpush3.bf16.msra.mxu1 %v219_v50  ;;  %709 = vmatprep.subr.bf16.mxu0 %v753_v51  ;;  %v106_v45 = vpack.c.bf16 %v71_v40, %v66_v39  ;;  %v108_v46 = vpack.c.bf16 %v73_v42, %v68_v41  ;;  %v65_v47 = vld [vmem:[%s1310_s0 + $0x190] sm:$0xff]  ;;  %v70_v48 = vld [vmem:[%s1310_s0 + $0x1b8] sm:$0xff]  ;;  %v72_v50 = vld [vmem:[%s1310_s0 + $0x1c8] sm:$0xff] }
  0x29   :  { %744 = vmatprep.subr.bf16.mxu1 %v753_v51  ;;  %v76_v52 = vld [vmem:[%s1310_s0 + $0x1e8] sm:$0xff]  ;;  %v78_v53 = vld [vmem:[%s1310_s0 + $0x1f8] sm:$0xff]  ;;  %v105_v54 = vpack.c.bf16 %v70_v48, %v65_v47  ;;  %v107_v55 = vpack.c.bf16 %v72_v50, %v67_v49  ;;  %v75_v58 = vld [vmem:[%s1310_s0 + $0x1e0] sm:$0xff] }
  0x2a   :  { %710 = vmatpush3.bf16.msra.mxu0 %v220_v60  ;;  %v111_v56 = vpack.c.bf16 %v76_v52, %v76_v52  ;;  %v113_v57 = vpack.c.bf16 %v78_v53, %v78_v53  ;;  %v77_v59 = vld [vmem:[%s1310_s0 + $0x1f0] sm:$0xff]  ;;  %v19_v62 = vld [vmem:[%s1310_s0 + $0x20] sm:$0xff]  ;;  %v24_v63 = vld [vmem:[%s1310_s0 + $0x48] sm:$0xff] }
  0x2b   :  { %711 = vmatprep.subr.bf16.mxu0 %v753_v51  ;;  %v112_v61 = vpack.c.bf16 %v77_v59, %v77_v59  ;;  %v59_v0 = vld [vmem:[%s1310_s0 + $0x160] sm:$0xff]  ;;  %v64_v1 = vld [vmem:[%s1310_s0 + $0x188] sm:$0xff]  ;;  %v84_v2 = vpack.c.bf16 %v24_v63, %v19_v62  ;;  %v49_v15 = vld [vmem:[%s1310_s0 + $0x110] sm:$0xff] }
  0x2c   :  { %748 = vmatpush3.bf16.msra.mxu1 %v220_v60  ;;  %v110_v60 = vpack.c.bf16 %v75_v58, %v75_v58  ;;  %v39_v10 = vld [vmem:[%s1310_s0 + $0xc0] sm:$0xff]  ;;  %v44_v11 = vld [vmem:[%s1310_s0 + $0xe8] sm:$0xff] }
  0x2d   :  { %293 = vmatmul.mubr.bf16.gmra.mrb[4].mxu0 %v85_v3  ;;  %745 = vmatprep.subr.bf16.mxu1 %v753_v51  ;;  %v104_v3 = vpack.c.bf16 %v64_v1, %v59_v0  ;;  %v79_v12 = vld [vmem:[%s1310_s0 + $0x200] sm:$0xff]  ;;  %v94_v13 = vpack.c.bf16 %v44_v11, %v39_v10 }
  0x2e   :  { %381 = vmatmul.mubr.bf16.gmra.mrb[4].mxu1 %v87_v4  ;;  %300 = vmatprep.mubr.bf16.mxu0 %v91_v5  ;;  %v29_v4 = vld [vmem:[%s1310_s0 + $0x70] sm:$0xff]  ;;  %v34_v5 = vld [vmem:[%s1310_s0 + $0x98] sm:$0xff]  ;;  %v114_v14 = vpack.c.bf16 %v79_v12, %v79_v12 }
  0x2f   :  { %388 = vmatprep.mubr.bf16.mxu1 %v93_v6  ;;  %712 = vmatpush3.bf16.msra.mxu0 %v221_v7  ;;  %v69_v6 = vld [vmem:[%s1310_s0 + $0x1b0] sm:$0xff]  ;;  %v89_v8 = vpack.c.bf16 %v34_v5, %v29_v4 }
  0x30   :  { %749 = vmatpush3.bf16.msra.mxu1 %v221_v7  ;;  %713 = vmatprep.subr.bf16.mxu0 %v753_v51  ;;  %v74_v7 = vld [vmem:[%s1310_s0 + $0x1d8] sm:$0xff] }
  0x31   :  { %746 = vmatprep.subr.bf16.mxu1 %v753_v51  ;;  %v109_v9 = vpack.c.bf16 %v74_v7, %v69_v6 }
  0x33   :  { %714 = vmatpush3.bf16.msra.mxu0 %v222_v16 }
  0x34   :  { %750 = vmatpush3.bf16.msra.mxu1 %v222_v16  ;;  %v54_v16 = vld [vmem:[%s1310_s0 + $0x138] sm:$0xff] }
  0x35   :  { %301 = vmatmul.mubr.bf16.gmra.mrb[8].mxu0 %v90_v19  ;;  %v99_v17 = vpack.c.bf16 %v54_v16, %v49_v15  ;;  %v1218_v19 = vld [vmem:[%s1311_s2] ss:$0 sm:$0xff] }
  0x36   :  { %389 = vmatmul.mubr.bf16.gmra.mrb[8].mxu1 %v92_v20  ;;  %308 = vmatprep.mubr.bf16.mxu0 %v96_v21 }
  0x37   :  { %396 = vmatprep.mubr.bf16.mxu1 %v98_v22 }
  0x3d   :  { %309 = vmatmul.mubr.bf16.gmra.mrb[12].mxu0 %v95_v31 }
  0x3e   :  { %397 = vmatmul.mubr.bf16.gmra.mrb[12].mxu1 %v97_v32  ;;  %316 = vmatprep.mubr.bf16.mxu0 %v101_v33 }
  0x3f   :  { %404 = vmatprep.mubr.bf16.mxu1 %v103_v34 }
  0x45   :  { %317 = vmatmul.mubr.bf16.gmra.mrb[16].mxu0 %v100_v43 }
  0x46   :  { %405 = vmatmul.mubr.bf16.gmra.mrb[16].mxu1 %v102_v44  ;;  %324 = vmatprep.mubr.bf16.mxu0 %v106_v45 }
  0x47   :  { %412 = vmatprep.mubr.bf16.mxu1 %v108_v46 }
  0x4d   :  { %325 = vmatmul.mubr.bf16.gmra.mrb[20].mxu0 %v105_v54 }
  0x4e   :  { %413 = vmatmul.mubr.bf16.gmra.mrb[20].mxu1 %v107_v55  ;;  %332 = vmatprep.mubr.bf16.mxu0 %v111_v56 }
  0x4f   :  { %420 = vmatprep.mubr.bf16.mxu1 %v113_v57 }
  0x55   :  { %333 = vmatmul.mubr.bf16.gmra.mrb[24].mxu0 %v110_v60 }
  0x56   :  { %421 = vmatmul.mubr.bf16.gmra.mrb[24].mxu1 %v112_v61  ;;  %715 = vmatprep.mubr.msk.bf16.mxu0 %vm754_vm0, %v753_v51 }
  0x57   :  { %731 = vmatprep.mubr.msk.bf16.mxu1 %vm754_vm0, %v753_v51 }
  0x5d   :  { %716 = vmatmul.mubr.msk.bf16.vlgmr.msra.gmra.mrb[28].mxu0 %vm230_vm1, %v84_v2 }
  0x5e   :  { %732 = vmatmul.mubr.msk.bf16.vlgmr.msra.gmra.mrb[28].mxu1 %vm230_vm1, %v104_v3  ;;  %719 = vmatprep.mubr.msk.bf16.mxu0 %vm754_vm0, %v753_v51 }
  0x5f   :  { %735 = vmatprep.mubr.msk.bf16.mxu1 %vm754_vm0, %v753_v51 }
  0x65   :  { %720 = vmatmul.mubr.msk.bf16.gmra.mrb[32].mxu0 %vm230_vm1, %v89_v8 }
  0x66   :  { %736 = vmatmul.mubr.msk.bf16.gmra.mrb[32].mxu1 %vm230_vm1, %v109_v9  ;;  %723 = vmatprep.mubr.msk.bf16.mxu0 %vm754_vm0, %v753_v51 }
  0x67   :  { %739 = vmatprep.mubr.msk.bf16.mxu1 %vm754_vm0, %v753_v51 }
  0x6d   :  { %724 = vmatmul.mubr.msk.bf16.gmra.mrb[36].mxu0 %vm230_vm1, %v94_v13 }
  0x6e   :  { %740 = vmatmul.mubr.msk.bf16.gmra.mrb[36].mxu1 %vm230_vm1, %v114_v14  ;;  %727 = vmatprep.mubr.msk.bf16.mxu0 %vm754_vm0, %v753_v51 }
  0x75   :  { %728 = vmatmul.mubr.msk.bf16.gmra.mrb[40].mxu0 %vm230_vm1, %v99_v17 }
  0xf8   :  { %v596_v18 = vpop.f32.mrb[0].mxu0 }
  0xf9   :  { %v597_v20 = vpop.f32.mrb[1].mxu0  ;;  %v654_v21 = vpop.f32.mrb[0].mxu1 }
  0xfa   :  { %v598_v51 = vadd.f32 %v597_v20, %v596_v18  ;;  %v599_v22 = vpop.f32.mrb[2].mxu0  ;;  %v655_v23 = vpop.f32.mrb[1].mxu1 }
  0xfb   :  { %v600_v24 = vpop.f32.mrb[3].mxu0  ;;  %v656_v25 = vadd.f32 %v655_v23, %v654_v21  ;;  %v657_v26 = vpop.f32.mrb[2].mxu1 }
  0xfc   :  { %v287_v27 = vadd.f32 %v598_v51, %v1218_v19  ;;  %v601_v28 = vadd.f32 %v600_v24, %v599_v22  ;;  %v658_v29 = vpop.f32.mrb[3].mxu1 }
  0xfd   :  { %v659_v30 = vadd.f32 %v658_v29, %v657_v26 }
  0xfe   :  { %v290_v31 = vadd.f32 %v601_v28, %v1218_v19  ;;  %v1222_v32 = vadd.f32 %v656_v25, %v287_v27 }
 0x100   :  { %v602_v33 = vpop.f32.mrb[4].mxu0  ;;  %v1224_v34 = vadd.f32 %v659_v30, %v290_v31 }
 0x101   :  { %v603_v35 = vpop.f32.mrb[5].mxu0  ;;  %v660_v36 = vpop.f32.mrb[4].mxu1 }
 0x102   :  { %v604_v37 = vadd.f32 %v603_v35, %v602_v33  ;;  %v605_v38 = vpop.f32.mrb[6].mxu0  ;;  %v661_v39 = vpop.f32.mrb[5].mxu1 }
 0x103   :  { %v606_v40 = vpop.f32.mrb[7].mxu0  ;;  %v662_v41 = vadd.f32 %v661_v39, %v660_v36  ;;  %v663_v42 = vpop.f32.mrb[6].mxu1 }
 0x104   :  { %v295_v43 = vadd.f32 %v604_v37, %v1218_v19  ;;  %v607_v44 = vadd.f32 %v606_v40, %v605_v38  ;;  %v664_v45 = vpop.f32.mrb[7].mxu1 }
 0x105   :  { %v665_v46 = vadd.f32 %v664_v45, %v663_v42 }
 0x106   :  { %v298_v47 = vadd.f32 %v607_v44, %v1218_v19  ;;  %v1228_v48 = vadd.f32 %v662_v41, %v295_v43 }
 0x108   :  { %v608_v49 = vpop.f32.mrb[8].mxu0  ;;  %v1230_v50 = vadd.f32 %v665_v46, %v298_v47 }
 0x109   :  { %v609_v52 = vpop.f32.mrb[9].mxu0  ;;  %v666_v53 = vpop.f32.mrb[8].mxu1 }
 0x10a   :  { %v610_v54 = vadd.f32 %v609_v52, %v608_v49  ;;  %v611_v55 = vpop.f32.mrb[10].mxu0  ;;  %v667_v56 = vpop.f32.mrb[9].mxu1 }
 0x10b   :  { %v612_v57 = vpop.f32.mrb[11].mxu0  ;;  %v668_v58 = vadd.f32 %v667_v56, %v666_v53  ;;  %v669_v59 = vpop.f32.mrb[10].mxu1 }
 0x10c   :  { %v303_v60 = vadd.f32 %v610_v54, %v1218_v19  ;;  %v613_v61 = vadd.f32 %v612_v57, %v611_v55  ;;  %v670_v62 = vpop.f32.mrb[11].mxu1 }
 0x10d   :  { %v671_v63 = vadd.f32 %v670_v62, %v669_v59 }
 0x10e   :  { %v306_v0 = vadd.f32 %v613_v61, %v1218_v19  ;;  %v1234_v1 = vadd.f32 %v668_v58, %v303_v60 }
 0x110   :  { %v614_v2 = vpop.f32.mrb[12].mxu0  ;;  %v1236_v3 = vadd.f32 %v671_v63, %v306_v0 }
 0x111   :  { %v615_v4 = vpop.f32.mrb[13].mxu0  ;;  %v672_v5 = vpop.f32.mrb[12].mxu1 }
 0x112   :  { %v616_v6 = vadd.f32 %v615_v4, %v614_v2  ;;  %v617_v7 = vpop.f32.mrb[14].mxu0  ;;  %v673_v8 = vpop.f32.mrb[13].mxu1 }
 0x113   :  { %v618_v9 = vpop.f32.mrb[15].mxu0  ;;  %v674_v10 = vadd.f32 %v673_v8, %v672_v5  ;;  %v675_v11 = vpop.f32.mrb[14].mxu1 }
 0x114   :  { %v311_v12 = vadd.f32 %v616_v6, %v1218_v19  ;;  %v619_v13 = vadd.f32 %v618_v9, %v617_v7  ;;  %v676_v14 = vpop.f32.mrb[15].mxu1 }
 0x115   :  { %v677_v15 = vadd.f32 %v676_v14, %v675_v11 }
 0x116   :  { %v314_v16 = vadd.f32 %v619_v13, %v1218_v19  ;;  %v1240_v17 = vadd.f32 %v674_v10, %v311_v12 }
 0x118   :  { %v620_v18 = vpop.f32.mrb[16].mxu0  ;;  %v1242_v20 = vadd.f32 %v677_v15, %v314_v16 }
 0x119   :  { %v621_v21 = vpop.f32.mrb[17].mxu0  ;;  %v678_v51 = vpop.f32.mrb[16].mxu1 }
 0x11a   :  { %v622_v22 = vadd.f32 %v621_v21, %v620_v18  ;;  %v623_v23 = vpop.f32.mrb[18].mxu0  ;;  %v679_v24 = vpop.f32.mrb[17].mxu1 }
 0x11b   :  { %v624_v25 = vpop.f32.mrb[19].mxu0  ;;  %v680_v26 = vadd.f32 %v679_v24, %v678_v51  ;;  %v681_v27 = vpop.f32.mrb[18].mxu1 }
 0x11c   :  { %v319_v28 = vadd.f32 %v622_v22, %v1218_v19  ;;  %v625_v29 = vadd.f32 %v624_v25, %v623_v23  ;;  %v682_v30 = vpop.f32.mrb[19].mxu1 }
 0x11d   :  { %v683_v31 = vadd.f32 %v682_v30, %v681_v27 }
 0x11e   :  { %v322_v33 = vadd.f32 %v625_v29, %v1218_v19  ;;  %v407_v35 = vadd.f32 %v680_v26, %v319_v28 }
 0x120   :  { %v626_v36 = vpop.f32.mrb[20].mxu0  ;;  %v410_v37 = vadd.f32 %v683_v31, %v322_v33 }
 0x121   :  { %v627_v38 = vpop.f32.mrb[21].mxu0  ;;  %v684_v39 = vpop.f32.mrb[20].mxu1 }
 0x122   :  { %v628_v40 = vadd.f32 %v627_v38, %v626_v36  ;;  %v629_v41 = vpop.f32.mrb[22].mxu0  ;;  %v685_v42 = vpop.f32.mrb[21].mxu1 }
 0x123   :  { %v630_v43 = vpop.f32.mrb[23].mxu0  ;;  %v686_v44 = vadd.f32 %v685_v42, %v684_v39  ;;  %v687_v45 = vpop.f32.mrb[22].mxu1 }
 0x124   :  { %v327_v46 = vadd.f32 %v628_v40, %v1218_v19  ;;  %v631_v47 = vadd.f32 %v630_v43, %v629_v41  ;;  %v688_v49 = vpop.f32.mrb[23].mxu1 }
 0x125   :  { %v689_v52 = vadd.f32 %v688_v49, %v687_v45 }
 0x126   :  { %v330_v53 = vadd.f32 %v631_v47, %v1218_v19  ;;  %v415_v54 = vadd.f32 %v686_v44, %v327_v46 }
 0x128   :  { %v632_v55 = vpop.f32.mrb[24].mxu0  ;;  %v418_v56 = vadd.f32 %v689_v52, %v330_v53 }
 0x129   :  { %v633_v57 = vpop.f32.mrb[25].mxu0  ;;  %v690_v58 = vpop.f32.mrb[24].mxu1 }
 0x12a   :  { %v634_v59 = vadd.f32 %v633_v57, %v632_v55  ;;  %v635_v60 = vpop.f32.mrb[26].mxu0  ;;  %v691_v61 = vpop.f32.mrb[25].mxu1 }
 0x12b   :  { %v636_v62 = vpop.f32.mrb[27].mxu0  ;;  %v692_v63 = vadd.f32 %v691_v61, %v690_v58  ;;  %v693_v0 = vpop.f32.mrb[26].mxu1 }
 0x12c   :  { %v335_v2 = vadd.f32 %v634_v59, %v1218_v19  ;;  %v694_v4 = vpop.f32.mrb[27].mxu1 }
 0x12e   :  { %v423_v5 = vadd.f32 %v692_v63, %v335_v2 }
 0x130   :  { %v462_v6 = vpop.f32.mrb[28].mxu0 }
 0x131   :  { %v463_v7 = vadd.f32 %v462_v6, %v1222_v32  ;;  %v494_v8 = vpop.f32.mrb[28].mxu1  ;;  %v717_v9 = vpop.f32.mrb[29].mxu0 }
 0x132   :  { %v495_v10 = vadd.f32 %v494_v8, %v407_v35  ;;  %v733_v11 = vpop.f32.mrb[29].mxu1  ;;  %v465_v12 = vpop.f32.mrb[30].mxu0 }
 0x133   :  { %vm516_vm2 = vcmp.ge.f32.partialorder %v463_v7, 0.0  ;;  %v529_v13 = vmul.f32 0.01, %v463_v7  ;;  %v466_v14 = vadd.f32 %v465_v12, %v1224_v34  ;;  %v497_v15 = vpop.f32.mrb[30].mxu1  ;;  %v718_v16 = vpop.f32.mrb[31].mxu0 }
 0x134   :  { %vm524_vm3 = vcmp.ge.f32.partialorder %v495_v10, 0.0  ;;  %v537_v18 = vmul.f32 0.01, %v495_v10  ;;  %v498_v21 = vadd.f32 %v497_v15, %v410_v37  ;;  %v734_v19 = vpop.f32.mrb[31].mxu1 }
 0x135   :  { %v542_v51 = vsel %vm516_vm2, %v463_v7, %v529_v13  ;;  %vm517_vm4 = vcmp.ge.f32.partialorder %v466_v14, 0.0  ;;  %v530_v22 = vmul.f32 0.01, %v466_v14 }
 0x136   :  { %555 = vst.msk [vmem:[%s1312_s3] sm:$0xff] %vm230_vm1, %v542_v51  ;;  %v550_v32 = vsel %vm524_vm3, %v495_v10, %v537_v18  ;;  %vm525_vm5 = vcmp.ge.f32.partialorder %v498_v21, 0.0  ;;  %v538_v23 = vmul.f32 0.01, %v498_v21 }
 0x137   :  { %563 = vst.msk [vmem:[%s1312_s3 + $0x40] sm:$0xff] %vm230_vm1, %v550_v32  ;;  %v543_v34 = vsel %vm517_vm4, %v466_v14, %v530_v22 }
 0x138   :  { %556 = vst.msk [vmem:[%s1312_s3 + $0x8] sm:$0xff] %vm230_vm1, %v543_v34  ;;  %v551_v24 = vsel %vm525_vm5, %v498_v21, %v538_v23  ;;  %v470_v25 = vpop.f32.mrb[32].mxu0 }
 0x139   :  { %564 = vst.msk [vmem:[%s1312_s3 + $0x48] sm:$0xff] %vm230_vm1, %v551_v24  ;;  %v471_v26 = vadd.f32 %v470_v25, %v1228_v48  ;;  %v502_v27 = vpop.f32.mrb[32].mxu1  ;;  %v721_v28 = vpop.f32.mrb[33].mxu0 }
 0x13a   :  { %v503_v29 = vadd.f32 %v502_v27, %v415_v54  ;;  %v737_v30 = vpop.f32.mrb[33].mxu1  ;;  %v473_v31 = vpop.f32.mrb[34].mxu0 }
 0x13b   :  { %vm518_vm6 = vcmp.ge.f32.partialorder %v471_v26, 0.0  ;;  %v531_v33 = vmul.f32 0.01, %v471_v26  ;;  %v474_v35 = vadd.f32 %v473_v31, %v1230_v50  ;;  %v505_v36 = vpop.f32.mrb[34].mxu1  ;;  %v722_v37 = vpop.f32.mrb[35].mxu0 }
 0x13c   :  { %vm526_vm7 = vcmp.ge.f32.partialorder %v503_v29, 0.0  ;;  %v539_v38 = vmul.f32 0.01, %v503_v29  ;;  %v506_v39 = vadd.f32 %v505_v36, %v418_v56  ;;  %v738_v40 = vpop.f32.mrb[35].mxu1 }
 0x13d   :  { %v544_v41 = vsel %vm518_vm6, %v471_v26, %v531_v33  ;;  %vm519_vm8 = vcmp.ge.f32.partialorder %v474_v35, 0.0  ;;  %v532_v42 = vmul.f32 0.01, %v474_v35 }
 0x13e   :  { %557 = vst.msk [vmem:[%s1312_s3 + $0x10] sm:$0xff] %vm230_vm1, %v544_v41  ;;  %v552_v48 = vsel %vm526_vm7, %v503_v29, %v539_v38  ;;  %vm527_vm9 = vcmp.ge.f32.partialorder %v506_v39, 0.0  ;;  %v540_v43 = vmul.f32 0.01, %v506_v39 }
 0x13f   :  { %565 = vst.msk [vmem:[%s1312_s3 + $0x50] sm:$0xff] %vm230_vm1, %v552_v48  ;;  %v545_v50 = vsel %vm519_vm8, %v474_v35, %v532_v42 }
 0x140   :  { %558 = vst.msk [vmem:[%s1312_s3 + $0x18] sm:$0xff] %vm230_vm1, %v545_v50  ;;  %v553_v44 = vsel %vm527_vm9, %v506_v39, %v540_v43  ;;  %v478_v45 = vpop.f32.mrb[36].mxu0 }
 0x141   :  { %566 = vst.msk [vmem:[%s1312_s3 + $0x58] sm:$0xff] %vm230_vm1, %v553_v44  ;;  %v479_v46 = vadd.f32 %v478_v45, %v1234_v1  ;;  %v510_v47 = vpop.f32.mrb[36].mxu1  ;;  %v725_v49 = vpop.f32.mrb[37].mxu0 }
 0x142   :  { %v511_v52 = vadd.f32 %v510_v47, %v423_v5  ;;  %v481_v53 = vpop.f32.mrb[38].mxu0  ;;  %v741_v54 = vpop.f32.mrb[37].mxu1 }
 0x143   :  { %vm520_vm10 = vcmp.ge.f32.partialorder %v479_v46, 0.0  ;;  %v533_v55 = vmul.f32 0.01, %v479_v46  ;;  %v482_v56 = vadd.f32 %v481_v53, %v1236_v3  ;;  %v726_v57 = vpop.f32.mrb[39].mxu0  ;;  %v513_v58 = vpop.f32.mrb[38].mxu1 }
 0x144   :  { %vm528_vm11 = vcmp.ge.f32.partialorder %v511_v52, 0.0  ;;  %v541_v59 = vmul.f32 0.01, %v511_v52  ;;  %v742_v60 = vpop.f32.mrb[39].mxu1 }
 0x145   :  { %v546_v61 = vsel %vm520_vm10, %v479_v46, %v533_v55  ;;  %vm521_vm12 = vcmp.ge.f32.partialorder %v482_v56, 0.0  ;;  %v534_v62 = vmul.f32 0.01, %v482_v56 }
 0x146   :  { %559 = vst.msk [vmem:[%s1312_s3 + $0x20] sm:$0xff] %vm230_vm1, %v546_v61  ;;  %v554_v1 = vsel %vm528_vm11, %v511_v52, %v541_v59 }
 0x147   :  { %567 = vst.msk [vmem:[%s1312_s3 + $0x60] sm:$0xff] %vm230_vm1, %v554_v1  ;;  %v547_v3 = vsel %vm521_vm12, %v482_v56, %v534_v62 }
 0x148   :  { %560 = vst.msk [vmem:[%s1312_s3 + $0x28] sm:$0xff] %vm230_vm1, %v547_v3  ;;  %v486_v63 = vpop.f32.mrb[40].mxu0 }
 0x149   :  { %v487_v0 = vadd.f32 %v486_v63, %v1240_v17  ;;  %v729_v2 = vpop.f32.mrb[41].mxu0 }
 0x14a   :  { %v489_v4 = vpop.f32.mrb[42].mxu0 }
 0x14b   :  { %vm522_vm13 = vcmp.ge.f32.partialorder %v487_v0, 0.0  ;;  %v535_v5 = vmul.f32 0.01, %v487_v0  ;;  %v490_v6 = vadd.f32 %v489_v4, %v1242_v20  ;;  %v730_v7 = vpop.f32.mrb[43].mxu0 }
 0x14d   :  { %v548_v8 = vsel %vm522_vm13, %v487_v0, %v535_v5  ;;  %vm523_vm14 = vcmp.ge.f32.partialorder %v490_v6, 0.0  ;;  %v536_v9 = vmul.f32 0.01, %v490_v6 }
 0x14e   :  { %561 = vst.msk [vmem:[%s1312_s3 + $0x30] sm:$0xff] %vm230_vm1, %v548_v8 }
 0x14f   :  { %v549_v10 = vsel %vm523_vm14, %v490_v6, %v536_v9 }
 0x150   :  { %562 = vst.msk [vmem:[%s1312_s3 + $0x38] sm:$0xff] %vm230_vm1, %v549_v10 }

// kernel: state_network_forward.9
= control target key start
LH: loop header
LB: loop body
LE: loop exit
PB: predicated region body
PF: predicated region fallthrough
CT: control target
= control target key end

     0   :  { %v155_v0 = vmov 0.0   ;;  %vm156_vm0 = vmmov 0   ;;  %vm34_vm1 = vcmask 130048   ;;  %s234_s1 = inlined_call_operand.vmem [shape: f32[16,16], index: 1, kind: input, shape index: {}]   ;;  %s235_s0 = inlined_call_operand.vmem [shape: f32[48,16], index: 0, kind: input, shape index: {}]   ;;  %s236_s2 = inlined_call_operand.vmem [shape: f32[1,16], index: 2, kind: input, shape index: {}]   ;;  %s237_s3 = inlined_call_operand.vmem [shape: f32[48,16], index: 3, kind: output, shape index: {}]  }
   0x1   :  { %151 = vmatprep.subr.bf16.mxu1 %v155_v0  ;;  %v24_v1 = vld [vmem:[%s234_s1] sm:$0xff]  ;;  %v25_v2 = vld [vmem:[%s234_s1 + $0x8] sm:$0xff]  ;;  %143 = vmatprep.mubr.msk.bf16.mxu1 %vm156_vm0, %v155_v0  ;;  %v17_v3 = vld [vmem:[%s235_s0 + $0x10] sm:$0xff] }
   0x2   :  { %v26_v4 = vpack.c.bf16 %v25_v2, %v24_v1  ;;  %137 = vmatprep.subr.bf16.mxu0 %v155_v0  ;;  %v18_v5 = vld [vmem:[%s235_s0 + $0x18] sm:$0xff]  ;;  %139 = vmatprep.mubr.msk.bf16.mxu0 %vm156_vm0, %v155_v0  ;;  %v15_v6 = vld [vmem:[%s235_s0] sm:$0xff]  ;;  %v16_v7 = vld [vmem:[%s235_s0 + $0x8] sm:$0xff] }
   0x3   :  { %v22_v8 = vpack.c.bf16 %v18_v5, %v17_v3  ;;  %v21_v9 = vpack.c.bf16 %v16_v7, %v15_v6  ;;  %v19_v10 = vld [vmem:[%s235_s0 + $0x20] sm:$0xff]  ;;  %v20_v11 = vld [vmem:[%s235_s0 + $0x28] sm:$0xff] }
   0x4   :  { %152 = vmatpush3.bf16.msra.mxu1 %v26_v4  ;;  %138 = vmatpush3.bf16.msra.mxu0 %v26_v4  ;;  %v23_v12 = vpack.c.bf16 %v20_v11, %v19_v10  ;;  %v129_v13 = vld [vmem:[%s236_s2] ss:$0 sm:$0xff] }
   0x7   :  { %144 = vmatmul.mubr.msk.bf16.vlgmr.msra.gmra.mrb[0].mxu1 %vm34_vm1, %v22_v8  ;;  %140 = vmatmul.mubr.msk.bf16.vlgmr.msra.gmra.mrb[0].mxu0 %vm34_vm1, %v21_v9 }
   0x8   :  { %147 = vmatprep.mubr.msk.bf16.mxu1 %vm156_vm0, %v155_v0 }
   0xf   :  { %148 = vmatmul.mubr.msk.bf16.gmra.mrb[4].mxu1 %vm34_vm1, %v23_v12 }
  0xda   :  { %v86_v14 = vpop.f32.mrb[0].mxu1  ;;  %v78_v15 = vpop.f32.mrb[0].mxu0 }
  0xdb   :  { %v87_v16 = vadd.f32 %v129_v13, %v86_v14  ;;  %v145_v17 = vpop.f32.mrb[1].mxu1  ;;  %v79_v18 = vadd.f32 %v129_v13, %v78_v15  ;;  %v141_v19 = vpop.f32.mrb[1].mxu0 }
  0xdc   :  { %v89_v20 = vpop.f32.mrb[2].mxu1  ;;  %v81_v21 = vpop.f32.mrb[2].mxu0 }
  0xdd   :  { %vm103_vm2 = vcmp.ge.f32.partialorder %v87_v16, 0.0  ;;  %v109_v22 = vmul.f32 0.01, %v87_v16  ;;  %v90_v23 = vadd.f32 %v129_v13, %v89_v20  ;;  %v146_v24 = vpop.f32.mrb[3].mxu1  ;;  %vm101_vm3 = vcmp.ge.f32.partialorder %v79_v18, 0.0  ;;  %v142_v25 = vpop.f32.mrb[3].mxu0 }
  0xde   :  { %v107_v26 = vmul.f32 0.01, %v79_v18  ;;  %v82_v27 = vadd.f32 %v129_v13, %v81_v21 }
  0xdf   :  { %v115_v28 = vsel %vm103_vm2, %v87_v16, %v109_v22  ;;  %vm104_vm4 = vcmp.ge.f32.partialorder %v90_v23, 0.0  ;;  %v110_v29 = vmul.f32 0.01, %v90_v23 }
  0xe0   :  { %121 = vst.msk [vmem:[%s237_s3 + $0x10] sm:$0xff] %vm34_vm1, %v115_v28  ;;  %v113_v30 = vsel %vm101_vm3, %v79_v18, %v107_v26  ;;  %vm102_vm5 = vcmp.ge.f32.partialorder %v82_v27, 0.0  ;;  %v108_v31 = vmul.f32 0.01, %v82_v27 }
  0xe1   :  { %v116_v32 = vsel %vm104_vm4, %v90_v23, %v110_v29  ;;  %119 = vst.msk [vmem:[%s237_s3] sm:$0xff] %vm34_vm1, %v113_v30 }
  0xe2   :  { %122 = vst.msk [vmem:[%s237_s3 + $0x18] sm:$0xff] %vm34_vm1, %v116_v32  ;;  %v114_v33 = vsel %vm102_vm5, %v82_v27, %v108_v31  ;;  %v94_v34 = vpop.f32.mrb[4].mxu1 }
  0xe3   :  { %120 = vst.msk [vmem:[%s237_s3 + $0x8] sm:$0xff] %vm34_vm1, %v114_v33  ;;  %v95_v35 = vadd.f32 %v129_v13, %v94_v34  ;;  %v149_v36 = vpop.f32.mrb[5].mxu1 }
  0xe4   :  { %v97_v37 = vpop.f32.mrb[6].mxu1 }
  0xe5   :  { %vm105_vm6 = vcmp.ge.f32.partialorder %v95_v35, 0.0  ;;  %v111_v38 = vmul.f32 0.01, %v95_v35  ;;  %v98_v39 = vadd.f32 %v129_v13, %v97_v37  ;;  %v150_v40 = vpop.f32.mrb[7].mxu1 }
  0xe7   :  { %v117_v41 = vsel %vm105_vm6, %v95_v35, %v111_v38  ;;  %vm106_vm7 = vcmp.ge.f32.partialorder %v98_v39, 0.0  ;;  %v112_v42 = vmul.f32 0.01, %v98_v39 }
  0xe8   :  { %123 = vst.msk [vmem:[%s237_s3 + $0x20] sm:$0xff] %vm34_vm1, %v117_v41 }
  0xe9   :  { %v118_v43 = vsel %vm106_vm7, %v98_v39, %v112_v42 }
  0xea   :  { %124 = vst.msk [vmem:[%s237_s3 + $0x28] sm:$0xff] %vm34_vm1, %v118_v43 }

// kernel: state_network_forward.10
= control target key start
LH: loop header
LB: loop body
LE: loop exit
PB: predicated region body
PF: predicated region fallthrough
CT: control target
= control target key end

     0   :  { %vm39_vm0 = vcmask 523264   ;;  %vm103_vm2 = vcmask 261120   ;;  %s199_s1 = inlined_call_operand.vmem [shape: f32[64,32], index: 1, kind: input, shape index: {}]   ;;  %s200_s0 = inlined_call_operand.vmem [shape: f32[22,64], index: 0, kind: input, shape index: {}]   ;;  %s201_s2 = inlined_call_operand.vmem [shape: f32[1,32], index: 2, kind: input, shape index: {}]   ;;  %s202_s3 = inlined_call_operand.vmem [shape: f32[22,32], index: 3, kind: output, shape index: {}]  }
   0x1   :  { %v20_v0 = vld [vmem:[%s199_s1] sm:$0xff]  ;;  %v21_v1 = vld [vmem:[%s199_s1 + $0x8] sm:$0xff]  ;;  %v22_v2 = vld [vmem:[%s199_s1 + $0x10] sm:$0xff] }
   0x2   :  { %v28_v3 = vpack.c.bf16 %v21_v1, %v20_v0  ;;  %v23_v4 = vld [vmem:[%s199_s1 + $0x18] sm:$0xff]  ;;  %v24_v6 = vld [vmem:[%s199_s1 + $0x20] sm:$0xff]  ;;  %v25_v7 = vld [vmem:[%s199_s1 + $0x28] sm:$0xff] }
   0x3   :  { %v29_v5 = vpack.c.bf16 %v23_v4, %v22_v2  ;;  %v15_v8 = vld [vmem:[%s200_s0] sm:$0xff]  ;;  %v16_v9 = vld [vmem:[%s200_s0 + $0x8] sm:$0xff]  ;;  %v30_v11 = vpack.c.bf16 %v25_v7, %v24_v6  ;;  %v26_v12 = vld [vmem:[%s199_s1 + $0x30] sm:$0xff] }
   0x4   :  { %120 = vmatprep.subr.bf16.mxu0 %v28_v3  ;;  %v18_v10 = vpack.c.bf16 %v16_v9, %v15_v8  ;;  %v27_v13 = vld [vmem:[%s199_s1 + $0x38] sm:$0xff]  ;;  %v17_v15 = vld [vmem:[%s200_s0 + $0x10] sm:$0xff]  ;;  %v111_v17 = vld [vmem:[%s201_s2] ss:$0 sm:$0xff] }
   0x5   :  { %121 = vmatpush3.bf16.msra.mxu0 %v28_v3  ;;  %v31_v14 = vpack.c.bf16 %v27_v13, %v26_v12  ;;  %v19_v16 = vpack.c.bf16 %v17_v15, %v17_v15 }
   0x6   :  { %122 = vmatprep.subr.bf16.mxu0 %v29_v5  ;;  %128 = vmatprep.mubr.msk.bf16.mxu0 %vm39_vm0, %v18_v10 }
   0x9   :  { %123 = vmatpush3.bf16.msra.mxu0 %v29_v5 }
   0xa   :  { %124 = vmatprep.subr.bf16.mxu0 %v30_v11 }
   0xd   :  { %125 = vmatpush3.bf16.msra.mxu0 %v30_v11 }
   0xe   :  { %126 = vmatprep.subr.bf16.mxu0 %v31_v14 }
  0x11   :  { %127 = vmatpush3.bf16.msra.mxu0 %v31_v14 }
  0x14   :  { %129 = vmatmul.mubr.msk.bf16.vlgmr.msra.gmra.mrb[0].mxu0 %vm39_vm0, %v19_v16 }
  0xe7   :  { %v130_v18 = vpop.f32.mrb[0].mxu0 }
  0xe8   :  { %v89_v19 = vadd.f32 %v130_v18, %v111_v17  ;;  %v80_v20 = vpop.f32.mrb[1].mxu0 }
  0xe9   :  { %v81_v21 = vadd.f32 %v111_v17, %v80_v20  ;;  %v131_v22 = vpop.f32.mrb[2].mxu0 }
  0xea   :  { %vm96_vm1 = vcmp.ge.f32.partialorder %v89_v19, 0.0  ;;  %v99_v23 = vmul.f32 0.01, %v89_v19  ;;  %v83_v24 = vpop.f32.mrb[3].mxu0 }
  0xeb   :  { %vm94_vm3 = vcmp.ge.f32.partialorder %v81_v21, 0.0  ;;  %v97_v25 = vmul.f32 0.01, %v81_v21  ;;  %v84_v26 = vadd.f32 %v111_v17, %v83_v24 }
  0xec   :  { %v102_v27 = vsel %vm96_vm1, %v89_v19, %v99_v23 }
  0xed   :  { %106 = vst.msk [vmem:[%s202_s3 + $0x10] sm:$0xff] %vm103_vm2, %v102_v27  ;;  %v100_v28 = vsel %vm94_vm3, %v81_v21, %v97_v25  ;;  %vm95_vm4 = vcmp.ge.f32.partialorder %v84_v26, 0.0  ;;  %v98_v29 = vmul.f32 0.01, %v84_v26 }
  0xee   :  { %104 = vst.msk [vmem:[%s202_s3] sm:$0xff] %vm103_vm2, %v100_v28 }
  0xef   :  { %v101_v30 = vsel %vm95_vm4, %v84_v26, %v98_v29 }
  0xf0   :  { %105 = vst.msk [vmem:[%s202_s3 + $0x8] sm:$0xff] %vm103_vm2, %v101_v30 }

// kernel: state_network_forward.11
= control target key start
LH: loop header
LB: loop body
LE: loop exit
PB: predicated region body
PF: predicated region fallthrough
CT: control target
= control target key end

     0   :  { %s5445_s0 = inlined_call_operand.vmem [shape: f32[2,3136], index: 0, kind: input, shape index: {}]   ;;  %s5446_s1 = inlined_call_operand.vmem [shape: f32[2,352], index: 1, kind: input, shape index: {}]   ;;  %s5447_s2 = inlined_call_operand.vmem [shape: f32[3136,256], index: 2, kind: input, shape index: {}]   ;;  %s5448_s3 = inlined_call_operand.vmem [shape: f32[1,256], index: 3, kind: input, shape index: {}]   ;;  %s5449_s4 = inlined_call_operand.vmem [shape: f32[256,64], index: 4, kind: input, shape index: {}]   ;;  %s5450_s5 = inlined_call_operand.vmem [shape: f32[1,64], index: 5, kind: input, shape index: {}]   ;;  %s5451_s6 = inlined_call_operand.vmem [shape: f32[352,64], index: 6, kind: input, shape index: {}]   ;;  %s5452_s7 = inlined_call_operand.vmem [shape: f32[1,64], index: 7, kind: input, shape index: {}]   ;;  %s5453_s8 = inlined_call_operand.vmem [shape: f32[64,64], index: 8, kind: input, shape index: {}]   ;;  %s5454_s9 = inlined_call_operand.vmem [shape: f32[64,64], index: 9, kind: input, shape index: {}]   ;;  %s5455_s10 = inlined_call_operand.vmem [shape: f32[1,64], index: 10, kind: input, shape index: {}]   ;;  %s5456_s11 = inlined_call_operand.hbm [shape: f32[2,64], index: 11, kind: output, shape index: {}]  }
   0x1   :  { %v214_v0 = vld [vmem:[%s5447_s2 + $0x8] sm:$0xff]  ;;  %v216_v1 = vld [vmem:[%s5447_s2 + $0x18] sm:$0xff]  ;;  %v213_v5 = vld [vmem:[%s5447_s2] sm:$0xff] }
   0x2   :  { %v534_v2 = vld [vmem:[%s5447_s2 + $0xa08] sm:$0xff]  ;;  %v998_v3 = vpack.c.bf16 %v216_v1, %v214_v0  ;;  %v536_v4 = vld [vmem:[%s5447_s2 + $0xa18] sm:$0xff]  ;;  %v215_v6 = vld [vmem:[%s5447_s2 + $0x10] sm:$0xff] }
   0x3   :  { %v1158_v7 = vpack.c.bf16 %v536_v4, %v534_v2  ;;  %v997_v8 = vpack.c.bf16 %v215_v6, %v213_v5  ;;  %v533_v9 = vld [vmem:[%s5447_s2 + $0xa00] sm:$0xff]  ;;  %v535_v10 = vld [vmem:[%s5447_s2 + $0xa10] sm:$0xff]  ;;  %v218_v11 = vld [vmem:[%s5447_s2 + $0x28] sm:$0xff] }
   0x4   :  { %1405 = vmatprep.subr.bf16.mxu1 %v998_v3  ;;  %v1157_v12 = vpack.c.bf16 %v535_v10, %v533_v9  ;;  %v220_v13 = vld [vmem:[%s5447_s2 + $0x38] sm:$0xff]  ;;  %v538_v14 = vld [vmem:[%s5447_s2 + $0xa28] sm:$0xff]  ;;  %v217_v18 = vld [vmem:[%s5447_s2 + $0x20] sm:$0xff] }
   0x5   :  { %v540_v15 = vld [vmem:[%s5447_s2 + $0xa38] sm:$0xff]  ;;  %1610 = vmatprep.subr.bf16.mxu0 %v1158_v7  ;;  %1406 = vmatpush1.bf16.msra.mxu1 %v997_v8  ;;  %v1000_v16 = vpack.c.bf16 %v220_v13, %v218_v11  ;;  %v219_v19 = vld [vmem:[%s5447_s2 + $0x30] sm:$0xff]  ;;  %v537_v20 = vld [vmem:[%s5447_s2 + $0xa20] sm:$0xff] }
   0x6   :  { %v1160_v17 = vpack.c.bf16 %v540_v15, %v538_v14  ;;  %1611 = vmatpush1.bf16.msra.mxu0 %v1157_v12  ;;  %v999_v21 = vpack.c.bf16 %v219_v19, %v217_v18  ;;  %v539_v22 = vld [vmem:[%s5447_s2 + $0xa30] sm:$0xff]  ;;  %v222_v23 = vld [vmem:[%s5447_s2 + $0x48] sm:$0xff]  ;;  %v224_v24 = vld [vmem:[%s5447_s2 + $0x58] sm:$0xff] }
   0x7   :  { %1407 = vmatprep.subr.bf16.mxu1 %v1000_v16  ;;  %v1159_v25 = vpack.c.bf16 %v539_v22, %v537_v20  ;;  %v1002_v26 = vpack.c.bf16 %v224_v24, %v222_v23  ;;  %v542_v27 = vld [vmem:[%s5447_s2 + $0xa48] sm:$0xff]  ;;  %v544_v28 = vld [vmem:[%s5447_s2 + $0xa58] sm:$0xff]  ;;  %v221_v29 = vld [vmem:[%s5447_s2 + $0x40] sm:$0xff] }
   0x8   :  { %1612 = vmatprep.subr.bf16.mxu0 %v1160_v17  ;;  %v1162_v30 = vpack.c.bf16 %v544_v28, %v542_v27  ;;  %v223_v31 = vld [vmem:[%s5447_s2 + $0x50] sm:$0xff]  ;;  %v541_v32 = vld [vmem:[%s5447_s2 + $0xa40] sm:$0xff]  ;;  %v226_v35 = vld [vmem:[%s5447_s2 + $0x68] sm:$0xff] }
   0x9   :  { %v543_v33 = vld [vmem:[%s5447_s2 + $0xa50] sm:$0xff]  ;;  %1408 = vmatpush1.bf16.msra.mxu1 %v999_v21  ;;  %v1001_v34 = vpack.c.bf16 %v223_v31, %v221_v29  ;;  %v228_v36 = vld [vmem:[%s5447_s2 + $0x78] sm:$0xff]  ;;  %v546_v37 = vld [vmem:[%s5447_s2 + $0xa68] sm:$0xff] }
   0xa   :  { %1613 = vmatpush1.bf16.msra.mxu0 %v1159_v25  ;;  %1409 = vmatprep.subr.bf16.mxu1 %v1002_v26  ;;  %v1161_v38 = vpack.c.bf16 %v543_v33, %v541_v32  ;;  %v1004_v39 = vpack.c.bf16 %v228_v36, %v226_v35  ;;  %v548_v40 = vld [vmem:[%s5447_s2 + $0xa78] sm:$0xff]  ;;  %v225_v41 = vld [vmem:[%s5447_s2 + $0x60] sm:$0xff]  ;;  %v227_v42 = vld [vmem:[%s5447_s2 + $0x70] sm:$0xff] }
   0xb   :  { %1614 = vmatprep.subr.bf16.mxu0 %v1162_v30  ;;  %v1164_v43 = vpack.c.bf16 %v548_v40, %v546_v37  ;;  %v545_v44 = vld [vmem:[%s5447_s2 + $0xa60] sm:$0xff]  ;;  %v547_v45 = vld [vmem:[%s5447_s2 + $0xa70] sm:$0xff]  ;;  %v230_v46 = vld [vmem:[%s5447_s2 + $0x88] sm:$0xff]  ;;  %v1003_v50 = vpack.c.bf16 %v227_v42, %v225_v41 }
   0xc   :  { %v232_v47 = vld [vmem:[%s5447_s2 + $0x98] sm:$0xff]  ;;  %v550_v48 = vld [vmem:[%s5447_s2 + $0xa88] sm:$0xff]  ;;  %v1163_v51 = vpack.c.bf16 %v547_v45, %v545_v44  ;;  %v229_v53 = vld [vmem:[%s5447_s2 + $0x80] sm:$0xff] }
   0xd   :  { %v552_v49 = vld [vmem:[%s5447_s2 + $0xa98] sm:$0xff]  ;;  %1410 = vmatpush1.bf16.msra.mxu1 %v1001_v34  ;;  %v1006_v52 = vpack.c.bf16 %v232_v47, %v230_v46  ;;  %v231_v54 = vld [vmem:[%s5447_s2 + $0x90] sm:$0xff]  ;;  %v549_v55 = vld [vmem:[%s5447_s2 + $0xa80] sm:$0xff]  ;;  %v2550_v46 = vmov 1983009808  }
   0xe   :  { %1615 = vmatpush1.bf16.msra.mxu0 %v1161_v38  ;;  %1411 = vmatprep.subr.bf16.mxu1 %v1004_v39  ;;  %v1166_v56 = vpack.c.bf16 %v552_v49, %v550_v48  ;;  %v551_v57 = vld [vmem:[%s5447_s2 + $0xa90] sm:$0xff]  ;;  %v234_v58 = vld [vmem:[%s5447_s2 + $0xa8] sm:$0xff]  ;;  %v236_v59 = vld [vmem:[%s5447_s2 + $0xb8] sm:$0xff]  ;;  %v1005_v62 = vpack.c.bf16 %v231_v54, %v229_v53  ;;  %v56_v47 = vunpack.c.l.s4 %v2550_v46  ;;  %v58_v48 = vlaneseq }
   0xf   :  { %1616 = vmatprep.subr.bf16.mxu0 %v1164_v43  ;;  %v554_v60 = vld [vmem:[%s5447_s2 + $0xaa8] sm:$0xff]  ;;  %v556_v61 = vld [vmem:[%s5447_s2 + $0xab8] sm:$0xff]  ;;  %v1165_v63 = vpack.c.bf16 %v551_v57, %v549_v55  ;;  %v1008_v0 = vpack.c.bf16 %v236_v59, %v234_v58  ;;  %v233_v1 = vld [vmem:[%s5447_s2 + $0xa0] sm:$0xff] }
  0x10   :  { %v235_v2 = vld [vmem:[%s5447_s2 + $0xb0] sm:$0xff]  ;;  %v553_v3 = vld [vmem:[%s5447_s2 + $0xaa0] sm:$0xff]  ;;  %v1168_v4 = vpack.c.bf16 %v556_v61, %v554_v60  ;;  %v238_v6 = vld [vmem:[%s5447_s2 + $0xc8] sm:$0xff]  ;;  %v57_v61 = vunpack.c.0.s8 %v56_v47 }
  0x11   :  { %1412 = vmatpush1.bf16.msra.mxu1 %v1003_v50  ;;  %v555_v5 = vld [vmem:[%s5447_s2 + $0xab0] sm:$0xff]  ;;  %v240_v7 = vld [vmem:[%s5447_s2 + $0xd8] sm:$0xff]  ;;  %v558_v8 = vld [vmem:[%s5447_s2 + $0xac8] sm:$0xff]  ;;  %v1007_v10 = vpack.c.bf16 %v235_v2, %v233_v1 }
  0x12   :  { %1617 = vmatpush1.bf16.msra.mxu0 %v1163_v51  ;;  %1413 = vmatprep.subr.bf16.mxu1 %v1006_v52  ;;  %v560_v9 = vld [vmem:[%s5447_s2 + $0xad8] sm:$0xff]  ;;  %v1167_v11 = vpack.c.bf16 %v555_v5, %v553_v3  ;;  %v1010_v12 = vpack.c.bf16 %v240_v7, %v238_v6  ;;  %v237_v13 = vld [vmem:[%s5447_s2 + $0xc0] sm:$0xff]  ;;  %v239_v14 = vld [vmem:[%s5447_s2 + $0xd0] sm:$0xff] }
  0x13   :  { %1618 = vmatprep.subr.bf16.mxu0 %v1166_v56  ;;  %v557_v15 = vld [vmem:[%s5447_s2 + $0xac0] sm:$0xff]  ;;  %v1170_v16 = vpack.c.bf16 %v560_v9, %v558_v8  ;;  %v559_v17 = vld [vmem:[%s5447_s2 + $0xad0] sm:$0xff]  ;;  %v242_v18 = vld [vmem:[%s5447_s2 + $0xe8] sm:$0xff]  ;;  %v1009_v22 = vpack.c.bf16 %v239_v14, %v237_v13 }
  0x14   :  { %v244_v19 = vld [vmem:[%s5447_s2 + $0xf8] sm:$0xff]  ;;  %v562_v20 = vld [vmem:[%s5447_s2 + $0xae8] sm:$0xff]  ;;  %v1169_v23 = vpack.c.bf16 %v559_v17, %v557_v15  ;;  %v241_v25 = vld [vmem:[%s5447_s2 + $0xe0] sm:$0xff] }
  0x15   :  { %1414 = vmatpush1.bf16.msra.mxu1 %v1005_v62  ;;  %v564_v21 = vld [vmem:[%s5447_s2 + $0xaf8] sm:$0xff]  ;;  %v1012_v24 = vpack.c.bf16 %v244_v19, %v242_v18  ;;  %v243_v26 = vld [vmem:[%s5447_s2 + $0xf0] sm:$0xff]  ;;  %v561_v27 = vld [vmem:[%s5447_s2 + $0xae0] sm:$0xff]  ;;  %v2867_v62 = vshrl.u32 %v58_v48, 7 }
  0x16   :  { %1619 = vmatpush1.bf16.msra.mxu0 %v1165_v63  ;;  %1415 = vmatprep.subr.bf16.mxu1 %v1008_v0  ;;  %v1172_v28 = vpack.c.bf16 %v564_v21, %v562_v20  ;;  %v563_v29 = vld [vmem:[%s5447_s2 + $0xaf0] sm:$0xff]  ;;  %v246_v30 = vld [vmem:[%s5447_s2 + $0x108] sm:$0xff]  ;;  %v248_v31 = vld [vmem:[%s5447_s2 + $0x118] sm:$0xff]  ;;  %v1011_v34 = vpack.c.bf16 %v243_v26, %v241_v25 }
  0x17   :  { %1620 = vmatprep.subr.bf16.mxu0 %v1168_v4  ;;  %v566_v32 = vld [vmem:[%s5447_s2 + $0xb08] sm:$0xff]  ;;  %v568_v33 = vld [vmem:[%s5447_s2 + $0xb18] sm:$0xff]  ;;  %v1171_v35 = vpack.c.bf16 %v563_v29, %v561_v27  ;;  %v1014_v36 = vpack.c.bf16 %v248_v31, %v246_v30  ;;  %v245_v37 = vld [vmem:[%s5447_s2 + $0x100] sm:$0xff] }
  0x18   :  { %v247_v38 = vld [vmem:[%s5447_s2 + $0x110] sm:$0xff]  ;;  %v565_v39 = vld [vmem:[%s5447_s2 + $0xb00] sm:$0xff]  ;;  %v1174_v40 = vpack.c.bf16 %v568_v33, %v566_v32  ;;  %v250_v42 = vld [vmem:[%s5447_s2 + $0x128] sm:$0xff] }
  0x19   :  { %1416 = vmatpush1.bf16.msra.mxu1 %v1007_v10  ;;  %v567_v41 = vld [vmem:[%s5447_s2 + $0xb10] sm:$0xff]  ;;  %v252_v43 = vld [vmem:[%s5447_s2 + $0x138] sm:$0xff]  ;;  %v570_v44 = vld [vmem:[%s5447_s2 + $0xb28] sm:$0xff]  ;;  %v1013_v49 = vpack.c.bf16 %v247_v38, %v245_v37 }
  0x1a   :  { %1621 = vmatpush1.bf16.msra.mxu0 %v1167_v11  ;;  %1417 = vmatprep.subr.bf16.mxu1 %v1010_v12  ;;  %v572_v45 = vld [vmem:[%s5447_s2 + $0xb38] sm:$0xff]  ;;  %v1173_v50 = vpack.c.bf16 %v567_v41, %v565_v39  ;;  %v1016_v51 = vpack.c.bf16 %v252_v43, %v250_v42  ;;  %v249_v52 = vld [vmem:[%s5447_s2 + $0x120] sm:$0xff]  ;;  %v251_v53 = vld [vmem:[%s5447_s2 + $0x130] sm:$0xff]  ;;  %v2894_v11 = vsub.s32 %v57_v61, %v2867_v62 }
  0x1b   :  { %1622 = vmatprep.subr.bf16.mxu0 %v1170_v16  ;;  %v569_v54 = vld [vmem:[%s5447_s2 + $0xb20] sm:$0xff]  ;;  %v1176_v55 = vpack.c.bf16 %v572_v45, %v570_v44  ;;  %v571_v56 = vld [vmem:[%s5447_s2 + $0xb30] sm:$0xff]  ;;  %v254_v57 = vld [vmem:[%s5447_s2 + $0x148] sm:$0xff]  ;;  %v1015_v63 = vpack.c.bf16 %v251_v53, %v249_v52 }
  0x1c   :  { %v256_v58 = vld [vmem:[%s5447_s2 + $0x158] sm:$0xff]  ;;  %v574_v59 = vld [vmem:[%s5447_s2 + $0xb48] sm:$0xff]  ;;  %v1175_v0 = vpack.c.bf16 %v571_v56, %v569_v54  ;;  %v253_v2 = vld [vmem:[%s5447_s2 + $0x140] sm:$0xff] }
  0x1d   :  { %1418 = vmatpush1.bf16.msra.mxu1 %v1009_v22  ;;  %v576_v60 = vld [vmem:[%s5447_s2 + $0xb58] sm:$0xff]  ;;  %v1018_v1 = vpack.c.bf16 %v256_v58, %v254_v57  ;;  %v255_v3 = vld [vmem:[%s5447_s2 + $0x150] sm:$0xff]  ;;  %v573_v4 = vld [vmem:[%s5447_s2 + $0xb40] sm:$0xff] }
  0x1e   :  { %1623 = vmatpush1.bf16.msra.mxu0 %v1169_v23  ;;  %1419 = vmatprep.subr.bf16.mxu1 %v1012_v24  ;;  %v1178_v5 = vpack.c.bf16 %v576_v60, %v574_v59  ;;  %v575_v6 = vld [vmem:[%s5447_s2 + $0xb50] sm:$0xff]  ;;  %v258_v7 = vld [vmem:[%s5447_s2 + $0x168] sm:$0xff]  ;;  %v260_v8 = vld [vmem:[%s5447_s2 + $0x178] sm:$0xff]  ;;  %v1017_v12 = vpack.c.bf16 %v255_v3, %v253_v2 }
  0x1f   :  { %1624 = vmatprep.subr.bf16.mxu0 %v1172_v28  ;;  %v578_v9 = vld [vmem:[%s5447_s2 + $0xb68] sm:$0xff]  ;;  %v580_v10 = vld [vmem:[%s5447_s2 + $0xb78] sm:$0xff]  ;;  %v257_v13 = vld [vmem:[%s5447_s2 + $0x160] sm:$0xff]  ;;  %v1177_v14 = vpack.c.bf16 %v575_v6, %v573_v4  ;;  %v1020_v15 = vpack.c.bf16 %v260_v8, %v258_v7 }
  0x20   :  { %v259_v16 = vld [vmem:[%s5447_s2 + $0x170] sm:$0xff]  ;;  %v577_v17 = vld [vmem:[%s5447_s2 + $0xb60] sm:$0xff]  ;;  %v1180_v19 = vpack.c.bf16 %v580_v10, %v578_v9  ;;  %v262_v20 = vld [vmem:[%s5447_s2 + $0x188] sm:$0xff] }
  0x21   :  { %1420 = vmatpush1.bf16.msra.mxu1 %v1011_v34  ;;  %v579_v18 = vld [vmem:[%s5447_s2 + $0xb70] sm:$0xff]  ;;  %v264_v21 = vld [vmem:[%s5447_s2 + $0x198] sm:$0xff]  ;;  %v2917_v22 = vld [vmem:[%s5445_s0] sm:$0xff]  ;;  %v1019_v27 = vpack.c.bf16 %v259_v16, %v257_v13 }
  0x22   :  { %1625 = vmatpush1.bf16.msra.mxu0 %v1171_v35  ;;  %1421 = vmatprep.subr.bf16.mxu1 %v1014_v36  ;;  %v582_v23 = vld [vmem:[%s5447_s2 + $0xb88] sm:$0xff]  ;;  %v584_v24 = vld [vmem:[%s5447_s2 + $0xb98] sm:$0xff]  ;;  %v2927_v25 = vrot.slane %v2917_v22, %v2894_v11  ;;  %v42_v26 = vld [vmem:[%s5445_s0 + $0x10] sm:$0xff]  ;;  %v1179_v29 = vpack.c.bf16 %v579_v18, %v577_v17  ;;  %v1022_v30 = vpack.c.bf16 %v264_v21, %v262_v20 }
  0x23   :  { %1626 = vmatprep.subr.bf16.mxu0 %v1174_v40  ;;  %v88_v28 = vcombine.high %v42_v26, %v42_v26  ;;  %v261_v31 = vld [vmem:[%s5447_s2 + $0x180] sm:$0xff]  ;;  %v263_v32 = vld [vmem:[%s5447_s2 + $0x190] sm:$0xff]  ;;  %v1182_v35 = vpack.c.bf16 %v584_v24, %v582_v23  ;;  %v266_v37 = vld [vmem:[%s5447_s2 + $0x1a8] sm:$0xff]  ;;  %v54_v4 = vcombine.high %v2917_v22, %v2917_v22 }
  0x24   :  { %v581_v33 = vld [vmem:[%s5447_s2 + $0xb80] sm:$0xff]  ;;  %v69_v34 = vcombine.high %v2927_v25, %v2927_v25  ;;  %v583_v36 = vld [vmem:[%s5447_s2 + $0xb90] sm:$0xff]  ;;  %v268_v38 = vld [vmem:[%s5447_s2 + $0x1b8] sm:$0xff]  ;;  %v1021_v43 = vpack.c.bf16 %v263_v32, %v261_v31 }
  0x25   :  { %1422 = vmatpush1.bf16.msra.mxu1 %v1013_v49  ;;  %v2953_v39 = vrot.slane %v88_v28, %v2894_v11  ;;  %v586_v40 = vld [vmem:[%s5447_s2 + $0xba8] sm:$0xff]  ;;  %v588_v41 = vld [vmem:[%s5447_s2 + $0xbb8] sm:$0xff]  ;;  %v1181_v45 = vpack.c.bf16 %v583_v36, %v581_v33  ;;  %v1024_v46 = vpack.c.bf16 %v268_v38, %v266_v37  ;;  %v265_v47 = vld [vmem:[%s5447_s2 + $0x1a0] sm:$0xff]  ;;  %v3032_v18 = vrot.slane %v54_v4, %v2894_v11 }
  0x26   :  { %1627 = vmatpush1.bf16.msra.mxu0 %v1173_v50  ;;  %1423 = vmatprep.subr.bf16.mxu1 %v1016_v51  ;;  %v189_v42 = vpack.c.bf16 %v69_v34, %v69_v34  ;;  %v267_v48 = vld [vmem:[%s5447_s2 + $0x1b0] sm:$0xff]  ;;  %v585_v49 = vld [vmem:[%s5447_s2 + $0xba0] sm:$0xff]  ;;  %v1184_v50 = vpack.c.bf16 %v588_v41, %v586_v40  ;;  %v270_v52 = vld [vmem:[%s5447_s2 + $0x1c8] sm:$0xff]  ;;  %v188_v33 = vpack.c.bf16 %v2927_v25, %v2927_v25 }
  0x27   :  { %1628 = vmatprep.subr.bf16.mxu0 %v1176_v55  ;;  %v104_v44 = vcombine.high %v2953_v39, %v2953_v39  ;;  %v587_v51 = vld [vmem:[%s5447_s2 + $0xbb0] sm:$0xff]  ;;  %v272_v53 = vld [vmem:[%s5447_s2 + $0x1d8] sm:$0xff]  ;;  %v590_v55 = vld [vmem:[%s5447_s2 + $0xbc8] sm:$0xff]  ;;  %v1023_v57 = vpack.c.bf16 %v267_v48, %v265_v47  ;;  %v70_v32 = vcombine.high %v3032_v18, %v3032_v18  ;;  %v198_v37 = vpack.c.bf16 %v2953_v39, %v2953_v39 }
  0x28   :  { %1437 = vmatprep.mubr.bf16.mxu1 %v189_v42  ;;  %v592_v56 = vld [vmem:[%s5447_s2 + $0xbd8] sm:$0xff]  ;;  %v1183_v58 = vpack.c.bf16 %v587_v51, %v585_v49  ;;  %v1026_v59 = vpack.c.bf16 %v272_v53, %v270_v52  ;;  %v269_v60 = vld [vmem:[%s5447_s2 + $0x1c0] sm:$0xff]  ;;  %v271_v61 = vld [vmem:[%s5447_s2 + $0x1d0] sm:$0xff] }
  0x29   :  { %1424 = vmatpush1.bf16.msra.mxu1 %v1015_v63  ;;  %v199_v54 = vpack.c.bf16 %v104_v44, %v104_v44  ;;  %v589_v63 = vld [vmem:[%s5447_s2 + $0xbc0] sm:$0xff]  ;;  %v274_v2 = vld [vmem:[%s5447_s2 + $0x1e8] sm:$0xff]  ;;  %v276_v3 = vld [vmem:[%s5447_s2 + $0x1f8] sm:$0xff]  ;;  %v1025_v7 = vpack.c.bf16 %v271_v61, %v269_v60 }
  0x2a   :  { %1629 = vmatpush1.bf16.msra.mxu0 %v1175_v0  ;;  %1425 = vmatprep.subr.bf16.mxu1 %v1018_v1  ;;  %v1186_v0 = vpack.c.bf16 %v592_v56, %v590_v55  ;;  %v591_v1 = vld [vmem:[%s5447_s2 + $0xbd0] sm:$0xff]  ;;  %v596_v6 = vld [vmem:[%s5447_s2 + $0xbf8] sm:$0xff]  ;;  %v1028_v9 = vpack.c.bf16 %v276_v3, %v274_v2  ;;  %v273_v10 = vld [vmem:[%s5447_s2 + $0x1e0] sm:$0xff] }
  0x2b   :  { %1630 = vmatprep.subr.bf16.mxu0 %v1178_v5  ;;  %1642 = vmatprep.mubr.bf16.mxu0 %v199_v54  ;;  %v594_v5 = vld [vmem:[%s5447_s2 + $0xbe8] sm:$0xff]  ;;  %v1185_v8 = vpack.c.bf16 %v591_v1, %v589_v63  ;;  %v593_v13 = vld [vmem:[%s5447_s2 + $0xbe0] sm:$0xff]  ;;  %v280_v17 = vld [vmem:[%s5447_s2 + $0x218] sm:$0xff] }
  0x2c   :  { %v278_v16 = vld [vmem:[%s5447_s2 + $0x208] sm:$0xff]  ;;  %v600_v20 = vld [vmem:[%s5447_s2 + $0xc18] sm:$0xff]  ;;  %v277_v24 = vld [vmem:[%s5447_s2 + $0x200] sm:$0xff] }
  0x2d   :  { %1426 = vmatpush1.bf16.msra.mxu1 %v1017_v12  ;;  %v275_v12 = vld [vmem:[%s5447_s2 + $0x1f0] sm:$0xff]  ;;  %v1030_v23 = vpack.c.bf16 %v280_v17, %v278_v16  ;;  %v284_v31 = vld [vmem:[%s5447_s2 + $0x238] sm:$0xff]  ;;  %v602_v34 = vld [vmem:[%s5447_s2 + $0xc28] sm:$0xff] }
  0x2e   :  { %1631 = vmatpush1.bf16.msra.mxu0 %v1177_v14  ;;  %1427 = vmatprep.subr.bf16.mxu1 %v1020_v15  ;;  %v1188_v14 = vpack.c.bf16 %v596_v6, %v594_v5  ;;  %v595_v15 = vld [vmem:[%s5447_s2 + $0xbf0] sm:$0xff]  ;;  %v1027_v21 = vpack.c.bf16 %v275_v12, %v273_v10  ;;  %v281_v25 = vld [vmem:[%s5447_s2 + $0x220] sm:$0xff]  ;;  %v286_v44 = vld [vmem:[%s5447_s2 + $0x248] sm:$0xff] }
  0x2f   :  { %1632 = vmatprep.subr.bf16.mxu0 %v1180_v19  ;;  %v598_v19 = vld [vmem:[%s5447_s2 + $0xc08] sm:$0xff]  ;;  %v1187_v22 = vpack.c.bf16 %v595_v15, %v593_v13  ;;  %v279_v26 = vld [vmem:[%s5447_s2 + $0x210] sm:$0xff]  ;;  %v601_v42 = vld [vmem:[%s5447_s2 + $0xc20] sm:$0xff] }
  0x30   :  { %v1190_v28 = vpack.c.bf16 %v600_v20, %v598_v19  ;;  %v1029_v36 = vpack.c.bf16 %v279_v26, %v277_v24  ;;  %v283_v41 = vld [vmem:[%s5447_s2 + $0x230] sm:$0xff]  ;;  %v606_v47 = vld [vmem:[%s5447_s2 + $0xc48] sm:$0xff]  ;;  %v608_v48 = vld [vmem:[%s5447_s2 + $0xc58] sm:$0xff] }
  0x31   :  { %1428 = vmatpush1.bf16.msra.mxu1 %v1019_v27  ;;  %v597_v27 = vld [vmem:[%s5447_s2 + $0xc00] sm:$0xff]  ;;  %v603_v39 = vld [vmem:[%s5447_s2 + $0xc30] sm:$0xff]  ;;  %v1031_v49 = vpack.c.bf16 %v283_v41, %v281_v25  ;;  %v1194_v55 = vpack.c.bf16 %v608_v48, %v606_v47  ;;  %v612_v60 = vld [vmem:[%s5447_s2 + $0xc78] sm:$0xff] }
  0x32   :  { %1633 = vmatpush1.bf16.msra.mxu0 %v1179_v29  ;;  %1429 = vmatprep.subr.bf16.mxu1 %v1022_v30  ;;  %v599_v29 = vld [vmem:[%s5447_s2 + $0xc10] sm:$0xff]  ;;  %v282_v30 = vld [vmem:[%s5447_s2 + $0x228] sm:$0xff]  ;;  %v285_v52 = vld [vmem:[%s5447_s2 + $0x240] sm:$0xff] }
  0x33   :  { %1634 = vmatprep.subr.bf16.mxu0 %v1182_v35  ;;  %v604_v35 = vld [vmem:[%s5447_s2 + $0xc38] sm:$0xff]  ;;  %v1189_v38 = vpack.c.bf16 %v599_v29, %v597_v27  ;;  %v1032_v40 = vpack.c.bf16 %v284_v31, %v282_v30  ;;  %v287_v53 = vld [vmem:[%s5447_s2 + $0x250] sm:$0xff]  ;;  %v605_v54 = vld [vmem:[%s5447_s2 + $0xc40] sm:$0xff] }
  0x34   :  { %v607_v56 = vld [vmem:[%s5447_s2 + $0xc50] sm:$0xff]  ;;  %v1033_v61 = vpack.c.bf16 %v287_v53, %v285_v52  ;;  %v289_v1 = vld [vmem:[%s5447_s2 + $0x260] sm:$0xff]  ;;  %v294_v6 = vld [vmem:[%s5447_s2 + $0x288] sm:$0xff] }
  0x35   :  { %1430 = vmatpush1.bf16.msra.mxu1 %v1021_v43  ;;  %v1192_v43 = vpack.c.bf16 %v604_v35, %v602_v34  ;;  %v1193_v63 = vpack.c.bf16 %v607_v56, %v605_v54  ;;  %v291_v2 = vld [vmem:[%s5447_s2 + $0x270] sm:$0xff]  ;;  %v609_v3 = vld [vmem:[%s5447_s2 + $0xc60] sm:$0xff]  ;;  %v298_v20 = vld [vmem:[%s5447_s2 + $0x2a8] sm:$0xff] }
  0x36   :  { %1635 = vmatpush1.bf16.msra.mxu0 %v1181_v45  ;;  %1431 = vmatprep.subr.bf16.mxu1 %v1024_v46  ;;  %v288_v45 = vld [vmem:[%s5447_s2 + $0x258] sm:$0xff]  ;;  %v191_v46 = vpack.c.bf16 %v70_v32, %v70_v32  ;;  %v611_v5 = vld [vmem:[%s5447_s2 + $0xc70] sm:$0xff]  ;;  %v1035_v10 = vpack.c.bf16 %v291_v2, %v289_v1  ;;  %v613_v16 = vld [vmem:[%s5447_s2 + $0xc80] sm:$0xff] }
  0x37   :  { %1636 = vmatprep.subr.bf16.mxu0 %v1184_v50  ;;  %v1191_v50 = vpack.c.bf16 %v603_v39, %v601_v42  ;;  %v1034_v51 = vpack.c.bf16 %v288_v45, %v286_v44  ;;  %v1195_v12 = vpack.c.bf16 %v611_v5, %v609_v3  ;;  %v295_v15 = vld [vmem:[%s5447_s2 + $0x290] sm:$0xff]  ;;  %v617_v30 = vld [vmem:[%s5447_s2 + $0xca0] sm:$0xff]  ;;  %v304_v34 = vld [vmem:[%s5447_s2 + $0x2d8] sm:$0xff] }
  0x38   :  { %v615_v19 = vld [vmem:[%s5447_s2 + $0xc90] sm:$0xff]  ;;  %v622_v35 = vld [vmem:[%s5447_s2 + $0xcc8] sm:$0xff]  ;;  %v621_v42 = vld [vmem:[%s5447_s2 + $0xcc0] sm:$0xff] }
  0x39   :  { %1432 = vmatpush1.bf16.msra.mxu1 %v1023_v57  ;;  %v290_v57 = vld [vmem:[%s5447_s2 + $0x268] sm:$0xff]  ;;  %v1197_v26 = vpack.c.bf16 %v615_v19, %v613_v16  ;;  %v299_v29 = vld [vmem:[%s5447_s2 + $0x2b0] sm:$0xff]  ;;  %v308_v45 = vld [vmem:[%s5447_s2 + $0x2f8] sm:$0xff] }
  0x3a   :  { %1637 = vmatpush1.bf16.msra.mxu0 %v1183_v58  ;;  %1433 = vmatprep.subr.bf16.mxu1 %v1026_v59  ;;  %v292_v58 = vld [vmem:[%s5447_s2 + $0x278] sm:$0xff]  ;;  %v610_v59 = vld [vmem:[%s5447_s2 + $0xc68] sm:$0xff]  ;;  %v619_v32 = vld [vmem:[%s5447_s2 + $0xcb0] sm:$0xff] }
  0x3b   :  { %1638 = vmatprep.subr.bf16.mxu0 %v1186_v0  ;;  %v1036_v0 = vpack.c.bf16 %v292_v58, %v290_v57  ;;  %v1196_v4 = vpack.c.bf16 %v612_v60, %v610_v59  ;;  %v303_v41 = vld [vmem:[%s5447_s2 + $0x2d0] sm:$0xff]  ;;  %v306_v44 = vld [vmem:[%s5447_s2 + $0x2e8] sm:$0xff]  ;;  %v628_v48 = vld [vmem:[%s5447_s2 + $0xcf8] sm:$0xff] }
  0x3c   :  { %v626_v47 = vld [vmem:[%s5447_s2 + $0xce8] sm:$0xff]  ;;  %v1044_v52 = vpack.c.bf16 %v308_v45, %v306_v44  ;;  %v305_v53 = vld [vmem:[%s5447_s2 + $0x2e0] sm:$0xff]  ;;  %v307_v54 = vld [vmem:[%s5447_s2 + $0x2f0] sm:$0xff] }
  0x3d   :  { %1434 = vmatpush1.bf16.msra.mxu1 %v1025_v7  ;;  %v296_v7 = vld [vmem:[%s5447_s2 + $0x298] sm:$0xff]  ;;  %v1204_v57 = vpack.c.bf16 %v628_v48, %v626_v47  ;;  %v627_v58 = vld [vmem:[%s5447_s2 + $0xcf0] sm:$0xff]  ;;  %v310_v59 = vld [vmem:[%s5447_s2 + $0x308] sm:$0xff]  ;;  %v1043_v1 = vpack.c.bf16 %v307_v54, %v305_v53 }
  0x3e   :  { %1639 = vmatpush1.bf16.msra.mxu0 %v1185_v8  ;;  %1435 = vmatprep.subr.bf16.mxu1 %v1028_v9  ;;  %v614_v8 = vld [vmem:[%s5447_s2 + $0xc88] sm:$0xff]  ;;  %v616_v9 = vld [vmem:[%s5447_s2 + $0xc98] sm:$0xff]  ;;  %v1038_v13 = vpack.c.bf16 %v296_v7, %v294_v6  ;;  %v311_v5 = vld [vmem:[%s5447_s2 + $0x310] sm:$0xff] }
  0x3f   :  { %1640 = vmatprep.subr.bf16.mxu0 %v1188_v14  ;;  %v293_v14 = vld [vmem:[%s5447_s2 + $0x280] sm:$0xff]  ;;  %v1198_v17 = vpack.c.bf16 %v616_v9, %v614_v8  ;;  %v312_v60 = vld [vmem:[%s5447_s2 + $0x318] sm:$0xff]  ;;  %v631_v8 = vld [vmem:[%s5447_s2 + $0xd10] sm:$0xff] }
  0x40   :  { %v1037_v24 = vpack.c.bf16 %v295_v15, %v293_v14  ;;  %v1046_v3 = vpack.c.bf16 %v312_v60, %v310_v59  ;;  %v629_v6 = vld [vmem:[%s5447_s2 + $0xd00] sm:$0xff]  ;;  %v314_v9 = vld [vmem:[%s5447_s2 + $0x328] sm:$0xff]  ;;  %v315_v19 = vld [vmem:[%s5447_s2 + $0x330] sm:$0xff] }
  0x41   :  { %1436 = vmatpush1.bf16.msra.mxu1 %v1027_v21  ;;  %v300_v21 = vld [vmem:[%s5447_s2 + $0x2b8] sm:$0xff]  ;;  %v1205_v15 = vpack.c.bf16 %v631_v8, %v629_v6  ;;  %v641_v44 = vld [vmem:[%s5447_s2 + $0xd60] sm:$0xff]  ;;  %v643_v47 = vld [vmem:[%s5447_s2 + $0xd70] sm:$0xff] }
  0x42   :  { %1641 = vmatpush1.bf16.msra.mxu0 %v1187_v22  ;;  %1446 = vmatprep.subr.bf16.mxu1 %v1030_v23  ;;  %v618_v22 = vld [vmem:[%s5447_s2 + $0xca8] sm:$0xff]  ;;  %v620_v23 = vld [vmem:[%s5447_s2 + $0xcb8] sm:$0xff]  ;;  %v1040_v27 = vpack.c.bf16 %v300_v21, %v298_v20  ;;  %v633_v20 = vld [vmem:[%s5447_s2 + $0xd20] sm:$0xff]  ;;  %v1211_v54 = vpack.c.bf16 %v643_v47, %v641_v44 }
  0x43   :  { %1651 = vmatprep.subr.bf16.mxu0 %v1190_v28  ;;  %v297_v28 = vld [vmem:[%s5447_s2 + $0x2a0] sm:$0xff]  ;;  %v1200_v31 = vpack.c.bf16 %v620_v23, %v618_v22  ;;  %v635_v22 = vld [vmem:[%s5447_s2 + $0xd30] sm:$0xff]  ;;  %v318_v23 = vld [vmem:[%s5447_s2 + $0x348] sm:$0xff] }
  0x44   :  { %1438 = vmatmul.mubr.bf16.vlgmr.msra.gmra.mrb[0].mxu1 %v188_v33  ;;  %v302_v33 = vld [vmem:[%s5447_s2 + $0x2c8] sm:$0xff]  ;;  %v647_v60 = vld [vmem:[%s5447_s2 + $0xd90] sm:$0xff]  ;;  %v341_v44 = vld [vmem:[%s5447_s2 + $0x400] sm:$0xff] }
  0x45   :  { %1447 = vmatpush1.bf16.msra.mxu1 %v1029_v36  ;;  %1643 = vmatmul.mubr.bf16.vlgmr.msra.gmra.mrb[0].mxu0 %v198_v37  ;;  %v624_v36 = vld [vmem:[%s5447_s2 + $0xcd8] sm:$0xff]  ;;  %v1039_v37 = vpack.c.bf16 %v299_v29, %v297_v28  ;;  %v1042_v25 = vpack.c.bf16 %v304_v34, %v302_v33  ;;  %v1207_v29 = vpack.c.bf16 %v635_v22, %v633_v20  ;;  %v637_v33 = vld [vmem:[%s5447_s2 + $0xd40] sm:$0xff]  ;;  %v326_v48 = vld [vmem:[%s5447_s2 + $0x388] sm:$0xff] }
  0x46   :  { %1652 = vmatpush1.bf16.msra.mxu0 %v1189_v38  ;;  %1448 = vmatprep.subr.bf16.mxu1 %v1032_v40  ;;  %v301_v38 = vld [vmem:[%s5447_s2 + $0x2c0] sm:$0xff]  ;;  %v1199_v40 = vpack.c.bf16 %v619_v32, %v617_v30  ;;  %v1202_v39 = vpack.c.bf16 %v624_v36, %v622_v35  ;;  %v319_v32 = vld [vmem:[%s5447_s2 + $0x350] sm:$0xff]  ;;  %v322_v36 = vld [vmem:[%s5447_s2 + $0x368] sm:$0xff] }
  0x47   :  { %1653 = vmatprep.subr.bf16.mxu0 %v1192_v43  ;;  %1478 = vmatprep.mubr.bf16.mxu1 %v191_v46  ;;  %v623_v43 = vld [vmem:[%s5447_s2 + $0xcd0] sm:$0xff]  ;;  %v3211_v46 = vld [vmem:[%s5445_s0 + $0x18] sm:$0xff]  ;;  %v661_v47 = vld [vmem:[%s5447_s2 + $0xe00] sm:$0xff] }
  0x48   :  { %v639_v35 = vld [vmem:[%s5447_s2 + $0xd50] sm:$0xff] }
  0x49   :  { %1449 = vmatpush1.bf16.msra.mxu1 %v1031_v49  ;;  %v3221_v49 = vrot.slane %v3211_v46, %v2894_v11  ;;  %v331_v6 = vld [vmem:[%s5447_s2 + $0x3b0] sm:$0xff] }
  0x4a   :  { %1654 = vmatpush1.bf16.msra.mxu0 %v1191_v50  ;;  %1450 = vmatprep.subr.bf16.mxu1 %v1034_v51  ;;  %v1041_v50 = vpack.c.bf16 %v303_v41, %v301_v38  ;;  %v1201_v51 = vpack.c.bf16 %v623_v43, %v621_v42  ;;  %v642_v38 = vld [vmem:[%s5447_s2 + $0xd68] sm:$0xff]  ;;  %v1209_v41 = vpack.c.bf16 %v639_v35, %v637_v33  ;;  %v321_v43 = vld [vmem:[%s5447_s2 + $0x360] sm:$0xff]  ;;  %v335_v20 = vld [vmem:[%s5447_s2 + $0x3d0] sm:$0xff] }
  0x4b   :  { %1655 = vmatprep.subr.bf16.mxu0 %v1194_v55  ;;  %v625_v55 = vld [vmem:[%s5447_s2 + $0xce0] sm:$0xff]  ;;  %v120_v56 = vcombine.high %v3221_v49, %v3221_v49 }
  0x4c   :  { %v1203_v2 = vpack.c.bf16 %v627_v58, %v625_v55  ;;  %v645_v58 = vld [vmem:[%s5447_s2 + $0xd80] sm:$0xff] }
  0x4d   :  { %1451 = vmatpush1.bf16.msra.mxu1 %v1033_v61  ;;  %v630_v61 = vld [vmem:[%s5447_s2 + $0xd08] sm:$0xff]  ;;  %v337_v33 = vld [vmem:[%s5447_s2 + $0x3e0] sm:$0xff] }
  0x4e   :  { %1656 = vmatpush1.bf16.msra.mxu0 %v1193_v63  ;;  %1452 = vmatprep.subr.bf16.mxu1 %v1036_v0  ;;  %v632_v63 = vld [vmem:[%s5447_s2 + $0xd18] sm:$0xff]  ;;  %v201_v0 = vpack.c.bf16 %v120_v56, %v120_v56  ;;  %v325_v56 = vld [vmem:[%s5447_s2 + $0x380] sm:$0xff] }
  0x4f   :  { %1657 = vmatprep.subr.bf16.mxu0 %v1196_v4  ;;  %v309_v4 = vld [vmem:[%s5447_s2 + $0x300] sm:$0xff]  ;;  %v1206_v7 = vpack.c.bf16 %v632_v63, %v630_v61  ;;  %v330_v61 = vld [vmem:[%s5447_s2 + $0x3a8] sm:$0xff]  ;;  %v332_v63 = vld [vmem:[%s5447_s2 + $0x3b8] sm:$0xff] }
  0x50   :  { %1683 = vmatprep.mubr.bf16.mxu0 %v201_v0  ;;  %v1045_v14 = vpack.c.bf16 %v311_v5, %v309_v4  ;;  %v650_v0 = vld [vmem:[%s5447_s2 + $0xda8] sm:$0xff]  ;;  %v1056_v4 = vpack.c.bf16 %v332_v63, %v330_v61  ;;  %v329_v5 = vld [vmem:[%s5447_s2 + $0x3a0] sm:$0xff]  ;;  %v347_v61 = vld [vmem:[%s5447_s2 + $0x430] sm:$0xff] }
  0x51   :  { %1453 = vmatpush1.bf16.msra.mxu1 %v1035_v10  ;;  %v316_v10 = vld [vmem:[%s5447_s2 + $0x338] sm:$0xff]  ;;  %v665_v63 = vld [vmem:[%s5447_s2 + $0xe20] sm:$0xff] }
  0x52   :  { %1658 = vmatpush1.bf16.msra.mxu0 %v1195_v12  ;;  %1454 = vmatprep.subr.bf16.mxu1 %v1038_v13  ;;  %v634_v12 = vld [vmem:[%s5447_s2 + $0xd28] sm:$0xff]  ;;  %v636_v13 = vld [vmem:[%s5447_s2 + $0xd38] sm:$0xff]  ;;  %v1048_v16 = vpack.c.bf16 %v316_v10, %v314_v9  ;;  %v651_v9 = vld [vmem:[%s5447_s2 + $0xdb0] sm:$0xff] }
  0x53   :  { %1659 = vmatprep.subr.bf16.mxu0 %v1198_v17  ;;  %v313_v17 = vld [vmem:[%s5447_s2 + $0x320] sm:$0xff]  ;;  %v1208_v21 = vpack.c.bf16 %v636_v13, %v634_v12  ;;  %v334_v10 = vld [vmem:[%s5447_s2 + $0x3c8] sm:$0xff]  ;;  %v336_v12 = vld [vmem:[%s5447_s2 + $0x3d8] sm:$0xff] }
  0x54   :  { %v1047_v28 = vpack.c.bf16 %v315_v19, %v313_v17  ;;  %v654_v13 = vld [vmem:[%s5447_s2 + $0xdc8] sm:$0xff]  ;;  %v1058_v17 = vpack.c.bf16 %v336_v12, %v334_v10  ;;  %v333_v19 = vld [vmem:[%s5447_s2 + $0x3c0] sm:$0xff] }
  0x55   :  { %1455 = vmatpush1.bf16.msra.mxu1 %v1037_v24  ;;  %v320_v24 = vld [vmem:[%s5447_s2 + $0x358] sm:$0xff] }
  0x56   :  { %1660 = vmatpush1.bf16.msra.mxu0 %v1197_v26  ;;  %1456 = vmatprep.subr.bf16.mxu1 %v1040_v27  ;;  %v638_v26 = vld [vmem:[%s5447_s2 + $0xd48] sm:$0xff]  ;;  %v640_v27 = vld [vmem:[%s5447_s2 + $0xd58] sm:$0xff]  ;;  %v1050_v30 = vpack.c.bf16 %v320_v24, %v318_v23  ;;  %v655_v23 = vld [vmem:[%s5447_s2 + $0xdd0] sm:$0xff] }
  0x57   :  { %1661 = vmatprep.subr.bf16.mxu0 %v1200_v31  ;;  %v317_v31 = vld [vmem:[%s5447_s2 + $0x340] sm:$0xff]  ;;  %v1210_v34 = vpack.c.bf16 %v640_v27, %v638_v26  ;;  %v338_v24 = vld [vmem:[%s5447_s2 + $0x3e8] sm:$0xff]  ;;  %v340_v26 = vld [vmem:[%s5447_s2 + $0x3f8] sm:$0xff]  ;;  %v105_v27 = vcombine.high %v3211_v46, %v3211_v46 }
  0x58   :  { %v339_v46 = vld [vmem:[%s5447_s2 + $0x3f0] sm:$0xff] }
  0x59   :  { %1457 = vmatpush1.bf16.msra.mxu1 %v1039_v37  ;;  %v324_v37 = vld [vmem:[%s5447_s2 + $0x378] sm:$0xff] }
  0x5a   :  { %1662 = vmatpush1.bf16.msra.mxu0 %v1199_v40  ;;  %1458 = vmatprep.subr.bf16.mxu1 %v1042_v25  ;;  %v644_v40 = vld [vmem:[%s5447_s2 + $0xd78] sm:$0xff]  ;;  %v1049_v25 = vpack.c.bf16 %v319_v32, %v317_v31  ;;  %v1052_v42 = vpack.c.bf16 %v324_v37, %v322_v36  ;;  %v1060_v32 = vpack.c.bf16 %v340_v26, %v338_v24  ;;  %v659_v36 = vld [vmem:[%s5447_s2 + $0xdf0] sm:$0xff]  ;;  %v342_v37 = vld [vmem:[%s5447_s2 + $0x408] sm:$0xff] }
  0x5b   :  { %1663 = vmatprep.subr.bf16.mxu0 %v1202_v39  ;;  %v323_v39 = vld [vmem:[%s5447_s2 + $0x370] sm:$0xff]  ;;  %v1212_v45 = vpack.c.bf16 %v644_v40, %v642_v38  ;;  %v344_v38 = vld [vmem:[%s5447_s2 + $0x418] sm:$0xff]  ;;  %v3438_v40 = vrot.slane %v105_v27, %v2894_v11 }
  0x5c   :  { %v1051_v53 = vpack.c.bf16 %v323_v39, %v321_v43  ;;  %v1062_v39 = vpack.c.bf16 %v344_v38, %v342_v37 }
  0x5d   :  { %1459 = vmatpush1.bf16.msra.mxu1 %v1041_v50  ;;  %v328_v50 = vld [vmem:[%s5447_s2 + $0x398] sm:$0xff] }
  0x5e   :  { %1664 = vmatpush1.bf16.msra.mxu0 %v1201_v51  ;;  %1460 = vmatprep.subr.bf16.mxu1 %v1044_v52  ;;  %v646_v51 = vld [vmem:[%s5447_s2 + $0xd88] sm:$0xff]  ;;  %v648_v52 = vld [vmem:[%s5447_s2 + $0xd98] sm:$0xff]  ;;  %v1054_v55 = vpack.c.bf16 %v328_v50, %v326_v48  ;;  %v663_v50 = vld [vmem:[%s5447_s2 + $0xe10] sm:$0xff] }
  0x5f   :  { %1665 = vmatprep.subr.bf16.mxu0 %v1204_v57  ;;  %v327_v57 = vld [vmem:[%s5447_s2 + $0x390] sm:$0xff]  ;;  %v1214_v59 = vpack.c.bf16 %v648_v52, %v646_v51  ;;  %v346_v51 = vld [vmem:[%s5447_s2 + $0x428] sm:$0xff]  ;;  %v348_v52 = vld [vmem:[%s5447_s2 + $0x438] sm:$0xff] }
  0x61   :  { %1461 = vmatpush1.bf16.msra.mxu1 %v1043_v1  ;;  %v652_v1 = vld [vmem:[%s5447_s2 + $0xdb8] sm:$0xff] }
  0x62   :  { %1666 = vmatpush1.bf16.msra.mxu0 %v1203_v2  ;;  %1462 = vmatprep.subr.bf16.mxu1 %v1046_v3  ;;  %v1053_v2 = vpack.c.bf16 %v327_v57, %v325_v56  ;;  %v1213_v3 = vpack.c.bf16 %v647_v60, %v645_v58  ;;  %v1216_v8 = vpack.c.bf16 %v652_v1, %v650_v0  ;;  %v668_v56 = vld [vmem:[%s5447_s2 + $0xe38] sm:$0xff]  ;;  %v667_v1 = vld [vmem:[%s5447_s2 + $0xe30] sm:$0xff] }
  0x63   :  { %1667 = vmatprep.subr.bf16.mxu0 %v1206_v7  ;;  %v649_v7 = vld [vmem:[%s5447_s2 + $0xda0] sm:$0xff]  ;;  %v200_v58 = vpack.c.bf16 %v3221_v49, %v3221_v49  ;;  %v1064_v60 = vpack.c.bf16 %v348_v52, %v346_v51  ;;  %v3488_v49 = vld [vmem:[%s5445_s0 + $0x8] sm:$0xff]  ;;  %v1223_v10 = vpack.c.bf16 %v667_v1, %v665_v63 }
  0x64   :  { %v365_v1 = vld [vmem:[%s5447_s2 + $0x4c0] sm:$0xff] }
  0x65   :  { %1463 = vmatpush1.bf16.msra.mxu1 %v1045_v14  ;;  %v656_v14 = vld [vmem:[%s5447_s2 + $0xdd8] sm:$0xff] }
  0x66   :  { %1668 = vmatpush1.bf16.msra.mxu0 %v1205_v15  ;;  %1464 = vmatprep.subr.bf16.mxu1 %v1048_v16  ;;  %v1055_v15 = vpack.c.bf16 %v331_v6, %v329_v5  ;;  %v1215_v16 = vpack.c.bf16 %v651_v9, %v649_v7  ;;  %v1218_v22 = vpack.c.bf16 %v656_v14, %v654_v13  ;;  %v670_v6 = vld [vmem:[%s5447_s2 + $0xe48] sm:$0xff]  ;;  %v672_v7 = vld [vmem:[%s5447_s2 + $0xe58] sm:$0xff]  ;;  %v349_v13 = vld [vmem:[%s5447_s2 + $0x440] sm:$0xff] }
  0x67   :  { %1669 = vmatprep.subr.bf16.mxu0 %v1208_v21  ;;  %v653_v21 = vld [vmem:[%s5447_s2 + $0xdc0] sm:$0xff]  ;;  %v351_v14 = vld [vmem:[%s5447_s2 + $0x450] sm:$0xff] }
  0x68   :  { %v1217_v31 = vpack.c.bf16 %v655_v23, %v653_v21  ;;  %v676_v23 = vld [vmem:[%s5447_s2 + $0xe78] sm:$0xff]  ;;  %v1065_v24 = vpack.c.bf16 %v351_v14, %v349_v13 }
  0x69   :  { %1465 = vmatpush1.bf16.msra.mxu1 %v1047_v28  ;;  %v658_v28 = vld [vmem:[%s5447_s2 + $0xde8] sm:$0xff] }
  0x6a   :  { %1670 = vmatpush1.bf16.msra.mxu0 %v1207_v29  ;;  %1466 = vmatprep.subr.bf16.mxu1 %v1050_v30  ;;  %v660_v29 = vld [vmem:[%s5447_s2 + $0xdf8] sm:$0xff]  ;;  %v1057_v30 = vpack.c.bf16 %v335_v20, %v333_v19  ;;  %v354_v19 = vld [vmem:[%s5447_s2 + $0x468] sm:$0xff] }
  0x6b   :  { %1671 = vmatprep.subr.bf16.mxu0 %v1210_v34  ;;  %v657_v34 = vld [vmem:[%s5447_s2 + $0xde0] sm:$0xff]  ;;  %v1220_v35 = vpack.c.bf16 %v660_v29, %v658_v28  ;;  %v356_v20 = vld [vmem:[%s5447_s2 + $0x478] sm:$0xff]  ;;  %v355_v29 = vld [vmem:[%s5447_s2 + $0x470] sm:$0xff] }
  0x6c   :  { %v1219_v43 = vpack.c.bf16 %v659_v36, %v657_v34  ;;  %v1068_v27 = vpack.c.bf16 %v356_v20, %v354_v19  ;;  %v353_v28 = vld [vmem:[%s5447_s2 + $0x460] sm:$0xff]  ;;  %v678_v34 = vld [vmem:[%s5447_s2 + $0xe88] sm:$0xff]  ;;  %v691_v20 = vld [vmem:[%s5447_s2 + $0xef0] sm:$0xff] }
  0x6d   :  { %1467 = vmatpush1.bf16.msra.mxu1 %v1049_v25  ;;  %v662_v25 = vld [vmem:[%s5447_s2 + $0xe08] sm:$0xff]  ;;  %v1067_v36 = vpack.c.bf16 %v355_v29, %v353_v28  ;;  %v373_v29 = vld [vmem:[%s5447_s2 + $0x500] sm:$0xff] }
  0x6e   :  { %1672 = vmatpush1.bf16.msra.mxu0 %v1209_v41  ;;  %1468 = vmatprep.subr.bf16.mxu1 %v1052_v42  ;;  %v664_v41 = vld [vmem:[%s5447_s2 + $0xe18] sm:$0xff]  ;;  %v1059_v42 = vpack.c.bf16 %v339_v46, %v337_v33  ;;  %v358_v33 = vld [vmem:[%s5447_s2 + $0x488] sm:$0xff] }
  0x6f   :  { %1673 = vmatprep.subr.bf16.mxu0 %v1212_v45  ;;  %v343_v45 = vld [vmem:[%s5447_s2 + $0x410] sm:$0xff]  ;;  %v1222_v48 = vpack.c.bf16 %v664_v41, %v662_v25  ;;  %v360_v46 = vld [vmem:[%s5447_s2 + $0x498] sm:$0xff]  ;;  %v357_v25 = vld [vmem:[%s5447_s2 + $0x480] sm:$0xff] }
  0x70   :  { %v1061_v57 = vpack.c.bf16 %v343_v45, %v341_v44  ;;  %v1070_v38 = vpack.c.bf16 %v360_v46, %v358_v33  ;;  %v359_v41 = vld [vmem:[%s5447_s2 + $0x490] sm:$0xff]  ;;  %v362_v44 = vld [vmem:[%s5447_s2 + $0x4a8] sm:$0xff]  ;;  %v364_v45 = vld [vmem:[%s5447_s2 + $0x4b8] sm:$0xff] }
  0x71   :  { %1469 = vmatpush1.bf16.msra.mxu1 %v1051_v53  ;;  %v121_v53 = vcombine.high %v3438_v40, %v3438_v40  ;;  %v1072_v52 = vpack.c.bf16 %v364_v45, %v362_v44  ;;  %v695_v33 = vld [vmem:[%s5447_s2 + $0xf10] sm:$0xff]  ;;  %v378_v46 = vld [vmem:[%s5447_s2 + $0x528] sm:$0xff] }
  0x72   :  { %1674 = vmatpush1.bf16.msra.mxu0 %v1211_v54  ;;  %1470 = vmatprep.subr.bf16.mxu1 %v1054_v55  ;;  %v190_v54 = vpack.c.bf16 %v3032_v18, %v3032_v18  ;;  %v666_v55 = vld [vmem:[%s5447_s2 + $0xe28] sm:$0xff]  ;;  %v1221_v18 = vpack.c.bf16 %v663_v50, %v661_v47  ;;  %v1069_v50 = vpack.c.bf16 %v359_v41, %v357_v25  ;;  %v377_v41 = vld [vmem:[%s5447_s2 + $0x520] sm:$0xff]  ;;  %v699_v44 = vld [vmem:[%s5447_s2 + $0xf30] sm:$0xff] }
  0x73   :  { %1675 = vmatprep.subr.bf16.mxu0 %v1214_v59  ;;  %v345_v59 = vld [vmem:[%s5447_s2 + $0x420] sm:$0xff]  ;;  %v1224_v0 = vpack.c.bf16 %v668_v56, %v666_v55  ;;  %v203_v5 = vpack.c.bf16 %v121_v53, %v121_v53  ;;  %v682_v47 = vld [vmem:[%s5447_s2 + $0xea8] sm:$0xff] }
  0x74   :  { %v361_v53 = vld [vmem:[%s5447_s2 + $0x4a0] sm:$0xff]  ;;  %v382_v45 = vld [vmem:[%s5447_s2 + $0x548] sm:$0xff] }
  0x75   :  { %1471 = vmatpush1.bf16.msra.mxu1 %v1053_v2  ;;  %v350_v2 = vld [vmem:[%s5447_s2 + $0x448] sm:$0xff]  ;;  %v681_v55 = vld [vmem:[%s5447_s2 + $0xea0] sm:$0xff] }
  0x76   :  { %1676 = vmatpush1.bf16.msra.mxu0 %v1213_v3  ;;  %1472 = vmatprep.subr.bf16.mxu1 %v1056_v4  ;;  %v352_v3 = vld [vmem:[%s5447_s2 + $0x458] sm:$0xff]  ;;  %v3501_v4 = vrot.slane %v3488_v49, %v2894_v11 }
  0x77   :  { %1677 = vmatprep.subr.bf16.mxu0 %v1216_v8  ;;  %v1063_v8 = vpack.c.bf16 %v347_v61, %v345_v59  ;;  %v1066_v12 = vpack.c.bf16 %v352_v3, %v350_v2  ;;  %v368_v59 = vld [vmem:[%s5447_s2 + $0x4d8] sm:$0xff]  ;;  %v367_v2 = vld [vmem:[%s5447_s2 + $0x4d0] sm:$0xff]  ;;  %v685_v3 = vld [vmem:[%s5447_s2 + $0xec0] sm:$0xff] }
  0x78   :  { %v86_v9 = vcombine.high %v3501_v4, %v3501_v4 }
  0x79   :  { %1473 = vmatpush1.bf16.msra.mxu1 %v1055_v15  ;;  %v669_v15 = vld [vmem:[%s5447_s2 + $0xe40] sm:$0xff] }
  0x7a   :  { %1678 = vmatpush1.bf16.msra.mxu0 %v1215_v16  ;;  %1474 = vmatprep.subr.bf16.mxu1 %v1058_v17  ;;  %v1226_v16 = vpack.c.bf16 %v672_v7, %v670_v6  ;;  %v671_v17 = vld [vmem:[%s5447_s2 + $0xe50] sm:$0xff]  ;;  %v193_v21 = vpack.c.bf16 %v86_v9, %v86_v9  ;;  %v370_v7 = vld [vmem:[%s5447_s2 + $0x4e8] sm:$0xff] }
  0x7b   :  { %1679 = vmatprep.subr.bf16.mxu0 %v1218_v22  ;;  %v674_v22 = vld [vmem:[%s5447_s2 + $0xe68] sm:$0xff]  ;;  %v1225_v26 = vpack.c.bf16 %v671_v17, %v669_v15  ;;  %v687_v6 = vld [vmem:[%s5447_s2 + $0xed0] sm:$0xff]  ;;  %v369_v15 = vld [vmem:[%s5447_s2 + $0x4e0] sm:$0xff] }
  0x7c   :  { %v690_v9 = vld [vmem:[%s5447_s2 + $0xee8] sm:$0xff]  ;;  %v1233_v13 = vpack.c.bf16 %v687_v6, %v685_v3  ;;  %v689_v17 = vld [vmem:[%s5447_s2 + $0xee0] sm:$0xff]  ;;  %v387_v3 = vld [vmem:[%s5447_s2 + $0x570] sm:$0xff] }
  0x7d   :  { %1475 = vmatpush1.bf16.msra.mxu1 %v1057_v30  ;;  %v673_v30 = vld [vmem:[%s5447_s2 + $0xe60] sm:$0xff] }
  0x7e   :  { %1680 = vmatpush1.bf16.msra.mxu0 %v1217_v31  ;;  %1476 = vmatprep.subr.bf16.mxu1 %v1060_v32  ;;  %v1228_v31 = vpack.c.bf16 %v676_v23, %v674_v22  ;;  %v675_v32 = vld [vmem:[%s5447_s2 + $0xe70] sm:$0xff]  ;;  %v376_v22 = vld [vmem:[%s5447_s2 + $0x518] sm:$0xff]  ;;  %v694_v23 = vld [vmem:[%s5447_s2 + $0xf08] sm:$0xff] }
  0x7f   :  { %1681 = vmatprep.subr.bf16.mxu0 %v1220_v35  ;;  %v680_v35 = vld [vmem:[%s5447_s2 + $0xe98] sm:$0xff]  ;;  %v1227_v37 = vpack.c.bf16 %v675_v32, %v673_v30  ;;  %v375_v30 = vld [vmem:[%s5447_s2 + $0x510] sm:$0xff] }
  0x81   :  { %1477 = vmatpush1.bf16.msra.mxu1 %v1059_v42  ;;  %v677_v42 = vld [vmem:[%s5447_s2 + $0xe80] sm:$0xff] }
  0x82   :  { %1682 = vmatpush1.bf16.msra.mxu0 %v1219_v43  ;;  %1487 = vmatprep.subr.bf16.mxu1 %v1062_v39  ;;  %v1230_v43 = vpack.c.bf16 %v680_v35, %v678_v34  ;;  %v679_v39 = vld [vmem:[%s5447_s2 + $0xe90] sm:$0xff]  ;;  %v380_v34 = vld [vmem:[%s5447_s2 + $0x538] sm:$0xff]  ;;  %v698_v35 = vld [vmem:[%s5447_s2 + $0xf28] sm:$0xff] }
  0x83   :  { %1692 = vmatprep.subr.bf16.mxu0 %v1222_v48  ;;  %v684_v48 = vld [vmem:[%s5447_s2 + $0xeb8] sm:$0xff]  ;;  %v1229_v51 = vpack.c.bf16 %v679_v39, %v677_v42  ;;  %v1080_v25 = vpack.c.bf16 %v380_v34, %v378_v46  ;;  %v379_v42 = vld [vmem:[%s5447_s2 + $0x530] sm:$0xff]  ;;  %v398_v34 = vld [vmem:[%s5447_s2 + $0x5c8] sm:$0xff] }
  0x84   :  { %1479 = vmatmul.mubr.bf16.vlgmr.msra.gmra.mrb[0].mxu1 %v190_v54  ;;  %v363_v54 = vld [vmem:[%s5447_s2 + $0x4b0] sm:$0xff]  ;;  %v1232_v56 = vpack.c.bf16 %v684_v48, %v682_v47  ;;  %v384_v47 = vld [vmem:[%s5447_s2 + $0x558] sm:$0xff]  ;;  %v702_v48 = vld [vmem:[%s5447_s2 + $0xf48] sm:$0xff] }
  0x85   :  { %1488 = vmatpush1.bf16.msra.mxu1 %v1061_v57  ;;  %1684 = vmatmul.mubr.bf16.vlgmr.msra.gmra.mrb[0].mxu0 %v200_v58  ;;  %v683_v57 = vld [vmem:[%s5447_s2 + $0xeb0] sm:$0xff]  ;;  %v366_v58 = vld [vmem:[%s5447_s2 + $0x4c8] sm:$0xff]  ;;  %v1071_v61 = vpack.c.bf16 %v363_v54, %v361_v53  ;;  %v1082_v53 = vpack.c.bf16 %v384_v47, %v382_v45  ;;  %v381_v54 = vld [vmem:[%s5447_s2 + $0x540] sm:$0xff] }
  0x86   :  { %1693 = vmatpush1.bf16.msra.mxu0 %v1221_v18  ;;  %1489 = vmatprep.subr.bf16.mxu1 %v1064_v60  ;;  %v686_v18 = vld [vmem:[%s5447_s2 + $0xec8] sm:$0xff]  ;;  %v688_v60 = vld [vmem:[%s5447_s2 + $0xed8] sm:$0xff]  ;;  %v1231_v63 = vpack.c.bf16 %v683_v57, %v681_v55  ;;  %v383_v55 = vld [vmem:[%s5447_s2 + $0x550] sm:$0xff] }
  0x87   :  { %1694 = vmatprep.subr.bf16.mxu0 %v1224_v0  ;;  %1724 = vmatprep.mubr.bf16.mxu0 %v203_v5  ;;  %v1074_v0 = vpack.c.bf16 %v368_v59, %v366_v58  ;;  %v1234_v5 = vpack.c.bf16 %v688_v60, %v686_v18  ;;  %v703_v58 = vld [vmem:[%s5447_s2 + $0xf50] sm:$0xff]  ;;  %v386_v59 = vld [vmem:[%s5447_s2 + $0x568] sm:$0xff]  ;;  %v388_v18 = vld [vmem:[%s5447_s2 + $0x578] sm:$0xff] }
  0x88   :  { %1519 = vmatprep.mubr.bf16.mxu1 %v193_v21  ;;  %v374_v21 = vld [vmem:[%s5447_s2 + $0x508] sm:$0xff]  ;;  %v715_v46 = vld [vmem:[%s5447_s2 + $0xfb0] sm:$0xff] }
  0x89   :  { %1490 = vmatpush1.bf16.msra.mxu1 %v1063_v8  ;;  %v372_v8 = vld [vmem:[%s5447_s2 + $0x4f8] sm:$0xff]  ;;  %v1078_v28 = vpack.c.bf16 %v376_v22, %v374_v21  ;;  %v706_v60 = vld [vmem:[%s5447_s2 + $0xf68] sm:$0xff]  ;;  %v711_v21 = vld [vmem:[%s5447_s2 + $0xf90] sm:$0xff] }
  0x8a   :  { %1695 = vmatpush1.bf16.msra.mxu0 %v1223_v10  ;;  %1491 = vmatprep.subr.bf16.mxu1 %v1066_v12  ;;  %v692_v10 = vld [vmem:[%s5447_s2 + $0xef8] sm:$0xff]  ;;  %v1073_v12 = vpack.c.bf16 %v367_v2, %v365_v1  ;;  %v1076_v14 = vpack.c.bf16 %v372_v8, %v370_v7  ;;  %v1084_v1 = vpack.c.bf16 %v388_v18, %v386_v59  ;;  %v385_v2 = vld [vmem:[%s5447_s2 + $0x560] sm:$0xff]  ;;  %v707_v7 = vld [vmem:[%s5447_s2 + $0xf70] sm:$0xff] }
  0x8b   :  { %1696 = vmatprep.subr.bf16.mxu0 %v1226_v16  ;;  %v371_v16 = vld [vmem:[%s5447_s2 + $0x4f0] sm:$0xff]  ;;  %v1236_v19 = vpack.c.bf16 %v692_v10, %v690_v9  ;;  %v390_v8 = vld [vmem:[%s5447_s2 + $0x588] sm:$0xff]  ;;  %v392_v9 = vld [vmem:[%s5447_s2 + $0x598] sm:$0xff] }
  0x8c   :  { %v710_v10 = vld [vmem:[%s5447_s2 + $0xf88] sm:$0xff]  ;;  %v719_v45 = vld [vmem:[%s5447_s2 + $0xfd0] sm:$0xff] }
  0x8d   :  { %1492 = vmatpush1.bf16.msra.mxu1 %v1065_v24  ;;  %v696_v24 = vld [vmem:[%s5447_s2 + $0xf18] sm:$0xff]  ;;  %v394_v22 = vld [vmem:[%s5447_s2 + $0x5a8] sm:$0xff]  ;;  %v723_v18 = vld [vmem:[%s5447_s2 + $0xff0] sm:$0xff] }
  0x8e   :  { %1697 = vmatpush1.bf16.msra.mxu0 %v1225_v26  ;;  %1493 = vmatprep.subr.bf16.mxu1 %v1068_v27  ;;  %v1075_v26 = vpack.c.bf16 %v371_v16, %v369_v15  ;;  %v1235_v27 = vpack.c.bf16 %v691_v20, %v689_v17  ;;  %v1238_v32 = vpack.c.bf16 %v696_v24, %v694_v23  ;;  %v389_v16 = vld [vmem:[%s5447_s2 + $0x580] sm:$0xff]  ;;  %v391_v17 = vld [vmem:[%s5447_s2 + $0x590] sm:$0xff]  ;;  %v396_v23 = vld [vmem:[%s5447_s2 + $0x5b8] sm:$0xff] }
  0x8f   :  { %1698 = vmatprep.subr.bf16.mxu0 %v1228_v31  ;;  %v693_v31 = vld [vmem:[%s5447_s2 + $0xf00] sm:$0xff]  ;;  %v1086_v15 = vpack.c.bf16 %v392_v9, %v390_v8  ;;  %v714_v24 = vld [vmem:[%s5447_s2 + $0xfa8] sm:$0xff]  ;;  %v407_v8 = vld [vmem:[%s5447_s2 + $0x610] sm:$0xff] }
  0x90   :  { %v402_v47 = vld [vmem:[%s5447_s2 + $0x5e8] sm:$0xff]  ;;  %v725_v9 = vld [vmem:[%s5447_s2 + $0x1000] sm:$0xff] }
  0x91   :  { %1494 = vmatpush1.bf16.msra.mxu1 %v1067_v36  ;;  %v700_v36 = vld [vmem:[%s5447_s2 + $0xf38] sm:$0xff] }
  0x92   :  { %1699 = vmatpush1.bf16.msra.mxu0 %v1227_v37  ;;  %1495 = vmatprep.subr.bf16.mxu1 %v1070_v38  ;;  %v1077_v37 = vpack.c.bf16 %v375_v30, %v373_v29  ;;  %v1237_v38 = vpack.c.bf16 %v695_v33, %v693_v31  ;;  %v1240_v39 = vpack.c.bf16 %v700_v36, %v698_v35  ;;  %v393_v30 = vld [vmem:[%s5447_s2 + $0x5a0] sm:$0xff]  ;;  %v395_v31 = vld [vmem:[%s5447_s2 + $0x5b0] sm:$0xff]  ;;  %v400_v35 = vld [vmem:[%s5447_s2 + $0x5d8] sm:$0xff] }
  0x93   :  { %1700 = vmatprep.subr.bf16.mxu0 %v1230_v43  ;;  %v697_v43 = vld [vmem:[%s5447_s2 + $0xf20] sm:$0xff]  ;;  %v1088_v29 = vpack.c.bf16 %v396_v23, %v394_v22  ;;  %v718_v36 = vld [vmem:[%s5447_s2 + $0xfc8] sm:$0xff]  ;;  %v202_v22 = vpack.c.bf16 %v3438_v40, %v3438_v40  ;;  %v731_v40 = vld [vmem:[%s5447_s2 + $0x1030] sm:$0xff] }
  0x95   :  { %1496 = vmatpush1.bf16.msra.mxu1 %v1069_v50  ;;  %v704_v50 = vld [vmem:[%s5447_s2 + $0xf58] sm:$0xff] }
  0x96   :  { %1701 = vmatpush1.bf16.msra.mxu0 %v1229_v51  ;;  %1497 = vmatprep.subr.bf16.mxu1 %v1072_v52  ;;  %v1079_v51 = vpack.c.bf16 %v379_v42, %v377_v41  ;;  %v1239_v52 = vpack.c.bf16 %v699_v44, %v697_v43  ;;  %v1242_v57 = vpack.c.bf16 %v704_v50, %v702_v48  ;;  %v397_v42 = vld [vmem:[%s5447_s2 + $0x5c0] sm:$0xff]  ;;  %v399_v43 = vld [vmem:[%s5447_s2 + $0x5d0] sm:$0xff]  ;;  %v404_v48 = vld [vmem:[%s5447_s2 + $0x5f8] sm:$0xff] }
  0x97   :  { %1702 = vmatprep.subr.bf16.mxu0 %v1232_v56  ;;  %v701_v56 = vld [vmem:[%s5447_s2 + $0xf40] sm:$0xff]  ;;  %v1090_v41 = vpack.c.bf16 %v400_v35, %v398_v34  ;;  %v71_v50 = vcombine.high %v3488_v49, %v3488_v49 }
  0x98   :  { %v401_v49 = vld [vmem:[%s5447_s2 + $0x5e0] sm:$0xff] }
  0x99   :  { %1498 = vmatpush1.bf16.msra.mxu1 %v1071_v61  ;;  %v708_v61 = vld [vmem:[%s5447_s2 + $0xf78] sm:$0xff] }
  0x9a   :  { %1703 = vmatpush1.bf16.msra.mxu0 %v1231_v63  ;;  %1499 = vmatprep.subr.bf16.mxu1 %v1074_v0  ;;  %v1081_v63 = vpack.c.bf16 %v383_v55, %v381_v54  ;;  %v1241_v0 = vpack.c.bf16 %v703_v58, %v701_v56  ;;  %v1244_v6 = vpack.c.bf16 %v708_v61, %v706_v60  ;;  %v3828_v54 = vld [vmem:[%s5445_s0 + $0x20] sm:$0xff]  ;;  %v406_v60 = vld [vmem:[%s5447_s2 + $0x608] sm:$0xff]  ;;  %v408_v61 = vld [vmem:[%s5447_s2 + $0x618] sm:$0xff] }
  0x9b   :  { %1704 = vmatprep.subr.bf16.mxu0 %v1234_v5  ;;  %v705_v5 = vld [vmem:[%s5447_s2 + $0xf60] sm:$0xff]  ;;  %v1092_v56 = vpack.c.bf16 %v404_v48, %v402_v47 }
  0x9c   :  { %v721_v58 = vld [vmem:[%s5447_s2 + $0xfe0] sm:$0xff] }
  0x9d   :  { %1500 = vmatpush1.bf16.msra.mxu1 %v1073_v12  ;;  %v712_v12 = vld [vmem:[%s5447_s2 + $0xf98] sm:$0xff] }
  0x9e   :  { %1705 = vmatpush1.bf16.msra.mxu0 %v1233_v13  ;;  %1501 = vmatprep.subr.bf16.mxu1 %v1076_v14  ;;  %v1083_v13 = vpack.c.bf16 %v387_v3, %v385_v2  ;;  %v1243_v14 = vpack.c.bf16 %v707_v7, %v705_v5  ;;  %v1246_v20 = vpack.c.bf16 %v712_v12, %v710_v10  ;;  %v405_v7 = vld [vmem:[%s5447_s2 + $0x600] sm:$0xff]  ;;  %v727_v12 = vld [vmem:[%s5447_s2 + $0x1010] sm:$0xff] }
  0x9f   :  { %1706 = vmatprep.subr.bf16.mxu0 %v1236_v19  ;;  %v709_v19 = vld [vmem:[%s5447_s2 + $0xf80] sm:$0xff]  ;;  %v3859_v2 = vrot.slane %v3828_v54, %v2894_v11  ;;  %v1251_v5 = vpack.c.bf16 %v723_v18, %v721_v58  ;;  %v1253_v23 = vpack.c.bf16 %v727_v12, %v725_v9  ;;  %v742_v58 = vld [vmem:[%s5447_s2 + $0x1088] sm:$0xff] }
  0xa0   :  { %v746_v9 = vld [vmem:[%s5447_s2 + $0x10a8] sm:$0xff] }
  0xa1   :  { %1502 = vmatpush1.bf16.msra.mxu1 %v1075_v26  ;;  %v716_v26 = vld [vmem:[%s5447_s2 + $0xfb8] sm:$0xff] }
  0xa2   :  { %1707 = vmatpush1.bf16.msra.mxu0 %v1235_v27  ;;  %1503 = vmatprep.subr.bf16.mxu1 %v1078_v28  ;;  %v1085_v27 = vpack.c.bf16 %v391_v17, %v389_v16  ;;  %v1245_v28 = vpack.c.bf16 %v711_v21, %v709_v19  ;;  %v1248_v33 = vpack.c.bf16 %v716_v26, %v714_v24  ;;  %v730_v17 = vld [vmem:[%s5447_s2 + $0x1028] sm:$0xff]  ;;  %v732_v19 = vld [vmem:[%s5447_s2 + $0x1038] sm:$0xff]  ;;  %v409_v24 = vld [vmem:[%s5447_s2 + $0x620] sm:$0xff] }
  0xa3   :  { %1708 = vmatprep.subr.bf16.mxu0 %v1238_v32  ;;  %v713_v32 = vld [vmem:[%s5447_s2 + $0xfa0] sm:$0xff]  ;;  %v192_v16 = vpack.c.bf16 %v3501_v4, %v3501_v4  ;;  %v1093_v21 = vpack.c.bf16 %v407_v8, %v405_v7  ;;  %v411_v26 = vld [vmem:[%s5447_s2 + $0x630] sm:$0xff]  ;;  %v426_v7 = vld [vmem:[%s5447_s2 + $0x6a8] sm:$0xff] }
  0xa4   :  { %v1095_v34 = vpack.c.bf16 %v411_v26, %v409_v24  ;;  %v428_v8 = vld [vmem:[%s5447_s2 + $0x6b8] sm:$0xff] }
  0xa5   :  { %1504 = vmatpush1.bf16.msra.mxu1 %v1077_v37  ;;  %v720_v37 = vld [vmem:[%s5447_s2 + $0xfd8] sm:$0xff] }
  0xa6   :  { %1709 = vmatpush1.bf16.msra.mxu0 %v1237_v38  ;;  %1505 = vmatprep.subr.bf16.mxu1 %v1080_v25  ;;  %v1087_v38 = vpack.c.bf16 %v395_v31, %v393_v30  ;;  %v1247_v25 = vpack.c.bf16 %v715_v46, %v713_v32  ;;  %v1250_v44 = vpack.c.bf16 %v720_v37, %v718_v36  ;;  %v416_v30 = vld [vmem:[%s5447_s2 + $0x658] sm:$0xff]  ;;  %v734_v32 = vld [vmem:[%s5447_s2 + $0x1048] sm:$0xff]  ;;  %v413_v37 = vld [vmem:[%s5447_s2 + $0x640] sm:$0xff] }
  0xa7   :  { %1710 = vmatprep.subr.bf16.mxu0 %v1240_v39  ;;  %v717_v39 = vld [vmem:[%s5447_s2 + $0xfc0] sm:$0xff] }
  0xa8   :  { %v1249_v55 = vpack.c.bf16 %v719_v45, %v717_v39  ;;  %v420_v39 = vld [vmem:[%s5447_s2 + $0x678] sm:$0xff] }
  0xa9   :  { %1506 = vmatpush1.bf16.msra.mxu1 %v1079_v51  ;;  %v722_v51 = vld [vmem:[%s5447_s2 + $0xfe8] sm:$0xff]  ;;  %v740_v45 = vld [vmem:[%s5447_s2 + $0x1078] sm:$0xff] }
  0xaa   :  { %1711 = vmatpush1.bf16.msra.mxu0 %v1239_v52  ;;  %1507 = vmatprep.subr.bf16.mxu1 %v1082_v53  ;;  %v724_v52 = vld [vmem:[%s5447_s2 + $0xff8] sm:$0xff]  ;;  %v1089_v53 = vpack.c.bf16 %v399_v43, %v397_v42  ;;  %v735_v42 = vld [vmem:[%s5447_s2 + $0x1050] sm:$0xff]  ;;  %v418_v43 = vld [vmem:[%s5447_s2 + $0x668] sm:$0xff] }
  0xab   :  { %1712 = vmatprep.subr.bf16.mxu0 %v1242_v57  ;;  %v403_v57 = vld [vmem:[%s5447_s2 + $0x5f0] sm:$0xff]  ;;  %v1252_v59 = vpack.c.bf16 %v724_v52, %v722_v51  ;;  %v417_v51 = vld [vmem:[%s5447_s2 + $0x660] sm:$0xff] }
  0xac   :  { %v1091_v3 = vpack.c.bf16 %v403_v57, %v401_v49  ;;  %v419_v52 = vld [vmem:[%s5447_s2 + $0x670] sm:$0xff]  ;;  %v422_v49 = vld [vmem:[%s5447_s2 + $0x688] sm:$0xff]  ;;  %v424_v57 = vld [vmem:[%s5447_s2 + $0x698] sm:$0xff] }
  0xad   :  { %1508 = vmatpush1.bf16.msra.mxu1 %v1081_v63  ;;  %v3849_v63 = vrot.slane %v71_v50, %v2894_v11  ;;  %v1100_v50 = vpack.c.bf16 %v420_v39, %v418_v43  ;;  %v1099_v18 = vpack.c.bf16 %v419_v52, %v417_v51  ;;  %v755_v43 = vld [vmem:[%s5447_s2 + $0x10f0] sm:$0xff]  ;;  %v438_v39 = vld [vmem:[%s5447_s2 + $0x708] sm:$0xff]  ;;  %v437_v52 = vld [vmem:[%s5447_s2 + $0x700] sm:$0xff] }
  0xae   :  { %1713 = vmatpush1.bf16.msra.mxu0 %v1241_v0  ;;  %1509 = vmatprep.subr.bf16.mxu1 %v1084_v1  ;;  %v726_v0 = vld [vmem:[%s5447_s2 + $0x1008] sm:$0xff]  ;;  %v728_v1 = vld [vmem:[%s5447_s2 + $0x1018] sm:$0xff] }
  0xaf   :  { %1714 = vmatprep.subr.bf16.mxu0 %v1244_v6  ;;  %v1094_v6 = vpack.c.bf16 %v408_v61, %v406_v60  ;;  %v1254_v10 = vpack.c.bf16 %v728_v1, %v726_v0  ;;  %v1102_v61 = vpack.c.bf16 %v424_v57, %v422_v49  ;;  %v421_v0 = vld [vmem:[%s5447_s2 + $0x680] sm:$0xff]  ;;  %v423_v1 = vld [vmem:[%s5447_s2 + $0x690] sm:$0xff]  ;;  %v442_v57 = vld [vmem:[%s5447_s2 + $0x728] sm:$0xff] }
  0xb0   :  { %v1101_v12 = vpack.c.bf16 %v423_v1, %v421_v0  ;;  %v759_v49 = vld [vmem:[%s5447_s2 + $0x1110] sm:$0xff]  ;;  %v441_v1 = vld [vmem:[%s5447_s2 + $0x720] sm:$0xff] }
  0xb1   :  { %1510 = vmatpush1.bf16.msra.mxu1 %v1083_v13  ;;  %v410_v13 = vld [vmem:[%s5447_s2 + $0x628] sm:$0xff] }
  0xb2   :  { %1715 = vmatpush1.bf16.msra.mxu0 %v1243_v14  ;;  %1511 = vmatprep.subr.bf16.mxu1 %v1086_v15  ;;  %v412_v14 = vld [vmem:[%s5447_s2 + $0x638] sm:$0xff]  ;;  %v87_v15 = vcombine.high %v3849_v63, %v3849_v63 }
  0xb3   :  { %1716 = vmatprep.subr.bf16.mxu0 %v1246_v20  ;;  %v137_v20 = vcombine.high %v3859_v2, %v3859_v2  ;;  %v1096_v4 = vpack.c.bf16 %v412_v14, %v410_v13  ;;  %v1104_v14 = vpack.c.bf16 %v428_v8, %v426_v7  ;;  %v763_v7 = vld [vmem:[%s5447_s2 + $0x1130] sm:$0xff]  ;;  %v446_v8 = vld [vmem:[%s5447_s2 + $0x748] sm:$0xff] }
  0xb4   :  { %v195_v31 = vpack.c.bf16 %v87_v15, %v87_v15  ;;  %v425_v15 = vld [vmem:[%s5447_s2 + $0x6a0] sm:$0xff] }
  0xb5   :  { %1512 = vmatpush1.bf16.msra.mxu1 %v1085_v27  ;;  %v729_v27 = vld [vmem:[%s5447_s2 + $0x1020] sm:$0xff]  ;;  %v205_v46 = vpack.c.bf16 %v137_v20, %v137_v20  ;;  %v747_v20 = vld [vmem:[%s5447_s2 + $0x10b0] sm:$0xff] }
  0xb6   :  { %1717 = vmatpush1.bf16.msra.mxu0 %v1245_v28  ;;  %1513 = vmatprep.subr.bf16.mxu1 %v1088_v29  ;;  %v1256_v28 = vpack.c.bf16 %v732_v19, %v730_v17  ;;  %v414_v29 = vld [vmem:[%s5447_s2 + $0x648] sm:$0xff]  ;;  %v1255_v35 = vpack.c.bf16 %v731_v40, %v729_v27  ;;  %v745_v17 = vld [vmem:[%s5447_s2 + $0x10a0] sm:$0xff]  ;;  %v431_v40 = vld [vmem:[%s5447_s2 + $0x6d0] sm:$0xff] }
  0xb7   :  { %1718 = vmatprep.subr.bf16.mxu0 %v1248_v33  ;;  %v736_v33 = vld [vmem:[%s5447_s2 + $0x1058] sm:$0xff]  ;;  %v1098_v36 = vpack.c.bf16 %v416_v30, %v414_v29  ;;  %v1263_v26 = vpack.c.bf16 %v747_v20, %v745_v17  ;;  %v749_v29 = vld [vmem:[%s5447_s2 + $0x10c0] sm:$0xff] }
  0xb9   :  { %1514 = vmatpush1.bf16.msra.mxu1 %v1087_v38  ;;  %v415_v38 = vld [vmem:[%s5447_s2 + $0x650] sm:$0xff] }
  0xba   :  { %1719 = vmatpush1.bf16.msra.mxu0 %v1247_v25  ;;  %1515 = vmatprep.subr.bf16.mxu1 %v1090_v41  ;;  %v733_v25 = vld [vmem:[%s5447_s2 + $0x1040] sm:$0xff]  ;;  %v1258_v41 = vpack.c.bf16 %v736_v33, %v734_v32  ;;  %v1097_v47 = vpack.c.bf16 %v415_v38, %v413_v37  ;;  %v434_v32 = vld [vmem:[%s5447_s2 + $0x6e8] sm:$0xff]  ;;  %v436_v33 = vld [vmem:[%s5447_s2 + $0x6f8] sm:$0xff] }
  0xbb   :  { %1720 = vmatprep.subr.bf16.mxu0 %v1250_v44  ;;  %v738_v44 = vld [vmem:[%s5447_s2 + $0x1068] sm:$0xff]  ;;  %v1257_v48 = vpack.c.bf16 %v735_v42, %v733_v25  ;;  %v1108_v37 = vpack.c.bf16 %v436_v33, %v434_v32  ;;  %v433_v38 = vld [vmem:[%s5447_s2 + $0x6e0] sm:$0xff]  ;;  %v435_v25 = vld [vmem:[%s5447_s2 + $0x6f0] sm:$0xff] }
  0xbd   :  { %1516 = vmatpush1.bf16.msra.mxu1 %v1089_v53  ;;  %v737_v53 = vld [vmem:[%s5447_s2 + $0x1060] sm:$0xff] }
  0xbe   :  { %1721 = vmatpush1.bf16.msra.mxu0 %v1249_v55  ;;  %1517 = vmatprep.subr.bf16.mxu1 %v1092_v56  ;;  %v1260_v55 = vpack.c.bf16 %v740_v45, %v738_v44  ;;  %v739_v56 = vld [vmem:[%s5447_s2 + $0x1070] sm:$0xff]  ;;  %v440_v44 = vld [vmem:[%s5447_s2 + $0x718] sm:$0xff]  ;;  %v758_v45 = vld [vmem:[%s5447_s2 + $0x1108] sm:$0xff] }
  0xbf   :  { %1722 = vmatprep.subr.bf16.mxu0 %v1252_v59  ;;  %v744_v59 = vld [vmem:[%s5447_s2 + $0x1098] sm:$0xff]  ;;  %v1259_v60 = vpack.c.bf16 %v739_v56, %v737_v53  ;;  %v1110_v51 = vpack.c.bf16 %v440_v44, %v438_v39  ;;  %v439_v53 = vld [vmem:[%s5447_s2 + $0x710] sm:$0xff] }
  0xc1   :  { %1518 = vmatpush1.bf16.msra.mxu1 %v1091_v3  ;;  %v741_v3 = vld [vmem:[%s5447_s2 + $0x1080] sm:$0xff] }
  0xc2   :  { %1723 = vmatpush1.bf16.msra.mxu0 %v1251_v5  ;;  %1528 = vmatprep.subr.bf16.mxu1 %v1094_v6  ;;  %v1262_v5 = vpack.c.bf16 %v744_v59, %v742_v58  ;;  %v743_v6 = vld [vmem:[%s5447_s2 + $0x1090] sm:$0xff]  ;;  %v444_v58 = vld [vmem:[%s5447_s2 + $0x738] sm:$0xff]  ;;  %v762_v59 = vld [vmem:[%s5447_s2 + $0x1128] sm:$0xff] }
  0xc3   :  { %1733 = vmatprep.subr.bf16.mxu0 %v1254_v10  ;;  %v748_v10 = vld [vmem:[%s5447_s2 + $0x10b8] sm:$0xff]  ;;  %v1261_v13 = vpack.c.bf16 %v743_v6, %v741_v3  ;;  %v1112_v0 = vpack.c.bf16 %v444_v58, %v442_v57  ;;  %v443_v3 = vld [vmem:[%s5447_s2 + $0x730] sm:$0xff] }
  0xc4   :  { %1520 = vmatmul.mubr.bf16.vlgmr.msra.gmra.mrb[0].mxu1 %v192_v16  ;;  %v427_v16 = vld [vmem:[%s5447_s2 + $0x6b0] sm:$0xff]  ;;  %v1264_v19 = vpack.c.bf16 %v748_v10, %v746_v9  ;;  %v448_v9 = vld [vmem:[%s5447_s2 + $0x758] sm:$0xff]  ;;  %v766_v10 = vld [vmem:[%s5447_s2 + $0x1148] sm:$0xff] }
  0xc5   :  { %1529 = vmatpush1.bf16.msra.mxu1 %v1093_v21  ;;  %1725 = vmatmul.mubr.bf16.vlgmr.msra.gmra.mrb[0].mxu0 %v202_v22  ;;  %v430_v21 = vld [vmem:[%s5447_s2 + $0x6c8] sm:$0xff]  ;;  %v432_v22 = vld [vmem:[%s5447_s2 + $0x6d8] sm:$0xff]  ;;  %v1103_v24 = vpack.c.bf16 %v427_v16, %v425_v15 }
  0xc6   :  { %1734 = vmatpush1.bf16.msra.mxu0 %v1253_v23  ;;  %1530 = vmatprep.subr.bf16.mxu1 %v1096_v4  ;;  %v750_v23 = vld [vmem:[%s5447_s2 + $0x10c8] sm:$0xff]  ;;  %v752_v4 = vld [vmem:[%s5447_s2 + $0x10d8] sm:$0xff]  ;;  %v1106_v27 = vpack.c.bf16 %v432_v22, %v430_v21 }
  0xc7   :  { %1735 = vmatprep.subr.bf16.mxu0 %v1256_v28  ;;  %1560 = vmatprep.mubr.bf16.mxu1 %v195_v31  ;;  %v429_v28 = vld [vmem:[%s5447_s2 + $0x6c0] sm:$0xff]  ;;  %v1266_v30 = vpack.c.bf16 %v752_v4, %v750_v23  ;;  %v751_v31 = vld [vmem:[%s5447_s2 + $0x10d0] sm:$0xff] }
  0xc8   :  { %1765 = vmatprep.mubr.bf16.mxu0 %v205_v46  ;;  %v754_v46 = vld [vmem:[%s5447_s2 + $0x10e8] sm:$0xff] }
  0xc9   :  { %1531 = vmatpush1.bf16.msra.mxu1 %v1095_v34  ;;  %v756_v34 = vld [vmem:[%s5447_s2 + $0x10f8] sm:$0xff] }
  0xca   :  { %1736 = vmatpush1.bf16.msra.mxu0 %v1255_v35  ;;  %1532 = vmatprep.subr.bf16.mxu1 %v1098_v36  ;;  %v1105_v35 = vpack.c.bf16 %v431_v40, %v429_v28  ;;  %v1265_v36 = vpack.c.bf16 %v751_v31, %v749_v29  ;;  %v1268_v42 = vpack.c.bf16 %v756_v34, %v754_v46 }
  0xcb   :  { %1737 = vmatprep.subr.bf16.mxu0 %v1258_v41  ;;  %v753_v41 = vld [vmem:[%s5447_s2 + $0x10e0] sm:$0xff] }
  0xcd   :  { %1533 = vmatpush1.bf16.msra.mxu1 %v1097_v47  ;;  %v760_v47 = vld [vmem:[%s5447_s2 + $0x1118] sm:$0xff] }
  0xce   :  { %1738 = vmatpush1.bf16.msra.mxu0 %v1257_v48  ;;  %1534 = vmatprep.subr.bf16.mxu1 %v1100_v50  ;;  %v1107_v48 = vpack.c.bf16 %v435_v25, %v433_v38  ;;  %v1267_v50 = vpack.c.bf16 %v755_v43, %v753_v41  ;;  %v1270_v56 = vpack.c.bf16 %v760_v47, %v758_v45 }
  0xcf   :  { %1739 = vmatprep.subr.bf16.mxu0 %v1260_v55  ;;  %v757_v55 = vld [vmem:[%s5447_s2 + $0x1100] sm:$0xff] }
  0xd1   :  { %1535 = vmatpush1.bf16.msra.mxu1 %v1099_v18  ;;  %v764_v18 = vld [vmem:[%s5447_s2 + $0x1138] sm:$0xff] }
  0xd2   :  { %1740 = vmatpush1.bf16.msra.mxu0 %v1259_v60  ;;  %1536 = vmatprep.subr.bf16.mxu1 %v1102_v61  ;;  %v1109_v60 = vpack.c.bf16 %v439_v53, %v437_v52  ;;  %v1269_v61 = vpack.c.bf16 %v759_v49, %v757_v55  ;;  %v1272_v6 = vpack.c.bf16 %v764_v18, %v762_v59 }
  0xd3   :  { %1741 = vmatprep.subr.bf16.mxu0 %v1262_v5  ;;  %v761_v5 = vld [vmem:[%s5447_s2 + $0x1120] sm:$0xff] }
  0xd5   :  { %1537 = vmatpush1.bf16.msra.mxu1 %v1101_v12  ;;  %v768_v12 = vld [vmem:[%s5447_s2 + $0x1158] sm:$0xff] }
  0xd6   :  { %1742 = vmatpush1.bf16.msra.mxu0 %v1261_v13  ;;  %1538 = vmatprep.subr.bf16.mxu1 %v1104_v14 }
  0xd7   :  { %1743 = vmatprep.subr.bf16.mxu0 %v1264_v19 }
  0xd9   :  { %1539 = vmatpush1.bf16.msra.mxu1 %v1103_v24 }
  0xda   :  { %1744 = vmatpush1.bf16.msra.mxu0 %v1263_v26  ;;  %1540 = vmatprep.subr.bf16.mxu1 %v1106_v27 }
  0xdb   :  { %1745 = vmatprep.subr.bf16.mxu0 %v1266_v30 }
  0xdd   :  { %1541 = vmatpush1.bf16.msra.mxu1 %v1105_v35 }
  0xde   :  { %1746 = vmatpush1.bf16.msra.mxu0 %v1265_v36  ;;  %1542 = vmatprep.subr.bf16.mxu1 %v1108_v37 }
  0xdf   :  { %1747 = vmatprep.subr.bf16.mxu0 %v1268_v42 }
  0xe1   :  { %1543 = vmatpush1.bf16.msra.mxu1 %v1107_v48 }
  0xe2   :  { %1748 = vmatpush1.bf16.msra.mxu0 %v1267_v50  ;;  %1544 = vmatprep.subr.bf16.mxu1 %v1110_v51 }
  0xe3   :  { %1749 = vmatprep.subr.bf16.mxu0 %v1270_v56 }
  0xe4   :  { %16 = vsyncpa [#allocation3], 0  ;;  %v1111_v13 = vpack.c.bf16 %v443_v3, %v441_v1  ;;  %v1271_v14 = vpack.c.bf16 %v763_v7, %v761_v5  ;;  %v1114_v15 = vpack.c.bf16 %v448_v9, %v446_v8  ;;  %v445_v16 = vld [vmem:[%s5447_s2 + $0x740] sm:$0xff]  ;;  %v447_v17 = vld [vmem:[%s5447_s2 + $0x750] sm:$0xff]  ;;  %v1274_v20 = vpack.c.bf16 %v768_v12, %v766_v10 }
  0xe5   :  { %1545 = vmatpush1.bf16.msra.mxu1 %v1109_v60  ;;  %v765_v19 = vld [vmem:[%s5447_s2 + $0x1140] sm:$0xff]  ;;  %v767_v21 = vld [vmem:[%s5447_s2 + $0x1150] sm:$0xff]  ;;  %v450_v22 = vld [vmem:[%s5447_s2 + $0x768] sm:$0xff]  ;;  %v1113_v26 = vpack.c.bf16 %v447_v17, %v445_v16  ;;  %vm1401_vm0 = vcmask 523264   ;;  %vm2553_vm1 = vmmov 0   ;;  %vm2135_vm2 = vcmask 785408  }
  0xe6   :  { %1750 = vmatpush1.bf16.msra.mxu0 %v1269_v61  ;;  %1546 = vmatprep.subr.bf16.mxu1 %v1112_v0  ;;  %v452_v23 = vld [vmem:[%s5447_s2 + $0x778] sm:$0xff]  ;;  %v770_v4 = vld [vmem:[%s5447_s2 + $0x1168] sm:$0xff]  ;;  %v1273_v27 = vpack.c.bf16 %v767_v21, %v765_v19  ;;  %v449_v40 = vld [vmem:[%s5447_s2 + $0x760] sm:$0xff]  ;;  %vm2341_vm3 = vcmask 517120  }
  0xe7   :  { %1751 = vmatprep.subr.bf16.mxu0 %v1272_v6  ;;  %v772_v24 = vld [vmem:[%s5447_s2 + $0x1178] sm:$0xff]  ;;  %v1116_v28 = vpack.c.bf16 %v452_v23, %v450_v22  ;;  %v451_v29 = vld [vmem:[%s5447_s2 + $0x770] sm:$0xff]  ;;  %v769_v30 = vld [vmem:[%s5447_s2 + $0x1160] sm:$0xff] }
  0xe8   :  { %v1276_v31 = vpack.c.bf16 %v772_v24, %v770_v4  ;;  %v771_v32 = vld [vmem:[%s5447_s2 + $0x1170] sm:$0xff]  ;;  %v454_v33 = vld [vmem:[%s5447_s2 + $0x788] sm:$0xff]  ;;  %v456_v46 = vld [vmem:[%s5447_s2 + $0x798] sm:$0xff]  ;;  %v1115_v36 = vpack.c.bf16 %v451_v29, %v449_v40 }
  0xe9   :  { %1547 = vmatpush1.bf16.msra.mxu1 %v1111_v13  ;;  %v774_v34 = vld [vmem:[%s5447_s2 + $0x1188] sm:$0xff]  ;;  %v776_v35 = vld [vmem:[%s5447_s2 + $0x1198] sm:$0xff]  ;;  %v1275_v37 = vpack.c.bf16 %v771_v32, %v769_v30  ;;  %v1118_v38 = vpack.c.bf16 %v456_v46, %v454_v33  ;;  %v453_v25 = vld [vmem:[%s5447_s2 + $0x780] sm:$0xff] }
  0xea   :  { %1752 = vmatpush1.bf16.msra.mxu0 %v1271_v14  ;;  %1548 = vmatprep.subr.bf16.mxu1 %v1114_v15  ;;  %v455_v41 = vld [vmem:[%s5447_s2 + $0x790] sm:$0xff]  ;;  %v773_v42 = vld [vmem:[%s5447_s2 + $0x1180] sm:$0xff]  ;;  %v1278_v43 = vpack.c.bf16 %v776_v35, %v774_v34  ;;  %v458_v44 = vld [vmem:[%s5447_s2 + $0x7a8] sm:$0xff]  ;;  %v122_v14 = vcombine.high %v3828_v54, %v3828_v54 }
  0xeb   :  { %1753 = vmatprep.subr.bf16.mxu0 %v1274_v20  ;;  %v775_v39 = vld [vmem:[%s5447_s2 + $0x1190] sm:$0xff]  ;;  %v460_v45 = vld [vmem:[%s5447_s2 + $0x7b8] sm:$0xff]  ;;  %v778_v47 = vld [vmem:[%s5447_s2 + $0x11a8] sm:$0xff]  ;;  %v1117_v50 = vpack.c.bf16 %v455_v41, %v453_v25 }
  0xec   :  { %v780_v48 = vld [vmem:[%s5447_s2 + $0x11b8] sm:$0xff]  ;;  %v1277_v51 = vpack.c.bf16 %v775_v39, %v773_v42  ;;  %v1120_v52 = vpack.c.bf16 %v460_v45, %v458_v44  ;;  %v457_v53 = vld [vmem:[%s5447_s2 + $0x7a0] sm:$0xff]  ;;  %v459_v55 = vld [vmem:[%s5447_s2 + $0x7b0] sm:$0xff]  ;;  %v204_v39 = vpack.c.bf16 %v3859_v2, %v3859_v2 }
  0xed   :  { %1549 = vmatpush1.bf16.msra.mxu1 %v1113_v26  ;;  %v777_v56 = vld [vmem:[%s5447_s2 + $0x11a0] sm:$0xff]  ;;  %v1280_v49 = vpack.c.bf16 %v780_v48, %v778_v47  ;;  %v779_v57 = vld [vmem:[%s5447_s2 + $0x11b0] sm:$0xff]  ;;  %v462_v58 = vld [vmem:[%s5447_s2 + $0x7c8] sm:$0xff]  ;;  %v1119_v61 = vpack.c.bf16 %v459_v55, %v457_v53 }
  0xee   :  { %1754 = vmatpush1.bf16.msra.mxu0 %v1273_v27  ;;  %1550 = vmatprep.subr.bf16.mxu1 %v1116_v28  ;;  %v464_v59 = vld [vmem:[%s5447_s2 + $0x7d8] sm:$0xff]  ;;  %v782_v18 = vld [vmem:[%s5447_s2 + $0x11c8] sm:$0xff]  ;;  %v1279_v0 = vpack.c.bf16 %v779_v57, %v777_v56  ;;  %v461_v3 = vld [vmem:[%s5447_s2 + $0x7c0] sm:$0xff]  ;;  %v4261_v28 = vrot.slane %v122_v14, %v2894_v11 }
  0xef   :  { %1755 = vmatprep.subr.bf16.mxu0 %v1276_v31  ;;  %v784_v60 = vld [vmem:[%s5447_s2 + $0x11d8] sm:$0xff]  ;;  %v1122_v1 = vpack.c.bf16 %v464_v59, %v462_v58  ;;  %v463_v5 = vld [vmem:[%s5447_s2 + $0x7d0] sm:$0xff]  ;;  %v781_v6 = vld [vmem:[%s5447_s2 + $0x11c0] sm:$0xff] }
  0xf0   :  { %v1282_v7 = vpack.c.bf16 %v784_v60, %v782_v18  ;;  %v783_v8 = vld [vmem:[%s5447_s2 + $0x11d0] sm:$0xff]  ;;  %v466_v9 = vld [vmem:[%s5447_s2 + $0x7e8] sm:$0xff]  ;;  %v468_v10 = vld [vmem:[%s5447_s2 + $0x7f8] sm:$0xff]  ;;  %v1121_v15 = vpack.c.bf16 %v463_v5, %v461_v3  ;;  %v138_v42 = vcombine.high %v4261_v28, %v4261_v28 }
  0xf1   :  { %1551 = vmatpush1.bf16.msra.mxu1 %v1115_v36  ;;  %v786_v12 = vld [vmem:[%s5447_s2 + $0x11e8] sm:$0xff]  ;;  %v788_v13 = vld [vmem:[%s5447_s2 + $0x11f8] sm:$0xff]  ;;  %v1281_v16 = vpack.c.bf16 %v783_v8, %v781_v6  ;;  %v1124_v17 = vpack.c.bf16 %v468_v10, %v466_v9  ;;  %v465_v19 = vld [vmem:[%s5447_s2 + $0x7e0] sm:$0xff] }
  0xf2   :  { %1756 = vmatpush1.bf16.msra.mxu0 %v1275_v37  ;;  %1552 = vmatprep.subr.bf16.mxu1 %v1118_v38  ;;  %v467_v20 = vld [vmem:[%s5447_s2 + $0x7f0] sm:$0xff]  ;;  %v785_v21 = vld [vmem:[%s5447_s2 + $0x11e0] sm:$0xff]  ;;  %v1284_v54 = vpack.c.bf16 %v788_v13, %v786_v12  ;;  %v470_v23 = vld [vmem:[%s5447_s2 + $0x808] sm:$0xff]  ;;  %v194_v38 = vpack.c.bf16 %v3849_v63, %v3849_v63 }
  0xf3   :  { %1757 = vmatprep.subr.bf16.mxu0 %v1278_v43  ;;  %v787_v22 = vld [vmem:[%s5447_s2 + $0x11f0] sm:$0xff]  ;;  %v472_v4 = vld [vmem:[%s5447_s2 + $0x818] sm:$0xff]  ;;  %v790_v26 = vld [vmem:[%s5447_s2 + $0x1208] sm:$0xff]  ;;  %v1123_v40 = vpack.c.bf16 %v467_v20, %v465_v19 }
  0xf4   :  { %v4252_v24 = vld.sshfl [vmem:[%s5445_s0 + $0x10] sm:$0xff pattern:$0x76325410]  ;;  %v792_v27 = vld [vmem:[%s5447_s2 + $0x1218] sm:$0xff]  ;;  %v1283_v29 = vpack.c.bf16 %v787_v22, %v785_v21  ;;  %v1126_v30 = vpack.c.bf16 %v472_v4, %v470_v23  ;;  %v469_v31 = vld [vmem:[%s5447_s2 + $0x800] sm:$0xff] }
  0xf5   :  { %1553 = vmatpush1.bf16.msra.mxu1 %v1117_v50  ;;  %v471_v32 = vld [vmem:[%s5447_s2 + $0x810] sm:$0xff]  ;;  %v789_v33 = vld [vmem:[%s5447_s2 + $0x1200] sm:$0xff]  ;;  %v1286_v46 = vpack.c.bf16 %v792_v27, %v790_v26  ;;  %v474_v35 = vld [vmem:[%s5447_s2 + $0x828] sm:$0xff]  ;;  %v103_v37 = vcombine.high %v4252_v24, %v4252_v24 }
  0xf6   :  { %1758 = vmatpush1.bf16.msra.mxu0 %v1277_v51  ;;  %1554 = vmatprep.subr.bf16.mxu1 %v1120_v52  ;;  %v791_v34 = vld [vmem:[%s5447_s2 + $0x1210] sm:$0xff]  ;;  %v476_v36 = vld [vmem:[%s5447_s2 + $0x838] sm:$0xff]  ;;  %v794_v25 = vld [vmem:[%s5447_s2 + $0x1228] sm:$0xff]  ;;  %v1125_v43 = vpack.c.bf16 %v471_v32, %v469_v31 }
  0xf7   :  { %1759 = vmatprep.subr.bf16.mxu0 %v1280_v49  ;;  %v796_v41 = vld [vmem:[%s5447_s2 + $0x1238] sm:$0xff]  ;;  %v1285_v44 = vpack.c.bf16 %v791_v34, %v789_v33  ;;  %v1128_v63 = vpack.c.bf16 %v476_v36, %v474_v35  ;;  %v473_v45 = vld [vmem:[%s5447_s2 + $0x820] sm:$0xff]  ;;  %v475_v47 = vld [vmem:[%s5447_s2 + $0x830] sm:$0xff]  ;;  %v197_v53 = vpack.c.bf16 %v103_v37, %v103_v37  ;;  %v207_v49 = vpack.c.bf16 %v138_v42, %v138_v42 }
  0xf8   :  { %v793_v48 = vld [vmem:[%s5447_s2 + $0x1220] sm:$0xff]  ;;  %v1288_v50 = vpack.c.bf16 %v796_v41, %v794_v25  ;;  %v795_v2 = vld [vmem:[%s5447_s2 + $0x1230] sm:$0xff]  ;;  %v478_v51 = vld [vmem:[%s5447_s2 + $0x848] sm:$0xff]  ;;  %v1127_v57 = vpack.c.bf16 %v475_v47, %v473_v45 }
  0xf9   :  { %1555 = vmatpush1.bf16.msra.mxu1 %v1119_v61  ;;  %v480_v52 = vld [vmem:[%s5447_s2 + $0x858] sm:$0xff]  ;;  %v798_v55 = vld [vmem:[%s5447_s2 + $0x1248] sm:$0xff]  ;;  %v1287_v58 = vpack.c.bf16 %v795_v2, %v793_v48  ;;  %v477_v18 = vld [vmem:[%s5447_s2 + $0x840] sm:$0xff] }
  0xfa   :  { %1760 = vmatpush1.bf16.msra.mxu0 %v1279_v0  ;;  %1556 = vmatprep.subr.bf16.mxu1 %v1122_v1  ;;  %v800_v56 = vld [vmem:[%s5447_s2 + $0x1258] sm:$0xff]  ;;  %v1130_v59 = vpack.c.bf16 %v480_v52, %v478_v51  ;;  %v479_v60 = vld [vmem:[%s5447_s2 + $0x850] sm:$0xff]  ;;  %v797_v61 = vld [vmem:[%s5447_s2 + $0x1240] sm:$0xff] }
  0xfb   :  { %1761 = vmatprep.subr.bf16.mxu0 %v1282_v7  ;;  %v1290_v0 = vpack.c.bf16 %v800_v56, %v798_v55  ;;  %v799_v1 = vld [vmem:[%s5447_s2 + $0x1250] sm:$0xff]  ;;  %v482_v3 = vld [vmem:[%s5447_s2 + $0x868] sm:$0xff]  ;;  %v484_v5 = vld [vmem:[%s5447_s2 + $0x878] sm:$0xff]  ;;  %v1129_v8 = vpack.c.bf16 %v479_v60, %v477_v18 }
  0xfc   :  { %v802_v6 = vld [vmem:[%s5447_s2 + $0x1268] sm:$0xff]  ;;  %v804_v7 = vld [vmem:[%s5447_s2 + $0x1278] sm:$0xff]  ;;  %v1289_v9 = vpack.c.bf16 %v799_v1, %v797_v61  ;;  %v1132_v10 = vpack.c.bf16 %v484_v5, %v482_v3  ;;  %v481_v12 = vld [vmem:[%s5447_s2 + $0x860] sm:$0xff] }
  0xfd   :  { %1557 = vmatpush1.bf16.msra.mxu1 %v1121_v15  ;;  %v483_v13 = vld [vmem:[%s5447_s2 + $0x870] sm:$0xff]  ;;  %v801_v14 = vld [vmem:[%s5447_s2 + $0x1260] sm:$0xff]  ;;  %v1292_v15 = vpack.c.bf16 %v804_v7, %v802_v6  ;;  %v488_v19 = vld [vmem:[%s5447_s2 + $0x898] sm:$0xff] }
  0xfe   :  { %1762 = vmatpush1.bf16.msra.mxu0 %v1281_v16  ;;  %1558 = vmatprep.subr.bf16.mxu1 %v1124_v17  ;;  %v803_v16 = vld [vmem:[%s5447_s2 + $0x1270] sm:$0xff]  ;;  %v486_v17 = vld [vmem:[%s5447_s2 + $0x888] sm:$0xff]  ;;  %v808_v21 = vld [vmem:[%s5447_s2 + $0x1298] sm:$0xff] }
  0xff   :  { %1763 = vmatprep.subr.bf16.mxu0 %v1284_v54  ;;  %v806_v20 = vld [vmem:[%s5447_s2 + $0x1288] sm:$0xff]  ;;  %v1131_v54 = vpack.c.bf16 %v483_v13, %v481_v12  ;;  %v1291_v22 = vpack.c.bf16 %v803_v16, %v801_v14  ;;  %v1134_v23 = vpack.c.bf16 %v488_v19, %v486_v17  ;;  %v485_v4 = vld [vmem:[%s5447_s2 + $0x880] sm:$0xff]  ;;  %v487_v26 = vld [vmem:[%s5447_s2 + $0x890] sm:$0xff] }
 0x100   :  { %v805_v27 = vld [vmem:[%s5447_s2 + $0x1280] sm:$0xff]  ;;  %v492_v31 = vld [vmem:[%s5447_s2 + $0x8b8] sm:$0xff]  ;;  %v810_v32 = vld [vmem:[%s5447_s2 + $0x12a8] sm:$0xff] }
 0x101   :  { %1559 = vmatpush1.bf16.msra.mxu1 %v1123_v40  ;;  %v1294_v40 = vpack.c.bf16 %v808_v21, %v806_v20  ;;  %v812_v33 = vld [vmem:[%s5447_s2 + $0x12b8] sm:$0xff]  ;;  %v489_v36 = vld [vmem:[%s5447_s2 + $0x8a0] sm:$0xff]  ;;  %v491_v37 = vld [vmem:[%s5447_s2 + $0x8b0] sm:$0xff] }
 0x102   :  { %1764 = vmatpush1.bf16.msra.mxu0 %v1283_v29  ;;  %1569 = vmatprep.subr.bf16.mxu1 %v1126_v30  ;;  %v807_v29 = vld [vmem:[%s5447_s2 + $0x1290] sm:$0xff]  ;;  %v490_v30 = vld [vmem:[%s5447_s2 + $0x8a8] sm:$0xff]  ;;  %v1296_v25 = vpack.c.bf16 %v812_v33, %v810_v32  ;;  %v493_v48 = vld [vmem:[%s5447_s2 + $0x8c0] sm:$0xff] }
 0x103   :  { %1774 = vmatprep.subr.bf16.mxu0 %v1286_v46  ;;  %v1133_v46 = vpack.c.bf16 %v487_v26, %v485_v4  ;;  %v1293_v34 = vpack.c.bf16 %v807_v29, %v805_v27  ;;  %v1136_v35 = vpack.c.bf16 %v492_v31, %v490_v30  ;;  %v811_v41 = vld [vmem:[%s5447_s2 + $0x12b0] sm:$0xff]  ;;  %v494_v42 = vld [vmem:[%s5447_s2 + $0x8c8] sm:$0xff]  ;;  %v813_v2 = vld [vmem:[%s5447_s2 + $0x12c0] sm:$0xff] }
 0x104   :  { %1561 = vmatmul.mubr.bf16.vlgmr.msra.gmra.mrb[0].mxu1 %v194_v38  ;;  %v809_v38 = vld [vmem:[%s5447_s2 + $0x12a0] sm:$0xff]  ;;  %v815_v52 = vld [vmem:[%s5447_s2 + $0x12d0] sm:$0xff]  ;;  %v500_v55 = vld [vmem:[%s5447_s2 + $0x8f8] sm:$0xff] }
 0x105   :  { %1570 = vmatpush1.bf16.msra.mxu1 %v1125_v43  ;;  %1766 = vmatmul.mubr.bf16.vlgmr.msra.gmra.mrb[0].mxu0 %v204_v39  ;;  %v496_v43 = vld [vmem:[%s5447_s2 + $0x8d8] sm:$0xff]  ;;  %v814_v39 = vld [vmem:[%s5447_s2 + $0x12c8] sm:$0xff]  ;;  %v1295_v45 = vpack.c.bf16 %v811_v41, %v809_v38  ;;  %v497_v18 = vld [vmem:[%s5447_s2 + $0x8e0] sm:$0xff] }
 0x106   :  { %1775 = vmatpush1.bf16.msra.mxu0 %v1285_v44  ;;  %1571 = vmatprep.subr.bf16.mxu1 %v1128_v63  ;;  %v816_v44 = vld [vmem:[%s5447_s2 + $0x12d8] sm:$0xff]  ;;  %v1135_v63 = vpack.c.bf16 %v491_v37, %v489_v36  ;;  %v1138_v47 = vpack.c.bf16 %v496_v43, %v494_v42  ;;  %v818_v56 = vld [vmem:[%s5447_s2 + $0x12e8] sm:$0xff]  ;;  %v499_v60 = vld [vmem:[%s5447_s2 + $0x8f0] sm:$0xff] }
 0x107   :  { %1776 = vmatprep.subr.bf16.mxu0 %v1288_v50  ;;  %1601 = vmatprep.mubr.bf16.mxu1 %v197_v53  ;;  %v495_v50 = vld [vmem:[%s5447_s2 + $0x8d0] sm:$0xff]  ;;  %v1298_v51 = vpack.c.bf16 %v816_v44, %v814_v39  ;;  %v498_v53 = vld [vmem:[%s5447_s2 + $0x8e8] sm:$0xff]  ;;  %v817_v61 = vld [vmem:[%s5447_s2 + $0x12e0] sm:$0xff] }
 0x108   :  { %1806 = vmatprep.mubr.bf16.mxu0 %v207_v49  ;;  %v820_v49 = vld [vmem:[%s5447_s2 + $0x12f8] sm:$0xff]  ;;  %v819_v1 = vld [vmem:[%s5447_s2 + $0x12f0] sm:$0xff]  ;;  %v502_v3 = vld [vmem:[%s5447_s2 + $0x908] sm:$0xff] }
 0x109   :  { %1572 = vmatpush1.bf16.msra.mxu1 %v1127_v57  ;;  %v1137_v57 = vpack.c.bf16 %v495_v50, %v493_v48  ;;  %v504_v5 = vld [vmem:[%s5447_s2 + $0x918] sm:$0xff]  ;;  %v822_v6 = vld [vmem:[%s5447_s2 + $0x1308] sm:$0xff]  ;;  %v501_v12 = vld [vmem:[%s5447_s2 + $0x900] sm:$0xff] }
 0x10a   :  { %1777 = vmatpush1.bf16.msra.mxu0 %v1287_v58  ;;  %1573 = vmatprep.subr.bf16.mxu1 %v1130_v59  ;;  %v1297_v58 = vpack.c.bf16 %v815_v52, %v813_v2  ;;  %v1140_v59 = vpack.c.bf16 %v500_v55, %v498_v53  ;;  %v824_v7 = vld [vmem:[%s5447_s2 + $0x1318] sm:$0xff]  ;;  %v503_v13 = vld [vmem:[%s5447_s2 + $0x910] sm:$0xff]  ;;  %v821_v14 = vld [vmem:[%s5447_s2 + $0x1300] sm:$0xff] }
 0x10b   :  { %1778 = vmatprep.subr.bf16.mxu0 %v1290_v0  ;;  %v1300_v0 = vpack.c.bf16 %v820_v49, %v818_v56  ;;  %v823_v16 = vld [vmem:[%s5447_s2 + $0x1310] sm:$0xff]  ;;  %v506_v17 = vld [vmem:[%s5447_s2 + $0x928] sm:$0xff]  ;;  %v508_v19 = vld [vmem:[%s5447_s2 + $0x938] sm:$0xff] }
 0x10c   :  { %v826_v20 = vld [vmem:[%s5447_s2 + $0x1328] sm:$0xff]  ;;  %v828_v21 = vld [vmem:[%s5447_s2 + $0x1338] sm:$0xff]  ;;  %v505_v4 = vld [vmem:[%s5447_s2 + $0x920] sm:$0xff] }
 0x10d   :  { %1574 = vmatpush1.bf16.msra.mxu1 %v1129_v8  ;;  %v1139_v8 = vpack.c.bf16 %v499_v60, %v497_v18  ;;  %v507_v26 = vld [vmem:[%s5447_s2 + $0x930] sm:$0xff]  ;;  %v825_v27 = vld [vmem:[%s5447_s2 + $0x1320] sm:$0xff]  ;;  %v510_v30 = vld [vmem:[%s5447_s2 + $0x948] sm:$0xff] }
 0x10e   :  { %1779 = vmatpush1.bf16.msra.mxu0 %v1289_v9  ;;  %1575 = vmatprep.subr.bf16.mxu1 %v1132_v10  ;;  %v1299_v9 = vpack.c.bf16 %v819_v1, %v817_v61  ;;  %v1142_v10 = vpack.c.bf16 %v504_v5, %v502_v3  ;;  %v827_v29 = vld [vmem:[%s5447_s2 + $0x1330] sm:$0xff]  ;;  %v512_v31 = vld [vmem:[%s5447_s2 + $0x958] sm:$0xff]  ;;  %v830_v32 = vld [vmem:[%s5447_s2 + $0x1348] sm:$0xff] }
 0x10f   :  { %1780 = vmatprep.subr.bf16.mxu0 %v1292_v15  ;;  %v1302_v15 = vpack.c.bf16 %v824_v7, %v822_v6  ;;  %v832_v33 = vld [vmem:[%s5447_s2 + $0x1358] sm:$0xff]  ;;  %v509_v36 = vld [vmem:[%s5447_s2 + $0x940] sm:$0xff]  ;;  %v511_v37 = vld [vmem:[%s5447_s2 + $0x950] sm:$0xff] }
 0x110   :  { %v829_v38 = vld [vmem:[%s5447_s2 + $0x1340] sm:$0xff]  ;;  %v831_v41 = vld [vmem:[%s5447_s2 + $0x1350] sm:$0xff]  ;;  %v514_v42 = vld [vmem:[%s5447_s2 + $0x968] sm:$0xff] }
 0x111   :  { %1576 = vmatpush1.bf16.msra.mxu1 %v1131_v54  ;;  %v1141_v54 = vpack.c.bf16 %v503_v13, %v501_v12  ;;  %v516_v43 = vld [vmem:[%s5447_s2 + $0x978] sm:$0xff]  ;;  %v834_v39 = vld [vmem:[%s5447_s2 + $0x1368] sm:$0xff]  ;;  %v513_v48 = vld [vmem:[%s5447_s2 + $0x960] sm:$0xff] }
 0x112   :  { %1781 = vmatpush1.bf16.msra.mxu0 %v1291_v22  ;;  %1577 = vmatprep.subr.bf16.mxu1 %v1134_v23  ;;  %v1301_v22 = vpack.c.bf16 %v823_v16, %v821_v14  ;;  %v1144_v23 = vpack.c.bf16 %v508_v19, %v506_v17  ;;  %v836_v44 = vld [vmem:[%s5447_s2 + $0x1378] sm:$0xff]  ;;  %v515_v50 = vld [vmem:[%s5447_s2 + $0x970] sm:$0xff]  ;;  %v833_v2 = vld [vmem:[%s5447_s2 + $0x1360] sm:$0xff] }
 0x113   :  { %1782 = vmatprep.subr.bf16.mxu0 %v1294_v40  ;;  %v1304_v40 = vpack.c.bf16 %v828_v21, %v826_v20  ;;  %v835_v52 = vld [vmem:[%s5447_s2 + $0x1370] sm:$0xff]  ;;  %v518_v53 = vld [vmem:[%s5447_s2 + $0x988] sm:$0xff]  ;;  %v520_v55 = vld [vmem:[%s5447_s2 + $0x998] sm:$0xff] }
 0x114   :  { %v838_v56 = vld [vmem:[%s5447_s2 + $0x1388] sm:$0xff]  ;;  %v840_v49 = vld [vmem:[%s5447_s2 + $0x1398] sm:$0xff]  ;;  %v517_v18 = vld [vmem:[%s5447_s2 + $0x980] sm:$0xff] }
 0x115   :  { %1578 = vmatpush1.bf16.msra.mxu1 %v1133_v46  ;;  %v1143_v46 = vpack.c.bf16 %v507_v26, %v505_v4  ;;  %v519_v60 = vld [vmem:[%s5447_s2 + $0x990] sm:$0xff]  ;;  %v837_v61 = vld [vmem:[%s5447_s2 + $0x1380] sm:$0xff]  ;;  %v522_v3 = vld [vmem:[%s5447_s2 + $0x9a8] sm:$0xff] }
 0x116   :  { %1783 = vmatpush1.bf16.msra.mxu0 %v1293_v34  ;;  %1579 = vmatprep.subr.bf16.mxu1 %v1136_v35  ;;  %v1303_v34 = vpack.c.bf16 %v827_v29, %v825_v27  ;;  %v1146_v35 = vpack.c.bf16 %v512_v31, %v510_v30  ;;  %v839_v1 = vld [vmem:[%s5447_s2 + $0x1390] sm:$0xff]  ;;  %v524_v5 = vld [vmem:[%s5447_s2 + $0x9b8] sm:$0xff]  ;;  %v842_v6 = vld [vmem:[%s5447_s2 + $0x13a8] sm:$0xff] }
 0x117   :  { %1784 = vmatprep.subr.bf16.mxu0 %v1296_v25  ;;  %v1306_v25 = vpack.c.bf16 %v832_v33, %v830_v32  ;;  %v844_v7 = vld [vmem:[%s5447_s2 + $0x13b8] sm:$0xff]  ;;  %v521_v12 = vld [vmem:[%s5447_s2 + $0x9a0] sm:$0xff]  ;;  %v523_v13 = vld [vmem:[%s5447_s2 + $0x9b0] sm:$0xff] }
 0x118   :  { %v841_v14 = vld [vmem:[%s5447_s2 + $0x13a0] sm:$0xff]  ;;  %v843_v16 = vld [vmem:[%s5447_s2 + $0x13b0] sm:$0xff]  ;;  %v526_v17 = vld [vmem:[%s5447_s2 + $0x9c8] sm:$0xff] }
 0x119   :  { %1580 = vmatpush1.bf16.msra.mxu1 %v1135_v63  ;;  %v1145_v63 = vpack.c.bf16 %v511_v37, %v509_v36  ;;  %v528_v19 = vld [vmem:[%s5447_s2 + $0x9d8] sm:$0xff]  ;;  %v846_v20 = vld [vmem:[%s5447_s2 + $0x13c8] sm:$0xff]  ;;  %v527_v26 = vld [vmem:[%s5447_s2 + $0x9d0] sm:$0xff] }
 0x11a   :  { %1785 = vmatpush1.bf16.msra.mxu0 %v1295_v45  ;;  %1581 = vmatprep.subr.bf16.mxu1 %v1138_v47  ;;  %v1305_v45 = vpack.c.bf16 %v831_v41, %v829_v38  ;;  %v1148_v47 = vpack.c.bf16 %v516_v43, %v514_v42  ;;  %v848_v21 = vld [vmem:[%s5447_s2 + $0x13d8] sm:$0xff]  ;;  %v1154_v4 = vpack.c.bf16 %v528_v19, %v526_v17  ;;  %v845_v27 = vld [vmem:[%s5447_s2 + $0x13c0] sm:$0xff]  ;;  %v530_v30 = vld [vmem:[%s5447_s2 + $0x9e8] sm:$0xff] }
 0x11b   :  { %1786 = vmatprep.subr.bf16.mxu0 %v1298_v51  ;;  %v1308_v51 = vpack.c.bf16 %v836_v44, %v834_v39  ;;  %v1314_v29 = vpack.c.bf16 %v848_v21, %v846_v20  ;;  %v532_v31 = vld [vmem:[%s5447_s2 + $0x9f8] sm:$0xff]  ;;  %v4628_v32 = vld [vmem:[%s5445_s0 + $0x28] sm:$0xff]  ;;  %v529_v37 = vld [vmem:[%s5447_s2 + $0x9e0] sm:$0xff] }
 0x11c   :  { %v850_v33 = vld [vmem:[%s5447_s2 + $0x13e8] sm:$0xff]  ;;  %v1156_v36 = vpack.c.bf16 %v532_v31, %v530_v30  ;;  %v531_v38 = vld [vmem:[%s5447_s2 + $0x9f0] sm:$0xff]  ;;  %v4647_v41 = vrot.slane %v4628_v32, %v2894_v11  ;;  %v984_v44 = vld [vmem:[%s5447_s2 + $0x1818] sm:$0xff] }
 0x11d   :  { %1582 = vmatpush1.bf16.msra.mxu1 %v1137_v57  ;;  %v1147_v57 = vpack.c.bf16 %v515_v50, %v513_v48  ;;  %v851_v43 = vld [vmem:[%s5447_s2 + $0x13f0] sm:$0xff]  ;;  %v982_v39 = vld [vmem:[%s5447_s2 + $0x1808] sm:$0xff]  ;;  %v989_v17 = vld [vmem:[%s5447_s2 + $0x1840] sm:$0xff] }
 0x11e   :  { %1787 = vmatpush1.bf16.msra.mxu0 %v1297_v58  ;;  %1583 = vmatprep.subr.bf16.mxu1 %v1140_v59  ;;  %v1307_v58 = vpack.c.bf16 %v835_v52, %v833_v2  ;;  %v1150_v59 = vpack.c.bf16 %v520_v55, %v518_v53  ;;  %v154_v50 = vcombine.high %v4647_v41, %v4647_v41  ;;  %v983_v52 = vld [vmem:[%s5447_s2 + $0x1810] sm:$0xff]  ;;  %v853_v55 = vld [vmem:[%s5447_s2 + $0x1400] sm:$0xff] }
 0x11f   :  { %1788 = vmatprep.subr.bf16.mxu0 %v1300_v0  ;;  %v1310_v0 = vpack.c.bf16 %v840_v49, %v838_v56  ;;  %v1382_v2 = vpack.c.bf16 %v984_v44, %v982_v39  ;;  %v855_v56 = vld [vmem:[%s5447_s2 + $0x1410] sm:$0xff]  ;;  %v858_v49 = vld [vmem:[%s5447_s2 + $0x1428] sm:$0xff]  ;;  %v993_v30 = vld [vmem:[%s5447_s2 + $0x1860] sm:$0xff] }
 0x120   :  { %v991_v19 = vld [vmem:[%s5447_s2 + $0x1850] sm:$0xff]  ;;  %v874_v44 = vld [vmem:[%s5447_s2 + $0x14a8] sm:$0xff] }
 0x121   :  { %1584 = vmatpush1.bf16.msra.mxu1 %v1139_v8  ;;  %v1149_v8 = vpack.c.bf16 %v519_v60, %v517_v18  ;;  %v988_v18 = vld [vmem:[%s5447_s2 + $0x1838] sm:$0xff]  ;;  %v206_v60 = vpack.c.bf16 %v4261_v28, %v4261_v28  ;;  %v859_v28 = vld [vmem:[%s5447_s2 + $0x1430] sm:$0xff] }
 0x122   :  { %1789 = vmatpush1.bf16.msra.mxu0 %v1299_v9  ;;  %1585 = vmatprep.subr.bf16.mxu1 %v1142_v10  ;;  %v1309_v9 = vpack.c.bf16 %v839_v1, %v837_v61  ;;  %v1152_v10 = vpack.c.bf16 %v524_v5, %v522_v3  ;;  %v209_v1 = vpack.c.bf16 %v154_v50, %v154_v50  ;;  %v985_v3 = vld [vmem:[%s5447_s2 + $0x1820] sm:$0xff]  ;;  %v987_v5 = vld [vmem:[%s5447_s2 + $0x1830] sm:$0xff] }
 0x123   :  { %1790 = vmatprep.subr.bf16.mxu0 %v1302_v15  ;;  %v1312_v15 = vpack.c.bf16 %v844_v7, %v842_v6  ;;  %v863_v21 = vld [vmem:[%s5447_s2 + $0x1450] sm:$0xff]  ;;  %v873_v50 = vld [vmem:[%s5447_s2 + $0x14a0] sm:$0xff] }
 0x124   :  { %v995_v31 = vld [vmem:[%s5447_s2 + $0x1870] sm:$0xff] }
 0x125   :  { %1586 = vmatpush1.bf16.msra.mxu1 %v1141_v54  ;;  %v1151_v54 = vpack.c.bf16 %v523_v13, %v521_v12  ;;  %v864_v12 = vld [vmem:[%s5447_s2 + $0x1458] sm:$0xff]  ;;  %v1383_v13 = vpack.c.bf16 %v987_v5, %v985_v3  ;;  %v871_v39 = vld [vmem:[%s5447_s2 + $0x1490] sm:$0xff]  ;;  %v885_v5 = vld [vmem:[%s5447_s2 + $0x1500] sm:$0xff] }
 0x126   :  { %1791 = vmatpush1.bf16.msra.mxu0 %v1301_v22  ;;  %1587 = vmatprep.subr.bf16.mxu1 %v1144_v23  ;;  %v525_v22 = vld [vmem:[%s5447_s2 + $0x9c0] sm:$0xff]  ;;  %v1311_v23 = vpack.c.bf16 %v843_v16, %v841_v14 }
 0x127   :  { %1792 = vmatprep.subr.bf16.mxu0 %v1304_v40  ;;  %v847_v40 = vld [vmem:[%s5447_s2 + $0x13d0] sm:$0xff] }
 0x129   :  { %1588 = vmatpush1.bf16.msra.mxu1 %v1143_v46  ;;  %v852_v46 = vld [vmem:[%s5447_s2 + $0x13f8] sm:$0xff] }
 0x12a   :  { %1793 = vmatpush1.bf16.msra.mxu0 %v1303_v34  ;;  %1589 = vmatprep.subr.bf16.mxu1 %v1146_v35  ;;  %v1153_v34 = vpack.c.bf16 %v527_v26, %v525_v22  ;;  %v1313_v35 = vpack.c.bf16 %v847_v40, %v845_v27  ;;  %v1316_v42 = vpack.c.bf16 %v852_v46, %v850_v33  ;;  %v996_v22 = vld [vmem:[%s5447_s2 + $0x1878] sm:$0xff]  ;;  %v2551_v26 = vmov 0   ;;  %v865_v46 = vld [vmem:[%s5447_s2 + $0x1460] sm:$0xff] }
 0x12b   :  { %1794 = vmatprep.subr.bf16.mxu0 %v1306_v25  ;;  %v849_v25 = vld [vmem:[%s5447_s2 + $0x13e0] sm:$0xff]  ;;  %v1385_v27 = vpack.c.bf16 %v991_v19, %v989_v17  ;;  %v895_v19 = vld [vmem:[%s5447_s2 + $0x1550] sm:$0xff] }
 0x12c   :  { %v1315_v48 = vpack.c.bf16 %v851_v43, %v849_v25  ;;  %v869_v43 = vld [vmem:[%s5447_s2 + $0x1480] sm:$0xff] }
 0x12d   :  { %1590 = vmatpush1.bf16.msra.mxu1 %v1145_v63  ;;  %v854_v63 = vld [vmem:[%s5447_s2 + $0x1408] sm:$0xff]  ;;  %v893_v17 = vld [vmem:[%s5447_s2 + $0x1540] sm:$0xff] }
 0x12e   :  { %1795 = vmatpush1.bf16.msra.mxu0 %v1305_v45  ;;  %1591 = vmatprep.subr.bf16.mxu1 %v1148_v47  ;;  %v856_v45 = vld [vmem:[%s5447_s2 + $0x1418] sm:$0xff]  ;;  %v1155_v47 = vpack.c.bf16 %v531_v38, %v529_v37  ;;  %v1387_v37 = vpack.c.bf16 %v995_v31, %v993_v30  ;;  %v2357_v38 = vld.sshfl [vmem:[%s5445_s0 + $0x30] sm:$0x3 pattern:$0x76325410]  ;;  %v901_v30 = vld [vmem:[%s5447_s2 + $0x1580] sm:$0xff] }
 0x12f   :  { %1796 = vmatprep.subr.bf16.mxu0 %v1308_v51  ;;  %v981_v51 = vld [vmem:[%s5447_s2 + $0x1800] sm:$0xff]  ;;  %v1318_v53 = vpack.c.bf16 %v856_v45, %v854_v63  ;;  %v876_v63 = vld [vmem:[%s5447_s2 + $0x14b8] sm:$0xff]  ;;  %v212_v45 = vpack.c.bf16 %v2357_v38, %v2357_v38  ;;  %v903_v31 = vld [vmem:[%s5447_s2 + $0x1590] sm:$0xff] }
 0x130   :  { %v1381_v61 = vpack.c.bf16 %v983_v52, %v981_v51  ;;  %v878_v51 = vld [vmem:[%s5447_s2 + $0x14c8] sm:$0xff]  ;;  %v880_v52 = vld [vmem:[%s5447_s2 + $0x14d8] sm:$0xff] }
 0x131   :  { %1592 = vmatpush1.bf16.msra.mxu1 %v1147_v57  ;;  %v196_v57 = vpack.c.bf16 %v4252_v24, %v4252_v24  ;;  %v857_v24 = vld [vmem:[%s5447_s2 + $0x1420] sm:$0xff]  ;;  %v910_v38 = vld [vmem:[%s5447_s2 + $0x15c8] sm:$0xff] }
 0x132   :  { %1797 = vmatpush1.bf16.msra.mxu0 %v1307_v58  ;;  %1593 = vmatprep.subr.bf16.mxu1 %v1150_v59  ;;  %v860_v58 = vld [vmem:[%s5447_s2 + $0x1438] sm:$0xff]  ;;  %v986_v59 = vld [vmem:[%s5447_s2 + $0x1828] sm:$0xff]  ;;  %v1319_v14 = vpack.c.bf16 %v859_v28, %v857_v24 }
 0x133   :  { %1798 = vmatprep.subr.bf16.mxu0 %v1310_v0  ;;  %v1317_v0 = vpack.c.bf16 %v855_v56, %v853_v55  ;;  %v1320_v6 = vpack.c.bf16 %v860_v58, %v858_v49  ;;  %v1384_v7 = vpack.c.bf16 %v988_v18, %v986_v59  ;;  %v1330_v55 = vpack.c.bf16 %v880_v52, %v878_v51  ;;  %v877_v56 = vld [vmem:[%s5447_s2 + $0x14c0] sm:$0xff]  ;;  %v879_v49 = vld [vmem:[%s5447_s2 + $0x14d0] sm:$0xff]  ;;  %v884_v58 = vld [vmem:[%s5447_s2 + $0x14f8] sm:$0xff] }
 0x134   :  { %v1329_v59 = vpack.c.bf16 %v879_v49, %v877_v56  ;;  %v888_v24 = vld [vmem:[%s5447_s2 + $0x1518] sm:$0xff]  ;;  %v890_v28 = vld [vmem:[%s5447_s2 + $0x1528] sm:$0xff]  ;;  %v915_v51 = vld [vmem:[%s5447_s2 + $0x15f0] sm:$0xff] }
 0x135   :  { %1594 = vmatpush1.bf16.msra.mxu1 %v1149_v8  ;;  %v990_v8 = vld [vmem:[%s5447_s2 + $0x1848] sm:$0xff] }
 0x136   :  { %1799 = vmatpush1.bf16.msra.mxu0 %v1309_v9  ;;  %1595 = vmatprep.subr.bf16.mxu1 %v1152_v10  ;;  %v992_v9 = vld [vmem:[%s5447_s2 + $0x1858] sm:$0xff]  ;;  %v862_v10 = vld [vmem:[%s5447_s2 + $0x1448] sm:$0xff] }
 0x137   :  { %1800 = vmatprep.subr.bf16.mxu0 %v1312_v15  ;;  %v861_v15 = vld [vmem:[%s5447_s2 + $0x1440] sm:$0xff]  ;;  %v1386_v16 = vpack.c.bf16 %v992_v9, %v990_v8  ;;  %v1322_v20 = vpack.c.bf16 %v864_v12, %v862_v10  ;;  %v891_v12 = vld [vmem:[%s5447_s2 + $0x1530] sm:$0xff]  ;;  %v918_v52 = vld [vmem:[%s5447_s2 + $0x1608] sm:$0xff] }
 0x138   :  { %v1321_v40 = vpack.c.bf16 %v863_v21, %v861_v15  ;;  %v889_v10 = vld [vmem:[%s5447_s2 + $0x1520] sm:$0xff]  ;;  %v900_v21 = vld [vmem:[%s5447_s2 + $0x1578] sm:$0xff] }
 0x139   :  { %1596 = vmatpush1.bf16.msra.mxu1 %v1151_v54  ;;  %v994_v54 = vld [vmem:[%s5447_s2 + $0x1868] sm:$0xff]  ;;  %v1335_v15 = vpack.c.bf16 %v891_v12, %v889_v10  ;;  %v932_v10 = vld [vmem:[%s5447_s2 + $0x1678] sm:$0xff] }
 0x13a   :  { %1801 = vmatpush1.bf16.msra.mxu0 %v1311_v23  ;;  %1597 = vmatprep.subr.bf16.mxu1 %v1154_v4  ;;  %v866_v23 = vld [vmem:[%s5447_s2 + $0x1468] sm:$0xff]  ;;  %v868_v4 = vld [vmem:[%s5447_s2 + $0x1478] sm:$0xff] }
 0x13b   :  { %1802 = vmatprep.subr.bf16.mxu0 %v1314_v29  ;;  %v1388_v29 = vpack.c.bf16 %v996_v22, %v994_v54  ;;  %v1324_v33 = vpack.c.bf16 %v868_v4, %v866_v23  ;;  %v1337_v54 = vpack.c.bf16 %v895_v19, %v893_v17  ;;  %v897_v23 = vld [vmem:[%s5447_s2 + $0x1560] sm:$0xff]  ;;  %v899_v4 = vld [vmem:[%s5447_s2 + $0x1570] sm:$0xff]  ;;  %v936_v17 = vld [vmem:[%s5447_s2 + $0x1698] sm:$0xff] }
 0x13d   :  { %1598 = vmatpush1.bf16.msra.mxu1 %v1153_v34  ;;  %v867_v34 = vld [vmem:[%s5447_s2 + $0x1470] sm:$0xff] }
 0x13e   :  { %1803 = vmatpush1.bf16.msra.mxu0 %v1313_v35  ;;  %1599 = vmatprep.subr.bf16.mxu1 %v1156_v36  ;;  %v870_v35 = vld [vmem:[%s5447_s2 + $0x1488] sm:$0xff]  ;;  %v872_v36 = vld [vmem:[%s5447_s2 + $0x1498] sm:$0xff]  ;;  %v1323_v25 = vpack.c.bf16 %v867_v34, %v865_v46  ;;  %v1341_v34 = vpack.c.bf16 %v903_v31, %v901_v30 }
 0x13f   :  { %1804 = vmatprep.subr.bf16.mxu0 %v1316_v42  ;;  %v1326_v42 = vpack.c.bf16 %v872_v36, %v870_v35  ;;  %v908_v46 = vld [vmem:[%s5447_s2 + $0x15b8] sm:$0xff]  ;;  %v905_v36 = vld [vmem:[%s5447_s2 + $0x15a0] sm:$0xff] }
 0x140   :  { %v944_v30 = vld [vmem:[%s5447_s2 + $0x16d8] sm:$0xff] }
 0x141   :  { %1600 = vmatpush1.bf16.msra.mxu1 %v1155_v47  ;;  %v1325_v47 = vpack.c.bf16 %v871_v39, %v869_v43  ;;  %v139_v43 = vcombine.high %v4628_v32, %v4628_v32 }
 0x142   :  { %1805 = vmatpush1.bf16.msra.mxu0 %v1315_v48  ;;  %1897 = vmatprep.subr.bf16.mxu1 %v1382_v2  ;;  %v1328_v48 = vpack.c.bf16 %v876_v63, %v874_v44  ;;  %v875_v2 = vld [vmem:[%s5447_s2 + $0x14b0] sm:$0xff]  ;;  %v909_v44 = vld [vmem:[%s5447_s2 + $0x15c0] sm:$0xff] }
 0x143   :  { %1815 = vmatprep.subr.bf16.mxu0 %v1318_v53  ;;  %v1327_v53 = vpack.c.bf16 %v875_v2, %v873_v50  ;;  %v911_v63 = vld [vmem:[%s5447_s2 + $0x15d0] sm:$0xff]  ;;  %v913_v2 = vld [vmem:[%s5447_s2 + $0x15e0] sm:$0xff] }
 0x144   :  { %1602 = vmatmul.mubr.bf16.vlgmr.msra.gmra.mrb[0].mxu1 %v196_v57  ;;  %v882_v57 = vld [vmem:[%s5447_s2 + $0x14e8] sm:$0xff]  ;;  %v1345_v32 = vpack.c.bf16 %v911_v63, %v909_v44  ;;  %v1942_v63 = vld [vmem:[%s5449_s4] sm:$0xff] }
 0x145   :  { %1807 = vmatmul.mubr.bf16.vlgmr.msra.gmra.mrb[0].mxu0 %v206_v60  ;;  %1898 = vmatpush1.bf16.msra.mxu1 %v1381_v61  ;;  %v1332_v18 = vpack.c.bf16 %v884_v58, %v882_v57  ;;  %v881_v60 = vld [vmem:[%s5447_s2 + $0x14e0] sm:$0xff]  ;;  %v883_v61 = vld [vmem:[%s5447_s2 + $0x14f0] sm:$0xff]  ;;  %v1959_v44 = vld [vmem:[%s5449_s4 + $0x88] sm:$0xff] }
 0x146   :  { %1816 = vmatpush1.bf16.msra.mxu0 %v1317_v0  ;;  %1847 = vmatprep.mubr.bf16.mxu0 %v209_v1  ;;  %v886_v0 = vld [vmem:[%s5447_s2 + $0x1508] sm:$0xff]  ;;  %v1331_v1 = vpack.c.bf16 %v883_v61, %v881_v60  ;;  %v917_v57 = vld [vmem:[%s5447_s2 + $0x1600] sm:$0xff]  ;;  %v919_v58 = vld [vmem:[%s5447_s2 + $0x1610] sm:$0xff]  ;;  %v208_v60 = vpack.c.bf16 %v4647_v41, %v4647_v41 }
 0x147   :  { %1817 = vmatprep.subr.bf16.mxu0 %v1320_v6  ;;  %1899 = vmatprep.subr.bf16.mxu1 %v1384_v7  ;;  %v1334_v3 = vpack.c.bf16 %v888_v24, %v886_v0  ;;  %v887_v6 = vld [vmem:[%s5447_s2 + $0x1510] sm:$0xff]  ;;  %v892_v7 = vld [vmem:[%s5447_s2 + $0x1538] sm:$0xff]  ;;  %v1349_v61 = vpack.c.bf16 %v919_v58, %v917_v57  ;;  %v949_v58 = vld [vmem:[%s5447_s2 + $0x1700] sm:$0xff] }
 0x148   :  { %1929 = vmatprep.mubr.bf16.mxu1 %v2551_v26  ;;  %v1333_v8 = vpack.c.bf16 %v887_v6, %v885_v5  ;;  %v1336_v9 = vpack.c.bf16 %v892_v7, %v890_v28  ;;  %v902_v26 = vld [vmem:[%s5447_s2 + $0x1588] sm:$0xff]  ;;  %v928_v41 = vld [vmem:[%s5447_s2 + $0x1658] sm:$0xff]  ;;  %v925_v7 = vld [vmem:[%s5447_s2 + $0x1640] sm:$0xff] }
 0x149   :  { %1900 = vmatpush1.bf16.msra.mxu1 %v1383_v13  ;;  %v894_v13 = vld [vmem:[%s5447_s2 + $0x1548] sm:$0xff] }
 0x14a   :  { %1818 = vmatpush1.bf16.msra.mxu0 %v1319_v14  ;;  %1901 = vmatprep.subr.bf16.mxu1 %v1386_v16  ;;  %v896_v14 = vld [vmem:[%s5447_s2 + $0x1558] sm:$0xff]  ;;  %v926_v5 = vld [vmem:[%s5447_s2 + $0x1648] sm:$0xff] }
 0x14b   :  { %1819 = vmatprep.subr.bf16.mxu0 %v1322_v20  ;;  %v1338_v16 = vpack.c.bf16 %v896_v14, %v894_v13  ;;  %v898_v20 = vld [vmem:[%s5447_s2 + $0x1568] sm:$0xff]  ;;  %v1354_v28 = vpack.c.bf16 %v928_v41, %v926_v5  ;;  %v929_v14 = vld [vmem:[%s5447_s2 + $0x1660] sm:$0xff]  ;;  %v1964_v5 = vld [vmem:[%s5449_s4 + $0xb0] sm:$0xff] }
 0x14c   :  { %v1340_v22 = vpack.c.bf16 %v900_v21, %v898_v20  ;;  %v933_v21 = vld [vmem:[%s5447_s2 + $0x1680] sm:$0xff]  ;;  %v1965_v41 = vld [vmem:[%s5449_s4 + $0xb8] sm:$0xff] }
 0x14d   :  { %1902 = vmatpush1.bf16.msra.mxu1 %v1385_v27  ;;  %v904_v27 = vld [vmem:[%s5447_s2 + $0x1598] sm:$0xff] }
 0x14e   :  { %1820 = vmatpush1.bf16.msra.mxu0 %v1321_v40  ;;  %1903 = vmatprep.subr.bf16.mxu1 %v1388_v29  ;;  %v1339_v40 = vpack.c.bf16 %v899_v4, %v897_v23  ;;  %v1342_v29 = vpack.c.bf16 %v904_v27, %v902_v26  ;;  %v940_v23 = vld [vmem:[%s5447_s2 + $0x16b8] sm:$0xff]  ;;  %v937_v27 = vld [vmem:[%s5447_s2 + $0x16a0] sm:$0xff] }
 0x14f   :  { %1821 = vmatprep.subr.bf16.mxu0 %v1324_v33  ;;  %v906_v33 = vld [vmem:[%s5447_s2 + $0x15a8] sm:$0xff] }
 0x150   :  { %v1344_v35 = vpack.c.bf16 %v908_v46, %v906_v33  ;;  %v941_v46 = vld [vmem:[%s5447_s2 + $0x16c0] sm:$0xff] }
 0x151   :  { %1904 = vmatpush1.bf16.msra.mxu1 %v1387_v37  ;;  %v907_v37 = vld [vmem:[%s5447_s2 + $0x15b0] sm:$0xff] }
 0x152   :  { %1822 = vmatpush1.bf16.msra.mxu0 %v1323_v25  ;;  %v912_v25 = vld [vmem:[%s5447_s2 + $0x15d8] sm:$0xff] }
 0x153   :  { %1823 = vmatprep.subr.bf16.mxu0 %v1326_v42  ;;  %v1343_v42 = vpack.c.bf16 %v907_v37, %v905_v36  ;;  %v1346_v39 = vpack.c.bf16 %v912_v25, %v910_v38  ;;  %v948_v36 = vld [vmem:[%s5447_s2 + $0x16f8] sm:$0xff]  ;;  %v945_v37 = vld [vmem:[%s5447_s2 + $0x16e0] sm:$0xff]  ;;  %v947_v38 = vld [vmem:[%s5447_s2 + $0x16f0] sm:$0xff] }
 0x154   :  { %2358 = vmatmul.mubr.msk.bf16.vlgmr.msra.gmra.mrb[4].mxu1 %vm1401_vm0, %v212_v45  ;;  %v914_v45 = vld [vmem:[%s5447_s2 + $0x15e8] sm:$0xff]  ;;  %v1363_v57 = vpack.c.bf16 %v947_v38, %v945_v37  ;;  %v1952_v37 = vld [vmem:[%s5449_s4 + $0x50] sm:$0xff]  ;;  %v1953_v38 = vld [vmem:[%s5449_s4 + $0x58] sm:$0xff] }
 0x156   :  { %1824 = vmatpush1.bf16.msra.mxu0 %v1325_v47  ;;  %v916_v47 = vld [vmem:[%s5447_s2 + $0x15f8] sm:$0xff] }
 0x157   :  { %1825 = vmatprep.subr.bf16.mxu0 %v1328_v48  ;;  %v4899_v48 = vrot.slane %v139_v43, %v2894_v11  ;;  %v1348_v50 = vpack.c.bf16 %v916_v47, %v914_v45  ;;  %v952_v43 = vld [vmem:[%s5447_s2 + $0x1718] sm:$0xff] }
 0x159   :  { %v155_v56 = vcombine.high %v4899_v48, %v4899_v48 }
 0x15a   :  { %1826 = vmatpush1.bf16.msra.mxu0 %v1327_v53  ;;  %v920_v53 = vld [vmem:[%s5447_s2 + $0x1618] sm:$0xff] }
 0x15b   :  { %1827 = vmatprep.subr.bf16.mxu0 %v1330_v55  ;;  %v1347_v55 = vpack.c.bf16 %v915_v51, %v913_v2  ;;  %v1350_v49 = vpack.c.bf16 %v920_v53, %v918_v52  ;;  %v211_v0 = vpack.c.bf16 %v155_v56, %v155_v56  ;;  %v1961_v2 = vld [vmem:[%s5449_s4 + $0x98] sm:$0xff]  ;;  %v1944_v53 = vld [vmem:[%s5449_s4 + $0x10] sm:$0xff]  ;;  %v1962_v56 = vld [vmem:[%s5449_s4 + $0xa0] sm:$0xff] }
 0x15e   :  { %1828 = vmatpush1.bf16.msra.mxu0 %v1329_v59  ;;  %v922_v59 = vld [vmem:[%s5447_s2 + $0x1628] sm:$0xff] }
 0x15f   :  { %1829 = vmatprep.subr.bf16.mxu0 %v1332_v18  ;;  %v924_v18 = vld [vmem:[%s5447_s2 + $0x1638] sm:$0xff] }
 0x160   :  { %v1352_v24 = vpack.c.bf16 %v924_v18, %v922_v59  ;;  %v951_v59 = vld [vmem:[%s5447_s2 + $0x1710] sm:$0xff] }
 0x162   :  { %1830 = vmatpush1.bf16.msra.mxu0 %v1331_v1  ;;  %v921_v1 = vld [vmem:[%s5447_s2 + $0x1620] sm:$0xff] }
 0x163   :  { %1831 = vmatprep.subr.bf16.mxu0 %v1334_v3  ;;  %v923_v3 = vld [vmem:[%s5447_s2 + $0x1630] sm:$0xff] }
 0x164   :  { %v1351_v6 = vpack.c.bf16 %v923_v3, %v921_v1  ;;  %v1947_v1 = vld [vmem:[%s5449_s4 + $0x28] sm:$0xff]  ;;  %v956_v3 = vld [vmem:[%s5447_s2 + $0x1738] sm:$0xff] }
 0x166   :  { %1832 = vmatpush1.bf16.msra.mxu0 %v1333_v8  ;;  %v927_v8 = vld [vmem:[%s5447_s2 + $0x1650] sm:$0xff] }
 0x167   :  { %1833 = vmatprep.subr.bf16.mxu0 %v1336_v9  ;;  %v930_v9 = vld [vmem:[%s5447_s2 + $0x1668] sm:$0xff]  ;;  %v1353_v12 = vpack.c.bf16 %v927_v8, %v925_v7  ;;  %v955_v7 = vld [vmem:[%s5447_s2 + $0x1730] sm:$0xff] }
 0x168   :  { %v1356_v13 = vpack.c.bf16 %v932_v10, %v930_v9  ;;  %v958_v10 = vld [vmem:[%s5447_s2 + $0x1748] sm:$0xff] }
 0x16a   :  { %1834 = vmatpush1.bf16.msra.mxu0 %v1335_v15  ;;  %v931_v15 = vld [vmem:[%s5447_s2 + $0x1670] sm:$0xff] }
 0x16b   :  { %1835 = vmatprep.subr.bf16.mxu0 %v1338_v16  ;;  %v934_v16 = vld [vmem:[%s5447_s2 + $0x1688] sm:$0xff]  ;;  %v1355_v19 = vpack.c.bf16 %v931_v15, %v929_v14  ;;  %v1949_v14 = vld [vmem:[%s5449_s4 + $0x38] sm:$0xff] }
 0x16c   :  { %v1358_v20 = vpack.c.bf16 %v936_v17, %v934_v16  ;;  %v960_v15 = vld [vmem:[%s5447_s2 + $0x1758] sm:$0xff]  ;;  %v1966_v16 = vld [vmem:[%s5449_s4 + $0xc0] sm:$0xff]  ;;  %v1967_v17 = vld [vmem:[%s5449_s4 + $0xc8] sm:$0xff] }
 0x16e   :  { %1836 = vmatpush1.bf16.msra.mxu0 %v1337_v54  ;;  %v935_v54 = vld [vmem:[%s5447_s2 + $0x1690] sm:$0xff] }
 0x16f   :  { %1837 = vmatprep.subr.bf16.mxu0 %v1340_v22  ;;  %v938_v22 = vld [vmem:[%s5447_s2 + $0x16a8] sm:$0xff]  ;;  %v1357_v4 = vpack.c.bf16 %v935_v54, %v933_v21  ;;  %v959_v21 = vld [vmem:[%s5447_s2 + $0x1750] sm:$0xff] }
 0x170   :  { %v1360_v26 = vpack.c.bf16 %v940_v23, %v938_v22  ;;  %v1370_v22 = vpack.c.bf16 %v960_v15, %v958_v10  ;;  %v962_v23 = vld [vmem:[%s5447_s2 + $0x1768] sm:$0xff] }
 0x172   :  { %1838 = vmatpush1.bf16.msra.mxu0 %v1339_v40  ;;  %v939_v40 = vld [vmem:[%s5447_s2 + $0x16b0] sm:$0xff] }
 0x173   :  { %1839 = vmatprep.subr.bf16.mxu0 %v1342_v29  ;;  %v942_v29 = vld [vmem:[%s5447_s2 + $0x16c8] sm:$0xff]  ;;  %v1359_v31 = vpack.c.bf16 %v939_v40, %v937_v27  ;;  %v964_v40 = vld [vmem:[%s5447_s2 + $0x1778] sm:$0xff] }
 0x174   :  { %v1362_v33 = vpack.c.bf16 %v944_v30, %v942_v29  ;;  %v1951_v27 = vld [vmem:[%s5449_s4 + $0x48] sm:$0xff]  ;;  %v1968_v29 = vld [vmem:[%s5449_s4 + $0xd0] sm:$0xff]  ;;  %v1969_v30 = vld [vmem:[%s5449_s4 + $0xd8] sm:$0xff] }
 0x176   :  { %1840 = vmatpush1.bf16.msra.mxu0 %v1341_v34  ;;  %v943_v34 = vld [vmem:[%s5447_s2 + $0x16d0] sm:$0xff] }
 0x177   :  { %1841 = vmatprep.subr.bf16.mxu0 %v1344_v35  ;;  %v946_v35 = vld [vmem:[%s5447_s2 + $0x16e8] sm:$0xff]  ;;  %v1361_v25 = vpack.c.bf16 %v943_v34, %v941_v46  ;;  %v1372_v34 = vpack.c.bf16 %v964_v40, %v962_v23  ;;  %v1389_v40 = vld [vmem:[%s5448_s3] sm:$0x3] }
 0x178   :  { %v1364_v45 = vpack.c.bf16 %v948_v36, %v946_v35  ;;  %v963_v35 = vld [vmem:[%s5447_s2 + $0x1770] sm:$0xff]  ;;  %v1987_v36 = vpack.c.bf16 %v1969_v30, %v1968_v29  ;;  %v1397_v29 = vsub.s32 1, %v2867_v62 }
 0x17a   :  { %1842 = vmatpush1.bf16.msra.mxu0 %v1343_v42  ;;  %v950_v42 = vld [vmem:[%s5447_s2 + $0x1708] sm:$0xff] }
 0x17b   :  { %1843 = vmatprep.subr.bf16.mxu0 %v1346_v39  ;;  %v1958_v39 = vld [vmem:[%s5449_s4 + $0x80] sm:$0xff] }
 0x17c   :  { %v1982_v47 = vpack.c.bf16 %v1959_v44, %v1958_v39  ;;  %v1979_v39 = vpack.c.bf16 %v1953_v38, %v1952_v37 }
 0x17e   :  { %1844 = vmatpush1.bf16.msra.mxu0 %v1345_v32  ;;  %v1943_v32 = vld [vmem:[%s5449_s4 + $0x8] sm:$0xff]  ;;  %2365 = vmatprep.subr.bf16.mxu1 %v1982_v47 }
 0x17f   :  { %1845 = vmatprep.subr.bf16.mxu0 %v1348_v50  ;;  %v1960_v50 = vld [vmem:[%s5449_s4 + $0x90] sm:$0xff]  ;;  %v1974_v51 = vpack.c.bf16 %v1943_v32, %v1942_v63  ;;  %v965_v63 = vld [vmem:[%s5447_s2 + $0x1780] sm:$0xff]  ;;  %v970_v47 = vld [vmem:[%s5447_s2 + $0x17a8] sm:$0xff] }
 0x180   :  { %v1983_v52 = vpack.c.bf16 %v1961_v2, %v1960_v50  ;;  %v972_v32 = vld [vmem:[%s5447_s2 + $0x17b8] sm:$0xff] }
 0x181   :  { %2366 = vmatpush3.bf16.msra.mxu1 %v1974_v51  ;;  %v1376_v2 = vpack.c.bf16 %v972_v32, %v970_v47  ;;  %v969_v51 = vld [vmem:[%s5447_s2 + $0x17a0] sm:$0xff]  ;;  %v2063_v47 = vld [vmem:[%s5451_s6 + $0x8] sm:$0xff] }
 0x182   :  { %1846 = vmatpush1.bf16.msra.mxu0 %v1347_v55  ;;  %v1945_v55 = vld [vmem:[%s5449_s4 + $0x18] sm:$0xff]  ;;  %2367 = vmatprep.subr.bf16.mxu1 %v1983_v52  ;;  %v971_v52 = vld [vmem:[%s5447_s2 + $0x17b0] sm:$0xff] }
 0x183   :  { %1856 = vmatprep.subr.bf16.mxu0 %v1350_v49  ;;  %v1963_v49 = vld [vmem:[%s5449_s4 + $0xa8] sm:$0xff]  ;;  %v1975_v18 = vpack.c.bf16 %v1945_v55, %v1944_v53  ;;  %v976_v55 = vld [vmem:[%s5447_s2 + $0x17d8] sm:$0xff] }
 0x184   :  { %v974_v53 = vld [vmem:[%s5447_s2 + $0x17c8] sm:$0xff] }
 0x185   :  { %1848 = vmatmul.mubr.bf16.vlgmr.msra.gmra.mrb[0].mxu0 %v208_v60  ;;  %v1366_v60 = vpack.c.bf16 %v952_v43, %v950_v42  ;;  %2368 = vmatpush3.bf16.msra.mxu1 %v1975_v18  ;;  %v968_v42 = vld [vmem:[%s5447_s2 + $0x1798] sm:$0xff] }
 0x186   :  { %1857 = vmatpush1.bf16.msra.mxu0 %v1349_v61  ;;  %1888 = vmatprep.mubr.bf16.mxu0 %v211_v0  ;;  %v954_v61 = vld [vmem:[%s5447_s2 + $0x1728] sm:$0xff]  ;;  %v1984_v0 = vpack.c.bf16 %v1963_v49, %v1962_v56  ;;  %v1375_v56 = vpack.c.bf16 %v971_v52, %v969_v51  ;;  %v1378_v49 = vpack.c.bf16 %v976_v55, %v974_v53  ;;  %v980_v18 = vld [vmem:[%s5447_s2 + $0x17f8] sm:$0xff] }
 0x187   :  { %1858 = vmatprep.subr.bf16.mxu0 %v1352_v24  ;;  %v1946_v24 = vld [vmem:[%s5449_s4 + $0x20] sm:$0xff]  ;;  %v1368_v9 = vpack.c.bf16 %v956_v3, %v954_v61  ;;  %v210_v3 = vpack.c.bf16 %v4899_v48, %v4899_v48  ;;  %v1955_v48 = vld [vmem:[%s5449_s4 + $0x68] sm:$0xff] }
 0x188   :  { %v1976_v8 = vpack.c.bf16 %v1947_v1, %v1946_v24  ;;  %2369 = vmatprep.subr.bf16.mxu1 %v1984_v0  ;;  %v977_v0 = vld [vmem:[%s5447_s2 + $0x17e0] sm:$0xff]  ;;  %v979_v24 = vld [vmem:[%s5447_s2 + $0x17f0] sm:$0xff] }
 0x189   :  { %v1379_v1 = vpack.c.bf16 %v979_v24, %v977_v0  ;;  %v2067_v0 = vld [vmem:[%s5451_s6 + $0x28] sm:$0xff]  ;;  %v2084_v24 = vld [vmem:[%s5451_s6 + $0xb0] sm:$0xff] }
 0x18a   :  { %1859 = vmatpush1.bf16.msra.mxu0 %v1351_v6  ;;  %v1365_v6 = vpack.c.bf16 %v951_v59, %v949_v58  ;;  %2370 = vmatpush3.bf16.msra.mxu1 %v1976_v8  ;;  %v975_v58 = vld [vmem:[%s5447_s2 + $0x17d0] sm:$0xff]  ;;  %v978_v59 = vld [vmem:[%s5447_s2 + $0x17e8] sm:$0xff]  ;;  %v1954_v8 = vld [vmem:[%s5449_s4 + $0x60] sm:$0xff] }
 0x18b   :  { %1860 = vmatprep.subr.bf16.mxu0 %v1354_v28  ;;  %v953_v28 = vld [vmem:[%s5447_s2 + $0x1720] sm:$0xff]  ;;  %v1380_v61 = vpack.c.bf16 %v980_v18, %v978_v59  ;;  %v1980_v10 = vpack.c.bf16 %v1955_v48, %v1954_v8  ;;  %v2083_v59 = vld [vmem:[%s5451_s6 + $0xa8] sm:$0xff] }
 0x18e   :  { %1861 = vmatpush1.bf16.msra.mxu0 %v1353_v12  ;;  %v1985_v12 = vpack.c.bf16 %v1965_v41, %v1964_v5  ;;  %v1970_v41 = vld [vmem:[%s5449_s4 + $0xe0] sm:$0xff] }
 0x18f   :  { %1862 = vmatprep.subr.bf16.mxu0 %v1356_v13  ;;  %v1948_v13 = vld [vmem:[%s5449_s4 + $0x30] sm:$0xff] }
 0x190   :  { %v1977_v54 = vpack.c.bf16 %v1949_v14, %v1948_v13  ;;  %2371 = vmatprep.subr.bf16.mxu1 %v1985_v12  ;;  %v1972_v13 = vld [vmem:[%s5449_s4 + $0xf0] sm:$0xff]  ;;  %v1973_v14 = vld [vmem:[%s5449_s4 + $0xf8] sm:$0xff] }
 0x191   :  { %v1989_v15 = vpack.c.bf16 %v1973_v14, %v1972_v13  ;;  %v2089_v13 = vld [vmem:[%s5451_s6 + $0xd8] sm:$0xff] }
 0x192   :  { %1863 = vmatpush1.bf16.msra.mxu0 %v1355_v19  ;;  %v1367_v19 = vpack.c.bf16 %v955_v7, %v953_v28  ;;  %2372 = vmatpush3.bf16.msra.mxu1 %v1977_v54 }
 0x193   :  { %1864 = vmatprep.subr.bf16.mxu0 %v1358_v20  ;;  %v957_v20 = vld [vmem:[%s5447_s2 + $0x1740] sm:$0xff] }
 0x196   :  { %1865 = vmatpush1.bf16.msra.mxu0 %v1357_v4  ;;  %v1986_v4 = vpack.c.bf16 %v1967_v17, %v1966_v16  ;;  %v1956_v16 = vld [vmem:[%s5449_s4 + $0x70] sm:$0xff]  ;;  %v1957_v17 = vld [vmem:[%s5449_s4 + $0x78] sm:$0xff] }
 0x197   :  { %1866 = vmatprep.subr.bf16.mxu0 %v1360_v26  ;;  %v1950_v26 = vld [vmem:[%s5449_s4 + $0x40] sm:$0xff] }
 0x198   :  { %v1978_v46 = vpack.c.bf16 %v1951_v27, %v1950_v26  ;;  %2373 = vmatprep.subr.bf16.mxu1 %v1986_v4  ;;  %v1393_v27 = vsub.s32 0, %v2867_v62 }
 0x19a   :  { %1867 = vmatpush1.bf16.msra.mxu0 %v1359_v31  ;;  %v1369_v31 = vpack.c.bf16 %v959_v21, %v957_v20  ;;  %2374 = vmatpush3.bf16.msra.mxu1 %v1978_v46  ;;  %v2078_v20 = vld [vmem:[%s5451_s6 + $0x80] sm:$0xff]  ;;  %v2079_v21 = vld [vmem:[%s5451_s6 + $0x88] sm:$0xff]  ;;  %v1394_v30 = vrot.slane %v1389_v40, %v1393_v27 }
 0x19b   :  { %1868 = vmatprep.subr.bf16.mxu0 %v1362_v33  ;;  %v961_v33 = vld [vmem:[%s5447_s2 + $0x1760] sm:$0xff]  ;;  %2375 = vmatprep.subr.bf16.mxu1 %v1987_v36  ;;  %v2114_v54 = vpack.c.bf16 %v2079_v21, %v2078_v20  ;;  %v2091_v20 = vld [vmem:[%s5451_s6 + $0xe8] sm:$0xff] }
 0x19c   :  { %v1371_v43 = vpack.c.bf16 %v963_v35, %v961_v33  ;;  %v5215_v33 = vld [vmem:[%s5446_s1] sm:$0x3f] }
 0x19d   :  { %v5219_v36 = vrot.slane %v5215_v33, %v2894_v11 }
 0x19e   :  { %1869 = vmatpush1.bf16.msra.mxu0 %v1361_v25  ;;  %v966_v25 = vld [vmem:[%s5447_s2 + $0x1788] sm:$0xff]  ;;  %2376 = vmatpush3.bf16.msra.mxu1 %v1979_v39 }
 0x19f   :  { %1870 = vmatprep.subr.bf16.mxu0 %v1364_v45  ;;  %v1374_v44 = vpack.c.bf16 %v968_v42, %v966_v25  ;;  %v967_v45 = vld [vmem:[%s5447_s2 + $0x1790] sm:$0xff] }
 0x1a0   :  { %v1373_v50 = vpack.c.bf16 %v967_v45, %v965_v63  ;;  %v2062_v45 = vld [vmem:[%s5451_s6] sm:$0xff] }
 0x1a1   :  { %v2106_v52 = vpack.c.bf16 %v2063_v47, %v2062_v45  ;;  %v2102_v47 = vld [vmem:[%s5451_s6 + $0x140] sm:$0xff] }
 0x1a2   :  { %1871 = vmatpush1.bf16.msra.mxu0 %v1363_v57  ;;  %v973_v57 = vld [vmem:[%s5447_s2 + $0x17c0] sm:$0xff] }
 0x1a3   :  { %1872 = vmatprep.subr.bf16.mxu0 %v1366_v60  ;;  %v1377_v60 = vpack.c.bf16 %v975_v58, %v973_v57  ;;  %v2065_v57 = vld [vmem:[%s5451_s6 + $0x18] sm:$0xff]  ;;  %v2082_v58 = vld [vmem:[%s5451_s6 + $0xa0] sm:$0xff] }
 0x1a6   :  { %1873 = vmatpush1.bf16.msra.mxu0 %v1365_v6  ;;  %v1971_v6 = vld [vmem:[%s5449_s4 + $0xe8] sm:$0xff] }
 0x1a7   :  { %1874 = vmatprep.subr.bf16.mxu0 %v1368_v9  ;;  %v1988_v7 = vpack.c.bf16 %v1971_v6, %v1970_v41  ;;  %v2068_v41 = vld [vmem:[%s5451_s6 + $0x30] sm:$0xff]  ;;  %v2069_v6 = vld [vmem:[%s5451_s6 + $0x38] sm:$0xff] }
 0x1a8   :  { %v2109_v8 = vpack.c.bf16 %v2069_v6, %v2068_v41 }
 0x1a9   :  { %2377 = vmatprep.subr.bf16.mxu1 %v1988_v7  ;;  %v2087_v7 = vld [vmem:[%s5451_s6 + $0xc8] sm:$0xff] }
 0x1aa   :  { %1875 = vmatpush1.bf16.msra.mxu0 %v1367_v19  ;;  %2378 = vmatpush3.bf16.msra.mxu1 %v1980_v10  ;;  %v1981_v19 = vpack.c.bf16 %v1957_v17, %v1956_v16  ;;  %v2071_v10 = vld [vmem:[%s5451_s6 + $0x48] sm:$0xff]  ;;  %v2072_v16 = vld [vmem:[%s5451_s6 + $0x50] sm:$0xff]  ;;  %v2073_v17 = vld [vmem:[%s5451_s6 + $0x58] sm:$0xff] }
 0x1ab   :  { %1876 = vmatprep.subr.bf16.mxu0 %v1370_v22  ;;  %2379 = vmatprep.subr.bf16.mxu1 %v1989_v15  ;;  %v2111_v21 = vpack.c.bf16 %v2073_v17, %v2072_v16  ;;  %v2221_v17 = vld [vmem:[%s5453_s8] sm:$0xff] }
 0x1ae   :  { %1877 = vmatpush1.bf16.msra.mxu0 %v1369_v31  ;;  %2380 = vmatpush3.bf16.msra.mxu1 %v1981_v19  ;;  %v1398_v31 = vrot.slane %v1389_v40, %v1397_v29  ;;  %v2090_v19 = vld [vmem:[%s5451_s6 + $0xe0] sm:$0xff]  ;;  %v2076_v29 = vld [vmem:[%s5451_s6 + $0x70] sm:$0xff] }
 0x1af   :  { %1878 = vmatprep.subr.bf16.mxu0 %v1372_v34  ;;  %2387 = vmatprep.subr.bf16.mxu1 %v2114_v54  ;;  %v2120_v54 = vpack.c.bf16 %v2091_v20, %v2090_v19  ;;  %v2222_v19 = vld [vmem:[%s5453_s8 + $0x8] sm:$0xff] }
 0x1b2   :  { %1879 = vmatpush1.bf16.msra.mxu0 %v1371_v43 }
 0x1b3   :  { %1880 = vmatprep.subr.bf16.mxu0 %v1374_v44  ;;  %v2055_v44 = vcombine.high %v5219_v36, %v5219_v36 }
 0x1b5   :  { %v2060_v53 = vpack.c.bf16 %v2055_v44, %v2055_v44  ;;  %v2100_v44 = vld [vmem:[%s5451_s6 + $0x130] sm:$0xff] }
 0x1b6   :  { %1881 = vmatpush1.bf16.msra.mxu0 %v1373_v50  ;;  %v2080_v50 = vld [vmem:[%s5451_s6 + $0x90] sm:$0xff] }
 0x1b7   :  { %1882 = vmatprep.subr.bf16.mxu0 %v1376_v2  ;;  %v2081_v2 = vld [vmem:[%s5451_s6 + $0x98] sm:$0xff] }
 0x1ba   :  { %1883 = vmatpush1.bf16.msra.mxu0 %v1375_v56  ;;  %v2115_v56 = vpack.c.bf16 %v2081_v2, %v2080_v50  ;;  %v2040_v50 = vcombine.high %v5215_v33, %v5215_v33  ;;  %v2234_v33 = vld [vmem:[%s5454_s9] sm:$0xff] }
 0x1bb   :  { %1884 = vmatprep.subr.bf16.mxu0 %v1378_v49  ;;  %v2064_v49 = vld [vmem:[%s5451_s6 + $0x10] sm:$0xff] }
 0x1bc   :  { %v2107_v18 = vpack.c.bf16 %v2065_v57, %v2064_v49  ;;  %v2236_v49 = vld [vmem:[%s5454_s9 + $0x10] sm:$0xff] }
 0x1be   :  { %1885 = vmatpush1.bf16.msra.mxu0 %v1377_v60  ;;  %v2116_v60 = vpack.c.bf16 %v2083_v59, %v2082_v58  ;;  %v2237_v58 = vld [vmem:[%s5454_s9 + $0x18] sm:$0xff] }
 0x1bf   :  { %1886 = vmatprep.subr.bf16.mxu0 %v1380_v61  ;;  %v2066_v61 = vld [vmem:[%s5451_s6 + $0x20] sm:$0xff]  ;;  %v2243_v59 = vpack.c.bf16 %v2237_v58, %v2236_v49 }
 0x1c2   :  { %1887 = vmatpush1.bf16.msra.mxu0 %v1379_v1  ;;  %v2085_v1 = vld [vmem:[%s5451_s6 + $0xb8] sm:$0xff] }
 0x1c5   :  { %1889 = vmatmul.mubr.bf16.vlgmr.msra.gmra.mrb[0].mxu0 %v210_v3  ;;  %v2108_v3 = vpack.c.bf16 %v2067_v0, %v2066_v61  ;;  %v2240_v0 = vld [vmem:[%s5454_s9 + $0x30] sm:$0xff] }
 0x217   :  { %v1603_v5 = vpop.f32.mrb[0].mxu1 }
 0x218   :  { %v1605_v28 = vpop.f32.mrb[1].mxu1  ;;  %v2466_v46 = vadd.f32 %v1603_v5, %v1394_v30  ;;  %v2117_v5 = vpack.c.bf16 %v2085_v1, %v2084_v24  ;;  %v2077_v30 = vld [vmem:[%s5451_s6 + $0x78] sm:$0xff] }
 0x219   :  { %v1607_v9 = vpop.f32.mrb[2].mxu1  ;;  %v2469_v34 = vadd.f32 %v1605_v28, %v1398_v31  ;;  %v2086_v28 = vld [vmem:[%s5451_s6 + $0xc0] sm:$0xff]  ;;  %v2113_v31 = vpack.c.bf16 %v2077_v30, %v2076_v29  ;;  %v2241_v24 = vld [vmem:[%s5454_s9 + $0x38] sm:$0xff]  ;;  %v2226_v29 = vld [vmem:[%s5453_s8 + $0x28] sm:$0xff] }
 0x21a   :  { %v1608_v12 = vpop.f32.mrb[3].mxu1  ;;  %v2118_v48 = vpack.c.bf16 %v2087_v7, %v2086_v28  ;;  %v2070_v9 = vld [vmem:[%s5451_s6 + $0x40] sm:$0xff]  ;;  %v2245_v1 = vpack.c.bf16 %v2241_v24, %v2240_v0 }
 0x21b   :  { %v2088_v12 = vld [vmem:[%s5451_s6 + $0xd0] sm:$0xff]  ;;  %v2110_v14 = vpack.c.bf16 %v2071_v10, %v2070_v9  ;;  %v2359_v30 = vld [vmem:[%s5450_s5] ss:$0 sm:$0xff] }
 0x21c   :  { %v2119_v15 = vpack.c.bf16 %v2089_v13, %v2088_v12  ;;  %v2360_v12 = vld [vmem:[%s5452_s7] ss:$0 sm:$0xff] }
 0x227   :  { %v1931_v22 = vpop.f32.mrb[4].mxu1 }
 0x228   :  { %v1933_v23 = vpop.f32.mrb[5].mxu1 }
 0x229   :  { %v1935_v4 = vpop.f32.mrb[6].mxu1 }
 0x22a   :  { %v1936_v26 = vpop.f32.mrb[7].mxu1  ;;  %v2092_v4 = vld [vmem:[%s5451_s6 + $0xf0] sm:$0xff] }
 0x22b   :  { %v2093_v26 = vld [vmem:[%s5451_s6 + $0xf8] sm:$0xff] }
 0x22c   :  { %v2121_v40 = vpack.c.bf16 %v2093_v26, %v2092_v4  ;;  %v2223_v4 = vld [vmem:[%s5453_s8 + $0x10] sm:$0xff]  ;;  %v2224_v26 = vld [vmem:[%s5453_s8 + $0x18] sm:$0xff] }
 0x298   :  { %v1890_v35 = vpop.f32.mrb[0].mxu0 }
 0x299   :  { %v2467_v37 = vadd.f32 %v2466_v46, %v1890_v35  ;;  %v1892_v38 = vpop.f32.mrb[1].mxu0  ;;  %v2094_v46 = vld [vmem:[%s5451_s6 + $0x100] sm:$0xff]  ;;  %v2059_v35 = vpack.c.bf16 %v5219_v36, %v5219_v36 }
 0x29a   :  { %v2470_v25 = vadd.f32 %v2469_v34, %v1892_v38  ;;  %v1894_v42 = vpop.f32.mrb[2].mxu0  ;;  %v2095_v34 = vld [vmem:[%s5451_s6 + $0x108] sm:$0xff]  ;;  %v2552_v38 = vmov 0.0   ;;  %v2098_v36 = vld [vmem:[%s5451_s6 + $0x120] sm:$0xff] }
 0x29b   :  { %v2468_v43 = vadd.f32 %v2467_v37, %v1931_v22  ;;  %v1895_v62 = vpop.f32.mrb[3].mxu0  ;;  %v2074_v22 = vld [vmem:[%s5451_s6 + $0x60] sm:$0xff]  ;;  %v2122_v37 = vpack.c.bf16 %v2095_v34, %v2094_v46  ;;  %v2097_v42 = vld [vmem:[%s5451_s6 + $0x118] sm:$0xff]  ;;  %v2227_v34 = vld [vmem:[%s5453_s8 + $0x30] sm:$0xff] }
 0x29c   :  { %v2471_v39 = vadd.f32 %v2470_v25, %v1933_v23  ;;  %v2075_v23 = vld [vmem:[%s5451_s6 + $0x68] sm:$0xff]  ;;  %v2096_v25 = vld [vmem:[%s5451_s6 + $0x110] sm:$0xff] }
 0x29d   :  { %v1938_v63 = vmax.f32 %v2468_v43, 0.0  ;;  %v2112_v27 = vpack.c.bf16 %v2075_v23, %v2074_v22  ;;  %v2123_v43 = vpack.c.bf16 %v2097_v42, %v2096_v25  ;;  %v2099_v62 = vld [vmem:[%s5451_s6 + $0x128] sm:$0xff]  ;;  %v2229_v22 = vpack.c.bf16 %v2222_v19, %v2221_v17 }
 0x29e   :  { %v1939_v32 = vmax.f32 %v2471_v39, 0.0  ;;  %v2124_v39 = vpack.c.bf16 %v2099_v62, %v2098_v36 }
 0x29f   :  { %v1940_v55 = vpack.c.bf16 %v1938_v63, %v1938_v63  ;;  %v2101_v63 = vld [vmem:[%s5451_s6 + $0x138] sm:$0xff] }
 0x2a0   :  { %v1941_v51 = vpack.c.bf16 %v1939_v32, %v1939_v32  ;;  %v2125_v45 = vpack.c.bf16 %v2101_v63, %v2100_v44  ;;  %v2103_v32 = vld [vmem:[%s5451_s6 + $0x148] sm:$0xff]  ;;  %v2364_v63 = vld [vmem:[%s5455_s10] ss:$0 sm:$0xff] }
 0x2a1   :  { %v2126_v2 = vpack.c.bf16 %v2103_v32, %v2102_v47 }
 0x2a2   :  { %2029 = vmatprep.mubr.bf16.mxu1 %v1941_v51  ;;  %v2104_v51 = vld [vmem:[%s5451_s6 + $0x150] sm:$0xff] }
 0x2a3   :  { %2030 = vmatmul.mubr.bf16.vlgmr.msra.gmra.mrb[8].mxu1 %v1940_v55 }
 0x2a4   :  { %2388 = vmatpush3.bf16.msra.mxu1 %v2106_v52  ;;  %2171 = vmatprep.mubr.bf16.mxu1 %v2060_v53  ;;  %v2105_v52 = vld [vmem:[%s5451_s6 + $0x158] sm:$0xff]  ;;  %v2054_v53 = vrot.slane %v2040_v50, %v2894_v11  ;;  %v2235_v11 = vld [vmem:[%s5454_s9 + $0x8] sm:$0xff] }
 0x2a5   :  { %2389 = vmatprep.subr.bf16.mxu1 %v2115_v56  ;;  %v2127_v55 = vpack.c.bf16 %v2105_v52, %v2104_v51  ;;  %v2242_v57 = vpack.c.bf16 %v2235_v11, %v2234_v33 }
 0x2a6   :  { %v2061_v56 = vpack.c.bf16 %v2054_v53, %v2054_v53 }
 0x2a8   :  { %2390 = vmatpush3.bf16.msra.mxu1 %v2107_v18  ;;  %v2238_v18 = vld [vmem:[%s5454_s9 + $0x20] sm:$0xff] }
 0x2a9   :  { %2391 = vmatprep.subr.bf16.mxu1 %v2116_v60  ;;  %v2239_v60 = vld [vmem:[%s5454_s9 + $0x28] sm:$0xff] }
 0x2aa   :  { %v2244_v61 = vpack.c.bf16 %v2239_v60, %v2238_v18 }
 0x2ac   :  { %2392 = vmatpush3.bf16.msra.mxu1 %v2108_v3 }
 0x2ad   :  { %2393 = vmatprep.subr.bf16.mxu1 %v2117_v5 }
 0x2b0   :  { %2394 = vmatpush3.bf16.msra.mxu1 %v2109_v8 }
 0x2b1   :  { %2395 = vmatprep.subr.bf16.mxu1 %v2118_v48 }
 0x2b4   :  { %2396 = vmatpush3.bf16.msra.mxu1 %v2110_v14 }
 0x2b5   :  { %2397 = vmatprep.subr.bf16.mxu1 %v2119_v15 }
 0x2b8   :  { %2398 = vmatpush3.bf16.msra.mxu1 %v2111_v21 }
 0x2b9   :  { %2399 = vmatprep.subr.bf16.mxu1 %v2120_v54 }
 0x2bc   :  { %2400 = vmatpush3.bf16.msra.mxu1 %v2112_v27  ;;  %v2230_v27 = vpack.c.bf16 %v2224_v26, %v2223_v4 }
 0x2bd   :  { %2401 = vmatprep.subr.bf16.mxu1 %v2121_v40  ;;  %v2225_v40 = vld [vmem:[%s5453_s8 + $0x20] sm:$0xff] }
 0x2c0   :  { %2402 = vmatpush3.bf16.msra.mxu1 %v2113_v31  ;;  %v2231_v31 = vpack.c.bf16 %v2226_v29, %v2225_v40 }
 0x2c1   :  { %2426 = vmatprep.subr.bf16.mxu1 %v2552_v38 }
 0x2c3   :  { %2172 = vmatmul.mubr.bf16.vlgmr.msra.gmra.mrb[12].mxu1 %v2059_v35  ;;  %v2228_v35 = vld [vmem:[%s5453_s8 + $0x38] sm:$0xff]  ;;  %s2554_s8 = smov [#allocation2]  }
 0x2c4   :  { %2427 = vmatpush3.bf16.msra.mxu1 %v2122_v37  ;;  %2438 = vmatprep.mubr.msk.bf16.mxu1 %vm2553_vm1, %v2552_v38  ;;  %v2232_v37 = vpack.c.bf16 %v2228_v35, %v2227_v34  ;;  %s2349_s20 = sshll.u32 %s2554_s8, 4  ;;  %s2350_s20 = int_to_ptr.vmem [resolvable:$true] %s2349_s20 }
 0x2c5   :  { %2428 = vmatprep.subr.bf16.mxu1 %v2552_v38  ;;  %s2526_s0 = scalar_lea.vmem %s2350_s20, 32  ;;  %p2531_p1 = scmp.lt.s32.totalorder %s2350_s20, %s2350_s20 }
 0x2c6   :  { %p2527_p0 = scmp.ne.s32.totalorder %s2350_s20, %s2526_s0  ;;  %p2532_p2 = scmp.lt.s32.totalorder %s2526_s0, %s2526_s0 }
 0x2c8   :  { %2429 = vmatpush3.bf16.msra.mxu1 %v2123_v43  ;;  %p2533_p3 = por %p2532_p2, %p2531_p1 }
 0x2c9   :  { %2430 = vmatprep.subr.bf16.mxu1 %v2552_v38 }
 0x2ca   :  { %p2534_p4 = pnand %p2533_p3, %p2527_p0 }
 0x2cc   :  { %2431 = vmatpush3.bf16.msra.mxu1 %v2124_v39 }
 0x2cd   :  { %2432 = vmatprep.subr.bf16.mxu1 %v2552_v38 }
 0x2d0   :  { %2433 = vmatpush3.bf16.msra.mxu1 %v2125_v45 }
 0x2d1   :  { %2434 = vmatprep.subr.bf16.mxu1 %v2552_v38 }
 0x2d4   :  { %2435 = vmatpush3.bf16.msra.mxu1 %v2126_v2 }
 0x2d5   :  { %2436 = vmatprep.subr.bf16.mxu1 %v2552_v38 }
 0x2d8   :  { %2437 = vmatpush3.bf16.msra.mxu1 %v2127_v55 }
 0x2d9   :  { %2442 = vmatprep.subr.bf16.mxu1 %v2552_v38 }
 0x2db   :  { %2439 = vmatmul.mubr.msk.bf16.vlgmr.msra.gmra.mrb[16].mxu1 %vm2135_vm2, %v2061_v56 }
 0x2dc   :  { %2450 = vmatprep.mubr.msk.bf16.mxu1 %vm2553_vm1, %v2552_v38  ;;  %2443 = vmatpush3.bf16.msra.mxu1 %v2242_v57 }
 0x2dd   :  { %2444 = vmatprep.subr.bf16.mxu1 %v2552_v38 }
 0x2e0   :  { %2445 = vmatpush3.bf16.msra.mxu1 %v2243_v59 }
 0x2e1   :  { %2446 = vmatprep.subr.bf16.mxu1 %v2552_v38 }
 0x2e4   :  { %2447 = vmatpush3.bf16.msra.mxu1 %v2244_v61 }
 0x2e5   :  { %2448 = vmatprep.subr.bf16.mxu1 %v2552_v38 }
 0x2e8   :  { %2449 = vmatpush3.bf16.msra.mxu1 %v2245_v1 }
 0x2e9   :  { %2454 = vmatprep.subr.bf16.mxu1 %v2552_v38 }
 0x376   :  { %v2381_v3 = vpop.f32.mrb[8].mxu1 }
 0x377   :  { %v2382_v5 = vpop.f32.mrb[9].mxu1 }
 0x378   :  { %v2383_v41 = vadd.f32 %v2382_v5, %v2381_v3  ;;  %v2384_v6 = vpop.f32.mrb[10].mxu1 }
 0x379   :  { %v2385_v28 = vpop.f32.mrb[11].mxu1 }
 0x37a   :  { %v2032_v46 = vadd.f32 %v2383_v41, %v2359_v30 }
 0x37c   :  { %v2037_v25 = vmax.f32 %v2032_v46, 0.0 }
 0x37e   :  { %v2220_v42 = vpack.c.bf16 %v2037_v25, %v2037_v25 }
 0x396   :  { %v2403_v7 = vpop.f32.mrb[12].mxu1 }
 0x397   :  { %v2404_v8 = vpop.f32.mrb[13].mxu1 }
 0x398   :  { %v2405_v48 = vadd.f32 %v2404_v8, %v2403_v7  ;;  %v2406_v9 = vpop.f32.mrb[14].mxu1 }
 0x399   :  { %v2407_v10 = vpop.f32.mrb[15].mxu1 }
 0x39a   :  { %v2174_v13 = vadd.f32 %v2405_v48, %v2360_v12 }
 0x3ae   :  { %v2213_v14 = vpop.f32.mrb[16].mxu1 }
 0x3af   :  { %v2214_v15 = vadd.f32 %v2213_v14, %v2174_v13  ;;  %v2440_v16 = vpop.f32.mrb[17].mxu1 }
 0x3b0   :  { %v2216_v20 = vpop.f32.mrb[18].mxu1 }
 0x3b1   :  { %v2219_v21 = vmax.f32 %v2214_v15, 0.0  ;;  %v2441_v54 = vpop.f32.mrb[19].mxu1 }
 0x3b3   :  { %v2233_v23 = vpack.c.bf16 %v2219_v21, %v2219_v21 }
 0x3b5   :  { %2451 = vmatmul.mubr.msk.bf16.vlgmr.msra.gmra.mrb[20].mxu1 %vm1401_vm0, %v2233_v23 }
 0x3b6   :  { %2455 = vmatpush3.bf16.msra.mxu1 %v2229_v22  ;;  %2462 = vmatprep.mubr.msk.bf16.mxu1 %vm2553_vm1, %v2552_v38 }
 0x3b7   :  { %2456 = vmatprep.subr.bf16.mxu1 %v2552_v38 }
 0x3ba   :  { %2457 = vmatpush3.bf16.msra.mxu1 %v2230_v27 }
 0x3bb   :  { %2458 = vmatprep.subr.bf16.mxu1 %v2552_v38 }
 0x3be   :  { %2459 = vmatpush3.bf16.msra.mxu1 %v2231_v31 }
 0x3bf   :  { %2460 = vmatprep.subr.bf16.mxu1 %v2552_v38 }
 0x3c2   :  { %2461 = vmatpush3.bf16.msra.mxu1 %v2232_v37 }
 0x3c5   :  { %2463 = vmatmul.mubr.msk.bf16.vlgmr.msra.gmra.mrb[24].mxu1 %vm1401_vm0, %v2220_v42 }
 0x488   :  { %v2283_v43 = vpop.f32.mrb[20].mxu1 }
 0x489   :  { %v2452_v36 = vpop.f32.mrb[21].mxu1 }
 0x48a   :  { %v2286_v62 = vpop.f32.mrb[22].mxu1 }
 0x48b   :  { %v2453_v39 = vpop.f32.mrb[23].mxu1 }
 0x498   :  { %v2326_v44 = vpop.f32.mrb[24].mxu1 }
 0x499   :  { %v2327_v45 = vadd.f32 %v2326_v44, %v2283_v43  ;;  %v2464_v47 = vpop.f32.mrb[25].mxu1 }
 0x49a   :  { %v2329_v32 = vpop.f32.mrb[26].mxu1 }
 0x49b   :  { %v2339_v50 = vadd.f32 %v2364_v63, %v2327_v45  ;;  %v2465_v38 = vpop.f32.mrb[27].mxu1 }
 0x49d   :  { %v2340_v2 = vmax.f32 %v2339_v50, 0.0 }
 0x49f   :  { %2342 = vst.msk [vmem:[#allocation2] sm:$0x3] %vm2341_vm3, %v2340_v2 }
 0x4a0   :  { %2537 = shalt.err (!%p2534_p4)
}
 0x4a1   :  { %s2538_s1 = scalar_lea.hbm %s5456_s11, 32 }
 0x4a2   :  { %p2539_p5 = scmp.ne.s32.totalorder %s5456_s11, %s2538_s1  ;;  %p2542_p6 = scmp.lt.u32.totalorder %s2538_s1, %s5456_s11 }
 0x4a4   :  { %p2544_p7 = pnand %p2542_p6, %p2539_p5 }
 0x4a6   :  { %2547 = shalt.err (!%p2544_p7)
}
 0x4a7   :  { %2352 = dma.vmem_to_hbm [thread:$0]  %s2350_s20, 32, %s5456_s11, [#allocation3]  }
 0x4a8   :  { %2548 = dma.done.wait [#allocation3], 32  }
 0x4a9   :  { %2549 = vsyncadd [#allocation3], 4294967264 }
 0x4aa   :  { %2356 = vsyncpa [#allocation3], 1 }

</bundles_post_ra>
